<compile_context>
chip_gen: v5e
topology: v5e:2x2
jax: 0.10.0
libtpu: 0.0.40
codegen_flags: <defaults>
</compile_context>

<pallas_src>
import math
import functools

import numpy as np
import jax
import jax.numpy as jnp
from jax.experimental import pallas as pl
from jax.experimental.pallas import tpu as pltpu


# ----------------------------------------------------------------------------
# Schedule (matches cosine_beta_schedule, computed in float64 via numpy)
# ----------------------------------------------------------------------------
def cosine_beta_schedule(timesteps, s=0.008):
    steps = timesteps + 1
    t = np.linspace(0, timesteps, steps, dtype=np.float64) / timesteps
    alphas_cumprod = np.cos((t + s) / (1 + s) * math.pi * 0.5) ** 2
    alphas_cumprod = alphas_cumprod / alphas_cumprod[0]
    betas = 1 - alphas_cumprod[1:] / alphas_cumprod[:-1]
    return np.clip(betas, 0.0, 0.999)


# ----------------------------------------------------------------------------
# Fused Pallas kernel: noising + conv1(+time,+SiLU) + conv2 + loss partial sum
# ----------------------------------------------------------------------------
def _fused_fwd_kernel(vp_ref, ep_ref, sab_ref, s1ab_ref, temb_ref,
                      wt_ref, bt_ref, w1_ref, b1_ref, w2_ref, b2_ref,
                      out_ref, p1_ref, h1p_ref, *, H, W, C, dim):
    b = pl.program_id(0)
    sab = sab_ref[b]            # sqrt(alpha_bar[T_b])       (SMEM scalar)
    s1ab = s1ab_ref[b]          # sqrt(1 - alpha_bar[T_b])   (SMEM scalar)

    vp = vp_ref[0]              # (H+2, W+2, C) f32, spatially padded with 0.5
    ep = ep_ref[0]              # (H+2, W+2, C) f32, spatially padded with 0.0

    # normalize + q-sample, fused.  Halo: sab*(2*0.5-1) + s1ab*0 == 0, so the padded x used by
    # the 3x3 convs is exactly zero-padded; x never goes to HBM.
    x = sab * (2.0 * vp - 1.0) + s1ab * ep

    # ---- conv1 (3x3, C -> dim): in-VMEM im2col, K packed & zero-padded, one MXU matmul ----
    p1_ref[...] = jnp.zeros(p1_ref.shape, p1_ref.dtype)        # also zeroes the K-pad columns
    for di in range(3):
        for dj in range(3):
            tap = di * 3 + dj
            p1_ref[:, tap * C:(tap + 1) * C] = (
                x[di:di + H, dj:dj + W, :].reshape(H * W, C))

    # time conditioning: SiLU(temb @ wt + bt), broadcast over the H*W rows inside the kernel
    tproj = jnp.dot(temb_ref[0], wt_ref[...],
                    preferred_element_type=jnp.float32) + bt_ref[...]       # (1, dim)
    tproj = tproj * jax.nn.sigmoid(tproj)

    h1 = jnp.dot(p1_ref[...].astype(jnp.bfloat16), w1_ref[...],
                 preferred_element_type=jnp.float32)                        # (H*W, dim) f32
    h1 = h1 + b1_ref[...] + tproj                                           # (1,dim) broadcasts
    h1 = h1 * jax.nn.sigmoid(h1)                                            # SiLU

    # ---- conv2 (3x3, dim -> C): zero-pad h1 inside VMEM, 9 accumulated MXU matmuls ----
    h1p_ref[...] = jnp.zeros(h1p_ref.shape, h1p_ref.dtype)
    h1p_ref[1:H + 1, 1:W + 1, :] = h1.reshape(H, W, dim)

    eps_pred = jnp.zeros((H * W, C), jnp.float32)
    for di in range(3):
        for dj in range(3):
            tap = di * 3 + dj
            sl = h1p_ref[di:di + H, dj:dj + W, :].reshape(H * W, dim)
            eps_pred = eps_pred + jnp.dot(
                sl.astype(jnp.bfloat16), w2_ref[tap * dim:(tap + 1) * dim, :],
                preferred_element_type=jnp.float32)
    eps_pred = eps_pred + b2_ref[...]                                       # (H*W, C)

    # ---- fused loss epilogue: per-image sum of (eps - eps_pred)^2 (no HBM round trip) ----
    eps_rows = ep[1:H + 1, 1:W + 1, :].reshape(H * W, C)
    d = eps_rows - eps_pred
    out_ref[...] = jnp.zeros(out_ref.shape, jnp.float32) + jnp.sum(d * d)


def fused_forward(vp, ep, sab, s1ab, temb, params, *, H, W, C, dim):
    B = vp.shape[0]
    Hp, Wp = H + 2, W + 2
    K1p = params["w1"].shape[0]      # 9*C padded up to a sublane multiple
    K2 = params["w2"].shape[0]       # 9*dim

    kernel = functools.partial(_fused_fwd_kernel, H=H, W=W, C=C, dim=dim)
    smem = pl.BlockSpec(memory_space=pltpu.MemorySpace.SMEM)

    grid_spec = pltpu.PrefetchScalarGridSpec(
        num_scalar_prefetch=0,
        grid=(B,),
        in_specs=[
            pl.BlockSpec((1, Hp, Wp, C), lambda b: (b, 0, 0, 0)),   # v, padded with 0.5
            pl.BlockSpec((1, Hp, Wp, C), lambda b: (b, 0, 0, 0)),   # eps, padded with 0.0
            smem,                                                    # sqrt(alpha_bar[T])
            smem,                                                    # sqrt(1 - alpha_bar[T])
            pl.BlockSpec((1, 1, dim), lambda b: (b, 0, 0)),          # time embedding
            pl.BlockSpec((dim, dim), lambda b: (0, 0)),              # wt
            pl.BlockSpec((1, dim), lambda b: (0, 0)),                # bt
            pl.BlockSpec((K1p, dim), lambda b: (0, 0)),              # w1 (bf16, K padded)
            pl.BlockSpec((1, dim), lambda b: (0, 0)),                # b1
            pl.BlockSpec((K2, C), lambda b: (0, 0)),                 # w2 (bf16)
            pl.BlockSpec((1, C), lambda b: (0, 0)),                  # b2
        ],
        out_specs=pl.BlockSpec((1, 1, 128), lambda b: (b, 0, 0)),
        scratch_shapes=[
            pltpu.VMEM((H * W, K1p), jnp.float32),    # conv1 im2col patches (VMEM only)
            pltpu.VMEM((Hp, Wp, dim), jnp.float32),   # zero-padded conv1 activations
        ],
    )
    partial = pl.pallas_call(
        kernel,
        out_shape=jax.ShapeDtypeStruct((B, 1, 128), jnp.float32),
        grid_spec=grid_spec,
        compiler_params=pltpu.CompilerParams(dimension_semantics=("parallel",)),
    )(vp, ep, sab, s1ab, temb,
      params["wt"], params["bt"], params["w1"], params["b1"],
      params["w2"], params["b2"])
    return partial[:, 0, 0]                                          # (B,) per-image sums


# ----------------------------------------------------------------------------
# Glue: time embedding, parameters, forward pass equivalent to `new.forward(v)`
# ----------------------------------------------------------------------------
def sinusoidal_emb(t, dim):
    half = dim // 2
    freqs = jnp.exp(-math.log(10000.0) * jnp.arange(half, dtype=jnp.float32) / (half - 1))
    args = t.astype(jnp.float32)[:, None] * freqs[None, :]
    return jnp.concatenate([jnp.sin(args), jnp.cos(args)], axis=-1)   # (B, dim)


def make_params(key, cin, dim):
    k1, k2, k3 = jax.random.split(key, 3)
    k1p = ((9 * cin + 15) // 16) * 16          # pad conv1 K (=9*cin) to a sublane multiple
    w1 = 0.05 * jax.random.normal(k1, (3, 3, cin, dim), jnp.float32)
    w1 = jnp.pad(w1.reshape(9 * cin, dim), ((0, k1p - 9 * cin), (0, 0)))
    w2 = 0.05 * jax.random.normal(k2, (3, 3, dim, cin), jnp.float32).reshape(9 * dim, cin)
    wt = 0.05 * jax.random.normal(k3, (dim, dim), jnp.float32)
    return dict(
        w1=w1.astype(jnp.bfloat16), b1=jnp.zeros((1, dim), jnp.float32),
        w2=w2.astype(jnp.bfloat16), b2=jnp.zeros((1, cin), jnp.float32),
        wt=wt, bt=jnp.zeros((1, dim), jnp.float32),
    )


def diffusion_forward(v, key, params, alpha_bar, Tsteps, dim):
    B, C, H, W = v.shape
    k_eps, k_t = jax.random.split(key)

    # eps ~ N(0,1), generated directly in NHWC (same distribution as the NCHW reference)
    eps = jax.random.normal(k_eps, (B, H, W, C), dtype=jnp.float32)
    T = jax.random.randint(k_t, (B,), 0, Tsteps)

    ab = jnp.asarray(alpha_bar, jnp.float32)[T]                      # (B,)
    sab = jnp.sqrt(ab)
    s1ab = jnp.sqrt(1.0 - ab)

    v_nhwc = jnp.transpose(v, (0, 2, 3, 1))
    # pad v with 0.5 (so 2*v-1 == 0 there) and eps with 0: the in-kernel q-sample then yields
    # an exactly zero-padded x for the 3x3 convs without materializing x in HBM.
    vp = jnp.pad(v_nhwc, ((0, 0), (1, 1), (1, 1), (0, 0)), constant_values=0.5)
    ep = jnp.pad(eps, ((0, 0), (1, 1), (1, 1), (0, 0)), constant_values=0.0)

    temb = sinusoidal_emb(T, dim).reshape(B, 1, dim)

    partial = fused_forward(vp, ep, sab, s1ab, temb, params, H=H, W=W, C=C, dim=dim)
    # loss = ((eps - eps_pred)**2).sum(dim=-3).mean()  ==  total_sum / (B*H*W)
    return jnp.sum(partial) / (B * H * W)


# ----------------------------------------------------------------------------
if __name__ == "__main__":
    B, C, H, W = 2, 3, 16, 16
    Tsteps = 1000
    dim = 32   # small stand-in encoder width (reference Unet uses dim=64)

    beta = cosine_beta_schedule(Tsteps)
    alpha = 1.0 - beta
    alpha_bar = np.cumprod(alpha)

    key = jax.random.PRNGKey(0)
    k_v, k_p, k_fwd = jax.random.split(key, 3)

    v = jax.random.uniform(k_v, (B, C, H, W), dtype=jnp.float32)     # image in [0, 1]
    params = make_params(k_p, C, dim)

    loss = diffusion_forward(v, k_fwd, params, alpha_bar, Tsteps, dim)
    loss = jax.block_until_ready(loss)
    assert loss.shape == () and jnp.isfinite(loss)
    print("KERNEL_OK")
</pallas_src>

<mosaic_0001>
module attributes {stable_mosaic.version = 11 : i64} {
  func.func @_fused_fwd_kernel(%arg0: i32, %arg1: memref<1x18x18x3xf32, #tpu.memory_space<vmem>>, %arg2: memref<1x18x18x3xf32, #tpu.memory_space<vmem>>, %arg3: memref<2xf32, #tpu.memory_space<smem>>, %arg4: memref<2xf32, #tpu.memory_space<smem>>, %arg5: memref<1x1x32xf32, #tpu.memory_space<vmem>>, %arg6: memref<32x32xf32, #tpu.memory_space<vmem>>, %arg7: memref<1x32xf32, #tpu.memory_space<vmem>>, %arg8: memref<32x32xbf16, #tpu.memory_space<vmem>>, %arg9: memref<1x32xf32, #tpu.memory_space<vmem>>, %arg10: memref<288x3xbf16, #tpu.memory_space<vmem>>, %arg11: memref<1x3xf32, #tpu.memory_space<vmem>>, %arg12: memref<1x1x128xf32, #tpu.memory_space<vmem>>, %arg13: memref<256x32xf32, #tpu.memory_space<vmem>>, %arg14: memref<18x18x32xf32, #tpu.memory_space<vmem>>) attributes {dimension_semantics = [#tpu.dimension_semantics<parallel>], iteration_bounds = array<i64: 2>, scalar_prefetch = 0 : i64, scratch_operands = 2 : i64, tpu.core_type = #tpu.core_type<tc>, window_params = [{transform_indices = @transform_0, window_bounds = array<i64: 1, 18, 18, 3>}, {transform_indices = @transform_1, window_bounds = array<i64: 1, 18, 18, 3>}, {transform_indices = @transform_2, window_bounds = array<i64: 2>}, {transform_indices = @transform_3, window_bounds = array<i64: 2>}, {transform_indices = @transform_4, window_bounds = array<i64: 1, 1, 32>}, {pipeline_mode = #tpu.pipeline_mode<synchronous>, transform_indices = @transform_5, window_bounds = array<i64: 32, 32>}, {pipeline_mode = #tpu.pipeline_mode<synchronous>, transform_indices = @transform_6, window_bounds = array<i64: 1, 32>}, {pipeline_mode = #tpu.pipeline_mode<synchronous>, transform_indices = @transform_7, window_bounds = array<i64: 32, 32>}, {pipeline_mode = #tpu.pipeline_mode<synchronous>, transform_indices = @transform_8, window_bounds = array<i64: 1, 32>}, {pipeline_mode = #tpu.pipeline_mode<synchronous>, transform_indices = @transform_9, window_bounds = array<i64: 288, 3>}, {pipeline_mode = #tpu.pipeline_mode<synchronous>, transform_indices = @transform_10, window_bounds = array<i64: 1, 3>}, {transform_indices = @transform_11, window_bounds = array<i64: 1, 1, 128>}]} {
    %0 = arith.index_cast %arg0 : i32 to index
    %1 = memref.load %arg3[%0] : memref<2xf32, #tpu.memory_space<smem>>
    %2 = arith.index_cast %arg0 : i32 to index
    %3 = memref.load %arg4[%2] : memref<2xf32, #tpu.memory_space<smem>>
    %c0 = arith.constant 0 : index
    %c0_0 = arith.constant 0 : index
    %c0_1 = arith.constant 0 : index
    %c0_2 = arith.constant 0 : index
    %4 = vector.load %arg1[%c0, %c0_0, %c0_1, %c0_2] : memref<1x18x18x3xf32, #tpu.memory_space<vmem>>, vector<1x18x18x3xf32>
    %5 = vector.shape_cast %4 : vector<1x18x18x3xf32> to vector<18x18x3xf32>
    %c0_3 = arith.constant 0 : index
    %c0_4 = arith.constant 0 : index
    %c0_5 = arith.constant 0 : index
    %c0_6 = arith.constant 0 : index
    %6 = vector.load %arg2[%c0_3, %c0_4, %c0_5, %c0_6] : memref<1x18x18x3xf32, #tpu.memory_space<vmem>>, vector<1x18x18x3xf32>
    %7 = vector.shape_cast %6 : vector<1x18x18x3xf32> to vector<18x18x3xf32>
    %cst = arith.constant 2.000000e+00 : f32
    %8 = vector.broadcast %cst : f32 to vector<18x18x3xf32>
    %9 = arith.mulf %8, %5 : vector<18x18x3xf32>
    %cst_7 = arith.constant 1.000000e+00 : f32
    %10 = vector.broadcast %cst_7 : f32 to vector<18x18x3xf32>
    %11 = arith.subf %9, %10 : vector<18x18x3xf32>
    %12 = vector.broadcast %1 : f32 to vector<18x18x3xf32>
    %13 = arith.mulf %12, %11 : vector<18x18x3xf32>
    %14 = vector.broadcast %3 : f32 to vector<18x18x3xf32>
    %15 = arith.mulf %14, %7 : vector<18x18x3xf32>
    %16 = arith.addf %13, %15 : vector<18x18x3xf32>
    %cst_8 = arith.constant 0.000000e+00 : f32
    %17 = vector.broadcast %cst_8 : f32 to vector<256x32xf32>
    %c0_9 = arith.constant 0 : index
    %c0_10 = arith.constant 0 : index
    %18 = vector.load %arg13[%c0_9, %c0_10] : memref<256x32xf32, #tpu.memory_space<vmem>>, vector<256x32xf32>
    tpu.vector_store %arg13[%c0_9, %c0_10], %17 {strides = array<i32>} : memref<256x32xf32, #tpu.memory_space<vmem>>, vector<256x32xf32>,
    %19 = vector.extract_strided_slice %16 {offsets = [0, 0, 0], sizes = [16, 16, 3], strides = [1, 1, 1]} : vector<18x18x3xf32> to vector<16x16x3xf32>
    %20 = vector.shape_cast %19 : vector<16x16x3xf32> to vector<256x3xf32>
    %c0_11 = arith.constant 0 : index
    %c0_12 = arith.constant 0 : index
    %21 = vector.load %arg13[%c0_11, %c0_12] : memref<256x32xf32, #tpu.memory_space<vmem>>, vector<256x3xf32>
    tpu.vector_store %arg13[%c0_11, %c0_12], %20 {strides = array<i32>} : memref<256x32xf32, #tpu.memory_space<vmem>>, vector<256x3xf32>,
    %22 = vector.extract_strided_slice %16 {offsets = [0, 1, 0], sizes = [16, 16, 3], strides = [1, 1, 1]} : vector<18x18x3xf32> to vector<16x16x3xf32>
    %23 = vector.shape_cast %22 : vector<16x16x3xf32> to vector<256x3xf32>
    %c0_13 = arith.constant 0 : index
    %c3 = arith.constant 3 : index
    %24 = vector.load %arg13[%c0_13, %c3] : memref<256x32xf32, #tpu.memory_space<vmem>>, vector<256x3xf32>
    tpu.vector_store %arg13[%c0_13, %c3], %23 {strides = array<i32>} : memref<256x32xf32, #tpu.memory_space<vmem>>, vector<256x3xf32>,
    %25 = vector.extract_strided_slice %16 {offsets = [0, 2, 0], sizes = [16, 16, 3], strides = [1, 1, 1]} : vector<18x18x3xf32> to vector<16x16x3xf32>
    %26 = vector.shape_cast %25 : vector<16x16x3xf32> to vector<256x3xf32>
    %c0_14 = arith.constant 0 : index
    %c6 = arith.constant 6 : index
    %27 = vector.load %arg13[%c0_14, %c6] : memref<256x32xf32, #tpu.memory_space<vmem>>, vector<256x3xf32>
    tpu.vector_store %arg13[%c0_14, %c6], %26 {strides = array<i32>} : memref<256x32xf32, #tpu.memory_space<vmem>>, vector<256x3xf32>,
    %28 = vector.extract_strided_slice %16 {offsets = [1, 0, 0], sizes = [16, 16, 3], strides = [1, 1, 1]} : vector<18x18x3xf32> to vector<16x16x3xf32>
    %29 = vector.shape_cast %28 : vector<16x16x3xf32> to vector<256x3xf32>
    %c0_15 = arith.constant 0 : index
    %c9 = arith.constant 9 : index
    %30 = vector.load %arg13[%c0_15, %c9] : memref<256x32xf32, #tpu.memory_space<vmem>>, vector<256x3xf32>
    tpu.vector_store %arg13[%c0_15, %c9], %29 {strides = array<i32>} : memref<256x32xf32, #tpu.memory_space<vmem>>, vector<256x3xf32>,
    %31 = vector.extract_strided_slice %16 {offsets = [1, 1, 0], sizes = [16, 16, 3], strides = [1, 1, 1]} : vector<18x18x3xf32> to vector<16x16x3xf32>
    %32 = vector.shape_cast %31 : vector<16x16x3xf32> to vector<256x3xf32>
    %c0_16 = arith.constant 0 : index
    %c12 = arith.constant 12 : index
    %33 = vector.load %arg13[%c0_16, %c12] : memref<256x32xf32, #tpu.memory_space<vmem>>, vector<256x3xf32>
    tpu.vector_store %arg13[%c0_16, %c12], %32 {strides = array<i32>} : memref<256x32xf32, #tpu.memory_space<vmem>>, vector<256x3xf32>,
    %34 = vector.extract_strided_slice %16 {offsets = [1, 2, 0], sizes = [16, 16, 3], strides = [1, 1, 1]} : vector<18x18x3xf32> to vector<16x16x3xf32>
    %35 = vector.shape_cast %34 : vector<16x16x3xf32> to vector<256x3xf32>
    %c0_17 = arith.constant 0 : index
    %c15 = arith.constant 15 : index
    %36 = vector.load %arg13[%c0_17, %c15] : memref<256x32xf32, #tpu.memory_space<vmem>>, vector<256x3xf32>
    tpu.vector_store %arg13[%c0_17, %c15], %35 {strides = array<i32>} : memref<256x32xf32, #tpu.memory_space<vmem>>, vector<256x3xf32>,
    %37 = vector.extract_strided_slice %16 {offsets = [2, 0, 0], sizes = [16, 16, 3], strides = [1, 1, 1]} : vector<18x18x3xf32> to vector<16x16x3xf32>
    %38 = vector.shape_cast %37 : vector<16x16x3xf32> to vector<256x3xf32>
    %c0_18 = arith.constant 0 : index
    %c18 = arith.constant 18 : index
    %39 = vector.load %arg13[%c0_18, %c18] : memref<256x32xf32, #tpu.memory_space<vmem>>, vector<256x3xf32>
    tpu.vector_store %arg13[%c0_18, %c18], %38 {strides = array<i32>} : memref<256x32xf32, #tpu.memory_space<vmem>>, vector<256x3xf32>,
    %40 = vector.extract_strided_slice %16 {offsets = [2, 1, 0], sizes = [16, 16, 3], strides = [1, 1, 1]} : vector<18x18x3xf32> to vector<16x16x3xf32>
    %41 = vector.shape_cast %40 : vector<16x16x3xf32> to vector<256x3xf32>
    %c0_19 = arith.constant 0 : index
    %c21 = arith.constant 21 : index
    %42 = vector.load %arg13[%c0_19, %c21] : memref<256x32xf32, #tpu.memory_space<vmem>>, vector<256x3xf32>
    tpu.vector_store %arg13[%c0_19, %c21], %41 {strides = array<i32>} : memref<256x32xf32, #tpu.memory_space<vmem>>, vector<256x3xf32>,
    %43 = vector.extract_strided_slice %16 {offsets = [2, 2, 0], sizes = [16, 16, 3], strides = [1, 1, 1]} : vector<18x18x3xf32> to vector<16x16x3xf32>
    %44 = vector.shape_cast %43 : vector<16x16x3xf32> to vector<256x3xf32>
    %c0_20 = arith.constant 0 : index
    %c24 = arith.constant 24 : index
    %45 = vector.load %arg13[%c0_20, %c24] : memref<256x32xf32, #tpu.memory_space<vmem>>, vector<256x3xf32>
    tpu.vector_store %arg13[%c0_20, %c24], %44 {strides = array<i32>} : memref<256x32xf32, #tpu.memory_space<vmem>>, vector<256x3xf32>,
    %c0_21 = arith.constant 0 : index
    %c0_22 = arith.constant 0 : index
    %c0_23 = arith.constant 0 : index
    %46 = vector.load %arg5[%c0_21, %c0_22, %c0_23] : memref<1x1x32xf32, #tpu.memory_space<vmem>>, vector<1x1x32xf32>
    %47 = vector.shape_cast %46 : vector<1x1x32xf32> to vector<1x32xf32>
    %c0_24 = arith.constant 0 : index
    %c0_25 = arith.constant 0 : index
    %48 = vector.load %arg6[%c0_24, %c0_25] : memref<32x32xf32, #tpu.memory_space<vmem>>, vector<32x32xf32>
    %cst_26 = arith.constant dense<0.000000e+00> : vector<1x32xf32>
    %49 = tpu.matmul %47, %48, %cst_26 {dimension_numbers = #tpu.dot_dimension_numbers<[1], [0], [0], [1], [0, 0, 1, 1], [], []>} : vector<1x32xf32>, vector<32x32xf32>, vector<1x32xf32> -> vector<1x32xf32>
    %c0_27 = arith.constant 0 : index
    %c0_28 = arith.constant 0 : index
    %50 = vector.load %arg7[%c0_27, %c0_28] : memref<1x32xf32, #tpu.memory_space<vmem>>, vector<1x32xf32>
    %51 = arith.addf %49, %50 : vector<1x32xf32>
    %52 = arith.negf %51 : vector<1x32xf32>
    %53 = math.exp %52 : vector<1x32xf32>
    %cst_29 = arith.constant 1.000000e+00 : f32
    %54 = vector.broadcast %cst_29 : f32 to vector<1x32xf32>
    %55 = arith.addf %54, %53 : vector<1x32xf32>
    %56 = arith.divf %54, %55 : vector<1x32xf32>
    %57 = arith.mulf %51, %56 : vector<1x32xf32>
    %c0_30 = arith.constant 0 : index
    %c0_31 = arith.constant 0 : index
    %58 = vector.load %arg13[%c0_30, %c0_31] : memref<256x32xf32, #tpu.memory_space<vmem>>, vector<256x32xf32>
    %59 = arith.truncf %58 : vector<256x32xf32> to vector<256x32xbf16>
    %c0_32 = arith.constant 0 : index
    %c0_33 = arith.constant 0 : index
    %60 = vector.load %arg8[%c0_32, %c0_33] : memref<32x32xbf16, #tpu.memory_space<vmem>>, vector<32x32xbf16>
    %cst_34 = arith.constant dense<0.000000e+00> : vector<256x32xf32>
    %61 = tpu.matmul %59, %60, %cst_34 {dimension_numbers = #tpu.dot_dimension_numbers<[1], [0], [0], [1], [0, 0, 1, 1], [], []>} : vector<256x32xbf16>, vector<32x32xbf16>, vector<256x32xf32> -> vector<256x32xf32>
    %c0_35 = arith.constant 0 : index
    %c0_36 = arith.constant 0 : index
    %62 = vector.load %arg9[%c0_35, %c0_36] : memref<1x32xf32, #tpu.memory_space<vmem>>, vector<1x32xf32>
    %63 = vector.broadcast %62 : vector<1x32xf32> to vector<256x32xf32>
    %64 = arith.addf %61, %63 : vector<256x32xf32>
    %65 = vector.broadcast %57 : vector<1x32xf32> to vector<256x32xf32>
    %66 = arith.addf %64, %65 : vector<256x32xf32>
    %67 = arith.negf %66 : vector<256x32xf32>
    %68 = math.exp %67 : vector<256x32xf32>
    %cst_37 = arith.constant 1.000000e+00 : f32
    %69 = vector.broadcast %cst_37 : f32 to vector<256x32xf32>
    %70 = arith.addf %69, %68 : vector<256x32xf32>
    %71 = arith.divf %69, %70 : vector<256x32xf32>
    %72 = arith.mulf %66, %71 : vector<256x32xf32>
    %cst_38 = arith.constant 0.000000e+00 : f32
    %73 = vector.broadcast %cst_38 : f32 to vector<18x18x32xf32>
    %c0_39 = arith.constant 0 : index
    %c0_40 = arith.constant 0 : index
    %c0_41 = arith.constant 0 : index
    %74 = vector.load %arg14[%c0_39, %c0_40, %c0_41] : memref<18x18x32xf32, #tpu.memory_space<vmem>>, vector<18x18x32xf32>
    tpu.vector_store %arg14[%c0_39, %c0_40, %c0_41], %73 {strides = array<i32>} : memref<18x18x32xf32, #tpu.memory_space<vmem>>, vector<18x18x32xf32>,
    %75 = vector.shape_cast %72 : vector<256x32xf32> to vector<16x16x32xf32>
    %c1 = arith.constant 1 : index
    %c1_42 = arith.constant 1 : index
    %c0_43 = arith.constant 0 : index
    %76 = vector.load %arg14[%c1, %c1_42, %c0_43] : memref<18x18x32xf32, #tpu.memory_space<vmem>>, vector<16x16x32xf32>
    tpu.vector_store %arg14[%c1, %c1_42, %c0_43], %75 {strides = array<i32>} : memref<18x18x32xf32, #tpu.memory_space<vmem>>, vector<16x16x32xf32>,
    %cst_44 = arith.constant 0.000000e+00 : f32
    %77 = vector.broadcast %cst_44 : f32 to vector<256x3xf32>
    %c0_45 = arith.constant 0 : index
    %c0_46 = arith.constant 0 : index
    %c0_47 = arith.constant 0 : index
    %78 = vector.load %arg14[%c0_45, %c0_46, %c0_47] : memref<18x18x32xf32, #tpu.memory_space<vmem>>, vector<16x16x32xf32>
    %79 = vector.shape_cast %78 : vector<16x16x32xf32> to vector<256x32xf32>
    %80 = arith.truncf %79 : vector<256x32xf32> to vector<256x32xbf16>
    %c0_48 = arith.constant 0 : index
    %c0_49 = arith.constant 0 : index
    %81 = vector.load %arg10[%c0_48, %c0_49] : memref<288x3xbf16, #tpu.memory_space<vmem>>, vector<32x3xbf16>
    %cst_50 = arith.constant dense<0.000000e+00> : vector<256x3xf32>
    %82 = tpu.matmul %80, %81, %cst_50 {dimension_numbers = #tpu.dot_dimension_numbers<[1], [0], [0], [1], [0, 0, 1, 1], [], []>} : vector<256x32xbf16>, vector<32x3xbf16>, vector<256x3xf32> -> vector<256x3xf32>
    %83 = arith.addf %77, %82 : vector<256x3xf32>
    %c0_51 = arith.constant 0 : index
    %c1_52 = arith.constant 1 : index
    %c0_53 = arith.constant 0 : index
    %84 = vector.load %arg14[%c0_51, %c1_52, %c0_53] : memref<18x18x32xf32, #tpu.memory_space<vmem>>, vector<16x16x32xf32>
    %85 = vector.shape_cast %84 : vector<16x16x32xf32> to vector<256x32xf32>
    %86 = arith.truncf %85 : vector<256x32xf32> to vector<256x32xbf16>
    %c32 = arith.constant 32 : index
    %c0_54 = arith.constant 0 : index
    %87 = vector.load %arg10[%c32, %c0_54] : memref<288x3xbf16, #tpu.memory_space<vmem>>, vector<32x3xbf16>
    %cst_55 = arith.constant dense<0.000000e+00> : vector<256x3xf32>
    %88 = tpu.matmul %86, %87, %cst_55 {dimension_numbers = #tpu.dot_dimension_numbers<[1], [0], [0], [1], [0, 0, 1, 1], [], []>} : vector<256x32xbf16>, vector<32x3xbf16>, vector<256x3xf32> -> vector<256x3xf32>
    %89 = arith.addf %83, %88 : vector<256x3xf32>
    %c0_56 = arith.constant 0 : index
    %c2 = arith.constant 2 : index
    %c0_57 = arith.constant 0 : index
    %90 = vector.load %arg14[%c0_56, %c2, %c0_57] : memref<18x18x32xf32, #tpu.memory_space<vmem>>, vector<16x16x32xf32>
    %91 = vector.shape_cast %90 : vector<16x16x32xf32> to vector<256x32xf32>
    %92 = arith.truncf %91 : vector<256x32xf32> to vector<256x32xbf16>
    %c64 = arith.constant 64 : index
    %c0_58 = arith.constant 0 : index
    %93 = vector.load %arg10[%c64, %c0_58] : memref<288x3xbf16, #tpu.memory_space<vmem>>, vector<32x3xbf16>
    %cst_59 = arith.constant dense<0.000000e+00> : vector<256x3xf32>
    %94 = tpu.matmul %92, %93, %cst_59 {dimension_numbers = #tpu.dot_dimension_numbers<[1], [0], [0], [1], [0, 0, 1, 1], [], []>} : vector<256x32xbf16>, vector<32x3xbf16>, vector<256x3xf32> -> vector<256x3xf32>
    %95 = arith.addf %89, %94 : vector<256x3xf32>
    %c1_60 = arith.constant 1 : index
    %c0_61 = arith.constant 0 : index
    %c0_62 = arith.constant 0 : index
    %96 = vector.load %arg14[%c1_60, %c0_61, %c0_62] : memref<18x18x32xf32, #tpu.memory_space<vmem>>, vector<16x16x32xf32>
    %97 = vector.shape_cast %96 : vector<16x16x32xf32> to vector<256x32xf32>
    %98 = arith.truncf %97 : vector<256x32xf32> to vector<256x32xbf16>
    %c96 = arith.constant 96 : index
    %c0_63 = arith.constant 0 : index
    %99 = vector.load %arg10[%c96, %c0_63] : memref<288x3xbf16, #tpu.memory_space<vmem>>, vector<32x3xbf16>
    %cst_64 = arith.constant dense<0.000000e+00> : vector<256x3xf32>
    %100 = tpu.matmul %98, %99, %cst_64 {dimension_numbers = #tpu.dot_dimension_numbers<[1], [0], [0], [1], [0, 0, 1, 1], [], []>} : vector<256x32xbf16>, vector<32x3xbf16>, vector<256x3xf32> -> vector<256x3xf32>
    %101 = arith.addf %95, %100 : vector<256x3xf32>
    %c1_65 = arith.constant 1 : index
    %c1_66 = arith.constant 1 : index
    %c0_67 = arith.constant 0 : index
    %102 = vector.load %arg14[%c1_65, %c1_66, %c0_67] : memref<18x18x32xf32, #tpu.memory_space<vmem>>, vector<16x16x32xf32>
    %103 = vector.shape_cast %102 : vector<16x16x32xf32> to vector<256x32xf32>
    %104 = arith.truncf %103 : vector<256x32xf32> to vector<256x32xbf16>
    %c128 = arith.constant 128 : index
    %c0_68 = arith.constant 0 : index
    %105 = vector.load %arg10[%c128, %c0_68] : memref<288x3xbf16, #tpu.memory_space<vmem>>, vector<32x3xbf16>
    %cst_69 = arith.constant dense<0.000000e+00> : vector<256x3xf32>
    %106 = tpu.matmul %104, %105, %cst_69 {dimension_numbers = #tpu.dot_dimension_numbers<[1], [0], [0], [1], [0, 0, 1, 1], [], []>} : vector<256x32xbf16>, vector<32x3xbf16>, vector<256x3xf32> -> vector<256x3xf32>
    %107 = arith.addf %101, %106 : vector<256x3xf32>
    %c1_70 = arith.constant 1 : index
    %c2_71 = arith.constant 2 : index
    %c0_72 = arith.constant 0 : index
    %108 = vector.load %arg14[%c1_70, %c2_71, %c0_72] : memref<18x18x32xf32, #tpu.memory_space<vmem>>, vector<16x16x32xf32>
    %109 = vector.shape_cast %108 : vector<16x16x32xf32> to vector<256x32xf32>
    %110 = arith.truncf %109 : vector<256x32xf32> to vector<256x32xbf16>
    %c160 = arith.constant 160 : index
    %c0_73 = arith.constant 0 : index
    %111 = vector.load %arg10[%c160, %c0_73] : memref<288x3xbf16, #tpu.memory_space<vmem>>, vector<32x3xbf16>
    %cst_74 = arith.constant dense<0.000000e+00> : vector<256x3xf32>
    %112 = tpu.matmul %110, %111, %cst_74 {dimension_numbers = #tpu.dot_dimension_numbers<[1], [0], [0], [1], [0, 0, 1, 1], [], []>} : vector<256x32xbf16>, vector<32x3xbf16>, vector<256x3xf32> -> vector<256x3xf32>
    %113 = arith.addf %107, %112 : vector<256x3xf32>
    %c2_75 = arith.constant 2 : index
    %c0_76 = arith.constant 0 : index
    %c0_77 = arith.constant 0 : index
    %114 = vector.load %arg14[%c2_75, %c0_76, %c0_77] : memref<18x18x32xf32, #tpu.memory_space<vmem>>, vector<16x16x32xf32>
    %115 = vector.shape_cast %114 : vector<16x16x32xf32> to vector<256x32xf32>
    %116 = arith.truncf %115 : vector<256x32xf32> to vector<256x32xbf16>
    %c192 = arith.constant 192 : index
    %c0_78 = arith.constant 0 : index
    %117 = vector.load %arg10[%c192, %c0_78] : memref<288x3xbf16, #tpu.memory_space<vmem>>, vector<32x3xbf16>
    %cst_79 = arith.constant dense<0.000000e+00> : vector<256x3xf32>
    %118 = tpu.matmul %116, %117, %cst_79 {dimension_numbers = #tpu.dot_dimension_numbers<[1], [0], [0], [1], [0, 0, 1, 1], [], []>} : vector<256x32xbf16>, vector<32x3xbf16>, vector<256x3xf32> -> vector<256x3xf32>
    %119 = arith.addf %113, %118 : vector<256x3xf32>
    %c2_80 = arith.constant 2 : index
    %c1_81 = arith.constant 1 : index
    %c0_82 = arith.constant 0 : index
    %120 = vector.load %arg14[%c2_80, %c1_81, %c0_82] : memref<18x18x32xf32, #tpu.memory_space<vmem>>, vector<16x16x32xf32>
    %121 = vector.shape_cast %120 : vector<16x16x32xf32> to vector<256x32xf32>
    %122 = arith.truncf %121 : vector<256x32xf32> to vector<256x32xbf16>
    %c224 = arith.constant 224 : index
    %c0_83 = arith.constant 0 : index
    %123 = vector.load %arg10[%c224, %c0_83] : memref<288x3xbf16, #tpu.memory_space<vmem>>, vector<32x3xbf16>
    %cst_84 = arith.constant dense<0.000000e+00> : vector<256x3xf32>
    %124 = tpu.matmul %122, %123, %cst_84 {dimension_numbers = #tpu.dot_dimension_numbers<[1], [0], [0], [1], [0, 0, 1, 1], [], []>} : vector<256x32xbf16>, vector<32x3xbf16>, vector<256x3xf32> -> vector<256x3xf32>
    %125 = arith.addf %119, %124 : vector<256x3xf32>
    %c2_85 = arith.constant 2 : index
    %c2_86 = arith.constant 2 : index
    %c0_87 = arith.constant 0 : index
    %126 = vector.load %arg14[%c2_85, %c2_86, %c0_87] : memref<18x18x32xf32, #tpu.memory_space<vmem>>, vector<16x16x32xf32>
    %127 = vector.shape_cast %126 : vector<16x16x32xf32> to vector<256x32xf32>
    %128 = arith.truncf %127 : vector<256x32xf32> to vector<256x32xbf16>
    %c256 = arith.constant 256 : index
    %c0_88 = arith.constant 0 : index
    %129 = vector.load %arg10[%c256, %c0_88] : memref<288x3xbf16, #tpu.memory_space<vmem>>, vector<32x3xbf16>
    %cst_89 = arith.constant dense<0.000000e+00> : vector<256x3xf32>
    %130 = tpu.matmul %128, %129, %cst_89 {dimension_numbers = #tpu.dot_dimension_numbers<[1], [0], [0], [1], [0, 0, 1, 1], [], []>} : vector<256x32xbf16>, vector<32x3xbf16>, vector<256x3xf32> -> vector<256x3xf32>
    %131 = arith.addf %125, %130 : vector<256x3xf32>
    %c0_90 = arith.constant 0 : index
    %c0_91 = arith.constant 0 : index
    %132 = vector.load %arg11[%c0_90, %c0_91] : memref<1x3xf32, #tpu.memory_space<vmem>>, vector<1x3xf32>
    %133 = vector.broadcast %132 : vector<1x3xf32> to vector<256x3xf32>
    %134 = arith.addf %131, %133 : vector<256x3xf32>
    %135 = vector.extract_strided_slice %7 {offsets = [1, 1, 0], sizes = [16, 16, 3], strides = [1, 1, 1]} : vector<18x18x3xf32> to vector<16x16x3xf32>
    %136 = vector.shape_cast %135 : vector<16x16x3xf32> to vector<256x3xf32>
    %137 = arith.subf %136, %134 : vector<256x3xf32>
    %cst_92 = arith.constant 0.000000e+00 : f32
    %138 = vector.broadcast %cst_92 : f32 to vector<1x1x128xf32>
    %139 = arith.mulf %137, %137 : vector<256x3xf32>
    %140 = vector.shape_cast %139 : vector<256x3xf32> to vector<1x256x3xf32>
    %cst_93 = arith.constant dense<0.000000e+00> : vector<1xf32>
    %141 = vector.multi_reduction <add>, %140, %cst_93 [1, 2] : vector<1x256x3xf32> to vector<1xf32>
    %142 = vector.shape_cast %141 : vector<1xf32> to vector<1x1x1xf32>
    %143 = vector.extract %142[0, 0, 0] : f32 from vector<1x1x1xf32>
    %144 = vector.broadcast %143 : f32 to vector<1x1x128xf32>
    %145 = arith.addf %138, %144 : vector<1x1x128xf32>
    %c0_94 = arith.constant 0 : index
    %c0_95 = arith.constant 0 : index
    %c0_96 = arith.constant 0 : index
    %146 = vector.load %arg12[%c0_94, %c0_95, %c0_96] : memref<1x1x128xf32, #tpu.memory_space<vmem>>, vector<1x1x128xf32>
    tpu.vector_store %arg12[%c0_94, %c0_95, %c0_96], %145 {strides = array<i32>} : memref<1x1x128xf32, #tpu.memory_space<vmem>>, vector<1x1x128xf32>,
    return
  }
  func.func @transform_0(%arg0: i32) -> (i32, i32, i32, i32) {
    %c0_i32 = arith.constant 0 : i32
    %c0_i32_0 = arith.constant 0 : i32
    %c0_i32_1 = arith.constant 0 : i32
    %c0_i32_2 = arith.constant 0 : i32
    return %arg0, %c0_i32, %c0_i32_0, %c0_i32_1 : i32, i32, i32, i32
  }
  func.func @transform_1(%arg0: i32) -> (i32, i32, i32, i32) {
    %c0_i32 = arith.constant 0 : i32
    %c0_i32_0 = arith.constant 0 : i32
    %c0_i32_1 = arith.constant 0 : i32
    %c0_i32_2 = arith.constant 0 : i32
    return %arg0, %c0_i32, %c0_i32_0, %c0_i32_1 : i32, i32, i32, i32
  }
  func.func @transform_2(%arg0: i32) -> i32 {
    %c0_i32 = arith.constant 0 : i32
    %c0_i32_0 = arith.constant 0 : i32
    return %c0_i32 : i32
  }
  func.func @transform_3(%arg0: i32) -> i32 {
    %c0_i32 = arith.constant 0 : i32
    %c0_i32_0 = arith.constant 0 : i32
    return %c0_i32 : i32
  }
  func.func @transform_4(%arg0: i32) -> (i32, i32, i32) {
    %c0_i32 = arith.constant 0 : i32
    %c0_i32_0 = arith.constant 0 : i32
    %c0_i32_1 = arith.constant 0 : i32
    return %arg0, %c0_i32, %c0_i32_0 : i32, i32, i32
  }
  func.func @transform_5(%arg0: i32) -> (i32, i32) {
    %c0_i32 = arith.constant 0 : i32
    %c0_i32_0 = arith.constant 0 : i32
    %c0_i32_1 = arith.constant 0 : i32
    return %c0_i32, %c0_i32_0 : i32, i32
  }
  func.func @transform_6(%arg0: i32) -> (i32, i32) {
    %c0_i32 = arith.constant 0 : i32
    %c0_i32_0 = arith.constant 0 : i32
    %c0_i32_1 = arith.constant 0 : i32
    return %c0_i32, %c0_i32_0 : i32, i32
  }
  func.func @transform_7(%arg0: i32) -> (i32, i32) {
    %c0_i32 = arith.constant 0 : i32
    %c0_i32_0 = arith.constant 0 : i32
    %c0_i32_1 = arith.constant 0 : i32
    return %c0_i32, %c0_i32_0 : i32, i32
  }
  func.func @transform_8(%arg0: i32) -> (i32, i32) {
    %c0_i32 = arith.constant 0 : i32
    %c0_i32_0 = arith.constant 0 : i32
    %c0_i32_1 = arith.constant 0 : i32
    return %c0_i32, %c0_i32_0 : i32, i32
  }
  func.func @transform_9(%arg0: i32) -> (i32, i32) {
    %c0_i32 = arith.constant 0 : i32
    %c0_i32_0 = arith.constant 0 : i32
    %c0_i32_1 = arith.constant 0 : i32
    return %c0_i32, %c0_i32_0 : i32, i32
  }
  func.func @transform_10(%arg0: i32) -> (i32, i32) {
    %c0_i32 = arith.constant 0 : i32
    %c0_i32_0 = arith.constant 0 : i32
    %c0_i32_1 = arith.constant 0 : i32
    return %c0_i32, %c0_i32_0 : i32, i32
  }
  func.func @transform_11(%arg0: i32) -> (i32, i32, i32) {
    %c0_i32 = arith.constant 0 : i32
    %c0_i32_0 = arith.constant 0 : i32
    %c0_i32_1 = arith.constant 0 : i32
    return %arg0, %c0_i32, %c0_i32_0 : i32, i32, i32
  }
}

</mosaic_0001>

<bundles_post_ra>
// kernel: tpu_custom_call.1
= control target key start
LH: loop header
LB: loop body
LE: loop exit
PB: predicated region body
PF: predicated region fallthrough
CT: control target
= control target key end

     0   :  { %s9714_s0 = inlined_call_operand.vmem [shape: f32[2,18,18,3], index: 0, kind: input, shape index: {}]   ;;  %s9715_s1 = inlined_call_operand.vmem [shape: f32[2,18,18,3], index: 1, kind: input, shape index: {}]   ;;  %s9716_s2 = inlined_call_operand.vmem [shape: f32[2], index: 2, kind: input, shape index: {}]   ;;  %s9717_s3 = inlined_call_operand.vmem [shape: f32[2], index: 3, kind: input, shape index: {}]   ;;  %s9718_s4 = inlined_call_operand.vmem [shape: f32[2,1,32], index: 4, kind: input, shape index: {}]   ;;  %s9719_s5 = inlined_call_operand.vmem [shape: f32[32,32], index: 5, kind: input, shape index: {}]   ;;  %s9720_s6 = inlined_call_operand.vmem [shape: f32[1,32], index: 6, kind: input, shape index: {}]   ;;  %s9721_s7 = inlined_call_operand.vmem [shape: bf16[32,32], index: 7, kind: input, shape index: {}]   ;;  %s9722_s8 = inlined_call_operand.vmem [shape: f32[1,32], index: 8, kind: input, shape index: {}]   ;;  %s9723_s9 = inlined_call_operand.vmem [shape: bf16[288,3], index: 9, kind: input, shape index: {}]   ;;  %s9724_s10 = inlined_call_operand.vmem [shape: f32[1,3], index: 10, kind: input, shape index: {}]   ;;  %s9725_s11 = inlined_call_operand.hbm [shape: f32[2,1,128], index: 11, kind: output, shape index: {}]  }
   0x1   :  { %9745 = sst [smem:[#allocation76_spill]] %s9714_s0 }
   0x2   :  { %9746 = sst [smem:[#allocation77_spill]] %s9715_s1 }
   0x3   :  { %9747 = sst [smem:[#allocation78_spill]] %s9716_s2 }
   0x4   :  { %9748 = sst [smem:[#allocation79_spill]] %s9717_s3 }
   0x5   :  { %16 = vsyncpa [#allocation6], 0 }
   0x6   :  { %17 = vsyncpa [#allocation8], 0 }
   0x7   :  { %18 = vsyncpa [#allocation5], 0 }
   0x8   :  { %20 = vsyncpa [#allocation5 + $0x1], 0  ;;  %s6451_s17 = smov 0   ;;  %s6453_s18 = smov 0  }
   0x9   :  { %s6455_s19 = smov 0   ;;  %s6457_s20 = smov 0  }
   0xa LB: > { %s6472_s21 = sadd.s32 4294967295, %s6378_s20   ;;  %s5657_s22 = sadd.s32 4294967294, %s6378_s20   ;;  %s6378_s20 = sphi %s6457_s20, %s9978_s20   ;;  %s6374_s19 = sphi %s6455_s19, %s9977_s19   ;;  %s6370_s18 = sphi %s6453_s18, %s9976_s18   ;;  %s6366_s17 = sphi %s6451_s17, %s9975_s17  }
   0xb   : > { %s6476_s23 = sadd.s32 1, %s6378_s20   ;;  %s279_s24 = sadd.s32 1, %s6374_s19 }
   0xc   : > { %s276_s25 = ssub.s32 %s6378_s20, %s6476_s23  ;;  %p289_p0 = scmp.ne.s32.totalorder %s6374_s19, %s6370_s18 }
   0xd   : > { %p277_p1 = scmp.eq.s32.totalorder %s276_s25, 0  ;;  %p290_p2 = scmp.eq.s32.totalorder %s6472_s21, 1 }
   0xe   : > { %p295_p3 = scmp.ne.s32.totalorder %s6370_s18, %s6366_s17  ;;  %p296_p4 = scmp.eq.s32.totalorder %s5657_s22, 1 }
   0xf   : > { %s6487_s26 = scalar_select %p277_p1, %s6374_s19, %s279_s24  }
  0x10   : > { %p6489_p5 = por %p290_p2, %p289_p0  ;;  %p6493_p6 = por %p296_p4, %p295_p3 }
  0x11   : > { %p5658_p7 = scmp.ge.s32.totalorder %s6378_s20, 1  ;;  %p303_p8 = scmp.lt.s32.totalorder %s6378_s20, 3 }
  0x12   : > { %p6045_p9 = scmp.eq.s32.totalorder %s6472_s21, 0  ;;  %s9751_s2 = sld [smem:[#allocation78_spill]] }
  0x13   : > { %p304_p10 = pnand %p5658_p7, %p303_p8  ;;  %s9752_s3 = sld [smem:[#allocation79_spill]] }
  0x14   : > { %s6380_s16 = smov [#allocation4]   ;;  %s6381_s22 = smov [#allocation7]  }
  0x15   : > { %p6034_p11 = pneg %p304_p10 }
  0x17   : > { %p6035_p12 = pnand %p6045_p9, %p6034_p11  ;;  %378 = sbr.rel (%p304_p10) target bundleno = 1845 (0x735), region = 64 }
  0x18   : > { %s315_s12 = sshll.u32 %s9751_s2, 4  ;;  %s316_s12 = int_to_ptr.vmem [resolvable:$true] %s315_s12 }
  0x19   : > { %s325_s15 = sshll.u32 %s9752_s3, 4  ;;  %s326_s15 = int_to_ptr.vmem [resolvable:$true] %s325_s15 }
  0x1a   : > { %6037 = dma.vmem_to_smem (!%p6035_p12), %s316_s12, 16, %s6380_s16, [#allocation6]  }
  0x1b   : > { %6040 = dma.vmem_to_smem (!%p6035_p12), %s326_s15, 16, %s6381_s22, [#allocation8]  }
  0x1c   : > { %6353 = dma.done.wait (%p6045_p9), [#allocation6], 16  }
  0x1d   : > { %6355 = vsyncadd (%p6045_p9), [#allocation6], 4294967280 }
  0x1e   : > { %6357 = dma.done.wait (%p6045_p9), [#allocation8], 16  }
  0x1f   : > { %6359 = vsyncadd (%p6045_p9), [#allocation8], 4294967280 }
  0x20   : > { %390 = sfence }
  0x21   : > { %p432_p13 = scmp.lt.s32.totalorder %s6472_s21, 1  ;;  %s446_s24 = sld [smem:[#allocation4 + %s6472_s21]]  ;;  %vm1152_vm0 = vcmask 1045504   ;;  %vm942_vm1 = vcmask 1046528   ;;  %vm828_vm2 = vcmask 261120   ;;  %vm861_vm3 = vcmask 23552  }
  0x22   : > { %s447_s25 = sld [smem:[#allocation7 + %s6472_s21]]  ;;  %s9728_s12 = smov 12   ;;  %vm1119_vm4 = vcmask 48152   ;;  %vm1329_vm5 = vcmask 72752   ;;  %vm1460_vm6 = vcmask 97352   ;;  %vm1595_vm7 = vcmask 121952  }
  0x23   : > { %s6520_s29 = scalar_select %p432_p13, %s6472_s21, 1  ;;  %vm1729_vm8 = vcmask 146552   ;;  %vm9742_vm9 = vcmask 171152   ;;  %vm1995_vm10 = vcmask 195752   ;;  %vm2129_vm11 = vcmask 220352  }
  0x24   : > { %s9753_s0 = sld [smem:[#allocation76_spill]]  ;;  %s9732_s13 = smov 15  }
  0x25   : > { %s6021_s30 = smul.u32 432, %s6520_s29  ;;  %s9754_s1 = sld [smem:[#allocation77_spill]] }
  0x26   : > { %s9726_s15 = smov 18   ;;  %s9738_s16 = smov 21  }
  0x27   : > { %v6541_v9 = vstv %s446_s24  ;;  %s9730_s24 = smov 6  }
  0x28   : > { %v6536_v3 = vstv %s447_s25  ;;  %s9740_s25 = smov 3  }
  0x2a   : > { %s6526_s14 = scalar_lea.vmem %s9753_s0, %s6021_s30  ;;  %s9757_s0 = smov 21  }
  0x2b   : > { %s6531_s22 = scalar_lea.vmem %s9754_s1, %s6021_s30  ;;  %v448_v0 = vld [vmem:[%s6526_s14] sm:$0xff]  ;;  %v449_v1 = vld [vmem:[%s6526_s14 + $0x8] sm:$0xff]  ;;  %v450_v7 = vld [vmem:[%s6526_s14 + $0x10] sm:$0x3]  ;;  %s9736_s30 = smov 9  }
  0x2c   : > { %v502_v2 = vld [vmem:[%s6531_s22] sm:$0xff]  ;;  %v503_v4 = vld [vmem:[%s6531_s22 + $0x8] sm:$0xff]  ;;  %v556_v5 = vmul.f32 2.0, %v448_v0  ;;  %v557_v6 = vmul.f32 2.0, %v449_v1  ;;  %v504_v10 = vld [vmem:[%s6531_s22 + $0x10] sm:$0x3] }
  0x2d   : > { %v452_v8 = vld [vmem:[%s6526_s14 + $0x20] sm:$0xff]  ;;  %v558_v11 = vmul.f32 2.0, %v450_v7  ;;  %v453_v12 = vld [vmem:[%s6526_s14 + $0x28] sm:$0x3]  ;;  %v720_v15 = vmul.f32 %v6536_v3, %v502_v2  ;;  %v721_v16 = vmul.f32 %v6536_v3, %v503_v4  ;;  %v451_v17 = vld [vmem:[%s6526_s14 + $0x18] sm:$0xff]  ;;  %v722_v19 = vmul.f32 %v6536_v3, %v504_v10  ;;  %s9758_s1 = smov 9  }
  0x2e   : > { %v5667_v13 = vadd.f32 -1.0, %v556_v5  ;;  %v5668_v14 = vadd.f32 -1.0, %v557_v6  ;;  %v560_v20 = vmul.f32 2.0, %v452_v8  ;;  %v561_v21 = vmul.f32 2.0, %v453_v12  ;;  %v505_v24 = vld [vmem:[%s6531_s22 + $0x18] sm:$0xff]  ;;  %v506_v31 = vld [vmem:[%s6531_s22 + $0x20] sm:$0xff] }
  0x2f   : > { %v5669_v18 = vadd.f32 -1.0, %v558_v11  ;;  %v559_v25 = vmul.f32 2.0, %v451_v17  ;;  %v723_v34 = vmul.f32 %v6536_v3, %v505_v24  ;;  %v507_v39 = vld [vmem:[%s6531_s22 + $0x28] sm:$0x3]  ;;  %v724_v44 = vmul.f32 %v6536_v3, %v506_v31  ;;  %v454_v54 = vld [vmem:[%s6526_s14 + $0x30] sm:$0xff]  ;;  %v455_v55 = vld [vmem:[%s6526_s14 + $0x38] sm:$0xff] }
  0x30   : > { %v665_v22 = vmul.f32 %v5667_v13, %v6541_v9  ;;  %v666_v23 = vmul.f32 %v5668_v14, %v6541_v9  ;;  %v5671_v32 = vadd.f32 -1.0, %v560_v20  ;;  %v5672_v33 = vadd.f32 -1.0, %v561_v21  ;;  %v456_v56 = vld [vmem:[%s6526_s14 + $0x40] sm:$0x3]  ;;  %v508_v4 = vld [vmem:[%s6531_s22 + $0x30] sm:$0xff]  ;;  %v509_v8 = vld [vmem:[%s6531_s22 + $0x38] sm:$0xff] }
  0x31   : > { %v667_v26 = vmul.f32 %v5669_v18, %v6541_v9  ;;  %v5670_v29 = vadd.f32 -1.0, %v559_v25  ;;  %v725_v45 = vmul.f32 %v6536_v3, %v507_v39  ;;  %v562_v58 = vmul.f32 2.0, %v454_v54  ;;  %v510_v10 = vld [vmem:[%s6531_s22 + $0x40] sm:$0x3]  ;;  %v459_v39 = vld [vmem:[%s6526_s14 + $0x58] sm:$0x3] }
  0x32   : > { %v6553_v27 = vadd.f32 %v720_v15, %v665_v22  ;;  %v6555_v28 = vadd.f32 %v721_v16, %v666_v23  ;;  %v669_v43 = vmul.f32 %v5671_v32, %v6541_v9  ;;  %v670_v48 = vmul.f32 %v5672_v33, %v6541_v9 }
  0x33   : > { %v776_v30 = vadd.f32 %v722_v19, %v667_v26  ;;  %v668_v42 = vmul.f32 %v5670_v29, %v6541_v9  ;;  %v563_v61 = vmul.f32 2.0, %v455_v55  ;;  %v564_v62 = vmul.f32 2.0, %v456_v56 }
  0x34   : > { %v1153_v35 = vrot.slane %v6553_v27, 2  ;;  %v1154_v36 = vrot.slane %v6555_v28, 2  ;;  %v943_v37 = vrot.slane %v6553_v27, 1  ;;  %v944_v38 = vrot.slane %v6555_v28, 1 }
  0x35   : > { %v1156_v46 = vrot.slane %v776_v30, 2  ;;  %v946_v47 = vrot.slane %v776_v30, 1  ;;  %v6573_v49 = vadd.f32 %v723_v34, %v668_v42  ;;  %v6577_v50 = vadd.f32 %v724_v44, %v669_v43  ;;  %v511_v42 = vld [vmem:[%s6531_s22 + $0x48] sm:$0xff]  ;;  %v512_v43 = vld [vmem:[%s6531_s22 + $0x50] sm:$0xff] }
  0x36   : > { %v1155_v40 = vsel %vm1152_vm0, %v1153_v35, %v1154_v36  ;;  %v945_v41 = vsel %vm942_vm1, %v943_v37, %v944_v38  ;;  %v779_v53 = vadd.f32 %v725_v45, %v670_v48  ;;  %v5673_v63 = vadd.f32 -1.0, %v562_v58  ;;  %v457_v35 = vld [vmem:[%s6526_s14 + $0x48] sm:$0xff] }
  0x37   : > { %1233 = vrot.lane.b32.xlu1 %v1155_v40, %s9730_s24  ;;  %1023 = vrot.lane.b32.xlu0 %v945_v41, %s9740_s25  ;;  %v1157_v51 = vsel %vm1152_vm0, %v1154_v36, %v1156_v46  ;;  %v947_v52 = vsel %vm942_vm1, %v944_v38, %v946_v47  ;;  %v949_v57 = vrot.slane %v6577_v50, 1  ;;  %v948_v60 = vrot.slane %v6573_v49, 1  ;;  %v458_v36 = vld [vmem:[%s6526_s14 + $0x50] sm:$0xff] }
  0x38   : > { %1364 = vrot.lane.b32.xlu2 %v6573_v49, %s9736_s30  ;;  %v951_v59 = vrot.slane %v779_v53, 1  ;;  %v1158_v0 = vrot.slane %v6573_v49, 2  ;;  %v5674_v5 = vadd.f32 -1.0, %v563_v61  ;;  %v5675_v6 = vadd.f32 -1.0, %v564_v62 }
  0x39   : > { %v950_v2 = vsel %vm942_vm1, %v948_v60, %v949_v57  ;;  %v1159_v7 = vrot.slane %v6577_v50, 2  ;;  %v671_v11 = vmul.f32 %v5673_v63, %v6541_v9  ;;  %v726_v12 = vmul.f32 %v6536_v3, %v508_v4 }
  0x3a   : > { %v952_v1 = vsel %vm942_vm1, %v949_v57, %v951_v59  ;;  %v1161_v13 = vrot.slane %v779_v53, 2  ;;  %v672_v15 = vmul.f32 %v5674_v5, %v6541_v9  ;;  %v673_v16 = vmul.f32 %v5675_v6, %v6541_v9  ;;  %v460_v6 = vld [vmem:[%s6526_s14 + $0x60] sm:$0xff] }
  0x3b   : > { %v1160_v14 = vsel %vm1152_vm0, %v1158_v0, %v1159_v7  ;;  %v727_v17 = vmul.f32 %v6536_v3, %v509_v8  ;;  %v728_v18 = vmul.f32 %v6536_v3, %v510_v10  ;;  %v6607_v19 = vadd.f32 %v726_v12, %v671_v11  ;;  %v515_v10 = vld [vmem:[%s6531_s22 + $0x68] sm:$0xff] }
  0x3c   : > { %v1162_v20 = vsel %vm1152_vm0, %v1159_v7, %v1161_v13  ;;  %v565_v37 = vmul.f32 2.0, %v457_v35  ;;  %v566_v38 = vmul.f32 2.0, %v458_v36  ;;  %v567_v44 = vmul.f32 2.0, %v459_v39  ;;  %v514_v13 = vld [vmem:[%s6531_s22 + $0x60] sm:$0xff] }
  0x3d   : > { %v6610_v21 = vadd.f32 %v727_v17, %v672_v15  ;;  %v782_v22 = vadd.f32 %v728_v18, %v673_v16  ;;  %v953_v25 = vrot.slane %v6607_v19, 1  ;;  %v1163_v26 = vrot.slane %v6607_v19, 2 }
  0x3e   : > { %v5676_v40 = vadd.f32 -1.0, %v565_v37  ;;  %v5677_v41 = vadd.f32 -1.0, %v566_v38  ;;  %v729_v47 = vmul.f32 %v6536_v3, %v511_v42  ;;  %v730_v48 = vmul.f32 %v6536_v3, %v512_v43  ;;  %v2166_v43 = vld [vmem:[%s9719_s5 + $0x18] sm:$0xff] }
  0x3f   : > { %1235 = vrot.lane.b32.xlu1 %v1157_v51, %s9730_s24  ;;  %1025 = vrot.lane.b32.xlu0 %v947_v52, %s9740_s25  ;;  %v954_v23 = vrot.slane %v6610_v21, 1  ;;  %v956_v24 = vrot.slane %v782_v22, 1  ;;  %v1164_v31 = vrot.slane %v6610_v21, 2  ;;  %v1166_v33 = vrot.slane %v782_v22, 2  ;;  %v513_v52 = vld [vmem:[%s6531_s22 + $0x58] sm:$0x3] }
  0x40   : > { %1366 = vrot.lane.b32.xlu2 %v6577_v50, %s9736_s30  ;;  %v674_v45 = vmul.f32 %v5676_v40, %v6541_v9  ;;  %v675_v46 = vmul.f32 %v5677_v41, %v6541_v9  ;;  %v5678_v51 = vadd.f32 -1.0, %v567_v44  ;;  %v731_v56 = vmul.f32 %v6536_v3, %v513_v52  ;;  %v462_v22 = vld [vmem:[%s6526_s14 + $0x70] sm:$0x3]  ;;  %2183 = vmatpush.msra.mxu0 %v2166_v43 }
  0x41   : > { %v6621_v29 = vsel %vm942_vm1, %v954_v23, %v956_v24  ;;  %v6624_v30 = vsel %vm942_vm1, %v953_v25, %v954_v23  ;;  %v6632_v32 = vsel %vm1152_vm0, %v1163_v26, %v1164_v31  ;;  %v6637_v34 = vsel %vm1152_vm0, %v1164_v31, %v1166_v33  ;;  %v2165_v44 = vld [vmem:[%s9719_s5 + $0x10] sm:$0xff] }
  0x42   : > { %v6663_v53 = vadd.f32 %v729_v47, %v674_v45  ;;  %v6665_v54 = vadd.f32 %v730_v48, %v675_v46  ;;  %v676_v55 = vmul.f32 %v5678_v51, %v6541_v9  ;;  %v6390_v5 = vmov 0.0   ;;  %v2164_v47 = vld [vmem:[%s9719_s5 + $0x8] sm:$0xff]  ;;  %2184 = vmatpush.msra.mxu0 %v2165_v44  ;;  %v2163_v51 = vld [vmem:[%s9719_s5] sm:$0xff] }
  0x43   : > { %829 = vst.msk [vmem:[#allocation2] sm:$0xff] %vm828_vm2, %v6390_v5  ;;  %v568_v8 = vmul.f32 2.0, %v460_v6  ;;  %v732_v17 = vmul.f32 %v6536_v3, %v514_v13  ;;  %v570_v23 = vmul.f32 2.0, %v462_v22 }
  0x44   : > { %v958_v57 = vrot.slane %v6663_v53, 1  ;;  %v959_v58 = vrot.slane %v6665_v54, 1  ;;  %v785_v59 = vadd.f32 %v731_v56, %v676_v55  ;;  %v1169_v63 = vrot.slane %v6665_v54, 2  ;;  %862 = vst.msk [vmem:[#allocation2] sm:$0xff] %vm861_vm3, %v6553_v27  ;;  %v461_v27 = vld [vmem:[%s6526_s14 + $0x68] sm:$0xff]  ;;  %2185 = vmatpush.msra.mxu0 %v2164_v47 }
  0x45   : > { %830 = vst.msk [vmem:[#allocation2 + $0x8] sm:$0xff] %vm828_vm2, %v6390_v5  ;;  %v569_v7 = vmul.f32 2.0, %v461_v27  ;;  %v5679_v12 = vadd.f32 -1.0, %v568_v8  ;;  %v5681_v25 = vadd.f32 -1.0, %v570_v23  ;;  %v465_v27 = vld [vmem:[%s6526_s14 + $0x88] sm:$0x3] }
  0x46   : > { %v961_v60 = vrot.slane %v785_v59, 1  ;;  %v6678_v61 = vsel %vm942_vm1, %v958_v57, %v959_v58  ;;  %v1171_v0 = vrot.slane %v785_v59, 2  ;;  %831 = vst.msk [vmem:[#allocation2 + $0x10] sm:$0xff] %vm828_vm2, %v6390_v5  ;;  %2186 = vmatpush.msra.mxu0 %v2163_v51  ;;  %v519_v8 = vld [vmem:[%s6531_s22 + $0x88] sm:$0x3] }
  0x47   : > { %1501 = vrot.lane.b32.xlu1 %v952_v1, %s9728_s12  ;;  %1499 = vrot.lane.b32.xlu0 %v950_v2, %s9728_s12  ;;  %832 = vst.msk [vmem:[#allocation2 + $0x18] sm:$0xff] %vm828_vm2, %v6390_v5  ;;  %v5680_v11 = vadd.f32 -1.0, %v569_v7  ;;  %v677_v16 = vmul.f32 %v5679_v12, %v6541_v9  ;;  %v518_v7 = vld [vmem:[%s6531_s22 + $0x80] sm:$0xff]  ;;  %v737_v22 = vmul.f32 %v6536_v3, %v519_v8 }
  0x48   : > { %1633 = vrot.lane.b32.xlu2 %v1160_v14, %s9732_s13  ;;  %v6685_v62 = vsel %vm942_vm1, %v959_v58, %v961_v60  ;;  %833 = vst.msk [vmem:[#allocation2 + $0x20] sm:$0xff] %vm828_vm2, %v6390_v5  ;;  %v463_v60 = vld [vmem:[%s6526_s14 + $0x78] sm:$0xff] }
  0x49   : > { %834 = vst.msk [vmem:[#allocation2 + $0x28] sm:$0xff] %vm828_vm2, %v6390_v5  ;;  %v678_v15 = vmul.f32 %v5680_v11, %v6541_v9  ;;  %v573_v11 = vmul.f32 2.0, %v465_v27 }
  0x4a   : > { %835 = vst.msk [vmem:[#allocation2 + $0x30] sm:$0xff] %vm828_vm2, %v6390_v5 }
  0x4b   : > { %836 = vst.msk [vmem:[#allocation2 + $0x38] sm:$0xff] %vm828_vm2, %v6390_v5 }
  0x4c   : > { %837 = vst.msk [vmem:[#allocation2 + $0x40] sm:$0xff] %vm828_vm2, %v6390_v5 }
  0x4d   : > { %838 = vst.msk [vmem:[#allocation2 + $0x48] sm:$0xff] %vm828_vm2, %v6390_v5 }
  0x4e   : > { %839 = vst.msk [vmem:[#allocation2 + $0x50] sm:$0xff] %vm828_vm2, %v6390_v5 }
  0x4f   : > { %1764 = vrot.lane.b32.xlu1 %v6607_v19, %s9726_s15  ;;  %1635 = vrot.lane.b32.xlu0 %v1162_v20, %s9732_s13  ;;  %840 = vst.msk [vmem:[#allocation2 + $0x58] sm:$0xff] %vm828_vm2, %v6390_v5 }
  0x50   : > { %1766 = vrot.lane.b32.xlu2 %v6610_v21, %s9726_s15  ;;  %s9734_s15 = smov 24   ;;  %841 = vst.msk [vmem:[#allocation2 + $0x60] sm:$0xff] %vm828_vm2, %v6390_v5 }
  0x51   : > { %842 = vst.msk [vmem:[#allocation2 + $0x68] sm:$0xff] %vm828_vm2, %v6390_v5 }
  0x52   : > { %843 = vst.msk [vmem:[#allocation2 + $0x70] sm:$0xff] %vm828_vm2, %v6390_v5 }
  0x53   : > { %844 = vst.msk [vmem:[#allocation2 + $0x78] sm:$0xff] %vm828_vm2, %v6390_v5 }
  0x54   : > { %845 = vst.msk [vmem:[#allocation2 + $0x80] sm:$0xff] %vm828_vm2, %v6390_v5 }
  0x55   : > { %846 = vst.msk [vmem:[#allocation2 + $0x88] sm:$0xff] %vm828_vm2, %v6390_v5 }
  0x56   : > { %847 = vst.msk [vmem:[#allocation2 + $0x90] sm:$0xff] %vm828_vm2, %v6390_v5 }
  0x57   : > { %1901 = vrot.lane.b32.xlu1 %v6621_v29, %s9738_s16  ;;  %1899 = vrot.lane.b32.xlu0 %v6624_v30, %s9738_s16  ;;  %848 = vst.msk [vmem:[#allocation2 + $0x98] sm:$0xff] %vm828_vm2, %v6390_v5 }
  0x58   : > { %2033 = vrot.lane.b32.xlu2 %v6632_v32, %s9734_s15  ;;  %849 = vst.msk [vmem:[#allocation2 + $0xa0] sm:$0xff] %vm828_vm2, %v6390_v5 }
  0x59   : > { %850 = vst.msk [vmem:[#allocation2 + $0xa8] sm:$0xff] %vm828_vm2, %v6390_v5 }
  0x5a   : > { %851 = vst.msk [vmem:[#allocation2 + $0xb0] sm:$0xff] %vm828_vm2, %v6390_v5 }
  0x5b   : > { %852 = vst.msk [vmem:[#allocation2 + $0xb8] sm:$0xff] %vm828_vm2, %v6390_v5 }
  0x5c   : > { %853 = vst.msk [vmem:[#allocation2 + $0xc0] sm:$0xff] %vm828_vm2, %v6390_v5 }
  0x5d   : > { %854 = vst.msk [vmem:[#allocation2 + $0xc8] sm:$0xff] %vm828_vm2, %v6390_v5 }
  0x5e   : > { %855 = vst.msk [vmem:[#allocation2 + $0xd0] sm:$0xff] %vm828_vm2, %v6390_v5 }
  0x5f   : > { %1027 = vrot.lane.b32.xlu1 %v950_v2, %s9740_s25  ;;  %2035 = vrot.lane.b32.xlu0 %v6637_v34, %s9734_s15  ;;  %v6692_v2 = vsel %vm1152_vm0, %v1169_v63, %v1171_v0  ;;  %856 = vst.msk [vmem:[#allocation2 + $0xd8] sm:$0xff] %vm828_vm2, %v6390_v5 }
  0x60   : > { %1029 = vrot.lane.b32.xlu2 %v952_v1, %s9740_s25  ;;  %v1168_v1 = vrot.slane %v6663_v53, 2  ;;  %857 = vst.msk [vmem:[#allocation2 + $0xe0] sm:$0xff] %vm828_vm2, %v6390_v5 }
  0x61   : > { %858 = vst.msk [vmem:[#allocation2 + $0xe8] sm:$0xff] %vm828_vm2, %v6390_v5 }
  0x62   : > { %v6695_v4 = vsel %vm1152_vm0, %v1168_v1, %v1169_v63  ;;  %859 = vst.msk [vmem:[#allocation2 + $0xf0] sm:$0xff] %vm828_vm2, %v6390_v5  ;;  %v517_v63 = vld [vmem:[%s6531_s22 + $0x78] sm:$0xff]  ;;  %v5998_v1 = vld [vmem:[%s9721_s7 + $0x8] sm:$0xff] }
  0x63   : > { %860 = vst.msk [vmem:[#allocation2 + $0xf8] sm:$0xff] %vm828_vm2, %v6390_v5  ;;  %v735_v13 = vmul.f32 %v6536_v3, %v517_v63  ;;  %2333 = vmatpush.bf16.msra.mxu1 %v5998_v1  ;;  %6017 = vmatpush.bf16.msra.mxu3 %v5998_v1 }
  0x64   : > { %3089 = vst.msk [vmem:[#allocation3] sm:$0xff] %vm828_vm2, %v6390_v5 }
  0x65   : > { %3090 = vst.msk [vmem:[#allocation3 + $0x8] sm:$0xff] %vm828_vm2, %v6390_v5 }
  0x66   : > { %3093 = vst.msk [vmem:[#allocation3 + $0x18] sm:$0xff] %vm828_vm2, %v6390_v5 }
  0x67   : > { %1239 = vrot.lane.b32.xlu1 %v1162_v20, %s9730_s24  ;;  %1237 = vrot.lane.b32.xlu0 %v1160_v14, %s9730_s24  ;;  %v733_v14 = vmul.f32 %v6536_v3, %v515_v10  ;;  %v6785_v20 = vadd.f32 %v732_v17, %v677_v16  ;;  %3094 = vst.msk [vmem:[#allocation3 + $0x20] sm:$0xff] %vm828_vm2, %v6390_v5  ;;  %v5684_v16 = vadd.f32 -1.0, %v573_v11  ;;  %v522_v11 = vld [vmem:[%s6531_s22 + $0xa0] sm:$0x3] }
  0x68   : > { %1368 = vrot.lane.b32.xlu2 %v6607_v19, %s9736_s30  ;;  %3096 = vst.msk [vmem:[#allocation3 + $0x30] sm:$0xff] %vm828_vm2, %v6390_v5  ;;  %v736_v17 = vmul.f32 %v6536_v3, %v518_v7 }
  0x69   : > { %v6783_v18 = vadd.f32 %v733_v14, %v678_v15  ;;  %3097 = vst.msk [vmem:[#allocation3 + $0x38] sm:$0xff] %vm828_vm2, %v6390_v5  ;;  %v963_v48 = vrot.slane %v6785_v20, 1  ;;  %v5997_v14 = vld [vmem:[%s9721_s7] sm:$0xff] }
  0x6a   : > { %3099 = vst.msk [vmem:[#allocation3 + $0x48] sm:$0xff] %vm828_vm2, %v6390_v5  ;;  %2334 = vmatpush.bf16.msra.mxu1 %v5997_v14  ;;  %6018 = vmatpush.bf16.msra.mxu3 %v5997_v14 }
  0x6b   : > { %v1174_v35 = vrot.slane %v6783_v18, 2  ;;  %v964_v36 = vrot.slane %v6783_v18, 1  ;;  %3100 = vst.msk [vmem:[#allocation3 + $0x50] sm:$0xff] %vm828_vm2, %v6390_v5 }
  0x6c   : > { %3102 = vst.msk [vmem:[#allocation3 + $0x60] sm:$0xff] %vm828_vm2, %v6390_v5 }
  0x6d   : > { %3103 = vst.msk [vmem:[#allocation3 + $0x68] sm:$0xff] %vm828_vm2, %v6390_v5  ;;  %v6906_v55 = vsel %vm942_vm1, %v963_v48, %v964_v36  ;;  %v520_v48 = vld [vmem:[%s6531_s22 + $0x90] sm:$0xff] }
  0x6e   : > { %3105 = vst.msk [vmem:[#allocation3 + $0x78] sm:$0xff] %vm828_vm2, %v6390_v5 }
  0x6f   : > { %1503 = vrot.lane.b32.xlu1 %v6624_v30, %s9728_s12  ;;  %1370 = vrot.lane.b32.xlu0 %v6610_v21, %s9736_s30  ;;  %3106 = vst.msk [vmem:[#allocation3 + $0x80] sm:$0xff] %vm828_vm2, %v6390_v5 }
  0x70   : > { %1505 = vrot.lane.b32.xlu2 %v6621_v29, %s9728_s12  ;;  %s9755_s12 = smov 18   ;;  %3108 = vst.msk [vmem:[#allocation3 + $0x90] sm:$0xff] %vm828_vm2, %v6390_v5 }
  0x71   : > { %3109 = vst.msk [vmem:[#allocation3 + $0x98] sm:$0xff] %vm828_vm2, %v6390_v5 }
  0x72   : > { %3111 = vst.msk [vmem:[#allocation3 + $0xa8] sm:$0xff] %vm828_vm2, %v6390_v5 }
  0x73   : > { %3112 = vst.msk [vmem:[#allocation3 + $0xb0] sm:$0xff] %vm828_vm2, %v6390_v5 }
  0x74   : > { %3114 = vst.msk [vmem:[#allocation3 + $0xc0] sm:$0xff] %vm828_vm2, %v6390_v5 }
  0x75   : > { %3115 = vst.msk [vmem:[#allocation3 + $0xc8] sm:$0xff] %vm828_vm2, %v6390_v5 }
  0x76   : > { %3117 = vst.msk [vmem:[#allocation3 + $0xd8] sm:$0xff] %vm828_vm2, %v6390_v5 }
  0x77   : > { %1639 = vrot.lane.b32.xlu1 %v6637_v34, %s9732_s13  ;;  %1637 = vrot.lane.b32.xlu0 %v6632_v32, %s9732_s13  ;;  %3118 = vst.msk [vmem:[#allocation3 + $0xe0] sm:$0xff] %vm828_vm2, %v6390_v5 }
  0x78   : > { %1768 = vrot.lane.b32.xlu2 %v6663_v53, %s9755_s12  ;;  %3120 = vst.msk [vmem:[#allocation3 + $0xf0] sm:$0xff] %vm828_vm2, %v6390_v5 }
  0x79   : > { %3121 = vst.msk [vmem:[#allocation3 + $0xf8] sm:$0xff] %vm828_vm2, %v6390_v5 }
  0x7a   : > { %3123 = vst.msk [vmem:[#allocation3 + $0x108] sm:$0xff] %vm828_vm2, %v6390_v5 }
  0x7b   : > { %3124 = vst.msk [vmem:[#allocation3 + $0x110] sm:$0xff] %vm828_vm2, %v6390_v5 }
  0x7c   : > { %3126 = vst.msk [vmem:[#allocation3 + $0x120] sm:$0xff] %vm828_vm2, %v6390_v5 }
  0x7d   : > { %3127 = vst.msk [vmem:[#allocation3 + $0x128] sm:$0xff] %vm828_vm2, %v6390_v5 }
  0x7e   : > { %3129 = vst.msk [vmem:[#allocation3 + $0x138] sm:$0xff] %vm828_vm2, %v6390_v5 }
  0x7f   : > { %1903 = vrot.lane.b32.xlu1 %v6678_v61, %s9738_s16  ;;  %1770 = vrot.lane.b32.xlu0 %v6665_v54, %s9755_s12  ;;  %3130 = vst.msk [vmem:[#allocation3 + $0x140] sm:$0xff] %vm828_vm2, %v6390_v5 }
  0x80   : > { %1905 = vrot.lane.b32.xlu2 %v6685_v62, %s9738_s16  ;;  %3132 = vst.msk [vmem:[#allocation3 + $0x150] sm:$0xff] %vm828_vm2, %v6390_v5 }
  0x81   : > { %3133 = vst.msk [vmem:[#allocation3 + $0x158] sm:$0xff] %vm828_vm2, %v6390_v5 }
  0x82   : > { %3135 = vst.msk [vmem:[#allocation3 + $0x168] sm:$0xff] %vm828_vm2, %v6390_v5 }
  0x83   : > { %3136 = vst.msk [vmem:[#allocation3 + $0x170] sm:$0xff] %vm828_vm2, %v6390_v5 }
  0x84   : > { %3138 = vst.msk [vmem:[#allocation3 + $0x180] sm:$0xff] %vm828_vm2, %v6390_v5 }
  0x85   : > { %3139 = vst.msk [vmem:[#allocation3 + $0x188] sm:$0xff] %vm828_vm2, %v6390_v5 }
  0x86   : > { %3141 = vst.msk [vmem:[#allocation3 + $0x198] sm:$0xff] %vm828_vm2, %v6390_v5 }
  0x87   : > { %2039 = vrot.lane.b32.xlu1 %v6692_v2, %s9734_s15  ;;  %2037 = vrot.lane.b32.xlu0 %v6695_v4, %s9734_s15  ;;  %3142 = vst.msk [vmem:[#allocation3 + $0x1a0] sm:$0xff] %vm828_vm2, %v6390_v5 }
  0x88   : > { %1031 = vrot.lane.b32.xlu2 %v6624_v30, %s9740_s25  ;;  %v679_v30 = vmul.f32 %v5681_v25, %v6541_v9  ;;  %863 = vst.msk [vmem:[#allocation2 + $0x8] sm:$0xff] %vm861_vm3, %v6555_v28 }
  0x89   : > { %864 = vst.msk [vmem:[#allocation2 + $0x10] sm:$0xff] %vm861_vm3, %v6573_v49 }
  0x8a   : > { %865 = vst.msk [vmem:[#allocation2 + $0x18] sm:$0xff] %vm861_vm3, %v6577_v50 }
  0x8b   : > { %866 = vst.msk [vmem:[#allocation2 + $0x20] sm:$0xff] %vm861_vm3, %v6607_v19 }
  0x8c   : > { %867 = vst.msk [vmem:[#allocation2 + $0x28] sm:$0xff] %vm861_vm3, %v6610_v21 }
  0x8d   : > { %868 = vst.msk [vmem:[#allocation2 + $0x30] sm:$0xff] %vm861_vm3, %v6663_v53 }
  0x8e   : > { %869 = vst.msk [vmem:[#allocation2 + $0x38] sm:$0xff] %vm861_vm3, %v6665_v54 }
  0x8f   : > { %1241 = vrot.lane.b32.xlu1 %v6632_v32, %s9730_s24  ;;  %1033 = vrot.lane.b32.xlu0 %v6621_v29, %s9740_s25  ;;  %v516_v29 = vld [vmem:[%s6531_s22 + $0x70] sm:$0x3]  ;;  %870 = vst.msk [vmem:[#allocation2 + $0x40] sm:$0xff] %vm861_vm3, %v6785_v20 }
  0x90   : > { %1243 = vrot.lane.b32.xlu2 %v6637_v34, %s9730_s24  ;;  %s9756_s24 = smov 12   ;;  %v734_v31 = vmul.f32 %v6536_v3, %v516_v29  ;;  %v1173_v34 = vrot.slane %v6785_v20, 2  ;;  %v682_v29 = vmul.f32 %v5684_v16, %v6541_v9  ;;  %871 = vst.msk [vmem:[#allocation2 + $0x48] sm:$0xff] %vm861_vm3, %v6783_v18  ;;  %v740_v16 = vmul.f32 %v6536_v3, %v522_v11 }
  0x92   : > { %v6818_v32 = vadd.f32 %v734_v31, %v679_v30  ;;  %v6824_v33 = vpop.permute.xlu2 %1364  ;;  %v6835_v38 = vsel %vm1152_vm0, %v1173_v34, %v1174_v35 }
  0x94   : > { %v966_v37 = vrot.slane %v6818_v32, 1  ;;  %v1176_v57 = vrot.slane %v6818_v32, 2  ;;  %v791_v32 = vadd.f32 %v737_v22, %v682_v29 }
  0x96   : > { %v6838_v39 = vsel %vm942_vm1, %v964_v36, %v966_v37  ;;  %v466_v37 = vld [vmem:[%s6526_s14 + $0x90] sm:$0xff] }
  0x97   : > { %1374 = vrot.lane.b32.xlu1 %v6665_v54, %s9736_s30  ;;  %1372 = vrot.lane.b32.xlu0 %v6663_v53, %s9736_s30  ;;  %s444_s30 = scalar_lea.vmem %s9718_s4, %s6520_s29  ;;  %s9759_s29 = smov 6   ;;  %v574_v43 = vmul.f32 2.0, %v466_v37 }
  0x98   : > { %1507 = vrot.lane.b32.xlu2 %v6678_v61, %s9756_s24  ;;  %v2162_v52 = vld [vmem:[%s444_s30] sm:$0x1] }
  0x99   : > { %5721 = vmatmul.msk.f32.vlgmr.msra.gmra.mxu0 %vm828_vm2, %v2162_v52  ;;  %v521_v52 = vld [vmem:[%s6531_s22 + $0x98] sm:$0xff] }
  0x9a   : > { %v6864_v42 = vpop.permute.xlu2 %1366 }
  0x9f   : > { %1641 = vrot.lane.b32.xlu1 %v6695_v4, %s9732_s13  ;;  %1509 = vrot.lane.b32.xlu0 %v6685_v62, %s9756_s24 }
  0xa0   : > { %1643 = vrot.lane.b32.xlu2 %v6692_v2, %s9732_s13  ;;  %s9762_s13 = smov 3  }
  0xa2   : > { %v6910_v56 = vpop.permute.xlu2 %1633 }
  0xa7   : > { %1774 = vrot.lane.b32.xlu1 %v6783_v18, %s9755_s12  ;;  %1772 = vrot.lane.b32.xlu0 %v6785_v20, %s9755_s12 }
  0xa8   : > { %1907 = vrot.lane.b32.xlu2 %v6906_v55, %s9757_s0 }
  0xa9   : > { %v1024_v24 = vpop.permute.xlu0 %1023  ;;  %v6806_v26 = vpop.permute.xlu1 %1233 }
  0xaa   : > { %1120 = vst.msk [vmem:[#allocation2] sm:$0xff] %vm1119_vm4, %v1024_v24  ;;  %v6950_v6 = vpop.permute.xlu2 %1766 }
  0xab   : > { %1330 = vst.msk [vmem:[#allocation2] sm:$0xff] %vm1329_vm5, %v6806_v26  ;;  %v971_v26 = vrot.slane %v791_v32, 1 }
  0xac   : > { %1461 = vst.msk [vmem:[#allocation2] sm:$0xff] %vm1460_vm6, %v6824_v33 }
  0xaf   : > { %2041 = vrot.lane.b32.xlu1 %v6835_v38, %s9734_s15  ;;  %1909 = vrot.lane.b32.xlu0 %v6838_v39, %s9738_s16  ;;  %s9760_s15 = smov 24  }
  0xb1   : > { %v6850_v40 = vpop.permute.xlu1 %1235  ;;  %v6852_v41 = vpop.permute.xlu0 %1025 }
  0xb2   : > { %v2034_v34 = vpop.permute.xlu2 %2033  ;;  %1121 = vst.msk [vmem:[#allocation2 + $0x8] sm:$0xff] %vm1119_vm4, %v6852_v41 }
  0xb3   : > { %1331 = vst.msk [vmem:[#allocation2 + $0x8] sm:$0xff] %vm1329_vm5, %v6850_v40  ;;  %v467_v40 = vld [vmem:[%s6526_s14 + $0x98] sm:$0xff] }
  0xb4   : > { %1462 = vst.msk [vmem:[#allocation2 + $0x8] sm:$0xff] %vm1460_vm6, %v6864_v42  ;;  %v575_v44 = vmul.f32 2.0, %v467_v40 }
  0xb6   : > { %v5686_v51 = vadd.f32 -1.0, %v575_v44 }
  0xb7   : > { %1037 = vrot.lane.b32.xlu1 %v6685_v62, %s9740_s25  ;;  %1035 = vrot.lane.b32.xlu0 %v6678_v61, %s9740_s25  ;;  %v571_v61 = vmul.f32 2.0, %v463_v60  ;;  %v6936_v62 = vsel %vm1152_vm0, %v1174_v35, %v1176_v57  ;;  %s9761_s25 = smov 15  }
  0xb8   : > { %2043 = vrot.lane.b32.xlu2 %v6936_v62, %s9760_s15 }
  0xb9   : > { %v6882_v45 = vpop.permute.xlu1 %1501  ;;  %v6884_v46 = vpop.permute.xlu0 %1499  ;;  %v5682_v0 = vadd.f32 -1.0, %v571_v61 }
  0xba   : > { %v1030_v21 = vpop.permute.xlu2 %1029  ;;  %1597 = vst.msk [vmem:[#allocation2 + $0x8] sm:$0xff] %vm1595_vm7, %v6882_v45 }
  0xbb   : > { %v680_v12 = vmul.f32 %v5682_v0, %v6541_v9  ;;  %1596 = vst.msk [vmem:[#allocation2] sm:$0xff] %vm1595_vm7, %v6884_v46  ;;  %v5685_v46 = vadd.f32 -1.0, %v574_v43  ;;  %v468_v0 = vld [vmem:[%s6526_s14 + $0xa0] sm:$0x3] }
  0xbc   : > { %1730 = vst.msk [vmem:[#allocation2] sm:$0xff] %vm1729_vm8, %v6910_v56 }
  0xbd   : > { %v6979_v30 = vadd.f32 %v735_v13, %v680_v12  ;;  %1123 = vst.msk [vmem:[#allocation2 + $0x18] sm:$0xff] %vm1119_vm4, %v1030_v21  ;;  %v683_v57 = vmul.f32 %v5685_v46, %v6541_v9  ;;  %v470_v21 = vld [vmem:[%s6526_s14 + $0xb0] sm:$0xff] }
  0xbf   : > { %1376 = vrot.lane.b32.xlu1 %v6785_v20, %s9758_s1  ;;  %1247 = vrot.lane.b32.xlu0 %v6692_v2, %s9759_s29  ;;  %v464_v2 = vld [vmem:[%s6526_s14 + $0x80] sm:$0xff]  ;;  %v968_v33 = vrot.slane %v6979_v30, 1  ;;  %v1181_v20 = vrot.slane %v791_v32, 2  ;;  %872 = vst.msk [vmem:[#allocation2 + $0x50] sm:$0xff] %vm861_vm3, %v6979_v30  ;;  %v1178_v47 = vrot.slane %v6979_v30, 2 }
  0xc0   : > { %v572_v10 = vmul.f32 2.0, %v464_v2  ;;  %1245 = vrot.lane.b32.xlu2 %v6695_v4, %s9759_s29 }
  0xc1   : > { %v6926_v58 = vpop.permute.xlu1 %1764  ;;  %v6928_v59 = vpop.permute.xlu0 %1635 }
  0xc2   : > { %v5683_v15 = vadd.f32 -1.0, %v572_v10  ;;  %1861 = vst.msk [vmem:[#allocation2] sm:$0xff] %vm9742_vm9, %v6926_v58  ;;  %v1369_v36 = vpop.permute.xlu2 %1368  ;;  %v738_v58 = vmul.f32 %v6536_v3, %v520_v48 }
  0xc3   : > { %1731 = vst.msk [vmem:[#allocation2 + $0x8] sm:$0xff] %vm1729_vm8, %v6928_v59 }
  0xc4   : > { %v681_v25 = vmul.f32 %v5683_v15, %v6541_v9  ;;  %1862 = vst.msk [vmem:[#allocation2 + $0x8] sm:$0xff] %vm9742_vm9, %v6950_v6  ;;  %v7091_v2 = vadd.f32 %v738_v58, %v683_v57  ;;  %v576_v6 = vmul.f32 2.0, %v468_v0 }
  0xc6   : > { %v6983_v31 = vadd.f32 %v736_v17, %v681_v25  ;;  %874 = vst.msk [vmem:[#allocation2 + $0x60] sm:$0xff] %vm861_vm3, %v7091_v2  ;;  %v5687_v10 = vadd.f32 -1.0, %v576_v6  ;;  %v973_v13 = vrot.slane %v7091_v2, 1 }
  0xc7   : > { %1513 = vrot.lane.b32.xlu1 %v6838_v39, %s9756_s24  ;;  %1511 = vrot.lane.b32.xlu0 %v6906_v55, %s9756_s24 }
  0xc8   : > { %v969_v28 = vrot.slane %v6983_v31, 1  ;;  %1378 = vrot.lane.b32.xlu2 %v6783_v18, %s9758_s1  ;;  %v1179_v18 = vrot.slane %v6983_v31, 2  ;;  %873 = vst.msk [vmem:[#allocation2 + $0x58] sm:$0xff] %vm861_vm3, %v6983_v31  ;;  %v685_v15 = vmul.f32 %v5687_v10, %v6541_v9 }
  0xc9   : > { %v1902_v23 = vpop.permute.xlu1 %1901  ;;  %v1900_v24 = vpop.permute.xlu0 %1899 }
  0xca   : > { %v7010_v50 = vsel %vm942_vm1, %v969_v28, %v971_v26  ;;  %v7015_v19 = vsel %vm942_vm1, %v968_v33, %v969_v28  ;;  %v7041_v35 = vsel %vm1152_vm0, %v1179_v18, %v1181_v20  ;;  %1997 = vst.msk [vmem:[#allocation2 + $0x8] sm:$0xff] %vm1995_vm10, %v1902_v23  ;;  %v1506_v45 = vpop.permute.xlu2 %1505  ;;  %v7080_v61 = vsel %vm1152_vm0, %v1178_v47, %v1179_v18  ;;  %v523_v20 = vld [vmem:[%s6531_s22 + $0xa8] sm:$0xff] }
  0xcb   : > { %1996 = vst.msk [vmem:[#allocation2] sm:$0xff] %vm1995_vm10, %v1900_v24  ;;  %v794_v23 = vadd.f32 %v740_v16, %v685_v15  ;;  %v1183_v28 = vrot.slane %v7091_v2, 2  ;;  %v578_v18 = vmul.f32 2.0, %v470_v21  ;;  %v741_v44 = vmul.f32 %v6536_v3, %v523_v20  ;;  %v473_v21 = vld [vmem:[%s6526_s14 + $0xc8] sm:$0xff] }
  0xcc   : > { %2130 = vst.msk [vmem:[#allocation2] sm:$0xff] %vm2129_vm11, %v2034_v34 }
  0xcd   : > { %v1186_v29 = vrot.slane %v794_v23, 2 }
  0xcf   : > { %1776 = vrot.lane.b32.xlu1 %v6979_v30, %s9755_s12  ;;  %1647 = vrot.lane.b32.xlu0 %v6936_v62, %s9761_s25 }
  0xd0   : > { %1645 = vrot.lane.b32.xlu2 %v6835_v38, %s9761_s25 }
  0xd1   : > { %v1028_v49 = vpop.permute.xlu1 %1027  ;;  %v2036_v4 = vpop.permute.xlu0 %2035 }
  0xd2   : > { %1122 = vst.msk [vmem:[#allocation2 + $0x10] sm:$0xff] %vm1119_vm4, %v1028_v49  ;;  %v1769_v1 = vpop.permute.xlu2 %1768 }
  0xd3   : > { %2131 = vst.msk [vmem:[#allocation2 + $0x8] sm:$0xff] %vm2129_vm11, %v2036_v4  ;;  %v2211_v59 = vld [vmem:[#allocation2] sm:$0xff] }
  0xd7   : > { %1913 = vrot.lane.b32.xlu1 %v7010_v50, %s9757_s0  ;;  %1911 = vrot.lane.b32.xlu0 %v7015_v19, %s9757_s0 }
  0xd8   : > { %1778 = vrot.lane.b32.xlu2 %v6983_v31, %s9755_s12 }
  0xd9   : > { %v1240_v53 = vpop.permute.xlu1 %1239  ;;  %v1238_v54 = vpop.permute.xlu0 %1237 }
  0xda   : > { %1333 = vst.msk [vmem:[#allocation2 + $0x18] sm:$0xff] %vm1329_vm5, %v1240_v53  ;;  %v2212_v60 = vld [vmem:[#allocation2 + $0x8] sm:$0xff]  ;;  %v1906_v12 = vpop.permute.xlu2 %1905  ;;  %v524_v53 = vld [vmem:[%s6531_s22 + $0xb0] sm:$0xff] }
  0xdb   : > { %1332 = vst.msk [vmem:[#allocation2 + $0x10] sm:$0xff] %vm1329_vm5, %v1238_v54  ;;  %v2243_v63 = vpack.c.bf16 %v2212_v60, %v2211_v59  ;;  %v469_v54 = vld [vmem:[%s6526_s14 + $0xa8] sm:$0xff] }
  0xdc   : > { %1463 = vst.msk [vmem:[#allocation2 + $0x10] sm:$0xff] %vm1460_vm6, %v1369_v36  ;;  %v577_v36 = vmul.f32 2.0, %v469_v54  ;;  %v581_v54 = vmul.f32 2.0, %v473_v21 }
  0xdd   : > { %5731 = vmatmul.msk.bf16.vlgmr.msra.gmra.mxu1 %vm828_vm2, %v2243_v63  ;;  %v525_v63 = vld [vmem:[%s6531_s22 + $0xb8] sm:$0x3] }
  0xde   : > { %v5688_v43 = vadd.f32 -1.0, %v577_v36  ;;  %v526_v36 = vld [vmem:[%s6531_s22 + $0xc0] sm:$0xff] }
  0xdf   : > { %1039 = vrot.lane.b32.xlu1 %v6906_v55, %s9762_s13  ;;  %2047 = vrot.lane.b32.xlu0 %v7041_v35, %s9760_s15 }
  0xe0   : > { %2045 = vrot.lane.b32.xlu2 %v7080_v61, %s9760_s15  ;;  %v686_v46 = vmul.f32 %v5688_v43, %v6541_v9 }
  0xe1   : > { %v1504_v41 = vpop.permute.xlu1 %1503  ;;  %v1371_v42 = vpop.permute.xlu0 %1370 }
  0xe2   : > { %1598 = vst.msk [vmem:[#allocation2 + $0x10] sm:$0xff] %vm1595_vm7, %v1504_v41  ;;  %v1032_v24 = vpop.permute.xlu2 %1031  ;;  %v5689_v41 = vadd.f32 -1.0, %v578_v18 }
  0xe3   : > { %1464 = vst.msk [vmem:[#allocation2 + $0x18] sm:$0xff] %vm1460_vm6, %v1371_v42  ;;  %v742_v42 = vmul.f32 %v6536_v3, %v524_v53  ;;  %v474_v53 = vld [vmem:[%s6526_s14 + $0xd0] sm:$0x3] }
  0xe4   : > { %1599 = vst.msk [vmem:[#allocation2 + $0x18] sm:$0xff] %vm1595_vm7, %v1506_v45  ;;  %v687_v45 = vmul.f32 %v5689_v41, %v6541_v9  ;;  %v527_v41 = vld [vmem:[%s6531_s22 + $0xc8] sm:$0xff] }
  0xe5   : > { %1124 = vst.msk [vmem:[#allocation2 + $0x20] sm:$0xff] %vm1119_vm4, %v1032_v24 }
  0xe6   : > { %v7162_v48 = vadd.f32 %v742_v42, %v687_v45  ;;  %v5692_v42 = vadd.f32 -1.0, %v581_v54  ;;  %v744_v45 = vmul.f32 %v6536_v3, %v526_v36  ;;  %v7347_v36 = vld [vmem:[%s9722_s8] ss:$0 sm:$0xff] }
  0xe7   : > { %1251 = vrot.lane.b32.xlu1 %v6936_v62, %s9759_s29  ;;  %1249 = vrot.lane.b32.xlu0 %v6835_v38, %s9759_s29  ;;  %v684_v38 = vmul.f32 %v5686_v51, %v6541_v9  ;;  %v739_v62 = vmul.f32 %v6536_v3, %v521_v52  ;;  %v976_v51 = vrot.slane %v794_v23, 1  ;;  %v7167_v52 = vadd.f32 %v741_v44, %v686_v46 }
  0xe8   : > { %1041 = vrot.lane.b32.xlu2 %v6838_v39, %s9762_s13  ;;  %877 = vst.msk [vmem:[#allocation2 + $0x78] sm:$0xff] %vm861_vm3, %v7162_v48  ;;  %v690_v46 = vmul.f32 %v5692_v42, %v6541_v9 }
  0xe9   : > { %v1640_v55 = vpop.permute.xlu1 %1639  ;;  %v1638_v56 = vpop.permute.xlu0 %1637  ;;  %v7096_v27 = vadd.f32 %v739_v62, %v684_v38  ;;  %876 = vst.msk [vmem:[#allocation2 + $0x70] sm:$0xff] %vm861_vm3, %v7167_v52 }
  0xea   : > { %1733 = vst.msk [vmem:[#allocation2 + $0x18] sm:$0xff] %vm1729_vm8, %v1640_v55  ;;  %v1244_v33 = vpop.permute.xlu2 %1243 }
  0xeb   : > { %1732 = vst.msk [vmem:[#allocation2 + $0x10] sm:$0xff] %vm1729_vm8, %v1638_v56  ;;  %v974_v14 = vrot.slane %v7096_v27, 1  ;;  %v1184_v25 = vrot.slane %v7096_v27, 2 }
  0xec   : > { %1863 = vst.msk [vmem:[#allocation2 + $0x10] sm:$0xff] %vm9742_vm9, %v1769_v1 }
  0xed   : > { %875 = vst.msk [vmem:[#allocation2 + $0x68] sm:$0xff] %vm861_vm3, %v7096_v27  ;;  %v7123_v39 = vsel %vm942_vm1, %v973_v13, %v974_v14  ;;  %v7137_v49 = vsel %vm1152_vm0, %v1184_v25, %v1186_v29  ;;  %v7141_v4 = vsel %vm1152_vm0, %v1183_v28, %v1184_v25  ;;  %v977_v57 = vsel %vm942_vm1, %v974_v14, %v976_v51  ;;  %v2167_v29 = vld [vmem:[%s9720_s6] sm:$0x1] }
  0xef   : > { %1515 = vrot.lane.b32.xlu1 %v7015_v19, %s9756_s24  ;;  %1382 = vrot.lane.b32.xlu0 %v6983_v31, %s9758_s1 }
  0xf0   : > { %1380 = vrot.lane.b32.xlu2 %v6979_v30, %s9758_s1 }
  0xf1   : > { %v1904_v7 = vpop.permute.xlu1 %1903  ;;  %v1771_v8 = vpop.permute.xlu0 %1770 }
  0xf2   : > { %1998 = vst.msk [vmem:[#allocation2 + $0x10] sm:$0xff] %vm1995_vm10, %v1904_v7  ;;  %v1508_v47 = vpop.permute.xlu2 %1507  ;;  %v1188_v7 = vrot.slane %v7167_v52, 2 }
  0xf3   : > { %1864 = vst.msk [vmem:[#allocation2 + $0x18] sm:$0xff] %vm9742_vm9, %v1771_v8  ;;  %v1189_v8 = vrot.slane %v7162_v48, 2 }
  0xf4   : > { %1999 = vst.msk [vmem:[#allocation2 + $0x18] sm:$0xff] %vm1995_vm10, %v1906_v12  ;;  %v979_v12 = vrot.slane %v7162_v48, 1 }
  0xf5   : > { %v7218_v14 = vsel %vm1152_vm0, %v1188_v7, %v1189_v8 }
  0xf7   : > { %1651 = vrot.lane.b32.xlu1 %v7041_v35, %s9761_s25  ;;  %1649 = vrot.lane.b32.xlu0 %v7080_v61, %s9761_s25 }
  0xf8   : > { %1517 = vrot.lane.b32.xlu2 %v7010_v50, %s9756_s24 }
  0xf9   : > { %v2040_v17 = vpop.permute.xlu1 %2039  ;;  %v2038_v22 = vpop.permute.xlu0 %2037 }
  0xfa   : > { %2133 = vst.msk [vmem:[#allocation2 + $0x18] sm:$0xff] %vm2129_vm11, %v2040_v17  ;;  %v1644_v58 = vpop.permute.xlu2 %1643 }
  0xfb   : > { %2132 = vst.msk [vmem:[#allocation2 + $0x10] sm:$0xff] %vm2129_vm11, %v2038_v22 }
  0xff   : > { %1915 = vrot.lane.b32.xlu1 %v7123_v39, %s9757_s0  ;;  %1782 = vrot.lane.b32.xlu0 %v7096_v27, %s9755_s12 }
 0x100   : > { %1780 = vrot.lane.b32.xlu2 %v7091_v2, %s9755_s12 }
 0x101   : > { %v1242_v31 = vpop.permute.xlu1 %1241  ;;  %v1034_v32 = vpop.permute.xlu0 %1033  ;;  %v2214_v34 = vld [vmem:[#allocation2 + $0x18] sm:$0xff] }
 0x102   : > { %1334 = vst.msk [vmem:[#allocation2 + $0x20] sm:$0xff] %vm1329_vm5, %v1242_v31  ;;  %v2213_v30 = vld [vmem:[#allocation2 + $0x10] sm:$0xff]  ;;  %v1908_v62 = vpop.permute.xlu2 %1907 }
 0x103   : > { %1125 = vst.msk [vmem:[#allocation2 + $0x28] sm:$0xff] %vm1119_vm4, %v1034_v32  ;;  %v2244_v26 = vpack.c.bf16 %v2214_v34, %v2213_v30 }
 0x104   : > { %1335 = vst.msk [vmem:[#allocation2 + $0x28] sm:$0xff] %vm1329_vm5, %v1244_v33  ;;  %v472_v33 = vld [vmem:[%s6526_s14 + $0xc0] sm:$0xff] }
 0x105   : > { %5732 = vmatmul.msk.bf16.gmra.mxu1 %vm828_vm2, %v2244_v26  ;;  %v978_v26 = vrot.slane %v7167_v52, 1 }
 0x107   : > { %2051 = vrot.lane.b32.xlu1 %v7137_v49, %s9760_s15  ;;  %2049 = vrot.lane.b32.xlu0 %v7141_v4, %s9760_s15  ;;  %v7257_v20 = vsel %vm942_vm1, %v978_v26, %v979_v12 }
 0x108   : > { %1917 = vrot.lane.b32.xlu2 %v977_v57, %s9757_s0 }
 0x109   : > { %v1375_v37 = vpop.permute.xlu1 %1374  ;;  %v1373_v40 = vpop.permute.xlu0 %1372 }
 0x10a   : > { %1466 = vst.msk [vmem:[#allocation2 + $0x28] sm:$0xff] %vm1460_vm6, %v1375_v37  ;;  %v582_v37 = vmul.f32 2.0, %v474_v53 }
 0x10b   : > { %1465 = vst.msk [vmem:[#allocation2 + $0x20] sm:$0xff] %vm1460_vm6, %v1373_v40 }
 0x10c   : > { %1600 = vst.msk [vmem:[#allocation2 + $0x20] sm:$0xff] %vm1595_vm7, %v1508_v47  ;;  %v745_v47 = vmul.f32 %v6536_v3, %v527_v41 }
 0x10f   : > { %1253 = vrot.lane.b32.xlu1 %v7080_v61, %s9759_s29  ;;  %1045 = vrot.lane.b32.xlu0 %v7010_v50, %s9762_s13  ;;  %v471_v50 = vld [vmem:[%s6526_s14 + $0xb8] sm:$0x3] }
 0x110   : > { %v579_v61 = vmul.f32 2.0, %v471_v50  ;;  %1043 = vrot.lane.b32.xlu2 %v7015_v19, %s9762_s13 }
 0x111   : > { %v1642_v55 = vpop.permute.xlu1 %1641  ;;  %v1510_v56 = vpop.permute.xlu0 %1509 }
 0x112   : > { %1734 = vst.msk [vmem:[#allocation2 + $0x20] sm:$0xff] %vm1729_vm8, %v1642_v55  ;;  %v5690_v38 = vadd.f32 -1.0, %v579_v61  ;;  %v2044_v19 = vpop.permute.xlu2 %2043  ;;  %v7285_v61 = vadd.f32 %v745_v47, %v690_v46 }
 0x113   : > { %1601 = vst.msk [vmem:[#allocation2 + $0x28] sm:$0xff] %vm1595_vm7, %v1510_v56 }
 0x114   : > { %1735 = vst.msk [vmem:[#allocation2 + $0x28] sm:$0xff] %vm1729_vm8, %v1644_v58  ;;  %v1194_v26 = vrot.slane %v7285_v61, 2 }
 0x115   : > { %879 = vst.msk [vmem:[#allocation2 + $0x88] sm:$0xff] %vm861_vm3, %v7285_v61 }
 0x116   : > { %v2188_v31 = vpop.f32.mrf.mxu0 }
 0x117   : > { %1386 = vrot.lane.b32.xlu1 %v7096_v27, %s9758_s1  ;;  %1384 = vrot.lane.b32.xlu0 %v7091_v2, %s9758_s1  ;;  %v688_v2 = vmul.f32 %v5690_v38, %v6541_v9  ;;  %v743_v27 = vmul.f32 %v6536_v3, %v525_v63  ;;  %v7242_v34 = vadd.f32 %v2188_v31, %v2167_v29 }
 0x118   : > { %1255 = vrot.lane.b32.xlu2 %v7041_v35, %s9759_s29 }
 0x119   : > { %v1775_v59 = vpop.permute.xlu1 %1774  ;;  %v1773_v60 = vpop.permute.xlu0 %1772  ;;  %v7200_v6 = vadd.f32 %v743_v27, %v688_v2  ;;  %v5722_v18 = vmul.f32 -1.442695, %v7242_v34  ;;  %v984_v2 = vrot.slane %v7285_v61, 1 }
 0x11a   : > { %1866 = vst.msk [vmem:[#allocation2 + $0x28] sm:$0xff] %vm9742_vm9, %v1775_v59  ;;  %v1246_v16 = vpop.permute.xlu2 %1245 }
 0x11b   : > { %1865 = vst.msk [vmem:[#allocation2 + $0x20] sm:$0xff] %vm9742_vm9, %v1773_v60  ;;  %v981_v13 = vrot.slane %v7200_v6, 1  ;;  %6095 = vpow2.f32 %v5722_v18  ;;  %v1191_v43 = vrot.slane %v7200_v6, 2 }
 0x11c   : > { %2000 = vst.msk [vmem:[#allocation2 + $0x20] sm:$0xff] %vm1995_vm10, %v1908_v62 }
 0x11d   : > { %v7221_v15 = vsel %vm942_vm1, %v979_v12, %v981_v13 }
 0x11f   : > { %1653 = vrot.lane.b32.xlu1 %v7141_v4, %s9761_s25  ;;  %1521 = vrot.lane.b32.xlu0 %v977_v57, %s9756_s24 }
 0x120   : > { %1519 = vrot.lane.b32.xlu2 %v7123_v39, %s9756_s24 }
 0x121   : > { %v2042_v0 = vpop.permute.xlu1 %2041  ;;  %v1910_v1 = vpop.permute.xlu0 %1909 }
 0x122   : > { %2134 = vst.msk [vmem:[#allocation2 + $0x20] sm:$0xff] %vm2129_vm11, %v2042_v0  ;;  %v1379_v25 = vpop.permute.xlu2 %1378  ;;  %v6096_v50 = vpop.eup %6095 }
 0x123   : > { %2001 = vst.msk [vmem:[#allocation2 + $0x28] sm:$0xff] %vm1995_vm10, %v1910_v1  ;;  %v2194_v38 = vadd.f32 1.0, %v6096_v50  ;;  %v475_v50 = vld [vmem:[%s6526_s14 + $0xd8] sm:$0xff] }
 0x124   : > { %2135 = vst.msk [vmem:[#allocation2 + $0x28] sm:$0xff] %vm2129_vm11, %v2044_v19 }
 0x125   : > { %6097 = vrcp.f32 %v2194_v38  ;;  %vm2200_vm12 = vweird.f32 %v2194_v38 }
 0x127   : > { %1786 = vrot.lane.b32.xlu1 %v7162_v48, %s9755_s12  ;;  %1784 = vrot.lane.b32.xlu0 %v7167_v52, %s9755_s12 }
 0x128   : > { %1655 = vrot.lane.b32.xlu2 %v7137_v49, %s9761_s25 }
 0x129   : > { %v1038_v10 = vpop.permute.xlu1 %1037  ;;  %v1036_v11 = vpop.permute.xlu0 %1035  ;;  %v2215_v35 = vld [vmem:[#allocation2 + $0x20] sm:$0xff] }
 0x12a   : > { %1127 = vst.msk [vmem:[#allocation2 + $0x38] sm:$0xff] %vm1119_vm4, %v1038_v10  ;;  %v1646_v30 = vpop.permute.xlu2 %1645 }
 0x12b   : > { %1126 = vst.msk [vmem:[#allocation2 + $0x30] sm:$0xff] %vm1119_vm4, %v1036_v11  ;;  %v2216_v17 = vld [vmem:[#allocation2 + $0x28] sm:$0xff]  ;;  %v6098_v6 = vpop.eup %6097 }
 0x12c   : > { %1336 = vst.msk [vmem:[#allocation2 + $0x30] sm:$0xff] %vm1329_vm5, %v1246_v16  ;;  %v2245_v22 = vpack.c.bf16 %v2216_v17, %v2215_v35  ;;  %v2196_v7 = vmul.f32 %v6098_v6, %v2194_v38  ;;  %vm2201_vm13 = vweird.f32 %v6098_v6  ;;  %v2206_v16 = vand.u32 2147483648, %v2194_v38 }
 0x12d   : > { %vm7319_vm14 = vmor %vm2200_vm12, %vm2201_vm13  ;;  %vm3091_vm12 = vcmask 254976  }
 0x12e   : > { %5733 = vmatmul.msk.bf16.gmra.mxu1 %vm828_vm2, %v2245_v22  ;;  %v2204_v22 = vand.u32 2147483647, %v2194_v38  ;;  %3095 = vst.msk [vmem:[#allocation3 + $0x28] sm:$0x3] %vm3091_vm12, %v6390_v5 }
 0x12f   : > { %2053 = vrot.lane.b32.xlu1 %v7218_v14, %s9760_s15  ;;  %1921 = vrot.lane.b32.xlu0 %v7221_v15, %s9757_s0  ;;  %3092 = vst.msk [vmem:[#allocation3 + $0x10] sm:$0x3] %vm3091_vm12, %v6390_v5 }
 0x130   : > { %1919 = vrot.lane.b32.xlu2 %v7257_v20, %s9757_s0  ;;  %vm2205_vm15 = vcmp.eq.f32.partialorder %v2204_v22, 8.507059e+37  ;;  %3098 = vst.msk [vmem:[#allocation3 + $0x40] sm:$0x3] %vm3091_vm12, %v6390_v5 }
 0x131   : > { %v1377_v23 = vpop.permute.xlu1 %1376  ;;  %v1248_v24 = vpop.permute.xlu0 %1247  ;;  %3101 = vst.msk [vmem:[#allocation3 + $0x58] sm:$0x3] %vm3091_vm12, %v6390_v5 }
 0x132   : > { %1467 = vst.msk [vmem:[#allocation2 + $0x30] sm:$0xff] %vm1460_vm6, %v1377_v23  ;;  %v1779_v56 = vpop.permute.xlu2 %1778  ;;  %v477_v23 = vld [vmem:[%s6526_s14 + $0xe8] sm:$0x3] }
 0x133   : > { %1337 = vst.msk [vmem:[#allocation2 + $0x38] sm:$0xff] %vm1329_vm5, %v1248_v24 }
 0x134   : > { %1468 = vst.msk [vmem:[#allocation2 + $0x38] sm:$0xff] %vm1460_vm6, %v1379_v25 }
 0x135   : > { %3104 = vst.msk [vmem:[#allocation3 + $0x70] sm:$0x3] %vm3091_vm12, %v6390_v5 }
 0x136   : > { %3107 = vst.msk [vmem:[#allocation3 + $0x88] sm:$0x3] %vm3091_vm12, %v6390_v5 }
 0x137   : > { %1049 = vrot.lane.b32.xlu1 %v977_v57, %s9762_s13  ;;  %1047 = vrot.lane.b32.xlu0 %v7123_v39, %s9762_s13  ;;  %v580_v39 = vmul.f32 2.0, %v472_v33  ;;  %v7273_v57 = vsel %vm1152_vm0, %v1189_v8, %v1191_v43  ;;  %v2197_v8 = vsub.f32 1.0, %v2196_v7  ;;  %3110 = vst.msk [vmem:[#allocation3 + $0xa0] sm:$0x3] %vm3091_vm12, %v6390_v5 }
 0x138   : > { %2055 = vrot.lane.b32.xlu2 %v7273_v57, %s9760_s15  ;;  %3113 = vst.msk [vmem:[#allocation3 + $0xb8] sm:$0x3] %vm3091_vm12, %v6390_v5 }
 0x139   : > { %v1514_v32 = vpop.permute.xlu1 %1513  ;;  %v1512_v28 = vpop.permute.xlu0 %1511  ;;  %v5691_v40 = vadd.f32 -1.0, %v580_v39  ;;  %3116 = vst.msk [vmem:[#allocation3 + $0xd0] sm:$0x3] %vm3091_vm12, %v6390_v5 }
 0x13a   : > { %1603 = vst.msk [vmem:[#allocation2 + $0x38] sm:$0xff] %vm1595_vm7, %v1514_v32  ;;  %v2046_v1 = vpop.permute.xlu2 %2045 }
 0x13b   : > { %1602 = vst.msk [vmem:[#allocation2 + $0x30] sm:$0xff] %vm1595_vm7, %v1512_v28  ;;  %v689_v44 = vmul.f32 %v5691_v40, %v6541_v9  ;;  %v2207_v28 = vor.u32 1.1754944e-38, %v2206_v16 }
 0x13c   : > { %1736 = vst.msk [vmem:[#allocation2 + $0x30] sm:$0xff] %vm1729_vm8, %v1646_v30 }
 0x13d   : > { %v7278_v58 = vadd.f32 %v744_v45, %v689_v44  ;;  %3119 = vst.msk [vmem:[#allocation3 + $0xe8] sm:$0x3] %vm3091_vm12, %v6390_v5 }
 0x13e   : > { %3122 = vst.msk [vmem:[#allocation3 + $0x100] sm:$0x3] %vm3091_vm12, %v6390_v5 }
 0x13f   : > { %1388 = vrot.lane.b32.xlu1 %v7167_v52, %s9758_s1  ;;  %1259 = vrot.lane.b32.xlu0 %v7137_v49, %s9759_s29  ;;  %v5693_v49 = vadd.f32 -1.0, %v582_v37  ;;  %v528_v52 = vld [vmem:[%s6531_s22 + $0xd0] sm:$0x3]  ;;  %878 = vst.msk [vmem:[#allocation2 + $0x80] sm:$0xff] %vm861_vm3, %v7278_v58  ;;  %v983_v19 = vrot.slane %v7278_v58, 1 }
 0x140   : > { %v746_v60 = vmul.f32 %v6536_v3, %v528_v52  ;;  %1257 = vrot.lane.b32.xlu2 %v7141_v4, %s9759_s29  ;;  %v2198_v4 = vmul.f32 %v6098_v6, %v2197_v8  ;;  %3125 = vst.msk [vmem:[#allocation3 + $0x118] sm:$0x3] %vm3091_vm12, %v6390_v5 }
 0x141   : > { %v1777_v51 = vpop.permute.xlu1 %1776  ;;  %v1648_v55 = vpop.permute.xlu0 %1647  ;;  %v691_v59 = vmul.f32 %v5693_v49, %v6541_v9  ;;  %v7308_v12 = vsel %vm942_vm1, %v983_v19, %v984_v2  ;;  %v3229_v19 = vld [vmem:[#allocation3 + $0x1] sm:$0xff]  ;;  %3128 = vst.msk [vmem:[#allocation3 + $0x130] sm:$0x3] %vm3091_vm12, %v6390_v5 }
 0x142   : > { %1867 = vst.msk [vmem:[#allocation2 + $0x30] sm:$0xff] %vm9742_vm9, %v1777_v51  ;;  %v1042_v35 = vpop.permute.xlu2 %1041  ;;  %v2199_v17 = vadd.f32 %v6098_v6, %v2198_v4 }
 0x143   : > { %1737 = vst.msk [vmem:[#allocation2 + $0x38] sm:$0xff] %vm1729_vm8, %v1648_v55  ;;  %v800_v62 = vadd.f32 %v746_v60, %v691_v59  ;;  %v476_v59 = vld [vmem:[%s6526_s14 + $0xe0] sm:$0xff]  ;;  %v529_v60 = vld [vmem:[%s6531_s22 + $0xd8] sm:$0xff] }
 0x144   : > { %1868 = vst.msk [vmem:[#allocation2 + $0x38] sm:$0xff] %vm9742_vm9, %v1779_v56  ;;  %v2203_v30 = vsel %vm7319_vm14, %v6098_v6, %v2199_v17  ;;  %v747_v6 = vmul.f32 %v6536_v3, %v529_v60 }
 0x145   : > { %v986_v27 = vrot.slane %v800_v62, 1  ;;  %1129 = vst.msk [vmem:[#allocation2 + $0x48] sm:$0xff] %vm1119_vm4, %v1042_v35  ;;  %v1196_v33 = vrot.slane %v800_v62, 2  ;;  %v2208_v39 = vsel %vm2205_vm15, %v2207_v28, %v2203_v30  ;;  %v6001_v62 = vld [vmem:[%s9723_s9 + $0x10] sm:$0xff] }
 0x146   : > { %v2210_v54 = vmul.f32 %v2208_v39, %v7242_v34  ;;  %v3230_v35 = vld [vmem:[#allocation3 + $0x9] sm:$0xff]  ;;  %3131 = vst.msk [vmem:[#allocation3 + $0x148] sm:$0x3] %vm3091_vm12, %v6390_v5 }
 0x147   : > { %1525 = vrot.lane.b32.xlu1 %v7221_v15, %s9756_s24  ;;  %1523 = vrot.lane.b32.xlu0 %v7257_v20, %s9756_s24  ;;  %v7305_v10 = vsel %vm942_vm1, %v984_v2, %v986_v27  ;;  %v7335_v21 = vsel %vm1152_vm0, %v1194_v26, %v1196_v33  ;;  %v584_v2 = vmul.f32 2.0, %v476_v59  ;;  %v3261_v16 = vpack.c.bf16 %v3230_v35, %v3229_v19 }
 0x148   : > { %1390 = vrot.lane.b32.xlu2 %v7162_v48, %s9758_s1  ;;  %v7352_v34 = vperm.slane %v2210_v54, 0  ;;  %3134 = vst.msk [vmem:[#allocation3 + $0x160] sm:$0x3] %vm3091_vm12, %v6390_v5 }
 0x149   : > { %v1914_v63 = vpop.permute.xlu1 %1913  ;;  %v1912_v0 = vpop.permute.xlu0 %1911  ;;  %v5695_v7 = vadd.f32 -1.0, %v584_v2  ;;  %3137 = vst.msk [vmem:[#allocation3 + $0x178] sm:$0x3] %vm3091_vm12, %v6390_v5 }
 0x14a   : > { %2003 = vst.msk [vmem:[#allocation2 + $0x38] sm:$0xff] %vm1995_vm10, %v1914_v63  ;;  %v1381_v29 = vpop.permute.xlu2 %1380  ;;  %v583_v63 = vmul.f32 2.0, %v475_v50 }
 0x14b   : > { %2002 = vst.msk [vmem:[#allocation2 + $0x30] sm:$0xff] %vm1995_vm10, %v1912_v0  ;;  %v693_v17 = vmul.f32 %v5695_v7, %v6541_v9  ;;  %v479_v7 = vld [vmem:[%s6526_s14 + $0xf8] sm:$0xff] }
 0x14c   : > { %2136 = vst.msk [vmem:[#allocation2 + $0x30] sm:$0xff] %vm2129_vm11, %v2046_v1  ;;  %v530_v1 = vld [vmem:[%s6531_s22 + $0xe0] sm:$0xff]  ;;  %v5694_v27 = vadd.f32 -1.0, %v583_v63 }
 0x14d   : > { %3140 = vst.msk [vmem:[#allocation3 + $0x190] sm:$0x3] %vm3091_vm12, %v6390_v5 }
 0x14e   : > { %v692_v8 = vmul.f32 %v5694_v27, %v6541_v9  ;;  %3143 = vst.msk [vmem:[#allocation3 + $0x1a8] sm:$0x3] %vm3091_vm12, %v6390_v5 }
 0x14f   : > { %1788 = vrot.lane.b32.xlu1 %v7278_v58, %s9755_s12  ;;  %1659 = vrot.lane.b32.xlu0 %v7273_v57, %s9761_s25 }
 0x150   : > { %1657 = vrot.lane.b32.xlu2 %v7218_v14, %s9761_s25  ;;  %v7434_v22 = vadd.f32 %v747_v6, %v692_v8  ;;  %v478_v8 = vld [vmem:[%s6526_s14 + $0xf0] sm:$0xff] }
 0x151   : > { %v1040_v11 = vpop.permute.xlu1 %1039  ;;  %v2048_v13 = vpop.permute.xlu0 %2047 }
 0x152   : > { %1128 = vst.msk [vmem:[#allocation2 + $0x40] sm:$0xff] %vm1119_vm4, %v1040_v11  ;;  %v748_v11 = vmul.f32 %v6536_v3, %v530_v1 }
 0x153   : > { %2137 = vst.msk [vmem:[#allocation2 + $0x38] sm:$0xff] %vm2129_vm11, %v2048_v13  ;;  %v2217_v31 = vld [vmem:[#allocation2 + $0x30] sm:$0xff] }
 0x154   : > { %880 = vst.msk [vmem:[#allocation2 + $0x90] sm:$0xff] %vm861_vm3, %v7434_v22 }
 0x157   : > { %1925 = vrot.lane.b32.xlu1 %v7305_v10, %s9757_s0  ;;  %1923 = vrot.lane.b32.xlu0 %v7308_v12, %s9757_s0 }
 0x158   : > { %1790 = vrot.lane.b32.xlu2 %v7285_v61, %s9755_s12 }
 0x159   : > { %v1252_v24 = vpop.permute.xlu1 %1251  ;;  %v1250_v25 = vpop.permute.xlu0 %1249 }
 0x15a   : > { %1339 = vst.msk [vmem:[#allocation2 + $0x48] sm:$0xff] %vm1329_vm5, %v1252_v24  ;;  %v2218_v32 = vld [vmem:[#allocation2 + $0x38] sm:$0xff]  ;;  %v2336_v37 = vpop.f32.mrf.mxu1 }
 0x15b   : > { %1338 = vst.msk [vmem:[#allocation2 + $0x40] sm:$0xff] %vm1329_vm5, %v1250_v25  ;;  %v2246_v48 = vpack.c.bf16 %v2218_v32, %v2217_v31  ;;  %v2337_v40 = vadd.f32 %v7347_v36, %v2336_v37  ;;  %v7442_v25 = vadd.f32 %v748_v11, %v693_v17  ;;  %v585_v31 = vmul.f32 2.0, %v477_v23 }
 0x15c   : > { %1469 = vst.msk [vmem:[#allocation2 + $0x40] sm:$0xff] %vm1460_vm6, %v1381_v29  ;;  %v988_v29 = vrot.slane %v7434_v22, 1 }
 0x15d   : > { %5734 = vmatmul.msk.bf16.gmra.mxu1 %vm828_vm2, %v2246_v48  ;;  %v7358_v42 = vadd.f32 %v7352_v34, %v2337_v40  ;;  %v989_v30 = vrot.slane %v7442_v25, 1  ;;  %v5696_v33 = vadd.f32 -1.0, %v585_v31  ;;  %881 = vst.msk [vmem:[#allocation2 + $0x98] sm:$0xff] %vm861_vm3, %v7442_v25 }
 0x15f   : > { %1051 = vrot.lane.b32.xlu1 %v7257_v20, %s9762_s13  ;;  %2059 = vrot.lane.b32.xlu0 %v7335_v21, %s9760_s15  ;;  %v1518_v20 = vpop.permute.xlu2 %1517  ;;  %v5747_v45 = vmul.f32 -1.442695, %v7358_v42 }
 0x161   : > { %v1516_v53 = vpop.permute.xlu1 %1515  ;;  %v1383_v18 = vpop.permute.xlu0 %1382  ;;  %6099 = vpow2.f32 %v5747_v45 }
 0x162   : > { %1604 = vst.msk [vmem:[#allocation2 + $0x40] sm:$0xff] %vm1595_vm7, %v1516_v53  ;;  %v2338_v49 = vpop.f32.mrf.mxu1  ;;  %v7463_v53 = vsel %vm942_vm1, %v988_v29, %v989_v30 }
 0x163   : > { %1470 = vst.msk [vmem:[#allocation2 + $0x48] sm:$0xff] %vm1460_vm6, %v1383_v18  ;;  %v2339_v47 = vadd.f32 %v7347_v36, %v2338_v49  ;;  %v531_v18 = vld [vmem:[%s6531_s22 + $0xe8] sm:$0x3]  ;;  %v1199_v49 = vrot.slane %v7442_v25, 2 }
 0x164   : > { %1605 = vst.msk [vmem:[#allocation2 + $0x48] sm:$0xff] %vm1595_vm7, %v1518_v20  ;;  %v694_v20 = vmul.f32 %v5696_v33, %v6541_v9 }
 0x165   : > { %v7380_v52 = vadd.f32 %v7352_v34, %v2339_v47  ;;  %v1198_v47 = vrot.slane %v7434_v22, 2 }
 0x167   : > { %1263 = vrot.lane.b32.xlu1 %v7273_v57, %s9759_s29  ;;  %1261 = vrot.lane.b32.xlu0 %v7218_v14, %s9759_s29  ;;  %v1781_v44 = vpop.permute.xlu2 %1780  ;;  %v1193_v14 = vrot.slane %v7278_v58, 2  ;;  %v6002_v57 = vld [vmem:[%s9723_s9 + $0x18] sm:$0xff]  ;;  %v5748_v38 = vmul.f32 -1.442695, %v7380_v52  ;;  %v7493_v59 = vsel %vm1152_vm0, %v1198_v47, %v1199_v49 }
 0x168   : > { %3347 = vmatpush.bf16.msrb.mxu0 %v6002_v57  ;;  %6019 = vmatpush.bf16.msra.mxu2 %v6002_v57 }
 0x169   : > { %v1652_v41 = vpop.permute.xlu1 %1651  ;;  %v1650_v43 = vpop.permute.xlu0 %1649  ;;  %v7370_v46 = vsel %vm1152_vm0, %v1193_v14, %v1194_v26  ;;  %6101 = vpow2.f32 %v5748_v38 }
 0x16a   : > { %1739 = vst.msk [vmem:[#allocation2 + $0x48] sm:$0xff] %vm1729_vm8, %v1652_v41  ;;  %2057 = vrot.lane.b32.xlu2 %v7370_v46, %s9760_s15 }
 0x16b   : > { %1738 = vst.msk [vmem:[#allocation2 + $0x40] sm:$0xff] %vm1729_vm8, %v1650_v43  ;;  %v749_v43 = vmul.f32 %v6536_v3, %v531_v18 }
 0x16c   : > { %1869 = vst.msk [vmem:[#allocation2 + $0x40] sm:$0xff] %vm9742_vm9, %v1781_v44  ;;  %3348 = vmatpush.bf16.msrb.mxu0 %v6001_v62  ;;  %6020 = vmatpush.bf16.msra.mxu2 %v6001_v62 }
 0x16d   : > { %v7486_v57 = vadd.f32 %v749_v43, %v694_v20 }
 0x16f   : > { %1527 = vrot.lane.b32.xlu1 %v7308_v12, %s9756_s24  ;;  %1394 = vrot.lane.b32.xlu0 %v7285_v61, %s9758_s1  ;;  %v7386_v56 = vpop.permute.xlu2 %1917  ;;  %v6100_v61 = vpop.eup %6099 }
 0x170   : > { %v7404_v0 = vadd.f32 1.0, %v6100_v61  ;;  %v6102_v24 = vpop.eup %6101  ;;  %5787 = vmatmul.msk.bf16.vlgmr.msrb.gmra.mxu0 %vm828_vm2, %v3261_v16 }
 0x171   : > { %v7377_v51 = vpop.permute.xlu1 %1915  ;;  %v7384_v55 = vpop.permute.xlu0 %1782  ;;  %v7445_v28 = vadd.f32 1.0, %v6102_v24  ;;  %v533_v24 = vld [vmem:[%s6531_s22 + $0xf8] sm:$0xff] }
 0x172   : > { %6103 = vrcp.f32 %v7404_v0  ;;  %1053 = vrot.lane.b32.xlu2 %v7221_v15, %s9762_s13  ;;  %v2586_v37 = vand.u32 2147483647, %v7404_v0  ;;  %v2588_v40 = vand.u32 2147483648, %v7404_v0  ;;  %2004 = vst.msk [vmem:[#allocation2 + $0x40] sm:$0xff] %vm1995_vm10, %v7377_v51  ;;  %vm2582_vm14 = vweird.f32 %v7404_v0 }
 0x173   : > { %6105 = vrcp.f32 %v7445_v28  ;;  %1870 = vst.msk [vmem:[#allocation2 + $0x48] sm:$0xff] %vm9742_vm9, %v7384_v55  ;;  %v1201_v51 = vrot.slane %v7486_v57, 2  ;;  %v2601_v27 = vand.u32 2147483647, %v7445_v28  ;;  %v2603_v6 = vand.u32 2147483648, %v7445_v28 }
 0x174   : > { %v2589_v61 = vor.u32 1.1754944e-38, %v2588_v40  ;;  %2005 = vst.msk [vmem:[#allocation2 + $0x48] sm:$0xff] %vm1995_vm10, %v7386_v56  ;;  %vm2587_vm12 = vcmp.eq.f32.partialorder %v2586_v37, 8.507059e+37  ;;  %v751_v18 = vmul.f32 %v6536_v3, %v533_v24 }
 0x175   : > { %v2604_v31 = vor.u32 1.1754944e-38, %v2603_v6 }
 0x177   : > { %1663 = vrot.lane.b32.xlu1 %v7335_v21, %s9761_s25  ;;  %1661 = vrot.lane.b32.xlu0 %v7370_v46, %s9761_s25  ;;  %v7431_v15 = vpop.permute.xlu2 %1043 }
 0x178   : > { %v6104_v32 = vpop.eup %6103  ;;  %1130 = vst.msk [vmem:[#allocation2 + $0x50] sm:$0xff] %vm1119_vm4, %v7431_v15  ;;  %v586_v15 = vmul.f32 2.0, %v478_v8 }
 0x179   : > { %v7425_v13 = vpop.permute.xlu1 %2051  ;;  %v7429_v4 = vpop.permute.xlu0 %2049  ;;  %v2578_v48 = vmul.f32 %v6104_v32, %v7404_v0  ;;  %vm2583_vm13 = vweird.f32 %v6104_v32  ;;  %v7505_v0 = vsel %vm1152_vm0, %v1199_v49, %v1201_v51 }
 0x17a   : > { %1392 = vrot.lane.b32.xlu2 %v7278_v58, %s9758_s1  ;;  %v6106_v60 = vpop.eup %6105  ;;  %vm2584_vm15 = vmor %vm2582_vm14, %vm2583_vm13  ;;  %2139 = vst.msk [vmem:[#allocation2 + $0x48] sm:$0xff] %vm2129_vm11, %v7425_v13  ;;  %vm2597_vm14 = vweird.f32 %v7445_v28 }
 0x17b   : > { %v2579_v39 = vsub.f32 1.0, %v2578_v48  ;;  %v2593_v62 = vmul.f32 %v6106_v60, %v7445_v28  ;;  %2138 = vst.msk [vmem:[#allocation2 + $0x40] sm:$0xff] %vm2129_vm11, %v7429_v4  ;;  %vm2598_vm13 = vweird.f32 %v6106_v60  ;;  %v587_v4 = vmul.f32 2.0, %v479_v7 }
 0x17d   : > { %v2580_v58 = vmul.f32 %v6104_v32, %v2579_v39  ;;  %v2594_v2 = vsub.f32 1.0, %v2593_v62  ;;  %v5698_v29 = vadd.f32 -1.0, %v587_v4 }
 0x17f   : > { %1794 = vrot.lane.b32.xlu0 %v7442_v25, %s9755_s12  ;;  %1927 = vrot.lane.b32.xlu1 %v7463_v53, %s9757_s0  ;;  %v1256_v14 = vpop.permute.xlu2 %1255  ;;  %v2581_v50 = vadd.f32 %v6104_v32, %v2580_v58  ;;  %v2595_v11 = vmul.f32 %v6106_v60, %v2594_v2  ;;  %v696_v40 = vmul.f32 %v5698_v29, %v6541_v9 }
 0x181   : > { %v1254_v41 = vpop.permute.xlu1 %1253  ;;  %v1046_v44 = vpop.permute.xlu0 %1045  ;;  %v2585_v38 = vsel %vm2584_vm15, %v6104_v32, %v2581_v50  ;;  %v2596_v23 = vadd.f32 %v6106_v60, %v2595_v11  ;;  %vm2599_vm15 = vmor %vm2597_vm14, %vm2598_vm13  ;;  %v2220_v48 = vld [vmem:[#allocation2 + $0x48] sm:$0xff] }
 0x182   : > { %v2341_v26 = vpop.f32.mrf.mxu1  ;;  %v2590_v63 = vsel %vm2587_vm12, %v2589_v61, %v2585_v38  ;;  %1529 = vrot.lane.b32.xlu2 %v7305_v10, %s9756_s24  ;;  %1340 = vst.msk [vmem:[#allocation2 + $0x50] sm:$0xff] %vm1329_vm5, %v1254_v41  ;;  %vm2602_vm12 = vcmp.eq.f32.partialorder %v2601_v27, 8.507059e+37  ;;  %v2219_v39 = vld [vmem:[#allocation2 + $0x40] sm:$0xff] }
 0x183   : > { %v2342_v54 = vadd.f32 %v7347_v36, %v2341_v26  ;;  %v3057_v1 = vmul.f32 %v2590_v63, %v7358_v42  ;;  %1131 = vst.msk [vmem:[#allocation2 + $0x58] sm:$0xff] %vm1119_vm4, %v1046_v44  ;;  %v5697_v26 = vadd.f32 -1.0, %v586_v15  ;;  %v2600_v33 = vsel %vm2599_vm15, %v6106_v60, %v2596_v23 }
 0x184   : > { %1341 = vst.msk [vmem:[#allocation2 + $0x58] sm:$0xff] %vm1329_vm5, %v1256_v14  ;;  %v2605_v28 = vsel %vm2602_vm12, %v2604_v31, %v2600_v33  ;;  %v2247_v37 = vpack.c.bf16 %v2220_v48, %v2219_v39  ;;  %v534_v48 = vld [vmem:[%s6531_s22 + $0x100] sm:$0x3] }
 0x185   : > { %v7480_v45 = vadd.f32 %v7352_v34, %v2342_v54  ;;  %3145 = vst.msk [vmem:[#allocation3 + $0x19] sm:$0xff] %vm828_vm2, %v3057_v1  ;;  %v532_v54 = vld [vmem:[%s6531_s22 + $0xf0] sm:$0xff]  ;;  %v3058_v20 = vmul.f32 %v2605_v28, %v7380_v52  ;;  %v695_v43 = vmul.f32 %v5697_v26, %v6541_v9  ;;  %v752_v33 = vmul.f32 %v6536_v3, %v534_v48 }
 0x186   : > { %v750_v52 = vmul.f32 %v6536_v3, %v532_v54  ;;  %5735 = vmatmul.msk.bf16.gmra.mxu1 %vm828_vm2, %v2247_v37 }
 0x187   : > { %v5749_v5 = vmul.f32 -1.442695, %v7480_v45  ;;  %2061 = vrot.lane.b32.xlu0 %v7493_v59, %s9760_s15  ;;  %2063 = vrot.lane.b32.xlu1 %v7505_v0, %s9760_s15  ;;  %v1520_v35 = vpop.permute.xlu2 %1519  ;;  %3146 = vst.msk [vmem:[#allocation3 + $0x21] sm:$0xff] %vm828_vm2, %v3058_v20 }
 0x188   : > { %v7566_v50 = vadd.f32 %v750_v52, %v695_v43 }
 0x189   : > { %6107 = vpow2.f32 %v5749_v5  ;;  %v1387_v19 = vpop.permute.xlu1 %1386  ;;  %v1385_v13 = vpop.permute.xlu0 %1384 }
 0x18a   : > { %v2343_v55 = vpop.f32.mrf.mxu1  ;;  %1472 = vst.msk [vmem:[#allocation2 + $0x58] sm:$0xff] %vm1460_vm6, %v1387_v19  ;;  %1792 = vrot.lane.b32.xlu2 %v7434_v22, %s9755_s12 }
 0x18b   : > { %v2344_v56 = vadd.f32 %v7347_v36, %v2343_v55  ;;  %1471 = vst.msk [vmem:[#allocation2 + $0x50] sm:$0xff] %vm1460_vm6, %v1385_v13 }
 0x18c   : > { %1606 = vst.msk [vmem:[#allocation2 + $0x50] sm:$0xff] %vm1595_vm7, %v1520_v35  ;;  %v3231_v61 = vld [vmem:[#allocation3 + $0x19] sm:$0xff] }
 0x18d   : > { %v7522_v42 = vadd.f32 %v7352_v34, %v2344_v56  ;;  %882 = vst.msk [vmem:[#allocation2 + $0xa0] sm:$0xff] %vm861_vm3, %v7566_v50 }
 0x18e   : > { %v3232_v51 = vld [vmem:[#allocation3 + $0x21] sm:$0xff] }
 0x18f   : > { %v5750_v16 = vmul.f32 -1.442695, %v7522_v42  ;;  %v6108_v17 = vpop.eup %6107  ;;  %1057 = vrot.lane.b32.xlu0 %v7305_v10, %s9762_s13  ;;  %1265 = vrot.lane.b32.xlu1 %v7370_v46, %s9759_s29  ;;  %v991_v10 = vrot.slane %v7486_v57, 1  ;;  %v1656_v44 = vpop.permute.xlu2 %1655  ;;  %v7558_v46 = vadd.f32 %v751_v18, %v696_v40  ;;  %v1203_v40 = vrot.slane %v7566_v50, 2 }
 0x190   : > { %v7534_v32 = vadd.f32 1.0, %v6108_v17 }
 0x191   : > { %6109 = vpow2.f32 %v5750_v16  ;;  %v1654_v41 = vpop.permute.xlu1 %1653  ;;  %v1522_v58 = vpop.permute.xlu0 %1521  ;;  %v7564_v57 = vsel %vm942_vm1, %v989_v30, %v991_v10  ;;  %883 = vst.msk [vmem:[#allocation2 + $0xa8] sm:$0xff] %vm861_vm3, %v7558_v46  ;;  %v994_v10 = vrot.slane %v7558_v46, 1 }
 0x192   : > { %6111 = vrcp.f32 %v7534_v32  ;;  %1740 = vst.msk [vmem:[#allocation2 + $0x50] sm:$0xff] %vm1729_vm8, %v1654_v41  ;;  %1929 = vrot.lane.b32.xlu2 %v7564_v57, %s9757_s0  ;;  %v2618_v30 = vand.u32 2147483648, %v7534_v32  ;;  %v2616_v55 = vand.u32 2147483647, %v7534_v32  ;;  %vm2612_vm14 = vweird.f32 %v7534_v32 }
 0x193   : > { %1607 = vst.msk [vmem:[#allocation2 + $0x58] sm:$0xff] %vm1595_vm7, %v1522_v58  ;;  %v1204_v41 = vrot.slane %v7558_v46, 2 }
 0x194   : > { %1741 = vst.msk [vmem:[#allocation2 + $0x58] sm:$0xff] %vm1729_vm8, %v1656_v44  ;;  %vm2617_vm12 = vcmp.eq.f32.partialorder %v2616_v55, 8.507059e+37 }
 0x195   : > { %v7625_v44 = vsel %vm1152_vm0, %v1203_v40, %v1204_v41 }
 0x197   : > { %v6110_v14 = vpop.eup %6109  ;;  %1396 = vrot.lane.b32.xlu0 %v7434_v22, %s9758_s1  ;;  %1398 = vrot.lane.b32.xlu1 %v7442_v25, %s9758_s1  ;;  %v3262_v22 = vpack.c.bf16 %v3232_v51, %v3231_v61  ;;  %v1920_v56 = vpop.permute.xlu2 %1919  ;;  %v2619_v25 = vor.u32 1.1754944e-38, %v2618_v30 }
 0x198   : > { %v2548_v49 = vadd.f32 1.0, %v6110_v14  ;;  %v6112_v47 = vpop.eup %6111 }
 0x199   : > { %v2608_v5 = vmul.f32 %v6112_v47, %v7534_v32  ;;  %v1787_v38 = vpop.permute.xlu1 %1786  ;;  %vm2613_vm13 = vweird.f32 %v6112_v47  ;;  %v1785_v63 = vpop.permute.xlu0 %1784  ;;  %5788 = vmatmul.msk.bf16.gmra.mxu0 %vm828_vm2, %v3262_v22  ;;  %v481_v22 = vld [vmem:[%s6526_s14 + $0x108] sm:$0xff] }
 0x19a   : > { %6113 = vrcp.f32 %v2548_v49  ;;  %1872 = vst.msk [vmem:[#allocation2 + $0x58] sm:$0xff] %vm9742_vm9, %v1787_v38  ;;  %vm2614_vm15 = vmor %vm2612_vm14, %vm2613_vm13  ;;  %v2633_v11 = vand.u32 2147483648, %v2548_v49  ;;  %1055 = vrot.lane.b32.xlu2 %v7308_v12, %s9762_s13  ;;  %v2631_v35 = vand.u32 2147483647, %v2548_v49  ;;  %vm2627_vm13 = vweird.f32 %v2548_v49 }
 0x19b   : > { %v2609_v60 = vsub.f32 1.0, %v2608_v5  ;;  %1871 = vst.msk [vmem:[#allocation2 + $0x50] sm:$0xff] %vm9742_vm9, %v1785_v63  ;;  %v482_v63 = vld [vmem:[%s6526_s14 + $0x110] sm:$0xff] }
 0x19c   : > { %2006 = vst.msk [vmem:[#allocation2 + $0x50] sm:$0xff] %vm1995_vm10, %v1920_v56  ;;  %v2634_v23 = vor.u32 1.1754944e-38, %v2633_v11  ;;  %v535_v56 = vld [vmem:[%s6531_s22 + $0x108] sm:$0xff] }
 0x19d   : > { %v2610_v62 = vmul.f32 %v6112_v47, %v2609_v60 }
 0x19f   : > { %v2611_v2 = vadd.f32 %v6112_v47, %v2610_v62  ;;  %1533 = vrot.lane.b32.xlu0 %v7564_v57, %s9756_s24  ;;  %1665 = vrot.lane.b32.xlu1 %v7493_v59, %s9761_s25  ;;  %v2056_v16 = vpop.permute.xlu2 %2055 }
 0x1a0   : > { %v6114_v1 = vpop.eup %6113 }
 0x1a1   : > { %v2623_v27 = vmul.f32 %v6114_v1, %v2548_v49  ;;  %v2615_v6 = vsel %vm2614_vm15, %v6112_v47, %v2611_v2  ;;  %vm2628_vm9 = vweird.f32 %v6114_v1  ;;  %v2054_v4 = vpop.permute.xlu1 %2053  ;;  %v1922_v15 = vpop.permute.xlu0 %1921  ;;  %vm2632_vm15 = vcmp.eq.f32.partialorder %v2631_v35, 8.507059e+37 }
 0x1a2   : > { %v2620_v19 = vsel %vm2617_vm12, %v2619_v25, %v2615_v6  ;;  %2140 = vst.msk [vmem:[#allocation2 + $0x50] sm:$0xff] %vm2129_vm11, %v2054_v4  ;;  %vm2629_vm14 = vmor %vm2627_vm13, %vm2628_vm9  ;;  %1267 = vrot.lane.b32.xlu2 %v7335_v21, %s9759_s29  ;;  %v590_v6 = vmul.f32 2.0, %v482_v63  ;;  %vm9765_vm9 = vcmask 171152  }
 0x1a3   : > { %v2624_v7 = vsub.f32 1.0, %v2623_v27  ;;  %v3059_v8 = vmul.f32 %v2620_v19, %v7480_v45  ;;  %v480_v45 = vld [vmem:[%s6526_s14 + $0x100] sm:$0x3]  ;;  %2007 = vst.msk [vmem:[#allocation2 + $0x58] sm:$0xff] %vm1995_vm10, %v1922_v15  ;;  %v536_v27 = vld [vmem:[%s6531_s22 + $0x110] sm:$0xff]  ;;  %vm9766_vm12 = vmmov %vm9765_vm9 }
 0x1a4   : > { %v588_v12 = vmul.f32 2.0, %v480_v45  ;;  %2141 = vst.msk [vmem:[#allocation2 + $0x58] sm:$0xff] %vm2129_vm11, %v2056_v16  ;;  %v5701_v4 = vadd.f32 -1.0, %v590_v6  ;;  %v754_v15 = vmul.f32 %v6536_v3, %v536_v27 }
 0x1a5   : > { %v2625_v13 = vmul.f32 %v6114_v1, %v2624_v7  ;;  %3147 = vst.msk [vmem:[#allocation3 + $0x31] sm:$0xff] %vm828_vm2, %v3059_v8  ;;  %v993_v8 = vrot.slane %v7566_v50, 1 }
 0x1a6   : > { %v5699_v31 = vadd.f32 -1.0, %v588_v12  ;;  %v699_v16 = vmul.f32 %v5701_v4, %v6541_v9 }
 0x1a7   : > { %v2626_v17 = vadd.f32 %v6114_v1, %v2625_v13  ;;  %1796 = vrot.lane.b32.xlu0 %v7566_v50, %s9755_s12  ;;  %1798 = vrot.lane.b32.xlu1 %v7558_v46, %s9755_s12  ;;  %v1258_v54 = vpop.permute.xlu2 %1257 }
 0x1a8   : > { %v697_v26 = vmul.f32 %v5699_v31, %v6541_v9  ;;  %v7671_v12 = vadd.f32 %v754_v15, %v699_v16 }
 0x1a9   : > { %v2630_v24 = vsel %vm2629_vm14, %v6114_v1, %v2626_v17  ;;  %v1050_v39 = vpop.permute.xlu1 %1049  ;;  %v2221_v28 = vld [vmem:[#allocation2 + $0x50] sm:$0xff]  ;;  %v589_v1 = vmul.f32 2.0, %v481_v22  ;;  %v7666_v17 = vsel %vm942_vm1, %v993_v8, %v994_v10 }
 0x1aa   : > { %v2635_v29 = vsel %vm2632_vm15, %v2634_v23, %v2630_v24  ;;  %1133 = vst.msk [vmem:[#allocation2 + $0x68] sm:$0xff] %vm1119_vm4, %v1050_v39  ;;  %v7610_v18 = vadd.f32 %v752_v33, %v697_v26  ;;  %1531 = vrot.lane.b32.xlu2 %v7463_v53, %s9756_s24  ;;  %v483_v23 = vld [vmem:[%s6526_s14 + $0x118] sm:$0x3] }
 0x1ab   : > { %v3060_v32 = vmul.f32 %v2635_v29, %v7522_v42  ;;  %v1048_v42 = vpop.permute.xlu0 %1047  ;;  %v2346_v21 = vpop.f32.mrf.mxu1  ;;  %v2222_v37 = vld [vmem:[#allocation2 + $0x58] sm:$0xff]  ;;  %v5700_v11 = vadd.f32 -1.0, %v589_v1  ;;  %885 = vst.msk [vmem:[#allocation2 + $0xb8] sm:$0xff] %vm861_vm3, %v7671_v12  ;;  %v591_v39 = vmul.f32 2.0, %v483_v23 }
 0x1ac   : > { %1132 = vst.msk [vmem:[#allocation2 + $0x60] sm:$0xff] %vm1119_vm4, %v1048_v42  ;;  %v2347_v20 = vadd.f32 %v7347_v36, %v2346_v21  ;;  %v2248_v43 = vpack.c.bf16 %v2222_v37, %v2221_v28  ;;  %v996_v52 = vrot.slane %v7610_v18, 1  ;;  %v3233_v61 = vld [vmem:[#allocation3 + $0x31] sm:$0xff]  ;;  %v1206_v48 = vrot.slane %v7610_v18, 2 }
 0x1ad   : > { %3148 = vst.msk [vmem:[#allocation3 + $0x39] sm:$0xff] %vm828_vm2, %v3060_v32  ;;  %v537_v21 = vld [vmem:[%s6531_s22 + $0x118] sm:$0x3] }
 0x1ae   : > { %1342 = vst.msk [vmem:[#allocation2 + $0x60] sm:$0xff] %vm1329_vm5, %v1258_v54  ;;  %v7620_v58 = vadd.f32 %v7352_v34, %v2347_v20  ;;  %5736 = vmatmul.msk.bf16.gmra.mxu1 %vm828_vm2, %v2248_v43  ;;  %v7629_v14 = vsel %vm942_vm1, %v994_v10, %v996_v52  ;;  %v7690_v54 = vsel %vm1152_vm0, %v1204_v41, %v1206_v48  ;;  %v5702_v20 = vadd.f32 -1.0, %v591_v39 }
 0x1af   : > { %1933 = vrot.lane.b32.xlu0 %v7629_v14, %s9757_s0  ;;  %2065 = vrot.lane.b32.xlu1 %v7625_v44, %s9760_s15  ;;  %v1391_v60 = vpop.permute.xlu2 %1390  ;;  %v755_v43 = vmul.f32 %v6536_v3, %v537_v21  ;;  %v485_v21 = vld [vmem:[%s6526_s14 + $0x128] sm:$0xff] }
 0x1b0   : > { %v5751_v49 = vmul.f32 -1.442695, %v7620_v58 }
 0x1b1   : > { %v1389_v47 = vpop.permute.xlu1 %1388 }
 0x1b2   : > { %6115 = vpow2.f32 %v5751_v49  ;;  %1473 = vst.msk [vmem:[#allocation2 + $0x60] sm:$0xff] %vm1460_vm6, %v1389_v47  ;;  %1667 = vrot.lane.b32.xlu2 %v7505_v0, %s9761_s25 }
 0x1b3   : > { %v1260_v5 = vpop.permute.xlu0 %1259  ;;  %v2348_v30 = vpop.f32.mrf.mxu1 }
 0x1b4   : > { %1343 = vst.msk [vmem:[#allocation2 + $0x68] sm:$0xff] %vm1329_vm5, %v1260_v5  ;;  %v3234_v51 = vld [vmem:[#allocation3 + $0x39] sm:$0xff]  ;;  %v2349_v38 = vadd.f32 %v7347_v36, %v2348_v30 }
 0x1b5   : > { %1474 = vst.msk [vmem:[#allocation2 + $0x68] sm:$0xff] %vm1460_vm6, %v1391_v60  ;;  %v3263_v62 = vpack.c.bf16 %v3234_v51, %v3233_v61  ;;  %v700_v60 = vmul.f32 %v5702_v20, %v6541_v9  ;;  %v538_v20 = vld [vmem:[%s6531_s22 + $0x120] sm:$0xff] }
 0x1b6   : > { %v7643_v55 = vadd.f32 %v7352_v34, %v2349_v38 }
 0x1b7   : > { %5789 = vmatmul.msk.bf16.gmra.mxu0 %vm828_vm2, %v3263_v62  ;;  %1059 = vrot.lane.b32.xlu0 %v7463_v53, %s9762_s13  ;;  %v1658_v35 = vpop.permute.xlu2 %1657  ;;  %v753_v53 = vmul.f32 %v6536_v3, %v535_v56  ;;  %v809_v63 = vadd.f32 %v755_v43, %v700_v60  ;;  %v539_v43 = vld [vmem:[%s6531_s22 + $0x128] sm:$0xff] }
 0x1b8   : > { %v6116_v2 = vpop.eup %6115  ;;  %v5752_v25 = vmul.f32 -1.442695, %v7643_v55  ;;  %1061 = vrot.lane.b32.xlu1 %v7564_v57, %s9762_s13  ;;  %v698_v57 = vmul.f32 %v5700_v11, %v6541_v9 }
 0x1b9   : > { %v2549_v19 = vadd.f32 1.0, %v6116_v2  ;;  %v1526_v7 = vpop.permute.xlu1 %1525  ;;  %v999_v2 = vrot.slane %v7671_v12, 1 }
 0x1ba   : > { %6117 = vpow2.f32 %v5752_v25  ;;  %1609 = vst.msk [vmem:[#allocation2 + $0x68] sm:$0xff] %vm1595_vm7, %v1526_v7  ;;  %v7668_v45 = vadd.f32 %v753_v53, %v698_v57  ;;  %1931 = vrot.lane.b32.xlu2 %v7666_v17, %s9757_s0  ;;  %v1001_v7 = vrot.slane %v809_v63, 1 }
 0x1bb   : > { %v1524_v13 = vpop.permute.xlu0 %1523  ;;  %6119 = vrcp.f32 %v2549_v19  ;;  %v2646_v18 = vand.u32 2147483647, %v2549_v19  ;;  %vm2642_vm14 = vweird.f32 %v2549_v19 }
 0x1bc   : > { %1608 = vst.msk [vmem:[#allocation2 + $0x60] sm:$0xff] %vm1595_vm7, %v1524_v13  ;;  %v998_v25 = vrot.slane %v7668_v45, 1  ;;  %v7723_v13 = vsel %vm942_vm1, %v999_v2, %v1001_v7 }
 0x1bd   : > { %1742 = vst.msk [vmem:[#allocation2 + $0x60] sm:$0xff] %vm1729_vm8, %v1658_v35 }
 0x1be   : > { %884 = vst.msk [vmem:[#allocation2 + $0xb0] sm:$0xff] %vm861_vm3, %v7668_v45  ;;  %v7719_v11 = vsel %vm942_vm1, %v998_v25, %v999_v2 }
 0x1bf   : > { %1271 = vrot.lane.b32.xlu0 %v7505_v0, %s9759_s29  ;;  %v1791_v33 = vpop.permute.xlu2 %1790 }
 0x1c0   : > { %v6118_v24 = vpop.eup %6117  ;;  %1400 = vrot.lane.b32.xlu1 %v7566_v50, %s9758_s1  ;;  %v2648_v50 = vand.u32 2147483648, %v2549_v19 }
 0x1c1   : > { %v6120_v29 = vpop.eup %6119  ;;  %v2550_v31 = vadd.f32 1.0, %v6118_v24  ;;  %v1789_v32 = vpop.permute.xlu1 %1788  ;;  %v1211_v24 = vrot.slane %v809_v63, 2 }
 0x1c2   : > { %v2638_v26 = vmul.f32 %v6120_v29, %v2549_v19  ;;  %1873 = vst.msk [vmem:[#allocation2 + $0x60] sm:$0xff] %vm9765_vm9, %v1789_v32  ;;  %vm2643_vm13 = vweird.f32 %v6120_v29  ;;  %2067 = vrot.lane.b32.xlu2 %v7690_v54, %s9760_s15  ;;  %v2649_v10 = vor.u32 1.1754944e-38, %v2648_v50  ;;  %vm2647_vm9 = vcmp.eq.f32.partialorder %v2646_v18, 8.507059e+37 }
 0x1c3   : > { %v1660_v0 = vpop.permute.xlu0 %1659  ;;  %6121 = vrcp.f32 %v2550_v31  ;;  %vm2644_vm15 = vmor %vm2642_vm14, %vm2643_vm13  ;;  %v2663_v38 = vand.u32 2147483648, %v2550_v31  ;;  %v2661_v22 = vand.u32 2147483647, %v2550_v31  ;;  %vm2657_vm13 = vweird.f32 %v2550_v31 }
 0x1c4   : > { %1743 = vst.msk [vmem:[#allocation2 + $0x68] sm:$0xff] %vm1729_vm8, %v1660_v0  ;;  %v2639_v42 = vsub.f32 1.0, %v2638_v26 }
 0x1c5   : > { %1874 = vst.msk [vmem:[#allocation2 + $0x68] sm:$0xff] %vm9766_vm12, %v1791_v33 }
 0x1c6   : > { %v2640_v28 = vmul.f32 %v6120_v29, %v2639_v42 }
 0x1c7   : > { %1535 = vrot.lane.b32.xlu0 %v7666_v17, %s9756_s24  ;;  %v2058_v5 = vpop.permute.xlu2 %2057 }
 0x1c8   : > { %v2641_v37 = vadd.f32 %v6120_v29, %v2640_v28  ;;  %1537 = vrot.lane.b32.xlu1 %v7629_v14, %s9756_s24 }
 0x1c9   : > { %v6122_v40 = vpop.eup %6121  ;;  %v1926_v41 = vpop.permute.xlu1 %1925 }
 0x1ca   : > { %v2645_v52 = vsel %vm2644_vm15, %v6120_v29, %v2641_v37  ;;  %v2653_v49 = vmul.f32 %v6122_v40, %v2550_v31  ;;  %2009 = vst.msk [vmem:[#allocation2 + $0x68] sm:$0xff] %vm1995_vm10, %v1926_v41  ;;  %vm2658_vm12 = vweird.f32 %v6122_v40  ;;  %1269 = vrot.lane.b32.xlu2 %v7493_v59, %s9759_s29  ;;  %vm2662_vm15 = vcmp.eq.f32.partialorder %v2661_v22, 8.507059e+37 }
 0x1cb   : > { %v1924_v47 = vpop.permute.xlu0 %1923  ;;  %v2650_v30 = vsel %vm2647_vm9, %v2649_v10, %v2645_v52  ;;  %vm2659_vm14 = vmor %vm2657_vm13, %vm2658_vm12  ;;  %vm9767_vm9 = vcmask 171152  }
 0x1cc   : > { %2008 = vst.msk [vmem:[#allocation2 + $0x60] sm:$0xff] %vm1995_vm10, %v1924_v47  ;;  %v3061_v61 = vmul.f32 %v2650_v30, %v7620_v58  ;;  %v2654_v51 = vsub.f32 1.0, %v2653_v49  ;;  %v2664_v58 = vor.u32 1.1754944e-38, %v2663_v38  ;;  %v1208_v30 = vrot.slane %v7668_v45, 2  ;;  %vm9768_vm12 = vmmov %vm9767_vm9 }
 0x1cd   : > { %2142 = vst.msk [vmem:[#allocation2 + $0x60] sm:$0xff] %vm2129_vm11, %v2058_v5  ;;  %v756_v5 = vmul.f32 %v6536_v3, %v538_v20 }
 0x1ce   : > { %3149 = vst.msk [vmem:[#allocation3 + $0x49] sm:$0xff] %vm828_vm2, %v3061_v61  ;;  %v2655_v62 = vmul.f32 %v6122_v40, %v2654_v51 }
 0x1cf   : > { %1671 = vrot.lane.b32.xlu0 %v7690_v54, %s9761_s25  ;;  %v1054_v19 = vpop.permute.xlu2 %1053 }
 0x1d0   : > { %v2656_v56 = vadd.f32 %v6122_v40, %v2655_v62  ;;  %1800 = vrot.lane.b32.xlu1 %v7668_v45, %s9755_s12  ;;  %1135 = vst.msk [vmem:[#allocation2 + $0x78] sm:$0xff] %vm1119_vm4, %v1054_v19 }
 0x1d1   : > { %v1052_v1 = vpop.permute.xlu1 %1051 }
 0x1d2   : > { %v2660_v27 = vsel %vm2659_vm14, %v6122_v40, %v2656_v56  ;;  %1134 = vst.msk [vmem:[#allocation2 + $0x70] sm:$0xff] %vm1119_vm4, %v1052_v1  ;;  %1402 = vrot.lane.b32.xlu2 %v7558_v46, %s9758_s1  ;;  %v1209_v46 = vrot.slane %v7671_v12, 2  ;;  %v593_v40 = vmul.f32 2.0, %v485_v21 }
 0x1d3   : > { %v2060_v6 = vpop.permute.xlu0 %2059  ;;  %v2665_v8 = vsel %vm2662_vm15, %v2664_v58, %v2660_v27 }
 0x1d4   : > { %2143 = vst.msk [vmem:[#allocation2 + $0x68] sm:$0xff] %vm2129_vm11, %v2060_v6  ;;  %v3062_v59 = vmul.f32 %v2665_v8, %v7643_v55  ;;  %v2223_v4 = vld [vmem:[#allocation2 + $0x60] sm:$0xff]  ;;  %v7741_v48 = vsel %vm1152_vm0, %v1209_v46, %v1211_v24  ;;  %v5704_v49 = vadd.f32 -1.0, %v593_v40  ;;  %v7780_v62 = vsel %vm1152_vm0, %v1208_v30, %v1209_v46 }
 0x1d5   : > { %v3235_v31 = vld [vmem:[#allocation3 + $0x49] sm:$0xff] }
 0x1d6   : > { %3150 = vst.msk [vmem:[#allocation3 + $0x51] sm:$0xff] %vm828_vm2, %v3062_v59 }
 0x1d7   : > { %1935 = vrot.lane.b32.xlu0 %v7719_v11, %s9757_s0  ;;  %v1393_v16 = vpop.permute.xlu2 %1392 }
 0x1d8   : > { %1937 = vrot.lane.b32.xlu1 %v7723_v13, %s9757_s0 }
 0x1d9   : > { %v1264_v55 = vpop.permute.xlu1 %1263 }
 0x1da   : > { %1345 = vst.msk [vmem:[#allocation2 + $0x78] sm:$0xff] %vm1329_vm5, %v1264_v55  ;;  %v2351_v53 = vpop.f32.mrf.mxu1  ;;  %1669 = vrot.lane.b32.xlu2 %v7625_v44, %s9761_s25 }
 0x1db   : > { %v1262_v35 = vpop.permute.xlu0 %1261  ;;  %v2224_v15 = vld [vmem:[#allocation2 + $0x68] sm:$0xff]  ;;  %v2352_v57 = vadd.f32 %v7347_v36, %v2351_v53 }
 0x1dc   : > { %1344 = vst.msk [vmem:[#allocation2 + $0x70] sm:$0xff] %vm1329_vm5, %v1262_v35  ;;  %v2249_v23 = vpack.c.bf16 %v2224_v15, %v2223_v4 }
 0x1dd   : > { %1475 = vst.msk [vmem:[#allocation2 + $0x70] sm:$0xff] %vm1460_vm6, %v1393_v16  ;;  %v7737_v29 = vadd.f32 %v7352_v34, %v2352_v57  ;;  %v3236_v32 = vld [vmem:[#allocation3 + $0x51] sm:$0xff] }
 0x1de   : > { %5737 = vmatmul.msk.bf16.gmra.mxu1 %vm828_vm2, %v2249_v23  ;;  %v3264_v26 = vpack.c.bf16 %v3236_v32, %v3235_v31  ;;  %v486_v32 = vld [vmem:[%s6526_s14 + $0x130] sm:$0x3] }
 0x1df   : > { %v5753_v0 = vmul.f32 -1.442695, %v7737_v29  ;;  %2071 = vrot.lane.b32.xlu0 %v7741_v48, %s9760_s15  ;;  %v1530_v28 = vpop.permute.xlu2 %1529 }
 0x1e0   : > { %5790 = vmatmul.msk.bf16.gmra.mxu0 %vm828_vm2, %v3264_v26  ;;  %1063 = vrot.lane.b32.xlu1 %v7666_v17, %s9762_s13  ;;  %v484_v17 = vld [vmem:[%s6526_s14 + $0x120] sm:$0xff] }
 0x1e1   : > { %6123 = vpow2.f32 %v5753_v0  ;;  %v1528_v33 = vpop.permute.xlu1 %1527  ;;  %v592_v37 = vmul.f32 2.0, %v484_v17  ;;  %v594_v0 = vmul.f32 2.0, %v486_v32 }
 0x1e2   : > { %1610 = vst.msk [vmem:[#allocation2 + $0x70] sm:$0xff] %vm1595_vm7, %v1528_v33  ;;  %v2353_v42 = vpop.f32.mrf.mxu1  ;;  %1802 = vrot.lane.b32.xlu2 %v7671_v12, %s9755_s12 }
 0x1e3   : > { %v1395_v39 = vpop.permute.xlu0 %1394  ;;  %v2354_v50 = vadd.f32 %v7347_v36, %v2353_v42  ;;  %v5703_v36 = vadd.f32 -1.0, %v592_v37 }
 0x1e4   : > { %1476 = vst.msk [vmem:[#allocation2 + $0x78] sm:$0xff] %vm1460_vm6, %v1395_v39  ;;  %v5705_v39 = vadd.f32 -1.0, %v594_v0 }
 0x1e5   : > { %1611 = vst.msk [vmem:[#allocation2 + $0x78] sm:$0xff] %vm1595_vm7, %v1530_v28  ;;  %v7756_v18 = vadd.f32 %v7352_v34, %v2354_v50  ;;  %v701_v51 = vmul.f32 %v5703_v36, %v6541_v9  ;;  %v540_v50 = vld [vmem:[%s6531_s22 + $0x130] sm:$0x3] }
 0x1e6   : > { %v703_v17 = vmul.f32 %v5705_v39, %v6541_v9  ;;  %v758_v21 = vmul.f32 %v6536_v3, %v540_v50 }
 0x1e7   : > { %v6124_v10 = vpop.eup %6123  ;;  %v5754_v41 = vmul.f32 -1.442695, %v7756_v18  ;;  %1273 = vrot.lane.b32.xlu0 %v7625_v44, %s9759_s29  ;;  %v757_v44 = vmul.f32 %v6536_v3, %v539_v43  ;;  %v1793_v61 = vpop.permute.xlu2 %1792  ;;  %v7777_v38 = vadd.f32 %v756_v5, %v701_v51 }
 0x1e8   : > { %v2551_v52 = vadd.f32 1.0, %v6124_v10  ;;  %1275 = vrot.lane.b32.xlu1 %v7690_v54, %s9759_s29  ;;  %v702_v54 = vmul.f32 %v5704_v49, %v6541_v9 }
 0x1e9   : > { %6125 = vpow2.f32 %v5754_v41  ;;  %v1664_v47 = vpop.permute.xlu1 %1663  ;;  %886 = vst.msk [vmem:[#allocation2 + $0xc0] sm:$0xff] %vm861_vm3, %v7777_v38  ;;  %v1003_v57 = vrot.slane %v7777_v38, 1  ;;  %v812_v41 = vadd.f32 %v758_v21, %v703_v17  ;;  %v1213_v30 = vrot.slane %v7777_v38, 2 }
 0x1ea   : > { %6127 = vrcp.f32 %v2551_v52  ;;  %1745 = vst.msk [vmem:[#allocation2 + $0x78] sm:$0xff] %vm1729_vm8, %v1664_v47  ;;  %v7782_v22 = vadd.f32 %v757_v44, %v702_v54  ;;  %2069 = vrot.lane.b32.xlu2 %v7780_v62, %s9760_s15  ;;  %v2678_v19 = vand.u32 2147483648, %v2551_v52  ;;  %v2676_v7 = vand.u32 2147483647, %v2551_v52 }
 0x1eb   : > { %v1662_v60 = vpop.permute.xlu0 %1661  ;;  %vm2672_vm14 = vweird.f32 %v2551_v52 }
 0x1ec   : > { %1744 = vst.msk [vmem:[#allocation2 + $0x70] sm:$0xff] %vm1729_vm8, %v1662_v60  ;;  %v2679_v55 = vor.u32 1.1754944e-38, %v2678_v19  ;;  %v1004_v16 = vrot.slane %v7782_v22, 1  ;;  %v1214_v5 = vrot.slane %v7782_v22, 2  ;;  %v1216_v60 = vrot.slane %v812_v41, 2 }
 0x1ed   : > { %1875 = vst.msk [vmem:[#allocation2 + $0x70] sm:$0xff] %vm9767_vm9, %v1793_v61  ;;  %vm2677_vm9 = vcmp.eq.f32.partialorder %v2676_v7, 8.507059e+37 }
 0x1ee   : > { %887 = vst.msk [vmem:[#allocation2 + $0xc8] sm:$0xff] %vm861_vm3, %v7782_v22 }
 0x1ef   : > { %v6126_v63 = vpop.eup %6125  ;;  %1406 = vrot.lane.b32.xlu0 %v7671_v12, %s9758_s1  ;;  %v1930_v6 = vpop.permute.xlu2 %1929 }
 0x1f0   : > { %v6128_v56 = vpop.eup %6127  ;;  %v2552_v58 = vadd.f32 1.0, %v6126_v63  ;;  %1539 = vrot.lane.b32.xlu1 %v7719_v11, %s9756_s24 }
 0x1f1   : > { %v2668_v1 = vmul.f32 %v6128_v56, %v2551_v52  ;;  %v1928_v27 = vpop.permute.xlu1 %1927  ;;  %vm2673_vm13 = vweird.f32 %v6128_v56 }
 0x1f2   : > { %6129 = vrcp.f32 %v2552_v58  ;;  %2010 = vst.msk [vmem:[#allocation2 + $0x70] sm:$0xff] %vm1995_vm10, %v1928_v27  ;;  %vm2674_vm15 = vmor %vm2672_vm14, %vm2673_vm13  ;;  %1065 = vrot.lane.b32.xlu2 %v7629_v14, %s9762_s13  ;;  %v2693_v26 = vand.u32 2147483648, %v2552_v58  ;;  %v2691_v33 = vand.u32 2147483647, %v2552_v58  ;;  %vm2687_vm13 = vweird.f32 %v2552_v58 }
 0x1f3   : > { %v1795_v2 = vpop.permute.xlu0 %1794  ;;  %v2669_v25 = vsub.f32 1.0, %v2668_v1  ;;  %v7852_v1 = vld [vmem:[%s9722_s8] ss:$0 sm:$0xff] }
 0x1f4   : > { %1876 = vst.msk [vmem:[#allocation2 + $0x78] sm:$0xff] %vm9768_vm12, %v1795_v2  ;;  %v2694_v28 = vor.u32 1.1754944e-38, %v2693_v26 }
 0x1f5   : > { %v2670_v12 = vmul.f32 %v6128_v56, %v2669_v25  ;;  %2011 = vst.msk [vmem:[#allocation2 + $0x78] sm:$0xff] %vm1995_vm10, %v1930_v6 }
 0x1f7   : > { %v2671_v8 = vadd.f32 %v6128_v56, %v2670_v12  ;;  %1673 = vrot.lane.b32.xlu0 %v7780_v62, %s9761_s25  ;;  %v1056_v31 = vpop.permute.xlu2 %1055 }
 0x1f8   : > { %v6130_v59 = vpop.eup %6129  ;;  %1675 = vrot.lane.b32.xlu1 %v7741_v48, %s9761_s25  ;;  %1136 = vst.msk [vmem:[#allocation2 + $0x80] sm:$0xff] %vm1119_vm4, %v1056_v31  ;;  %v541_v31 = vld [vmem:[%s6531_s22 + $0x138] sm:$0xff] }
 0x1f9   : > { %v2675_v35 = vsel %vm2674_vm15, %v6128_v56, %v2671_v8  ;;  %v2683_v53 = vmul.f32 %v6130_v59, %v2552_v58  ;;  %v2064_v24 = vpop.permute.xlu1 %2063  ;;  %vm2688_vm12 = vweird.f32 %v6130_v59  ;;  %vm2692_vm15 = vcmp.eq.f32.partialorder %v2691_v33, 8.507059e+37 }
 0x1fa   : > { %v2680_v4 = vsel %vm2677_vm9, %v2679_v55, %v2675_v35  ;;  %2145 = vst.msk [vmem:[#allocation2 + $0x78] sm:$0xff] %vm2129_vm11, %v2064_v24  ;;  %vm2689_vm14 = vmor %vm2687_vm13, %vm2688_vm12  ;;  %1404 = vrot.lane.b32.xlu2 %v7668_v45, %s9758_s1  ;;  %v7834_v45 = vsel %vm1152_vm0, %v1214_v5, %v1216_v60  ;;  %v488_v35 = vld [vmem:[%s6526_s14 + $0x140] sm:$0xff]  ;;  %vm9769_vm9 = vcmask 171152   ;;  %v759_v33 = vmul.f32 %v6536_v3, %v541_v31 }
 0x1fb   : > { %v2062_v15 = vpop.permute.xlu0 %2061  ;;  %v3063_v23 = vmul.f32 %v2680_v4, %v7737_v29  ;;  %v2684_v46 = vsub.f32 1.0, %v2683_v53  ;;  %v7814_v29 = vsel %vm942_vm1, %v1003_v57, %v1004_v16  ;;  %v487_v53 = vld [vmem:[%s6526_s14 + $0x138] sm:$0xff]  ;;  %v596_v57 = vmul.f32 2.0, %v488_v35  ;;  %vm9770_vm12 = vmmov %vm9769_vm9 }
 0x1fc   : > { %2144 = vst.msk [vmem:[#allocation2 + $0x70] sm:$0xff] %vm2129_vm11, %v2062_v15 }
 0x1fd   : > { %3151 = vst.msk [vmem:[#allocation3 + $0x61] sm:$0xff] %vm828_vm2, %v3063_v23  ;;  %v2685_v14 = vmul.f32 %v6130_v59, %v2684_v46  ;;  %v542_v46 = vld [vmem:[%s6531_s22 + $0x140] sm:$0xff]  ;;  %v5707_v24 = vadd.f32 -1.0, %v596_v57 }
 0x1fe   : > { %v760_v0 = vmul.f32 %v6536_v3, %v542_v46 }
 0x1ff   : > { %v2686_v42 = vadd.f32 %v6130_v59, %v2685_v14  ;;  %1806 = vrot.lane.b32.xlu0 %v7782_v22, %s9755_s12  ;;  %v1268_v36 = vpop.permute.xlu2 %1267  ;;  %v705_v26 = vmul.f32 %v5707_v24, %v6541_v9 }
 0x200   : > { %1939 = vrot.lane.b32.xlu1 %v7814_v29, %s9757_s0 }
 0x201   : > { %v2690_v20 = vsel %vm2689_vm14, %v6130_v59, %v2686_v42  ;;  %v1266_v52 = vpop.permute.xlu1 %1265  ;;  %v2226_v49 = vld [vmem:[#allocation2 + $0x78] sm:$0xff]  ;;  %v7907_v21 = vadd.f32 %v760_v0, %v705_v26 }
 0x202   : > { %v2695_v37 = vsel %vm2692_vm15, %v2694_v28, %v2690_v20  ;;  %1346 = vst.msk [vmem:[#allocation2 + $0x80] sm:$0xff] %vm1329_vm5, %v1266_v52  ;;  %1541 = vrot.lane.b32.xlu2 %v7723_v13, %s9756_s24  ;;  %v489_v28 = vld [vmem:[%s6526_s14 + $0x148] sm:$0x3]  ;;  %v6006_v0 = vld [vmem:[%s9723_s9 + $0x38] sm:$0xff] }
 0x203   : > { %v1058_v40 = vpop.permute.xlu0 %1057  ;;  %v2225_v10 = vld [vmem:[#allocation2 + $0x70] sm:$0xff]  ;;  %v3064_v43 = vmul.f32 %v2695_v37, %v7756_v18  ;;  %v7837_v18 = vsel %vm1152_vm0, %v1213_v30, %v1214_v5  ;;  %v2356_v58 = vpop.f32.mrf.mxu1  ;;  %v597_v37 = vmul.f32 2.0, %v489_v28  ;;  %889 = vst.msk [vmem:[#allocation2 + $0xd8] sm:$0xff] %vm861_vm3, %v7907_v21  ;;  %3930 = vmatpush.bf16.msrb.mxu1 %v6006_v0 }
 0x204   : > { %1137 = vst.msk [vmem:[#allocation2 + $0x88] sm:$0xff] %vm1119_vm4, %v1058_v40  ;;  %v2250_v47 = vpack.c.bf16 %v2226_v49, %v2225_v10  ;;  %v3237_v54 = vld [vmem:[#allocation3 + $0x61] sm:$0xff]  ;;  %v2357_v2 = vadd.f32 %v7852_v1, %v2356_v58  ;;  %v6005_v28 = vld [vmem:[%s9723_s9 + $0x30] sm:$0xff] }
 0x205   : > { %3152 = vst.msk [vmem:[#allocation3 + $0x69] sm:$0xff] %vm828_vm2, %v3064_v43  ;;  %v543_v43 = vld [vmem:[%s6531_s22 + $0x148] sm:$0x3] }
 0x206   : > { %1347 = vst.msk [vmem:[#allocation2 + $0x88] sm:$0xff] %vm1329_vm5, %v1268_v36  ;;  %5738 = vmatmul.msk.bf16.gmra.mxu1 %vm828_vm2, %v2250_v47  ;;  %v7862_v25 = vadd.f32 %v7352_v34, %v2357_v2  ;;  %v761_v49 = vmul.f32 %v6536_v3, %v543_v43  ;;  %v1219_v2 = vrot.slane %v7907_v21, 2 }
 0x207   : > { %2073 = vrot.lane.b32.xlu0 %v7837_v18, %s9760_s15  ;;  %v1532_v51 = vpop.permute.xlu2 %1531  ;;  %3931 = vmatpush.bf16.msrb.mxu1 %v6005_v28 }
 0x208   : > { %2075 = vrot.lane.b32.xlu1 %v7834_v45, %s9760_s15  ;;  %v5755_v12 = vmul.f32 -1.442695, %v7862_v25 }
 0x209   : > { %v1399_v61 = vpop.permute.xlu1 %1398 }
 0x20a   : > { %1478 = vst.msk [vmem:[#allocation2 + $0x88] sm:$0xff] %vm1460_vm6, %v1399_v61  ;;  %1804 = vrot.lane.b32.xlu2 %v7777_v38, %s9755_s12  ;;  %6131 = vpow2.f32 %v5755_v12 }
 0x20b   : > { %v1397_v44 = vpop.permute.xlu0 %1396 }
 0x20c   : > { %1477 = vst.msk [vmem:[#allocation2 + $0x80] sm:$0xff] %vm1460_vm6, %v1397_v44  ;;  %v3238_v63 = vld [vmem:[#allocation3 + $0x69] sm:$0xff] }
 0x20d   : > { %1612 = vst.msk [vmem:[#allocation2 + $0x80] sm:$0xff] %vm1595_vm7, %v1532_v51  ;;  %v3265_v56 = vpack.c.bf16 %v3238_v63, %v3237_v54 }
 0x20f   : > { %5791 = vmatmul.msk.bf16.gmra.mxu0 %vm828_vm2, %v3265_v56  ;;  %1069 = vrot.lane.b32.xlu0 %v7723_v13, %s9762_s13  ;;  %v1668_v19 = vpop.permute.xlu2 %1667  ;;  %v1006_v13 = vrot.slane %v812_v41, 1  ;;  %v5708_v41 = vadd.f32 -1.0, %v597_v37 }
 0x210   : > { %1277 = vrot.lane.b32.xlu1 %v7780_v62, %s9759_s29  ;;  %v2358_v62 = vpop.f32.mrf.mxu1 }
 0x211   : > { %v1666_v6 = vpop.permute.xlu1 %1665  ;;  %v7871_v7 = vsel %vm942_vm1, %v1004_v16, %v1006_v13  ;;  %v2359_v8 = vadd.f32 %v7852_v1, %v2358_v62  ;;  %v6132_v16 = vpop.eup %6131  ;;  %v706_v36 = vmul.f32 %v5708_v41, %v6541_v9 }
 0x212   : > { %1746 = vst.msk [vmem:[#allocation2 + $0x80] sm:$0xff] %vm1729_vm8, %v1666_v6  ;;  %1941 = vrot.lane.b32.xlu2 %v7871_v7, %s9757_s0  ;;  %v7888_v23 = vadd.f32 1.0, %v6132_v16 }
 0x213   : > { %v1534_v27 = vpop.permute.xlu0 %1533  ;;  %v7881_v59 = vadd.f32 %v7352_v34, %v2359_v8  ;;  %v7931_v44 = vadd.f32 %v761_v49, %v706_v36 }
 0x214   : > { %1613 = vst.msk [vmem:[#allocation2 + $0x88] sm:$0xff] %vm1595_vm7, %v1534_v27  ;;  %v2708_v47 = vand.u32 2147483648, %v7888_v23  ;;  %v2706_v60 = vand.u32 2147483647, %v7888_v23  ;;  %vm2702_vm14 = vweird.f32 %v7888_v23  ;;  %v1009_v27 = vrot.slane %v7907_v21, 1 }
 0x215   : > { %1747 = vst.msk [vmem:[#allocation2 + $0x88] sm:$0xff] %vm1729_vm8, %v1668_v19  ;;  %v1011_v62 = vrot.slane %v7931_v44, 1 }
 0x216   : > { %v2709_v19 = vor.u32 1.1754944e-38, %v2708_v47 }
 0x217   : > { %1408 = vrot.lane.b32.xlu0 %v7777_v38, %s9758_s1  ;;  %v1932_v15 = vpop.permute.xlu2 %1931  ;;  %v595_v38 = vmul.f32 2.0, %v487_v53 }
 0x218   : > { %1410 = vrot.lane.b32.xlu1 %v7782_v22, %s9758_s1  ;;  %v5756_v22 = vmul.f32 -1.442695, %v7881_v59 }
 0x219   : > { %v1799_v4 = vpop.permute.xlu1 %1798  ;;  %v5706_v32 = vadd.f32 -1.0, %v595_v38 }
 0x21a   : > { %1878 = vst.msk [vmem:[#allocation2 + $0x88] sm:$0xff] %vm9770_vm12, %v1799_v4  ;;  %6133 = vpow2.f32 %v5756_v22  ;;  %1067 = vrot.lane.b32.xlu2 %v7719_v11, %s9762_s13 }
 0x21b   : > { %v1797_v55 = vpop.permute.xlu0 %1796  ;;  %6135 = vrcp.f32 %v7888_v23  ;;  %v704_v14 = vmul.f32 %v5706_v32, %v6541_v9 }
 0x21c   : > { %1877 = vst.msk [vmem:[#allocation2 + $0x80] sm:$0xff] %vm9769_vm9, %v1797_v55  ;;  %vm2707_vm9 = vcmp.eq.f32.partialorder %v2706_v60, 8.507059e+37 }
 0x21d   : > { %2012 = vst.msk [vmem:[#allocation2 + $0x80] sm:$0xff] %vm1995_vm10, %v1932_v15  ;;  %v7909_v20 = vadd.f32 %v759_v33, %v704_v14  ;;  %v7956_v15 = vsel %vm942_vm1, %v1009_v27, %v1011_v62 }
 0x21f   : > { %1545 = vrot.lane.b32.xlu0 %v7871_v7, %s9756_s24  ;;  %v2068_v50 = vpop.permute.xlu2 %2067  ;;  %888 = vst.msk [vmem:[#allocation2 + $0xd0] sm:$0xff] %vm861_vm3, %v7909_v20  ;;  %v1008_v47 = vrot.slane %v7909_v20, 1 }
 0x220   : > { %1677 = vrot.lane.b32.xlu1 %v7837_v18, %s9761_s25  ;;  %v6134_v17 = vpop.eup %6133 }
 0x221   : > { %v2066_v42 = vpop.permute.xlu1 %2065  ;;  %v6136_v40 = vpop.eup %6135  ;;  %v7911_v10 = vadd.f32 1.0, %v6134_v17  ;;  %v490_v17 = vld [vmem:[%s6526_s14 + $0x150] sm:$0xff] }
 0x222   : > { %2146 = vst.msk [vmem:[#allocation2 + $0x80] sm:$0xff] %vm2129_vm11, %v2066_v42  ;;  %v2698_v11 = vmul.f32 %v6136_v40, %v7888_v23  ;;  %1279 = vrot.lane.b32.xlu2 %v7741_v48, %s9759_s29  ;;  %vm2703_vm13 = vweird.f32 %v6136_v40  ;;  %v1218_v48 = vrot.slane %v7909_v20, 2 }
 0x223   : > { %v1934_v39 = vpop.permute.xlu0 %1933  ;;  %6137 = vrcp.f32 %v7911_v10  ;;  %vm2704_vm15 = vmor %vm2702_vm14, %vm2703_vm13  ;;  %v2723_v16 = vand.u32 2147483648, %v7911_v10  ;;  %vm2717_vm13 = vweird.f32 %v7911_v10 }
 0x224   : > { %2013 = vst.msk [vmem:[#allocation2 + $0x88] sm:$0xff] %vm1995_vm10, %v1934_v39  ;;  %v2699_v52 = vsub.f32 1.0, %v2698_v11  ;;  %v7947_v35 = vsel %vm1152_vm0, %v1218_v48, %v1219_v2  ;;  %v491_v11 = vld [vmem:[%s6526_s14 + $0x158] sm:$0xff]  ;;  %v8010_v48 = vsel %vm942_vm1, %v1008_v47, %v1009_v27 }
 0x225   : > { %2147 = vst.msk [vmem:[#allocation2 + $0x88] sm:$0xff] %vm2129_vm11, %v2068_v50  ;;  %v2724_v14 = vor.u32 1.1754944e-38, %v2723_v16  ;;  %v599_v36 = vmul.f32 2.0, %v491_v11  ;;  %v3814_v11 = vld [vmem:[#allocation3 + $0x30] sm:$0xff] }
 0x226   : > { %v2700_v5 = vmul.f32 %v6136_v40, %v2699_v52  ;;  %v545_v52 = vld [vmem:[%s6531_s22 + $0x158] sm:$0xff] }
 0x227   : > { %1808 = vrot.lane.b32.xlu0 %v7909_v20, %s9755_s12  ;;  %v1270_v51 = vpop.permute.xlu2 %1269 }
 0x228   : > { %1810 = vrot.lane.b32.xlu1 %v7907_v21, %s9755_s12  ;;  %v2701_v63 = vadd.f32 %v6136_v40, %v2700_v5 }
 0x229   : > { %v2227_v54 = vld [vmem:[#allocation2 + $0x80] sm:$0xff]  ;;  %v6138_v6 = vpop.eup %6137 }
 0x22a   : > { %v1062_v61 = vpop.permute.xlu1 %1061  ;;  %v2705_v8 = vsel %vm2704_vm15, %v6136_v40, %v2701_v63  ;;  %v2713_v55 = vmul.f32 %v6138_v6, %v7911_v10  ;;  %1543 = vrot.lane.b32.xlu2 %v7814_v29, %s9756_s24  ;;  %vm2718_vm12 = vweird.f32 %v6138_v6  ;;  %v544_v40 = vld [vmem:[%s6531_s22 + $0x150] sm:$0xff] }
 0x22b   : > { %v1060_v30 = vpop.permute.xlu0 %1059  ;;  %1139 = vst.msk [vmem:[#allocation2 + $0x98] sm:$0xff] %vm1119_vm4, %v1062_v61  ;;  %v2361_v56 = vpop.f32.mrf.mxu1  ;;  %v2710_v53 = vsel %vm2707_vm9, %v2709_v19, %v2705_v8  ;;  %vm2719_vm14 = vmor %vm2717_vm13, %vm2718_vm12  ;;  %v5710_v61 = vadd.f32 -1.0, %v599_v36  ;;  %v492_v19 = vld [vmem:[%s6526_s14 + $0x160] sm:$0x3]  ;;  %vm9771_vm9 = vcmask 171152  }
 0x22c   : > { %1138 = vst.msk [vmem:[#allocation2 + $0x90] sm:$0xff] %vm1119_vm4, %v1060_v30  ;;  %v2228_v58 = vld [vmem:[#allocation2 + $0x88] sm:$0xff]  ;;  %v2362_v12 = vadd.f32 %v7852_v1, %v2361_v56  ;;  %v3065_v57 = vmul.f32 %v2710_v53, %v7862_v25  ;;  %v2714_v38 = vsub.f32 1.0, %v2713_v55  ;;  %v2721_v25 = vand.u32 2147483647, %v7911_v10  ;;  %vm9772_vm12 = vmmov %vm9771_vm9 }
 0x22d   : > { %1348 = vst.msk [vmem:[#allocation2 + $0x90] sm:$0xff] %vm1329_vm5, %v1270_v51  ;;  %v2251_v13 = vpack.c.bf16 %v2228_v58, %v2227_v54  ;;  %v598_v10 = vmul.f32 2.0, %v490_v17  ;;  %v762_v30 = vmul.f32 %v6536_v3, %v544_v40  ;;  %v3812_v51 = vld [vmem:[#allocation3 + $0x18] sm:$0xff]  ;;  %v763_v54 = vmul.f32 %v6536_v3, %v545_v52 }
 0x22e   : > { %v7950_v4 = vadd.f32 %v7352_v34, %v2362_v12  ;;  %3153 = vst.msk [vmem:[#allocation3 + $0x79] sm:$0xff] %vm828_vm2, %v3065_v57  ;;  %v2715_v23 = vmul.f32 %v6138_v6, %v2714_v38  ;;  %vm2722_vm15 = vcmp.eq.f32.partialorder %v2721_v25, 8.507059e+37  ;;  %v708_v58 = vmul.f32 %v5710_v61, %v6541_v9 }
 0x22f   : > { %5739 = vmatmul.msk.bf16.gmra.mxu1 %vm828_vm2, %v2251_v13  ;;  %1945 = vrot.lane.b32.xlu0 %v7956_v15, %s9757_s0  ;;  %v1403_v31 = vpop.permute.xlu2 %1402  ;;  %v5709_v5 = vadd.f32 -1.0, %v598_v10  ;;  %v600_v38 = vmul.f32 2.0, %v492_v19 }
 0x230   : > { %v5757_v22 = vmul.f32 -1.442695, %v7950_v4  ;;  %2077 = vrot.lane.b32.xlu1 %v7947_v35, %s9760_s15  ;;  %v2716_v32 = vadd.f32 %v6138_v6, %v2715_v23  ;;  %v8018_v12 = vadd.f32 %v763_v54, %v708_v58 }
 0x231   : > { %v707_v56 = vmul.f32 %v5709_v5, %v6541_v9 }
 0x232   : > { %6139 = vpow2.f32 %v5757_v22  ;;  %v1401_v24 = vpop.permute.xlu1 %1400  ;;  %v2720_v39 = vsel %vm2719_vm14, %v6138_v6, %v2716_v32  ;;  %1679 = vrot.lane.b32.xlu2 %v7834_v45, %s9761_s25  ;;  %891 = vst.msk [vmem:[#allocation2 + $0xe8] sm:$0xff] %vm861_vm3, %v8018_v12  ;;  %v546_v32 = vld [vmem:[%s6531_s22 + $0x160] sm:$0x3] }
 0x233   : > { %v1272_v46 = vpop.permute.xlu0 %1271  ;;  %1479 = vst.msk [vmem:[#allocation2 + $0x90] sm:$0xff] %vm1460_vm6, %v1401_v24  ;;  %v2363_v26 = vpop.f32.mrf.mxu1  ;;  %v2725_v42 = vsel %vm2722_vm15, %v2724_v14, %v2720_v39  ;;  %v8013_v6 = vadd.f32 %v762_v30, %v707_v56 }
 0x234   : > { %1349 = vst.msk [vmem:[#allocation2 + $0x98] sm:$0xff] %vm1329_vm5, %v1272_v46  ;;  %v2364_v33 = vadd.f32 %v7852_v1, %v2363_v26  ;;  %v3066_v37 = vmul.f32 %v2725_v42, %v7881_v59  ;;  %v5711_v46 = vadd.f32 -1.0, %v600_v38  ;;  %v764_v42 = vmul.f32 %v6536_v3, %v546_v32 }
 0x235   : > { %1480 = vst.msk [vmem:[#allocation2 + $0x98] sm:$0xff] %vm1460_vm6, %v1403_v31  ;;  %v3239_v62 = vld [vmem:[#allocation3 + $0x79] sm:$0xff]  ;;  %v1013_v5 = vrot.slane %v8013_v6, 1  ;;  %v1224_v38 = vrot.slane %v8018_v12, 2 }
 0x236   : > { %v7978_v50 = vadd.f32 %v7352_v34, %v2364_v33  ;;  %3154 = vst.msk [vmem:[#allocation3 + $0x81] sm:$0xff] %vm828_vm2, %v3066_v37  ;;  %v3815_v33 = vld [vmem:[#allocation3 + $0x38] sm:$0xff]  ;;  %v709_v39 = vmul.f32 %v5711_v46, %v6541_v9 }
 0x237   : > { %1071 = vrot.lane.b32.xlu0 %v7814_v29, %s9762_s13  ;;  %v3813_v29 = vld [vmem:[#allocation3 + $0x20] sm:$0xff]  ;;  %890 = vst.msk [vmem:[#allocation2 + $0xe0] sm:$0xff] %vm861_vm3, %v8013_v6  ;;  %v3845_v52 = vpack.c.bf16 %v3815_v33, %v3814_v11  ;;  %v493_v33 = vld [vmem:[%s6526_s14 + $0x168] sm:$0xff]  ;;  %v548_v11 = vld [vmem:[%s6531_s22 + $0x170] sm:$0xff] }
 0x238   : > { %v6140_v41 = vpop.eup %6139  ;;  %v5758_v43 = vmul.f32 -1.442695, %v7978_v50  ;;  %1073 = vrot.lane.b32.xlu1 %v7871_v7, %s9762_s13  ;;  %v1670_v7 = vpop.permute.xlu2 %1669  ;;  %v3844_v63 = vpack.c.bf16 %v3813_v29, %v3812_v51 }
 0x239   : > { %v7996_v59 = vadd.f32 1.0, %v6140_v41 }
 0x23a   : > { %6141 = vpow2.f32 %v5758_v43  ;;  %v1538_v60 = vpop.permute.xlu1 %1537  ;;  %1943 = vrot.lane.b32.xlu2 %v8010_v48, %s9757_s0 }
 0x23b   : > { %v1536_v49 = vpop.permute.xlu0 %1535  ;;  %6143 = vrcp.f32 %v7996_v59  ;;  %1615 = vst.msk [vmem:[#allocation2 + $0x98] sm:$0xff] %vm1595_vm7, %v1538_v60  ;;  %v2736_v31 = vand.u32 2147483647, %v7996_v59  ;;  %vm2732_vm14 = vweird.f32 %v7996_v59 }
 0x23c   : > { %1614 = vst.msk [vmem:[#allocation2 + $0x90] sm:$0xff] %vm1595_vm7, %v1536_v49 }
 0x23d   : > { %1748 = vst.msk [vmem:[#allocation2 + $0x90] sm:$0xff] %vm1729_vm8, %v1670_v7  ;;  %v3240_v8 = vld [vmem:[#allocation3 + $0x81] sm:$0xff] }
 0x23e   : > { %v3266_v53 = vpack.c.bf16 %v3240_v8, %v3239_v62  ;;  %v3817_v8 = vld [vmem:[#allocation3 + $0x50] sm:$0xff] }
 0x23f   : > { %5859 = vmatmul.msk.bf16.vlgmr.msrb.gmra.mxu1 %vm828_vm2, %v3844_v63  ;;  %1283 = vrot.lane.b32.xlu0 %v7834_v45, %s9759_s29  ;;  %v1221_v45 = vrot.slane %v7931_v44, 2  ;;  %v2738_v44 = vand.u32 2147483648, %v7996_v59 }
 0x240   : > { %v6142_v13 = vpop.eup %6141  ;;  %1412 = vrot.lane.b32.xlu1 %v7909_v20, %s9758_s1  ;;  %v1803_v22 = vpop.permute.xlu2 %1802  ;;  %5792 = vmatmul.msk.bf16.gmra.mxu0 %vm828_vm2, %v3266_v53 }
 0x241   : > { %v6144_v27 = vpop.eup %6143  ;;  %v8026_v55 = vadd.f32 1.0, %v6142_v13  ;;  %v8041_v25 = vsel %vm1152_vm0, %v1219_v2, %v1221_v45  ;;  %v2739_v0 = vor.u32 1.1754944e-38, %v2738_v44  ;;  %v3816_v45 = vld [vmem:[#allocation3 + $0x48] sm:$0xff] }
 0x242   : > { %v2728_v20 = vmul.f32 %v6144_v27, %v7996_v59  ;;  %v1801_v16 = vpop.permute.xlu1 %1800  ;;  %vm2733_vm13 = vweird.f32 %v6144_v27  ;;  %2079 = vrot.lane.b32.xlu2 %v8041_v25, %s9760_s15  ;;  %v818_v59 = vadd.f32 %v764_v42, %v709_v39  ;;  %v494_v39 = vld [vmem:[%s6526_s14 + $0x170] sm:$0xff] }
 0x243   : > { %v1672_v57 = vpop.permute.xlu0 %1671  ;;  %6145 = vrcp.f32 %v8026_v55  ;;  %1879 = vst.msk [vmem:[#allocation2 + $0x90] sm:$0xff] %vm9771_vm9, %v1801_v16  ;;  %vm2734_vm15 = vmor %vm2732_vm14, %vm2733_vm13  ;;  %vm2737_vm9 = vcmp.eq.f32.partialorder %v2736_v31, 8.507059e+37  ;;  %v2753_v36 = vand.u32 2147483648, %v8026_v55  ;;  %v2751_v29 = vand.u32 2147483647, %v8026_v55 }
 0x244   : > { %1749 = vst.msk [vmem:[#allocation2 + $0x98] sm:$0xff] %vm1729_vm8, %v1672_v57  ;;  %v2729_v23 = vsub.f32 1.0, %v2728_v20  ;;  %vm2747_vm13 = vweird.f32 %v8026_v55  ;;  %v1016_v30 = vrot.slane %v818_v59, 1  ;;  %v1226_v20 = vrot.slane %v818_v59, 2  ;;  %v3819_v59 = vld [vmem:[#allocation3 + $0x68] sm:$0xff] }
 0x245   : > { %1880 = vst.msk [vmem:[#allocation2 + $0x98] sm:$0xff] %vm9772_vm12, %v1803_v22  ;;  %v2754_v60 = vor.u32 1.1754944e-38, %v2753_v36  ;;  %v3846_v16 = vpack.c.bf16 %v3817_v8, %v3816_v45 }
 0x246   : > { %v2730_v24 = vmul.f32 %v6144_v27, %v2729_v23  ;;  %v8101_v22 = vsel %vm1152_vm0, %v1224_v38, %v1226_v20 }
 0x247   : > { %1547 = vrot.lane.b32.xlu0 %v8010_v48, %s9756_s24 }
 0x248   : > { %v2731_v26 = vadd.f32 %v6144_v27, %v2730_v24  ;;  %1549 = vrot.lane.b32.xlu1 %v7956_v15, %s9756_s24  ;;  %v2070_v40 = vpop.permute.xlu2 %2069 }
 0x249   : > { %v6146_v2 = vpop.eup %6145 }
 0x24a   : > { %v2735_v28 = vsel %vm2734_vm15, %v6144_v27, %v2731_v26  ;;  %v2743_v17 = vmul.f32 %v6146_v2, %v8026_v55  ;;  %v1938_v37 = vpop.permute.xlu1 %1937  ;;  %vm2748_vm12 = vweird.f32 %v6146_v2  ;;  %1281 = vrot.lane.b32.xlu2 %v7837_v18, %s9759_s29  ;;  %vm2752_vm15 = vcmp.eq.f32.partialorder %v2751_v29, 8.507059e+37  ;;  %v3580_v29 = vld [vmem:[#allocation3 + $0xa] sm:$0xff] }
 0x24b   : > { %v1936_v14 = vpop.permute.xlu0 %1935  ;;  %v2740_v10 = vsel %vm2737_vm9, %v2739_v0, %v2735_v28  ;;  %2015 = vst.msk [vmem:[#allocation2 + $0x98] sm:$0xff] %vm1995_vm10, %v1938_v37  ;;  %vm2749_vm14 = vmor %vm2747_vm13, %vm2748_vm12  ;;  %v547_v37 = vld [vmem:[%s6531_s22 + $0x168] sm:$0xff]  ;;  %vm9773_vm9 = vcmask 171152  }
 0x24c   : > { %2014 = vst.msk [vmem:[#allocation2 + $0x90] sm:$0xff] %vm1995_vm10, %v1936_v14  ;;  %v3067_v41 = vmul.f32 %v2740_v10, %v7950_v4  ;;  %v2744_v43 = vsub.f32 1.0, %v2743_v17  ;;  %v1014_v4 = vrot.slane %v8018_v12, 1  ;;  %v6003_v17 = vld [vmem:[%s9723_s9 + $0x20] sm:$0xff]  ;;  %vm9774_vm12 = vmmov %vm9773_vm9 }
 0x24d   : > { %2148 = vst.msk [vmem:[#allocation2 + $0x90] sm:$0xff] %vm2129_vm11, %v2070_v40  ;;  %v601_v40 = vmul.f32 2.0, %v493_v33 }
 0x24e   : > { %3155 = vst.msk [vmem:[#allocation3 + $0x91] sm:$0xff] %vm828_vm2, %v3067_v41  ;;  %v2745_v49 = vmul.f32 %v6146_v2, %v2744_v43  ;;  %v8077_v18 = vsel %vm942_vm1, %v1013_v5, %v1014_v4  ;;  %v8080_v58 = vsel %vm942_vm1, %v1014_v4, %v1016_v30  ;;  %v602_v41 = vmul.f32 2.0, %v494_v39  ;;  %v495_v39 = vld [vmem:[%s6526_s14 + $0x178] sm:$0x3] }
 0x24f   : > { %5860 = vmatmul.msk.bf16.gmra.mxu1 %vm828_vm2, %v3845_v52  ;;  %1683 = vrot.lane.b32.xlu0 %v8041_v25, %s9761_s25  ;;  %v5712_v43 = vadd.f32 -1.0, %v601_v40  ;;  %v765_v52 = vmul.f32 %v6536_v3, %v547_v37  ;;  %v1223_v4 = vrot.slane %v8013_v6, 2  ;;  %v603_v37 = vmul.f32 2.0, %v495_v39 }
 0x250   : > { %v2746_v47 = vadd.f32 %v6146_v2, %v2745_v49  ;;  %1812 = vrot.lane.b32.xlu1 %v8013_v6, %s9755_s12  ;;  %v1066_v54 = vpop.permute.xlu2 %1065  ;;  %v3579_v49 = vld [vmem:[#allocation3 + $0x2] sm:$0xff]  ;;  %v5713_v5 = vadd.f32 -1.0, %v602_v41 }
 0x251   : > { %1141 = vst.msk [vmem:[#allocation2 + $0xa8] sm:$0xff] %vm1119_vm4, %v1066_v54  ;;  %v5714_v41 = vadd.f32 -1.0, %v603_v37 }
 0x252   : > { %v2750_v61 = vsel %vm2749_vm14, %v6146_v2, %v2746_v47  ;;  %v1064_v51 = vpop.permute.xlu1 %1063  ;;  %1414 = vrot.lane.b32.xlu2 %v7907_v21, %s9758_s1 }
 0x253   : > { %v2072_v7 = vpop.permute.xlu0 %2071  ;;  %v2755_v63 = vsel %vm2752_vm15, %v2754_v60, %v2750_v61  ;;  %1140 = vst.msk [vmem:[#allocation2 + $0xa0] sm:$0xff] %vm1119_vm4, %v1064_v51  ;;  %v766_v60 = vmul.f32 %v6536_v3, %v548_v11  ;;  %v3611_v61 = vpack.c.bf16 %v3580_v29, %v3579_v49  ;;  %v711_v51 = vmul.f32 %v5713_v5, %v6541_v9 }
 0x254   : > { %2149 = vst.msk [vmem:[#allocation2 + $0x98] sm:$0xff] %vm2129_vm11, %v2072_v7  ;;  %v3068_v56 = vmul.f32 %v2755_v63, %v7978_v50  ;;  %v2229_v13 = vld [vmem:[#allocation2 + $0x90] sm:$0xff]  ;;  %v3818_v7 = vld [vmem:[#allocation3 + $0x60] sm:$0xff]  ;;  %v712_v49 = vmul.f32 %v5714_v41, %v6541_v9 }
 0x255   : > { %v3241_v23 = vld [vmem:[#allocation3 + $0x91] sm:$0xff]  ;;  %v3847_v30 = vpack.c.bf16 %v3819_v59, %v3818_v7 }
 0x256   : > { %3156 = vst.msk [vmem:[#allocation3 + $0x99] sm:$0xff] %vm828_vm2, %v3068_v56  ;;  %v8150_v56 = vsel %vm1152_vm0, %v1223_v4, %v1224_v38 }
 0x257   : > { %1947 = vrot.lane.b32.xlu0 %v8077_v18, %s9757_s0 }
 0x258   : > { %1949 = vrot.lane.b32.xlu1 %v8080_v58, %s9757_s0  ;;  %v1405_v53 = vpop.permute.xlu2 %1404 }
 0x25a   : > { %v1276_v27 = vpop.permute.xlu1 %1275  ;;  %1681 = vrot.lane.b32.xlu2 %v7947_v35, %s9761_s25 }
 0x25b   : > { %v1274_v50 = vpop.permute.xlu0 %1273  ;;  %v2366_v19 = vpop.f32.mrf.mxu1  ;;  %v2230_v62 = vld [vmem:[#allocation2 + $0x98] sm:$0xff]  ;;  %1351 = vst.msk [vmem:[#allocation2 + $0xa8] sm:$0xff] %vm1329_vm5, %v1276_v27 }
 0x25c   : > { %1350 = vst.msk [vmem:[#allocation2 + $0xa0] sm:$0xff] %vm1329_vm5, %v1274_v50  ;;  %v2367_v55 = vadd.f32 %v7852_v1, %v2366_v19  ;;  %v2252_v57 = vpack.c.bf16 %v2230_v62, %v2229_v13  ;;  %v8152_v50 = vadd.f32 %v766_v60, %v711_v51 }
 0x25d   : > { %1481 = vst.msk [vmem:[#allocation2 + $0xa0] sm:$0xff] %vm1460_vm6, %v1405_v53  ;;  %v3242_v44 = vld [vmem:[#allocation3 + $0x99] sm:$0xff] }
 0x25e   : > { %v8094_v21 = vadd.f32 %v7352_v34, %v2367_v55  ;;  %5740 = vmatmul.msk.bf16.vlgmr.msra.gmra.mxu3 %vm828_vm2, %v2252_v57  ;;  %v3267_v24 = vpack.c.bf16 %v3242_v44, %v3241_v23  ;;  %893 = vst.msk [vmem:[#allocation2 + $0xf8] sm:$0xff] %vm861_vm3, %v8152_v50 }
 0x25f   : > { %5861 = vmatmul.msk.bf16.gmra.mxu1 %vm828_vm2, %v3846_v16  ;;  %2083 = vrot.lane.b32.xlu0 %v8101_v22, %s9760_s15 }
 0x260   : > { %v5759_v46 = vmul.f32 -1.442695, %v8094_v21  ;;  %1075 = vrot.lane.b32.xlu1 %v8010_v48, %s9762_s13  ;;  %5793 = vmatmul.msk.bf16.gmra.mxu0 %vm828_vm2, %v3267_v24  ;;  %v1542_v0 = vpop.permute.xlu2 %1541  ;;  %v6004_v48 = vld [vmem:[%s9723_s9 + $0x28] sm:$0xff] }
 0x261   : > { %3697 = vmatpush.bf16.msra.mxu0 %v6004_v48 }
 0x262   : > { %6147 = vpow2.f32 %v5759_v46  ;;  %v1540_v26 = vpop.permute.xlu1 %1539  ;;  %1814 = vrot.lane.b32.xlu2 %v8018_v12, %s9755_s12 }
 0x263   : > { %v1407_v31 = vpop.permute.xlu0 %1406  ;;  %v2368_v32 = vpop.f32.mrf.mxu1  ;;  %1616 = vst.msk [vmem:[#allocation2 + $0xa0] sm:$0xff] %vm1595_vm7, %v1540_v26  ;;  %v1019_v26 = vrot.slane %v8152_v50, 1 }
 0x264   : > { %1482 = vst.msk [vmem:[#allocation2 + $0xa8] sm:$0xff] %vm1460_vm6, %v1407_v31  ;;  %v2369_v2 = vadd.f32 %v7852_v1, %v2368_v32  ;;  %v3821_v31 = vld [vmem:[#allocation3 + $0x80] sm:$0xff] }
 0x265   : > { %1617 = vst.msk [vmem:[#allocation2 + $0xa8] sm:$0xff] %vm1595_vm7, %v1542_v0  ;;  %3698 = vmatpush.bf16.msra.mxu0 %v6003_v17  ;;  %v3582_v17 = vld [vmem:[#allocation3 + $0x22] sm:$0xff] }
 0x266   : > { %v8116_v14 = vadd.f32 %v7352_v34, %v2369_v2 }
 0x267   : > { %1285 = vrot.lane.b32.xlu0 %v7947_v35, %s9759_s29 }
 0x268   : > { %v6148_v42 = vpop.eup %6147  ;;  %v5760_v28 = vmul.f32 -1.442695, %v8116_v14  ;;  %1287 = vrot.lane.b32.xlu1 %v8041_v25, %s9759_s29  ;;  %v1805_v35 = vpop.permute.xlu2 %1804  ;;  %v710_v25 = vmul.f32 %v5712_v43, %v6541_v9 }
 0x269   : > { %v2557_v10 = vadd.f32 1.0, %v6148_v42 }
 0x26a   : > { %6149 = vpow2.f32 %v5760_v28  ;;  %v1676_v47 = vpop.permute.xlu1 %1675  ;;  %v8144_v54 = vadd.f32 %v765_v52, %v710_v25  ;;  %2081 = vrot.lane.b32.xlu2 %v8150_v56, %s9760_s15  ;;  %v3820_v28 = vld [vmem:[#allocation3 + $0x78] sm:$0xff] }
 0x26b   : > { %6151 = vrcp.f32 %v2557_v10  ;;  %v1674_v36 = vpop.permute.xlu0 %1673  ;;  %1751 = vst.msk [vmem:[#allocation2 + $0xa8] sm:$0xff] %vm1729_vm8, %v1676_v47  ;;  %v2768_v53 = vand.u32 2147483648, %v2557_v10  ;;  %v2766_v45 = vand.u32 2147483647, %v2557_v10  ;;  %vm2762_vm14 = vweird.f32 %v2557_v10 }
 0x26c   : > { %1750 = vst.msk [vmem:[#allocation2 + $0xa0] sm:$0xff] %vm1729_vm8, %v1674_v36  ;;  %v1018_v32 = vrot.slane %v8144_v54, 1  ;;  %v549_v36 = vld [vmem:[%s6531_s22 + $0x178] sm:$0x3] }
 0x26d   : > { %1881 = vst.msk [vmem:[#allocation2 + $0xa0] sm:$0xff] %vm9773_vm9, %v1805_v35  ;;  %v2769_v16 = vor.u32 1.1754944e-38, %v2768_v53  ;;  %vm2767_vm9 = vcmp.eq.f32.partialorder %v2766_v45, 8.507059e+37  ;;  %v767_v29 = vmul.f32 %v6536_v3, %v549_v36  ;;  %v3823_v53 = vld [vmem:[#allocation3 + $0x98] sm:$0xff] }
 0x26e   : > { %892 = vst.msk [vmem:[#allocation2 + $0xf0] sm:$0xff] %vm861_vm3, %v8144_v54  ;;  %v8191_v11 = vsel %vm942_vm1, %v1018_v32, %v1019_v26 }
 0x26f   : > { %5862 = vmatmul.msk.bf16.gmra.mxu1 %vm828_vm2, %v3847_v30  ;;  %1418 = vrot.lane.b32.xlu0 %v8018_v12, %s9758_s1  ;;  %v8205_v25 = vadd.f32 %v767_v29, %v712_v49  ;;  %v3586_v29 = vld [vmem:[#allocation3 + $0x52] sm:$0xff] }
 0x270   : > { %v6150_v63 = vpop.eup %6149  ;;  %1551 = vrot.lane.b32.xlu1 %v8077_v18, %s9756_s24  ;;  %5835 = vmatmul.msk.bf16.vlgmr.msra.gmra.mxu0 %vm828_vm2, %v3611_v61  ;;  %v1942_v12 = vpop.permute.xlu2 %1941 }
 0x271   : > { %v6152_v19 = vpop.eup %6151  ;;  %v8156_v13 = vadd.f32 1.0, %v6150_v63 }
 0x272   : > { %v2758_v62 = vmul.f32 %v6152_v19, %v2557_v10  ;;  %v1940_v55 = vpop.permute.xlu1 %1939  ;;  %vm2763_vm13 = vweird.f32 %v6152_v19  ;;  %1077 = vrot.lane.b32.xlu2 %v7956_v15, %s9762_s13  ;;  %v3581_v15 = vld [vmem:[#allocation3 + $0x1a] sm:$0xff]  ;;  %v3848_v10 = vpack.c.bf16 %v3821_v31, %v3820_v28  ;;  %v1021_v28 = vrot.slane %v8205_v25, 1 }
 0x273   : > { %6153 = vrcp.f32 %v8156_v13  ;;  %v1807_v8 = vpop.permute.xlu0 %1806  ;;  %2016 = vst.msk [vmem:[#allocation2 + $0xa0] sm:$0xff] %vm1995_vm10, %v1940_v55  ;;  %vm2764_vm15 = vmor %vm2762_vm14, %vm2763_vm13  ;;  %v2783_v42 = vand.u32 2147483648, %v8156_v13  ;;  %vm2777_vm13 = vweird.f32 %v8156_v13  ;;  %v3612_v52 = vpack.c.bf16 %v3582_v17, %v3581_v15  ;;  %v496_v15 = vld [vmem:[%s6526_s14 + $0x180] sm:$0xff]  ;;  %v497_v17 = vld [vmem:[%s6526_s14 + $0x188] sm:$0xff] }
 0x274   : > { %v2759_v27 = vsub.f32 1.0, %v2758_v62  ;;  %1882 = vst.msk [vmem:[#allocation2 + $0xa8] sm:$0xff] %vm9774_vm12, %v1807_v8  ;;  %v1228_v62 = vrot.slane %v8144_v54, 2  ;;  %v605_v41 = vmul.f32 2.0, %v497_v17 }
 0x275   : > { %2017 = vst.msk [vmem:[#allocation2 + $0xa8] sm:$0xff] %vm1995_vm10, %v1942_v12  ;;  %v2784_v59 = vor.u32 1.1754944e-38, %v2783_v42 }
 0x276   : > { %v2760_v57 = vmul.f32 %v6152_v19, %v2759_v27 }
 0x277   : > { %1685 = vrot.lane.b32.xlu0 %v8150_v56, %s9761_s25 }
 0x278   : > { %v2761_v38 = vadd.f32 %v6152_v19, %v2760_v57  ;;  %1687 = vrot.lane.b32.xlu1 %v8101_v22, %s9761_s25  ;;  %v1068_v33 = vpop.permute.xlu2 %1067 }
 0x279   : > { %v6154_v20 = vpop.eup %6153  ;;  %1142 = vst.msk [vmem:[#allocation2 + $0xb0] sm:$0xff] %vm1119_vm4, %v1068_v33 }
 0x27a   : > { %v2765_v23 = vsel %vm2764_vm15, %v6152_v19, %v2761_v38  ;;  %v2773_v44 = vmul.f32 %v6154_v20, %v8156_v13  ;;  %v2076_v48 = vpop.permute.xlu1 %2075  ;;  %vm2778_vm12 = vweird.f32 %v6154_v20  ;;  %1416 = vrot.lane.b32.xlu2 %v8013_v6, %s9758_s1  ;;  %v1231_v6 = vrot.slane %v8205_v25, 2  ;;  %v3583_v38 = vld [vmem:[#allocation3 + $0x32] sm:$0xff] }
 0x27b   : > { %v2770_v46 = vsel %vm2767_vm9, %v2769_v16, %v2765_v23  ;;  %v2074_v24 = vpop.permute.xlu0 %2073  ;;  %2151 = vst.msk [vmem:[#allocation2 + $0xa8] sm:$0xff] %vm2129_vm11, %v2076_v48  ;;  %vm2779_vm14 = vmor %vm2777_vm13, %vm2778_vm12  ;;  %vm9775_vm9 = vcmask 171152   ;;  %v5716_v25 = vadd.f32 -1.0, %v605_v41 }
 0x27c   : > { %v3069_v2 = vmul.f32 %v2770_v46, %v8094_v21  ;;  %v2774_v0 = vsub.f32 1.0, %v2773_v44  ;;  %2150 = vst.msk [vmem:[#allocation2 + $0xa0] sm:$0xff] %vm2129_vm11, %v2074_v24  ;;  %v2781_v21 = vand.u32 2147483647, %v8156_v13  ;;  %v1229_v13 = vrot.slane %v8152_v50, 2  ;;  %v3822_v44 = vld [vmem:[#allocation3 + $0x90] sm:$0xff]  ;;  %vm9776_vm12 = vmmov %vm9775_vm9 }
 0x27d   : > { %v3849_v31 = vpack.c.bf16 %v3823_v53, %v3822_v44 }
 0x27e   : > { %3157 = vst.msk [vmem:[#allocation3 + $0xa9] sm:$0xff] %vm828_vm2, %v3069_v2  ;;  %v2775_v40 = vmul.f32 %v6154_v20, %v2774_v0  ;;  %vm2782_vm15 = vcmp.eq.f32.partialorder %v2781_v21, 8.507059e+37  ;;  %v8221_v8 = vsel %vm1152_vm0, %v1229_v13, %v1231_v6  ;;  %v8224_v27 = vsel %vm1152_vm0, %v1228_v62, %v1229_v13 }
 0x27f   : > { %5863 = vmatmul.msk.bf16.gmra.mxu1 %vm828_vm2, %v3848_v10  ;;  %1818 = vrot.lane.b32.xlu0 %v8152_v50, %s9755_s12  ;;  %v714_v62 = vmul.f32 %v5716_v25, %v6541_v9 }
 0x280   : > { %v2776_v43 = vadd.f32 %v6154_v20, %v2775_v40  ;;  %1951 = vrot.lane.b32.xlu1 %v8191_v11, %s9757_s0  ;;  %5836 = vmatmul.msk.bf16.gmra.mxu0 %vm828_vm2, %v3612_v52  ;;  %v1280_v63 = vpop.permute.xlu2 %1279  ;;  %v604_v40 = vmul.f32 2.0, %v496_v15 }
 0x282   : > { %v2780_v47 = vsel %vm2779_vm14, %v6154_v20, %v2776_v43  ;;  %v1278_v7 = vpop.permute.xlu1 %1277  ;;  %v2232_v61 = vld [vmem:[#allocation2 + $0xa8] sm:$0xff]  ;;  %1553 = vrot.lane.b32.xlu2 %v8080_v58, %s9756_s24  ;;  %v3584_v20 = vld [vmem:[#allocation3 + $0x3a] sm:$0xff] }
 0x283   : > { %v2785_v35 = vsel %vm2782_vm15, %v2784_v59, %v2780_v47  ;;  %v1070_v4 = vpop.permute.xlu0 %1069  ;;  %v2231_v5 = vld [vmem:[#allocation2 + $0xa0] sm:$0xff]  ;;  %v2371_v30 = vpop.f32.mrf.mxu1  ;;  %1352 = vst.msk [vmem:[#allocation2 + $0xb0] sm:$0xff] %vm1329_vm5, %v1278_v7  ;;  %v3613_v0 = vpack.c.bf16 %v3584_v20, %v3583_v38  ;;  %v5715_v47 = vadd.f32 -1.0, %v604_v40  ;;  %v498_v20 = vld [vmem:[%s6526_s14 + $0x190] sm:$0x3] }
 0x284   : > { %v3070_v60 = vmul.f32 %v2785_v35, %v8116_v14  ;;  %1143 = vst.msk [vmem:[#allocation2 + $0xb8] sm:$0xff] %vm1119_vm4, %v1070_v4  ;;  %v2372_v51 = vadd.f32 %v7852_v1, %v2371_v30  ;;  %v2253_v19 = vpack.c.bf16 %v2232_v61, %v2231_v5  ;;  %v550_v5 = vld [vmem:[%s6531_s22 + $0x180] sm:$0xff]  ;;  %v551_v30 = vld [vmem:[%s6531_s22 + $0x188] sm:$0xff] }
 0x285   : > { %1353 = vst.msk [vmem:[#allocation2 + $0xb8] sm:$0xff] %vm1329_vm5, %v1280_v63  ;;  %v3243_v46 = vld [vmem:[#allocation3 + $0xa9] sm:$0xff]  ;;  %v713_v63 = vmul.f32 %v5715_v47, %v6541_v9 }
 0x286   : > { %3158 = vst.msk [vmem:[#allocation3 + $0xb1] sm:$0xff] %vm828_vm2, %v3070_v60  ;;  %v8216_v14 = vadd.f32 %v7352_v34, %v2372_v51  ;;  %5741 = vmatmul.msk.bf16.gmra.mxu3 %vm828_vm2, %v2253_v19  ;;  %v3824_v49 = vld [vmem:[#allocation3 + $0xa8] sm:$0xff]  ;;  %v768_v19 = vmul.f32 %v6536_v3, %v550_v5 }
 0x287   : > { %2085 = vrot.lane.b32.xlu0 %v8224_v27, %s9760_s15 }
 0x288   : > { %v5761_v55 = vmul.f32 -1.442695, %v8216_v14  ;;  %2087 = vrot.lane.b32.xlu1 %v8221_v8, %s9760_s15  ;;  %v1544_v23 = vpop.permute.xlu2 %1543 }
 0x28a   : > { %6155 = vpow2.f32 %v5761_v55  ;;  %v1411_v57 = vpop.permute.xlu1 %1410  ;;  %1816 = vrot.lane.b32.xlu2 %v8144_v54, %s9755_s12  ;;  %v769_v55 = vmul.f32 %v6536_v3, %v551_v30 }
 0x28b   : > { %v1409_v12 = vpop.permute.xlu0 %1408  ;;  %v2373_v45 = vpop.f32.mrf.mxu1  ;;  %1484 = vst.msk [vmem:[#allocation2 + $0xb8] sm:$0xff] %vm1460_vm6, %v1411_v57 }
 0x28c   : > { %1483 = vst.msk [vmem:[#allocation2 + $0xb0] sm:$0xff] %vm1460_vm6, %v1409_v12  ;;  %v2374_v16 = vadd.f32 %v7852_v1, %v2373_v45 }
 0x28d   : > { %v3244_v24 = vld [vmem:[#allocation3 + $0xb1] sm:$0xff]  ;;  %1618 = vst.msk [vmem:[#allocation2 + $0xb0] sm:$0xff] %vm1595_vm7, %v1544_v23 }
 0x28e   : > { %v3268_v32 = vpack.c.bf16 %v3244_v24, %v3243_v46  ;;  %v8238_v2 = vadd.f32 %v7352_v34, %v2374_v16  ;;  %v8292_v46 = vadd.f32 %v768_v19, %v713_v63  ;;  %v606_v24 = vmul.f32 2.0, %v498_v20 }
 0x28f   : > { %5864 = vmatmul.msk.bf16.gmra.mxu1 %vm828_vm2, %v3849_v31  ;;  %1081 = vrot.lane.b32.xlu0 %v8080_v58, %s9762_s13 }
 0x290   : > { %5794 = vmatmul.msk.bf16.vlgmr.msra.gmra.mxu2 %vm828_vm2, %v3268_v32  ;;  %v6156_v48 = vpop.eup %6155  ;;  %v5762_v1 = vmul.f32 -1.442695, %v8238_v2  ;;  %5837 = vmatmul.msk.bf16.gmra.mxu0 %vm828_vm2, %v3613_v0  ;;  %v1680_v58 = vpop.permute.xlu2 %1679 }
 0x291   : > { %v2559_v33 = vadd.f32 1.0, %v6156_v48  ;;  %1289 = vrot.lane.b32.xlu1 %v8150_v56, %s9759_s29  ;;  %v8259_v56 = vsel %vm942_vm1, %v1019_v26, %v1021_v28  ;;  %v3825_v26 = vld [vmem:[#allocation3 + $0xb0] sm:$0xff] }
 0x292   : > { %6157 = vpow2.f32 %v5762_v1  ;;  %v1678_v42 = vpop.permute.xlu1 %1677  ;;  %1953 = vrot.lane.b32.xlu2 %v8259_v56, %s9757_s0  ;;  %v3850_v4 = vpack.c.bf16 %v3825_v26, %v3824_v49  ;;  %v552_v48 = vld [vmem:[%s6531_s22 + $0x190] sm:$0x3]  ;;  %v1628_v49 = vrot.slane %v8292_v46, 2 }
 0x293   : > { %v1546_v39 = vpop.permute.xlu0 %1545  ;;  %6159 = vrcp.f32 %v2559_v33  ;;  %1752 = vst.msk [vmem:[#allocation2 + $0xb0] sm:$0xff] %vm1729_vm8, %v1678_v42  ;;  %v2798_v35 = vand.u32 2147483648, %v2559_v33  ;;  %v2796_v7 = vand.u32 2147483647, %v2559_v33  ;;  %vm2792_vm14 = vweird.f32 %v2559_v33 }
 0x294   : > { %1619 = vst.msk [vmem:[#allocation2 + $0xb8] sm:$0xff] %vm1595_vm7, %v1546_v39  ;;  %v770_v39 = vmul.f32 %v6536_v3, %v552_v48 }
 0x295   : > { %1753 = vst.msk [vmem:[#allocation2 + $0xb8] sm:$0xff] %vm1729_vm8, %v1680_v58  ;;  %v2799_v6 = vor.u32 1.1754944e-38, %v2798_v35 }
 0x297   : > { %1420 = vrot.lane.b32.xlu0 %v8144_v54, %s9758_s1 }
 0x298   : > { %v6158_v37 = vpop.eup %6157  ;;  %v1944_v59 = vpop.permute.xlu2 %1943 }
 0x299   : > { %v6160_v21 = vpop.eup %6159  ;;  %v8263_v10 = vadd.f32 1.0, %v6158_v37  ;;  %1422 = vrot.lane.b32.xlu1 %v8152_v50, %s9758_s1  ;;  %v3585_v50 = vld [vmem:[#allocation3 + $0x4a] sm:$0xff] }
 0x29a   : > { %v2788_v43 = vmul.f32 %v6160_v21, %v2559_v33  ;;  %v1811_v36 = vpop.permute.xlu1 %1810  ;;  %vm2793_vm13 = vweird.f32 %v6160_v21  ;;  %v3614_v61 = vpack.c.bf16 %v3586_v29, %v3585_v50  ;;  %1079 = vrot.lane.b32.xlu2 %v8077_v18, %s9762_s13  ;;  %v8296_v18 = vadd.f32 %v769_v55, %v714_v62  ;;  %v8326_v29 = vpop.f32.mrf.mxu0 }
 0x29b   : > { %v1809_v52 = vpop.permute.xlu0 %1808  ;;  %6161 = vrcp.f32 %v8263_v10  ;;  %1884 = vst.msk [vmem:[#allocation2 + $0xb8] sm:$0xff] %vm9776_vm12, %v1811_v36  ;;  %vm2794_vm15 = vmor %vm2792_vm14, %vm2793_vm13  ;;  %v2813_v31 = vand.u32 2147483648, %v8263_v10  ;;  %v2811_v0 = vand.u32 2147483647, %v8263_v10  ;;  %vm2807_vm13 = vweird.f32 %v8263_v10  ;;  %v3588_v36 = vld [vmem:[#allocation3 + $0x6a] sm:$0xff] }
 0x29c   : > { %1883 = vst.msk [vmem:[#allocation2 + $0xb0] sm:$0xff] %vm9775_vm9, %v1809_v52  ;;  %v2789_v54 = vsub.f32 1.0, %v2788_v43  ;;  %vm2797_vm9 = vcmp.eq.f32.partialorder %v2796_v7, 8.507059e+37  ;;  %v1495_v52 = vrot.slane %v8296_v18, 1  ;;  %v1629_v50 = vrot.slane %v8296_v18, 2 }
 0x29d   : > { %2018 = vst.msk [vmem:[#allocation2 + $0xb0] sm:$0xff] %vm1995_vm10, %v1944_v59  ;;  %v2814_v42 = vor.u32 1.1754944e-38, %v2813_v31 }
 0x29e   : > { %v2790_v60 = vmul.f32 %v6160_v21, %v2789_v54  ;;  %v8321_v54 = vld [vmem:[%s9722_s8] ss:$0 sm:$0xff]  ;;  %v8339_v5 = vsel %vm1152_vm0, %v1628_v49, %v1629_v50 }
 0x29f   : > { %5865 = vmatmul.msk.bf16.gmra.mxu1 %vm828_vm2, %v3850_v4  ;;  %1557 = vrot.lane.b32.xlu0 %v8259_v56, %s9756_s24 }
 0x2a0   : > { %v2791_v51 = vadd.f32 %v6160_v21, %v2790_v60  ;;  %5838 = vmatmul.msk.bf16.gmra.mxu0 %vm828_vm2, %v3614_v61  ;;  %v2080_v44 = vpop.permute.xlu2 %2079 }
 0x2a1   : > { %v6162_v13 = vpop.eup %6161  ;;  %1689 = vrot.lane.b32.xlu1 %v8224_v27, %s9761_s25 }
 0x2a2   : > { %v2795_v12 = vsel %vm2794_vm15, %v6160_v21, %v2791_v51  ;;  %v2803_v53 = vmul.f32 %v6162_v13, %v8263_v10  ;;  %v2078_v38 = vpop.permute.xlu1 %2077  ;;  %vm2808_vm12 = vweird.f32 %v6162_v13  ;;  %vm2812_vm15 = vcmp.eq.f32.partialorder %v2811_v0, 8.507059e+37  ;;  %1291 = vrot.lane.b32.xlu2 %v8101_v22, %s9759_s29  ;;  %v3587_v22 = vld [vmem:[#allocation3 + $0x62] sm:$0xff] }
 0x2a3   : > { %v1946_v57 = vpop.permute.xlu0 %1945  ;;  %v2800_v45 = vsel %vm2797_vm9, %v2799_v6, %v2795_v12  ;;  %2152 = vst.msk [vmem:[#allocation2 + $0xb0] sm:$0xff] %vm2129_vm11, %v2078_v38  ;;  %vm2809_vm14 = vmor %vm2807_vm13, %vm2808_vm12  ;;  %v3615_v4 = vpack.c.bf16 %v3588_v36, %v3587_v22  ;;  %v500_v0 = vld [vmem:[%s6526_s14 + $0x1a0] sm:$0xff]  ;;  %vm9777_vm9 = vcmask 171152  }
 0x2a4   : > { %2019 = vst.msk [vmem:[#allocation2 + $0xb8] sm:$0xff] %vm1995_vm10, %v1946_v57  ;;  %v3071_v16 = vmul.f32 %v2800_v45, %v8216_v14  ;;  %v2804_v23 = vsub.f32 1.0, %v2803_v53  ;;  %v5717_v14 = vadd.f32 -1.0, %v606_v24  ;;  %v8356_v53 = vpop.f32.mrf.mxu0  ;;  %vm9778_vm12 = vmmov %vm9777_vm9 }
 0x2a5   : > { %2153 = vst.msk [vmem:[#allocation2 + $0xb8] sm:$0xff] %vm2129_vm11, %v2080_v44  ;;  %v3589_v44 = vld [vmem:[#allocation3 + $0x7a] sm:$0xff] }
 0x2a6   : > { %3159 = vst.msk [vmem:[#allocation3 + $0xc1] sm:$0xff] %vm828_vm2, %v3071_v16  ;;  %v2805_v32 = vmul.f32 %v6162_v13, %v2804_v23  ;;  %v715_v33 = vmul.f32 %v5717_v14, %v6541_v9  ;;  %v1494_v23 = vrot.slane %v8292_v46, 1  ;;  %v501_v14 = vld [vmem:[%s6526_s14 + $0x1a8] sm:$0x3] }
 0x2a7   : > { %1820 = vrot.lane.b32.xlu0 %v8292_v46, %s9755_s12 }
 0x2a8   : > { %v2806_v1 = vadd.f32 %v6162_v13, %v2805_v32  ;;  %v8310_v15 = vadd.f32 %v770_v39, %v715_v33  ;;  %v1282_v10 = vpop.permute.xlu2 %1281  ;;  %v1496_v31 = vsel %vm942_vm1, %v1494_v23, %v1495_v52  ;;  %v499_v32 = vld [vmem:[%s6526_s14 + $0x198] sm:$0xff] }
 0x2a9   : > { %1822 = vrot.lane.b32.xlu1 %v8296_v18, %s9755_s12 }
 0x2aa   : > { %v2810_v28 = vsel %vm2809_vm14, %v6162_v13, %v2806_v1  ;;  %v1074_v37 = vpop.permute.xlu1 %1073  ;;  %v2233_v40 = vld [vmem:[#allocation2 + $0xb0] sm:$0xff]  ;;  %v1497_v26 = vrot.slane %v8310_v15, 1  ;;  %1555 = vrot.lane.b32.xlu2 %v8191_v11, %s9756_s24 }
 0x2ab   : > { %v1072_v58 = vpop.permute.xlu0 %1071  ;;  %v2815_v17 = vsel %vm2812_vm15, %v2814_v42, %v2810_v28  ;;  %1145 = vst.msk [vmem:[#allocation2 + $0xc8] sm:$0xff] %vm1119_vm4, %v1074_v37  ;;  %v607_v28 = vmul.f32 2.0, %v499_v32 }
 0x2ac   : > { %1144 = vst.msk [vmem:[#allocation2 + $0xc0] sm:$0xff] %vm1119_vm4, %v1072_v58  ;;  %v3072_v21 = vmul.f32 %v2815_v17, %v8238_v2  ;;  %v2376_v41 = vpop.f32.mrf.mxu1  ;;  %v2234_v43 = vld [vmem:[#allocation2 + $0xb8] sm:$0xff]  ;;  %v8330_v47 = vsel %vm942_vm1, %v1495_v52, %v1497_v26  ;;  %v8378_v33 = vpop.f32.mrf.mxu0  ;;  %v608_v58 = vmul.f32 2.0, %v500_v0  ;;  %v554_v26 = vld [vmem:[%s6531_s22 + $0x1a0] sm:$0xff] }
 0x2ad   : > { %1354 = vst.msk [vmem:[#allocation2 + $0xc0] sm:$0xff] %vm1329_vm5, %v1282_v10  ;;  %v2377_v2 = vadd.f32 %v8321_v54, %v2376_v41  ;;  %v2254_v59 = vpack.c.bf16 %v2234_v43, %v2233_v40  ;;  %v3245_v51 = vld [vmem:[#allocation3 + $0xc1] sm:$0xff]  ;;  %v609_v40 = vmul.f32 2.0, %v501_v14  ;;  %v5718_v52 = vadd.f32 -1.0, %v607_v28 }
 0x2ae   : > { %3160 = vst.msk [vmem:[#allocation3 + $0xc9] sm:$0xff] %vm828_vm2, %v3072_v21  ;;  %v3826_v13 = vld [vmem:[#allocation3 + $0xc0] sm:$0xff]  ;;  %v5719_v22 = vadd.f32 -1.0, %v608_v58 }
 0x2af   : > { %v8333_v35 = vadd.f32 %v7352_v34, %v2377_v2  ;;  %5742 = vmatmul.msk.bf16.gmra.mxu3 %vm828_vm2, %v2254_v59  ;;  %1957 = vrot.lane.b32.xlu0 %v8330_v47, %s9757_s0  ;;  %v5720_v2 = vadd.f32 -1.0, %v609_v40  ;;  %v555_v59 = vld [vmem:[%s6531_s22 + $0x1a8] sm:$0x3] }
 0x2b0   : > { %5839 = vmatmul.msk.bf16.gmra.mxu0 %vm828_vm2, %v3615_v4  ;;  %v1415_v30 = vpop.permute.xlu2 %1414 }
 0x2b1   : > { %v5763_v25 = vmul.f32 -1.442695, %v8333_v35  ;;  %2089 = vrot.lane.b32.xlu1 %v8339_v5, %s9760_s15 }
 0x2b2   : > { %v1413_v7 = vpop.permute.xlu1 %1412  ;;  %1691 = vrot.lane.b32.xlu2 %v8221_v8, %s9761_s25 }
 0x2b3   : > { %v1284_v60 = vpop.permute.xlu0 %1283  ;;  %6163 = vpow2.f32 %v5763_v25  ;;  %1485 = vst.msk [vmem:[#allocation2 + $0xc0] sm:$0xff] %vm1460_vm6, %v1413_v7  ;;  %v772_v25 = vmul.f32 %v6536_v3, %v554_v26 }
 0x2b4   : > { %1355 = vst.msk [vmem:[#allocation2 + $0xc8] sm:$0xff] %vm1329_vm5, %v1284_v60  ;;  %v2378_v61 = vpop.f32.mrf.mxu1 }
 0x2b5   : > { %1486 = vst.msk [vmem:[#allocation2 + $0xc8] sm:$0xff] %vm1460_vm6, %v1415_v30  ;;  %v2379_v63 = vadd.f32 %v8321_v54, %v2378_v61  ;;  %v3246_v19 = vld [vmem:[#allocation3 + $0xc9] sm:$0xff] }
 0x2b6   : > { %v3827_v6 = vld [vmem:[#allocation3 + $0xc8] sm:$0xff]  ;;  %v3269_v62 = vpack.c.bf16 %v3246_v19, %v3245_v51  ;;  %v716_v51 = vmul.f32 %v5718_v52, %v6541_v9 }
 0x2b7   : > { %v3851_v55 = vpack.c.bf16 %v3827_v6, %v3826_v13  ;;  %v8354_v12 = vadd.f32 %v7352_v34, %v2379_v63  ;;  %1083 = vrot.lane.b32.xlu0 %v8191_v11, %s9762_s13  ;;  %v717_v63 = vmul.f32 %v5719_v22, %v6541_v9  ;;  %v3593_v22 = vld [vmem:[#allocation3 + $0xaa] sm:$0xff] }
 0x2b8   : > { %5795 = vmatmul.msk.bf16.gmra.mxu2 %vm828_vm2, %v3269_v62  ;;  %v1682_v11 = vpop.permute.xlu2 %1681  ;;  %v3591_v62 = vld [vmem:[#allocation3 + $0x92] sm:$0xff] }
 0x2b9   : > { %5866 = vmatmul.msk.bf16.gmra.mxu1 %vm828_vm2, %v3851_v55  ;;  %v6164_v57 = vpop.eup %6163  ;;  %v5764_v45 = vmul.f32 -1.442695, %v8354_v12  ;;  %1085 = vrot.lane.b32.xlu1 %v8259_v56, %s9762_s13  ;;  %v3590_v56 = vld [vmem:[#allocation3 + $0x82] sm:$0xff]  ;;  %v3592_v55 = vld [vmem:[#allocation3 + $0x9a] sm:$0xff] }
 0x2ba   : > { %v2561_v38 = vadd.f32 1.0, %v6164_v57  ;;  %v1550_v16 = vpop.permute.xlu1 %1549  ;;  %v3616_v24 = vpack.c.bf16 %v3590_v56, %v3589_v44  ;;  %1955 = vrot.lane.b32.xlu2 %v1496_v31, %s9757_s0  ;;  %v718_v57 = vmul.f32 %v5720_v2, %v6541_v9  ;;  %v3617_v44 = vpack.c.bf16 %v3592_v55, %v3591_v62 }
 0x2bb   : > { %v1548_v20 = vpop.permute.xlu0 %1547  ;;  %6165 = vpow2.f32 %v5764_v45  ;;  %1621 = vst.msk [vmem:[#allocation2 + $0xc8] sm:$0xff] %vm1595_vm7, %v1550_v16  ;;  %v773_v45 = vmul.f32 %v6536_v3, %v555_v59  ;;  %v8428_v9 = vadd.f32 %v772_v25, %v717_v63 }
 0x2bc   : > { %1620 = vst.msk [vmem:[#allocation2 + $0xc0] sm:$0xff] %vm1595_vm7, %v1548_v20  ;;  %6167 = vrcp.f32 %v2561_v38  ;;  %v2826_v41 = vand.u32 2147483647, %v2561_v38  ;;  %v2828_v43 = vand.u32 2147483648, %v2561_v38  ;;  %vm2822_vm14 = vweird.f32 %v2561_v38 }
 0x2bd   : > { %1754 = vst.msk [vmem:[#allocation2 + $0xc0] sm:$0xff] %vm1729_vm8, %v1682_v11 }
 0x2bf   : > { %1295 = vrot.lane.b32.xlu0 %v8221_v8, %s9759_s29  ;;  %v1631_v8 = vrot.slane %v8310_v15, 2 }
 0x2c0   : > { %5840 = vmatmul.msk.bf16.gmra.mxu0 %vm828_vm2, %v3616_v24  ;;  %v1815_v21 = vpop.permute.xlu2 %1814 }
 0x2c1   : > { %v6166_v48 = vpop.eup %6165  ;;  %1424 = vrot.lane.b32.xlu1 %v8292_v46, %s9758_s1  ;;  %v553_v46 = vld [vmem:[%s6531_s22 + $0x198] sm:$0xff]  ;;  %v1632_v15 = vsel %vm1152_vm0, %v1629_v50, %v1631_v8  ;;  %v2829_v50 = vor.u32 1.1754944e-38, %v2828_v43 }
 0x2c2   : > { %v6168_v1 = vpop.eup %6167  ;;  %v8380_v39 = vadd.f32 1.0, %v6166_v48  ;;  %v1813_v37 = vpop.permute.xlu1 %1812  ;;  %v771_v4 = vmul.f32 %v6536_v3, %v553_v46  ;;  %2091 = vrot.lane.b32.xlu2 %v1632_v15, %s9760_s15  ;;  %v1895_v48 = vrot.slane %v8428_v9, 1 }
 0x2c3   : > { %v1684_v42 = vpop.permute.xlu0 %1683  ;;  %v2818_v17 = vmul.f32 %v6168_v1, %v2561_v38  ;;  %1885 = vst.msk [vmem:[#allocation2 + $0xc0] sm:$0xff] %vm9777_vm9, %v1813_v37  ;;  %vm2823_vm13 = vweird.f32 %v6168_v1  ;;  %vm8403_vm9 = vcmp.eq.f32.partialorder %v2826_v41, 8.507059e+37  ;;  %v8418_v38 = vpop.f32.mrf.mxu0 }
 0x2c4   : > { %1755 = vst.msk [vmem:[#allocation2 + $0xc8] sm:$0xff] %vm1729_vm8, %v1684_v42  ;;  %6169 = vrcp.f32 %v8380_v39  ;;  %vm8399_vm15 = vmor %vm2822_vm14, %vm2823_vm13  ;;  %v2843_v11 = vand.u32 2147483648, %v8380_v39  ;;  %v8426_v56 = vadd.f32 %v771_v4, %v716_v51  ;;  %v2841_v24 = vand.u32 2147483647, %v8380_v39 }
 0x2c5   : > { %v2819_v10 = vsub.f32 1.0, %v2818_v17  ;;  %1886 = vst.msk [vmem:[#allocation2 + $0xc8] sm:$0xff] %vm9778_vm12, %v1815_v21  ;;  %vm2837_vm13 = vweird.f32 %v8380_v39 }
 0x2c6   : > { %v1894_v14 = vrot.slane %v8426_v56, 1 }
 0x2c7   : > { %v2820_v36 = vmul.f32 %v6168_v1, %v2819_v10  ;;  %1559 = vrot.lane.b32.xlu0 %v1496_v31, %s9756_s24  ;;  %v827_v31 = vadd.f32 %v773_v45, %v718_v57 }
 0x2c8   : > { %v2082_v20 = vpop.permute.xlu2 %2081 }
 0x2c9   : > { %v2821_v49 = vadd.f32 %v6168_v1, %v2820_v36  ;;  %1561 = vrot.lane.b32.xlu1 %v8330_v47, %s9756_s24  ;;  %v1897_v42 = vrot.slane %v827_v31, 1  ;;  %v2031_v46 = vrot.slane %v827_v31, 2  ;;  %v3594_v36 = vld [vmem:[#allocation3 + $0xb2] sm:$0xff] }
 0x2ca   : > { %v6170_v60 = vpop.eup %6169  ;;  %v1950_v6 = vpop.permute.xlu1 %1949  ;;  %1293 = vrot.lane.b32.xlu2 %v8224_v27, %s9759_s29  ;;  %v1896_v27 = vsel %vm942_vm1, %v1894_v14, %v1895_v48  ;;  %v3618_v7 = vpack.c.bf16 %v3594_v36, %v3593_v22 }
 0x2cb   : > { %v1948_v61 = vpop.permute.xlu0 %1947  ;;  %v2825_v19 = vsel %vm8399_vm15, %v6168_v1, %v2821_v49  ;;  %v2833_v13 = vmul.f32 %v6170_v60, %v8380_v39  ;;  %2021 = vst.msk [vmem:[#allocation2 + $0xc8] sm:$0xff] %vm1995_vm10, %v1950_v6  ;;  %vm2838_vm12 = vweird.f32 %v6170_v60  ;;  %vm2842_vm15 = vcmp.eq.f32.partialorder %v2841_v24, 8.507059e+37  ;;  %v8442_v28 = vpop.f32.mrf.mxu0 }
 0x2cc   : > { %2020 = vst.msk [vmem:[#allocation2 + $0xc0] sm:$0xff] %vm1995_vm10, %v1948_v61  ;;  %v2830_v47 = vsel %vm8403_vm9, %v2829_v50, %v2825_v19  ;;  %vm2839_vm14 = vmor %vm2837_vm13, %vm2838_vm12  ;;  %v1898_v8 = vsel %vm942_vm1, %v1895_v48, %v1897_v42  ;;  %vm9783_vm9 = vcmask 171152  }
 0x2cd   : > { %v3073_v16 = vmul.f32 %v2830_v47, %v8333_v35  ;;  %v2834_v23 = vsub.f32 1.0, %v2833_v13  ;;  %2154 = vst.msk [vmem:[#allocation2 + $0xc0] sm:$0xff] %vm2129_vm11, %v2082_v20  ;;  %v2844_v35 = vor.u32 1.1754944e-38, %v2843_v11  ;;  %v2028_v47 = vrot.slane %v8426_v56, 2  ;;  %v3596_v11 = vld [vmem:[#allocation3 + $0xca] sm:$0xff]  ;;  %vm9784_vm12 = vmmov %vm9783_vm9 }
 0x2cf   : > { %3161 = vst.msk [vmem:[#allocation3 + $0xd9] sm:$0xff] %vm828_vm2, %v3073_v16  ;;  %v2835_v3 = vmul.f32 %v6170_v60, %v2834_v23  ;;  %1695 = vrot.lane.b32.xlu0 %v1632_v15, %s9761_s25  ;;  %v3595_v23 = vld [vmem:[#allocation3 + $0xc2] sm:$0xff] }
 0x2d0   : > { %5841 = vmatmul.msk.bf16.gmra.mxu0 %vm828_vm2, %v3617_v44  ;;  %v1078_v17 = vpop.permute.xlu2 %1077  ;;  %v3619_v24 = vpack.c.bf16 %v3596_v11, %v3595_v23 }
 0x2d1   : > { %v2836_v32 = vadd.f32 %v6170_v60, %v2835_v3  ;;  %1824 = vrot.lane.b32.xlu1 %v8426_v56, %s9755_s12  ;;  %1147 = vst.msk [vmem:[#allocation2 + $0xd8] sm:$0xff] %vm1119_vm4, %v1078_v17 }
 0x2d2   : > { %v1076_v39 = vpop.permute.xlu1 %1075  ;;  %1426 = vrot.lane.b32.xlu2 %v8296_v18, %s9758_s1  ;;  %s5555_s1 = scalar_lea.hbm %s9725_s11, %s6472_s21  ;;  %s6328_s21 = scalar_lea.hbm %s9725_s11, 2 }
 0x2d3   : > { %v2084_v0 = vpop.permute.xlu0 %2083  ;;  %v2840_v1 = vsel %vm2839_vm14, %v6170_v60, %v2836_v32  ;;  %1146 = vst.msk [vmem:[#allocation2 + $0xd0] sm:$0xff] %vm1119_vm4, %v1076_v39  ;;  %v8459_v15 = vpop.f32.mrf.mxu0 }
 0x2d4   : > { %2155 = vst.msk [vmem:[#allocation2 + $0xc8] sm:$0xff] %vm2129_vm11, %v2084_v0  ;;  %v2845_v58 = vsel %vm2842_vm15, %v2844_v35, %v2840_v1  ;;  %v2235_v21 = vld [vmem:[#allocation2 + $0xc0] sm:$0xff] }
 0x2d5   : > { %v3074_v37 = vmul.f32 %v2845_v58, %v8354_v12  ;;  %v2029_v12 = vrot.slane %v8428_v9, 2 }
 0x2d6   : > { %v3247_v26 = vld [vmem:[#allocation3 + $0xd9] sm:$0xff] }
 0x2d7   : > { %3162 = vst.msk [vmem:[#allocation3 + $0xe1] sm:$0xff] %vm828_vm2, %v3074_v37  ;;  %1959 = vrot.lane.b32.xlu0 %v1896_v27, %s9757_s0  ;;  %v2032_v18 = vsel %vm1152_vm0, %v2029_v12, %v2031_v46  ;;  %v3828_v59 = vld [vmem:[#allocation3 + $0xd8] sm:$0xff] }
 0x2d8   : > { %v1417_v52 = vpop.permute.xlu2 %1416 }
 0x2d9   : > { %1961 = vrot.lane.b32.xlu1 %v1898_v8, %s9757_s0 }
 0x2da   : > { %v1288_v41 = vpop.permute.xlu1 %1287  ;;  %1693 = vrot.lane.b32.xlu2 %v8339_v5, %s9761_s25  ;;  %s5559_s25 = sshll.u32 %s5555_s1, 4  ;;  %s5560_s25 = int_to_ptr.hbm [resolvable:$true] %s5559_s25 }
 0x2db   : > { %v1286_v40 = vpop.permute.xlu0 %1285  ;;  %v2236_v10 = vld [vmem:[#allocation2 + $0xc8] sm:$0xff]  ;;  %1357 = vst.msk [vmem:[#allocation2 + $0xd8] sm:$0xff] %vm1329_vm5, %v1288_v41  ;;  %v8476_v13 = vpop.f32.mrf.mxu0  ;;  %s6322_s16 = sshra.s32 %s5560_s25, 4  ;;  %s6323_s16 = int_to_ptr.hbm [resolvable:$true] %s6322_s16 }
 0x2dc   : > { %1356 = vst.msk [vmem:[#allocation2 + $0xd0] sm:$0xff] %vm1329_vm5, %v1286_v40  ;;  %v2255_v43 = vpack.c.bf16 %v2236_v10, %v2235_v21  ;;  %s6324_s3 = scalar_lea.hbm %s6323_s16, 1  ;;  %p6329_p3 = scmp.lt.s32.totalorder %s6323_s16, %s9725_s11 }
 0x2dd   : > { %1487 = vst.msk [vmem:[#allocation2 + $0xd0] sm:$0xff] %vm1460_vm6, %v1417_v52  ;;  %p6325_p0 = scmp.ne.s32.totalorder %s6323_s16, %s6324_s3  ;;  %p6330_p4 = scmp.lt.s32.totalorder %s6328_s21, %s6324_s3 }
 0x2de   : > { %5743 = vmatmul.msk.bf16.gmra.mxu3 %vm828_vm2, %v2255_v43  ;;  %v3248_v2 = vld [vmem:[#allocation3 + $0xe1] sm:$0xff] }
 0x2df   : > { %v3829_v49 = vld [vmem:[#allocation3 + $0xe0] sm:$0xff]  ;;  %v3270_v4 = vpack.c.bf16 %v3248_v2, %v3247_v26  ;;  %2095 = vrot.lane.b32.xlu0 %v2032_v18, %s9760_s15  ;;  %p6326_p1 = pnand %p6325_p0, %p6489_p5  ;;  %p6331_p7 = por %p6330_p4, %p6329_p3 }
 0x2e0   : > { %v3852_v25 = vpack.c.bf16 %v3829_v49, %v3828_v59  ;;  %5842 = vmatmul.msk.bf16.gmra.mxu0 %vm828_vm2, %v3618_v7  ;;  %v1554_v63 = vpop.permute.xlu2 %1553  ;;  %v3597_v21 = vld [vmem:[#allocation3 + $0xda] sm:$0xff]  ;;  %v3598_v10 = vld [vmem:[#allocation3 + $0xe2] sm:$0xff] }
 0x2e1   : > { %v2381_v60 = vpop.f32.mrf.mxu3  ;;  %5796 = vmatmul.msk.bf16.gmra.mxu2 %vm828_vm2, %v3270_v4  ;;  %v3620_v26 = vpack.c.bf16 %v3598_v10, %v3597_v21  ;;  %p6327_p2 = pneg %p6326_p1 }
 0x2e2   : > { %v2382_v30 = vadd.f32 %v8321_v54, %v2381_v60  ;;  %5867 = vmatmul.msk.bf16.gmra.mxu1 %vm828_vm2, %v3852_v25  ;;  %v1552_v51 = vpop.permute.xlu1 %1551  ;;  %1826 = vrot.lane.b32.xlu2 %v8428_v9, %s9755_s12  ;;  %v2030_v9 = vsel %vm1152_vm0, %v2028_v47, %v2029_v12 }
 0x2e3   : > { %v1419_v50 = vpop.permute.xlu0 %1418  ;;  %1622 = vst.msk [vmem:[#allocation2 + $0xd0] sm:$0xff] %vm1595_vm7, %v1552_v51  ;;  %v8489_v3 = vpop.f32.mrf.mxu0  ;;  %p6332_p8 = pnand %p6331_p7, %p6327_p2 }
 0x2e4   : > { %v8468_v61 = vadd.f32 %v7352_v34, %v2382_v30  ;;  %1488 = vst.msk [vmem:[#allocation2 + $0xd8] sm:$0xff] %vm1460_vm6, %v1419_v50 }
 0x2e5   : > { %1623 = vst.msk [vmem:[#allocation2 + $0xd8] sm:$0xff] %vm1595_vm7, %v1554_v63 }
 0x2e6   : > { %v5765_v19 = vmul.f32 -1.442695, %v8468_v61 }
 0x2e8   : > { %6171 = vpow2.f32 %v5765_v19  ;;  %v1817_v5 = vpop.permute.xlu2 %1816 }
 0x2e9   : > { %v2383_v6 = vpop.f32.mrf.mxu3 }
 0x2ea   : > { %v2384_v62 = vadd.f32 %v8321_v54, %v2383_v6  ;;  %v1688_v45 = vpop.permute.xlu1 %1687  ;;  %2093 = vrot.lane.b32.xlu2 %v2030_v9, %s9760_s15 }
 0x2eb   : > { %v1686_v55 = vpop.permute.xlu0 %1685  ;;  %1757 = vst.msk [vmem:[#allocation2 + $0xd8] sm:$0xff] %vm1729_vm8, %v1688_v45  ;;  %v8497_v1 = vpop.f32.mrf.mxu0 }
 0x2ec   : > { %v8480_v57 = vadd.f32 %v7352_v34, %v2384_v62  ;;  %1756 = vst.msk [vmem:[#allocation2 + $0xd0] sm:$0xff] %vm1729_vm8, %v1686_v55 }
 0x2ed   : > { %1887 = vst.msk [vmem:[#allocation2 + $0xd0] sm:$0xff] %vm9783_vm9, %v1817_v5 }
 0x2ee   : > { %v6172_v20 = vpop.eup %6171  ;;  %v5766_v16 = vmul.f32 -1.442695, %v8480_v57 }
 0x2ef   : > { %v2563_v44 = vadd.f32 1.0, %v6172_v20 }
 0x2f0   : > { %6173 = vpow2.f32 %v5766_v16  ;;  %5843 = vmatmul.msk.bf16.gmra.mxu0 %vm828_vm2, %v3619_v24  ;;  %v1954_v56 = vpop.permute.xlu2 %1953 }
 0x2f1   : > { %6175 = vrcp.f32 %v2563_v44  ;;  %v2858_v42 = vand.u32 2147483648, %v2563_v44  ;;  %v2856_v37 = vand.u32 2147483647, %v2563_v44  ;;  %vm2852_vm13 = vweird.f32 %v2563_v44 }
 0x2f2   : > { %v1952_v32 = vpop.permute.xlu1 %1951 }
 0x2f3   : > { %v1819_v31 = vpop.permute.xlu0 %1818  ;;  %2022 = vst.msk [vmem:[#allocation2 + $0xd0] sm:$0xff] %vm1995_vm10, %v1952_v32  ;;  %v2859_v46 = vor.u32 1.1754944e-38, %v2858_v42  ;;  %vm2857_vm15 = vcmp.eq.f32.partialorder %v2856_v37, 8.507059e+37  ;;  %v8503_v18 = vpop.f32.mrf.mxu0 }
 0x2f4   : > { %1888 = vst.msk [vmem:[#allocation2 + $0xd8] sm:$0xff] %vm9784_vm12, %v1819_v31 }
 0x2f5   : > { %2023 = vst.msk [vmem:[#allocation2 + $0xd8] sm:$0xff] %vm1995_vm10, %v1954_v56 }
 0x2f6   : > { %v6174_v35 = vpop.eup %6173 }
 0x2f7   : > { %v6176_v0 = vpop.eup %6175  ;;  %v2564_v14 = vadd.f32 1.0, %v6174_v35 }
 0x2f8   : > { %v2848_v48 = vmul.f32 %v6176_v0, %v2563_v44  ;;  %vm2853_vm0 = vweird.f32 %v6176_v0  ;;  %v1080_v8 = vpop.permute.xlu2 %1079 }
 0x2f9   : > { %6177 = vrcp.f32 %v2564_v14  ;;  %1148 = vst.msk [vmem:[#allocation2 + $0xe0] sm:$0xff] %vm1119_vm4, %v1080_v8  ;;  %vm2854_vm14 = vmor %vm2852_vm13, %vm2853_vm0  ;;  %v2873_v2 = vand.u32 2147483648, %v2564_v14  ;;  %v2871_v25 = vand.u32 2147483647, %v2564_v14  ;;  %vm2867_vm12 = vweird.f32 %v2564_v14 }
 0x2fa   : > { %v2849_v39 = vsub.f32 1.0, %v2848_v48  ;;  %v2088_v27 = vpop.permute.xlu1 %2087 }
 0x2fb   : > { %v2086_v58 = vpop.permute.xlu0 %2085  ;;  %2157 = vst.msk [vmem:[#allocation2 + $0xd8] sm:$0xff] %vm2129_vm11, %v2088_v27  ;;  %v2874_v51 = vor.u32 1.1754944e-38, %v2873_v2  ;;  %vm2872_vm13 = vcmp.eq.f32.partialorder %v2871_v25, 8.507059e+37  ;;  %v8513_v5 = vpop.f32.mrf.mxu0 }
 0x2fc   : > { %v2850_v17 = vmul.f32 %v6176_v0, %v2849_v39  ;;  %2156 = vst.msk [vmem:[#allocation2 + $0xd0] sm:$0xff] %vm2129_vm11, %v2086_v58 }
 0x2fd   : > { %9785 = vst [vmem:[#allocation13_spill] sm:$0xff] %v8513_v5 }
 0x2fe   : > { %v2851_v40 = vadd.f32 %v6176_v0, %v2850_v17 }
 0x2ff   : > { %v6178_v12 = vpop.eup %6177 }
 0x300   : > { %v2855_v41 = vsel %vm2854_vm14, %v6176_v0, %v2851_v40  ;;  %v2863_v43 = vmul.f32 %v6178_v12, %v2564_v14  ;;  %5844 = vmatmul.msk.bf16.gmra.mxu0 %vm828_vm2, %v3620_v26  ;;  %vm2868_vm9 = vweird.f32 %v6178_v12  ;;  %v1292_v30 = vpop.permute.xlu2 %1291  ;;  %vm9787_vm14 = vcmask 171152  }
 0x301   : > { %v2860_v52 = vsel %vm2857_vm15, %v2859_v46, %v2855_v41  ;;  %vm2869_vm0 = vmor %vm2867_vm12, %vm2868_vm9 }
 0x302   : > { %v3075_v22 = vmul.f32 %v2860_v52, %v8468_v61  ;;  %v2864_v36 = vsub.f32 1.0, %v2863_v43  ;;  %v2238_v7 = vld [vmem:[#allocation2 + $0xd8] sm:$0xff]  ;;  %vm9788_vm15 = vmmov %vm9787_vm14 }
 0x303   : > { %v1082_v59 = vpop.permute.xlu0 %1081  ;;  %v2237_v49 = vld [vmem:[#allocation2 + $0xd0] sm:$0xff]  ;;  %v1290_v60 = vpop.permute.xlu1 %1289 }
 0x304   : > { %3163 = vst.msk [vmem:[#allocation3 + $0xf1] sm:$0xff] %vm828_vm2, %v3075_v22  ;;  %v2865_v4 = vmul.f32 %v6178_v12, %v2864_v36  ;;  %v2256_v50 = vpack.c.bf16 %v2238_v7, %v2237_v49  ;;  %v8531_v17 = vpop.f32.mrf.mxu0 }
 0x305   : > { %1149 = vst.msk [vmem:[#allocation2 + $0xe8] sm:$0xff] %vm1119_vm4, %v1082_v59 }
 0x306   : > { %v2866_v61 = vadd.f32 %v6178_v12, %v2865_v4  ;;  %1359 = vst.msk [vmem:[#allocation2 + $0xe8] sm:$0xff] %vm1329_vm5, %v1292_v30  ;;  %5744 = vmatmul.msk.bf16.gmra.mxu3 %vm828_vm2, %v2256_v50 }
 0x307   : > { %1358 = vst.msk [vmem:[#allocation2 + $0xe0] sm:$0xff] %vm1329_vm5, %v1290_v60 }
 0x308   : > { %v2870_v63 = vsel %vm2869_vm0, %v6178_v12, %v2866_v61  ;;  %v1556_v16 = vpop.permute.xlu2 %1555  ;;  %9786 = vst [vmem:[#allocation14_spill] sm:$0xff] %v8531_v17 }
 0x309   : > { %v2875_v19 = vsel %vm2872_vm13, %v2874_v51, %v2870_v63  ;;  %v2386_v62 = vpop.f32.mrf.mxu3 }
 0x30a   : > { %v3076_v6 = vmul.f32 %v2875_v19, %v8480_v57  ;;  %v2387_v55 = vadd.f32 %v8321_v54, %v2386_v62 }
 0x30b   : > { %v1421_v45 = vpop.permute.xlu0 %1420  ;;  %v1423_v47 = vpop.permute.xlu1 %1422  ;;  %v3249_v11 = vld [vmem:[#allocation3 + $0xf1] sm:$0xff] }
 0x30c   : > { %3164 = vst.msk [vmem:[#allocation3 + $0xf9] sm:$0xff] %vm828_vm2, %v3076_v6  ;;  %v8517_v20 = vadd.f32 %v7352_v34, %v2387_v55  ;;  %v3830_v14 = vld [vmem:[#allocation3 + $0xf0] sm:$0xff] }
 0x30d   : > { %1489 = vst.msk [vmem:[#allocation2 + $0xe0] sm:$0xff] %vm1460_vm6, %v1421_v45 }
 0x30e   : > { %1624 = vst.msk [vmem:[#allocation2 + $0xe0] sm:$0xff] %vm1595_vm7, %v1556_v16  ;;  %v5767_v23 = vmul.f32 -1.442695, %v8517_v20 }
 0x30f   : > { %1490 = vst.msk [vmem:[#allocation2 + $0xe8] sm:$0xff] %vm1460_vm6, %v1423_v47 }
 0x310   : > { %6179 = vpow2.f32 %v5767_v23  ;;  %v1692_v42 = vpop.permute.xlu2 %1691 }
 0x311   : > { %v2388_v57 = vpop.f32.mrf.mxu3 }
 0x312   : > { %v2389_v44 = vadd.f32 %v8321_v54, %v2388_v57 }
 0x313   : > { %v1558_v24 = vpop.permute.xlu0 %1557  ;;  %v3250_v9 = vld [vmem:[#allocation3 + $0xf9] sm:$0xff]  ;;  %v1690_v56 = vpop.permute.xlu1 %1689 }
 0x314   : > { %v3599_v31 = vld [vmem:[#allocation3 + $0xf2] sm:$0xff]  ;;  %v3600_v32 = vld [vmem:[#allocation3 + $0xfa] sm:$0xff]  ;;  %1625 = vst.msk [vmem:[#allocation2 + $0xe8] sm:$0xff] %vm1595_vm7, %v1558_v24  ;;  %v3271_v35 = vpack.c.bf16 %v3250_v9, %v3249_v11  ;;  %v8526_v39 = vadd.f32 %v7352_v34, %v2389_v44 }
 0x315   : > { %v3621_v0 = vpack.c.bf16 %v3600_v32, %v3599_v31  ;;  %v3831_v48 = vld [vmem:[#allocation3 + $0xf8] sm:$0xff]  ;;  %1758 = vst.msk [vmem:[#allocation2 + $0xe0] sm:$0xff] %vm1729_vm8, %v1690_v56  ;;  %v8553_v56 = vpop.f32.mrf.mxu0 }
 0x316   : > { %v8529_v58 = vpack.c.bf16 %v3831_v48, %v3830_v14  ;;  %1759 = vst.msk [vmem:[#allocation2 + $0xe8] sm:$0xff] %vm1729_vm8, %v1692_v42  ;;  %5797 = vmatmul.msk.bf16.gmra.mxu2 %vm828_vm2, %v3271_v35  ;;  %v6180_v37 = vpop.eup %6179  ;;  %v5768_v27 = vmul.f32 -1.442695, %v8526_v39 }
 0x317   : > { %5845 = vmatmul.msk.bf16.gmra.mxu0 %vm828_vm2, %v3621_v0  ;;  %v2565_v8 = vadd.f32 1.0, %v6180_v37  ;;  %9789 = vst [vmem:[#allocation15_spill] sm:$0xff] %v8553_v56 }
 0x318   : > { %5868 = vmatmul.msk.bf16.gmra.mxu1 %vm828_vm2, %v8529_v58  ;;  %6181 = vpow2.f32 %v5768_v27  ;;  %v1956_v10 = vpop.permute.xlu2 %1955 }
 0x319   : > { %6183 = vrcp.f32 %v2565_v8  ;;  %v2888_v22 = vand.u32 2147483648, %v2565_v8  ;;  %v2886_v59 = vand.u32 2147483647, %v2565_v8  ;;  %vm2882_vm12 = vweird.f32 %v2565_v8 }
 0x31b   : > { %v1821_v40 = vpop.permute.xlu0 %1820  ;;  %v1823_v21 = vpop.permute.xlu1 %1822  ;;  %v2889_v60 = vor.u32 1.1754944e-38, %v2888_v22  ;;  %vm2887_vm13 = vcmp.eq.f32.partialorder %v2886_v59, 8.507059e+37 }
 0x31c   : > { %1889 = vst.msk [vmem:[#allocation2 + $0xe0] sm:$0xff] %vm9787_vm14, %v1821_v40 }
 0x31d   : > { %1890 = vst.msk [vmem:[#allocation2 + $0xe8] sm:$0xff] %vm9788_vm15, %v1823_v21  ;;  %v8570_v22 = vpop.f32.mrf.mxu0 }
 0x31e   : > { %2024 = vst.msk [vmem:[#allocation2 + $0xe0] sm:$0xff] %vm1995_vm10, %v1956_v10  ;;  %v6182_v12 = vpop.eup %6181 }
 0x31f   : > { %v6184_v46 = vpop.eup %6183  ;;  %v2566_v41 = vadd.f32 1.0, %v6182_v12  ;;  %9790 = vst [vmem:[#allocation16_spill] sm:$0xff] %v8570_v22  ;;  %v4045_v22 = vld [vmem:[#allocation3 + $0x19] sm:$0xff] }
 0x320   : > { %v2878_v43 = vmul.f32 %v6184_v46, %v2565_v8  ;;  %vm2883_vm9 = vweird.f32 %v6184_v46  ;;  %v2092_v49 = vpop.permute.xlu2 %2091 }
 0x321   : > { %6185 = vrcp.f32 %v2566_v41  ;;  %vm2884_vm0 = vmor %vm2882_vm12, %vm2883_vm9  ;;  %v2903_v63 = vand.u32 2147483648, %v2566_v41  ;;  %v2901_v45 = vand.u32 2147483647, %v2566_v41  ;;  %vm2897_vm15 = vweird.f32 %v2566_v41 }
 0x322   : > { %v2879_v52 = vsub.f32 1.0, %v2878_v43 }
 0x323   : > { %v1958_v26 = vpop.permute.xlu0 %1957  ;;  %v2090_v36 = vpop.permute.xlu1 %2089  ;;  %vm2902_vm12 = vcmp.eq.f32.partialorder %v2901_v45, 8.507059e+37 }
 0x324   : > { %2025 = vst.msk [vmem:[#allocation2 + $0xe8] sm:$0xff] %vm1995_vm10, %v1958_v26  ;;  %v2880_v2 = vmul.f32 %v6184_v46, %v2879_v52 }
 0x325   : > { %2158 = vst.msk [vmem:[#allocation2 + $0xe0] sm:$0xff] %vm2129_vm11, %v2090_v36 }
 0x326   : > { %2159 = vst.msk [vmem:[#allocation2 + $0xe8] sm:$0xff] %vm2129_vm11, %v2092_v49  ;;  %v2881_v4 = vadd.f32 %v6184_v46, %v2880_v2 }
 0x327   : > { %v6186_v25 = vpop.eup %6185 }
 0x328   : > { %v2885_v7 = vsel %vm2884_vm0, %v6184_v46, %v2881_v4  ;;  %v2893_v30 = vmul.f32 %v6186_v25, %v2566_v41  ;;  %vm2898_vm14 = vweird.f32 %v6186_v25  ;;  %v1294_v44 = vpop.permute.xlu2 %1293 }
 0x329   : > { %v2890_v50 = vsel %vm2887_vm13, %v2889_v60, %v2885_v7  ;;  %vm2899_vm9 = vmor %vm2897_vm15, %vm2898_vm14 }
 0x32a   : > { %v3077_v61 = vmul.f32 %v2890_v50, %v8517_v20  ;;  %v2894_v51 = vsub.f32 1.0, %v2893_v30  ;;  %v2904_v20 = vor.u32 1.1754944e-38, %v2903_v63 }
 0x32b   : > { %v1084_v19 = vpop.permute.xlu0 %1083  ;;  %v1086_v62 = vpop.permute.xlu1 %1085 }
 0x32c   : > { %v2239_v6 = vld [vmem:[#allocation2 + $0xe0] sm:$0xff]  ;;  %3165 = vst.msk [vmem:[#allocation3 + $0x109] sm:$0xff] %vm828_vm2, %v3077_v61  ;;  %v2895_v55 = vmul.f32 %v6186_v25, %v2894_v51 }
 0x32d   : > { %v2240_v47 = vld [vmem:[#allocation2 + $0xe8] sm:$0xff]  ;;  %1150 = vst.msk [vmem:[#allocation2 + $0xf0] sm:$0xff] %vm1119_vm4, %v1084_v19 }
 0x32e   : > { %v2257_v16 = vpack.c.bf16 %v2240_v47, %v2239_v6  ;;  %v2896_v23 = vadd.f32 %v6186_v25, %v2895_v55  ;;  %1151 = vst.msk [vmem:[#allocation2 + $0xf8] sm:$0xff] %vm1119_vm4, %v1086_v62  ;;  %vm9791_vm4 = vcmask 171152  }
 0x32f   : > { %1360 = vst.msk [vmem:[#allocation2 + $0xf0] sm:$0xff] %vm1329_vm5, %v1294_v44 }
 0x330   : > { %5745 = vmatmul.msk.bf16.gmra.mxu3 %vm828_vm2, %v2257_v16  ;;  %v2900_v57 = vsel %vm2899_vm9, %v6186_v25, %v2896_v23  ;;  %v1427_v48 = vpop.permute.xlu2 %1426 }
 0x331   : > { %v2905_v11 = vsel %vm2902_vm12, %v2904_v20, %v2900_v57 }
 0x332   : > { %v3078_v24 = vmul.f32 %v2905_v11, %v8526_v39  ;;  %v2391_v9 = vpop.f32.mrf.mxu3 }
 0x333   : > { %v2392_v31 = vadd.f32 %v8321_v54, %v2391_v9  ;;  %v1296_v32 = vpop.permute.xlu0 %1295  ;;  %v1425_v0 = vpop.permute.xlu1 %1424  ;;  %v3251_v42 = vld [vmem:[#allocation3 + $0x109] sm:$0xff] }
 0x334   : > { %3166 = vst.msk [vmem:[#allocation3 + $0x111] sm:$0xff] %vm828_vm2, %v3078_v24  ;;  %v3832_v46 = vld [vmem:[#allocation3 + $0x108] sm:$0xff] }
 0x335   : > { %v8557_v35 = vadd.f32 %v7352_v34, %v2392_v31  ;;  %1361 = vst.msk [vmem:[#allocation2 + $0xf8] sm:$0xff] %vm1329_vm5, %v1296_v32  ;;  %vm9792_vm5 = vmmov %vm9791_vm4 }
 0x336   : > { %1491 = vst.msk [vmem:[#allocation2 + $0xf0] sm:$0xff] %vm1460_vm6, %v1425_v0 }
 0x337   : > { %v5769_v14 = vmul.f32 -1.442695, %v8557_v35  ;;  %1492 = vst.msk [vmem:[#allocation2 + $0xf8] sm:$0xff] %vm1460_vm6, %v1427_v48 }
 0x338   : > { %v1694_v49 = vpop.permute.xlu2 %1693 }
 0x339   : > { %6187 = vpow2.f32 %v5769_v14 }
 0x33a   : > { %v2393_v39 = vpop.f32.mrf.mxu3 }
 0x33b   : > { %v2394_v37 = vadd.f32 %v8321_v54, %v2393_v39  ;;  %v1560_v27 = vpop.permute.xlu0 %1559  ;;  %v3252_v8 = vld [vmem:[#allocation3 + $0x111] sm:$0xff]  ;;  %v1562_v26 = vpop.permute.xlu1 %1561 }
 0x33c   : > { %v3601_v40 = vld [vmem:[#allocation3 + $0x10a] sm:$0xff]  ;;  %v3602_v21 = vld [vmem:[#allocation3 + $0x112] sm:$0xff]  ;;  %1626 = vst.msk [vmem:[#allocation2 + $0xf0] sm:$0xff] %vm1595_vm7, %v1560_v27  ;;  %v3272_v10 = vpack.c.bf16 %v3252_v8, %v3251_v42 }
 0x33d   : > { %v3622_v12 = vpack.c.bf16 %v3602_v21, %v3601_v40  ;;  %v3833_v41 = vld [vmem:[#allocation3 + $0x110] sm:$0xff]  ;;  %v8566_v43 = vadd.f32 %v7352_v34, %v2394_v37  ;;  %1627 = vst.msk [vmem:[#allocation2 + $0xf8] sm:$0xff] %vm1595_vm7, %v1562_v26  ;;  %v8589_v40 = vpop.f32.mrf.mxu0 }
 0x33e   : > { %v8568_v52 = vpack.c.bf16 %v3833_v41, %v3832_v46  ;;  %5798 = vmatmul.msk.bf16.gmra.mxu2 %vm828_vm2, %v3272_v10  ;;  %1760 = vst.msk [vmem:[#allocation2 + $0xf0] sm:$0xff] %vm1729_vm8, %v1694_v49  ;;  %v6000_v41 = vld [vmem:[%s9723_s9 + $0x8] sm:$0xff] }
 0x33f   : > { %5846 = vmatmul.msk.bf16.gmra.mxu0 %vm828_vm2, %v3622_v12  ;;  %v6188_v36 = vpop.eup %6187  ;;  %v5770_v2 = vmul.f32 -1.442695, %v8566_v43  ;;  %3496 = vmatpush.bf16.msrb.mxu3 %v6000_v41 }
 0x340   : > { %5869 = vmatmul.msk.bf16.gmra.mxu1 %vm828_vm2, %v8568_v52  ;;  %v2567_v59 = vadd.f32 1.0, %v6188_v36  ;;  %v1827_v61 = vpop.permute.xlu2 %1826 }
 0x341   : > { %6189 = vpow2.f32 %v5770_v2 }
 0x342   : > { %6191 = vrcp.f32 %v2567_v59  ;;  %v2918_v19 = vand.u32 2147483648, %v2567_v59  ;;  %v2916_v62 = vand.u32 2147483647, %v2567_v59  ;;  %vm2912_vm7 = vweird.f32 %v2567_v59 }
 0x343   : > { %v1696_v4 = vpop.permute.xlu0 %1695  ;;  %v1825_v25 = vpop.permute.xlu1 %1824 }
 0x344   : > { %1761 = vst.msk [vmem:[#allocation2 + $0xf8] sm:$0xff] %vm1729_vm8, %v1696_v4  ;;  %v2919_v16 = vor.u32 1.1754944e-38, %v2918_v19  ;;  %vm2917_vm0 = vcmp.eq.f32.partialorder %v2916_v62, 8.507059e+37  ;;  %v3178_v19 = vld [vmem:[#allocation3 + $0x8] sm:$0xff] }
 0x345   : > { %1891 = vst.msk [vmem:[#allocation2 + $0xf0] sm:$0xff] %vm9791_vm4, %v1825_v25 }
 0x346   : > { %1892 = vst.msk [vmem:[#allocation2 + $0xf8] sm:$0xff] %vm9792_vm5, %v1827_v61 }
 0x347   : > { %v6190_v60 = vpop.eup %6189 }
 0x348   : > { %v6192_v7 = vpop.eup %6191  ;;  %v2568_v30 = vadd.f32 1.0, %v6190_v60  ;;  %v2094_v57 = vpop.permute.xlu2 %2093 }
 0x349   : > { %v2908_v50 = vmul.f32 %v6192_v7, %v2567_v59  ;;  %vm2913_vm6 = vweird.f32 %v6192_v7 }
 0x34a   : > { %6193 = vrcp.f32 %v2568_v30  ;;  %vm2914_vm8 = vmor %vm2912_vm7, %vm2913_vm6  ;;  %v2933_v31 = vand.u32 2147483648, %v2568_v30  ;;  %v2931_v0 = vand.u32 2147483647, %v2568_v30  ;;  %vm2927_vm13 = vweird.f32 %v2568_v30 }
 0x34b   : > { %v2909_v51 = vsub.f32 1.0, %v2908_v50  ;;  %v1960_v63 = vpop.permute.xlu0 %1959  ;;  %v1962_v55 = vpop.permute.xlu1 %1961  ;;  %v5999_v50 = vld [vmem:[%s9723_s9] sm:$0xff] }
 0x34c   : > { %2026 = vst.msk [vmem:[#allocation2 + $0xf0] sm:$0xff] %vm1995_vm10, %v1960_v63  ;;  %v2934_v48 = vor.u32 1.1754944e-38, %v2933_v31  ;;  %vm2932_vm15 = vcmp.eq.f32.partialorder %v2931_v0, 8.507059e+37  ;;  %3497 = vmatpush.bf16.msrb.mxu3 %v5999_v50  ;;  %v3177_v63 = vld [vmem:[#allocation3] sm:$0xff]  ;;  %v3179_v31 = vld [vmem:[#allocation3 + $0x18] sm:$0xff] }
 0x34d   : > { %v2910_v6 = vmul.f32 %v6192_v7, %v2909_v51  ;;  %2027 = vst.msk [vmem:[#allocation2 + $0xf8] sm:$0xff] %vm1995_vm10, %v1962_v55 }
 0x34e   : > { %2160 = vst.msk [vmem:[#allocation2 + $0xf0] sm:$0xff] %vm2129_vm11, %v2094_v57 }
 0x34f   : > { %v2911_v45 = vadd.f32 %v6192_v7, %v2910_v6  ;;  %v3209_v6 = vpack.c.bf16 %v3178_v19, %v3177_v63 }
 0x350   : > { %v6194_v47 = vpop.eup %6193 }
 0x351   : > { %v2915_v23 = vsel %vm2914_vm8, %v6192_v7, %v2911_v45  ;;  %v2923_v20 = vmul.f32 %v6194_v47, %v2568_v30  ;;  %vm2928_vm10 = vweird.f32 %v6194_v47  ;;  %v8603_v30 = vpop.f32.mrf.mxu0 }
 0x352   : > { %v2920_v11 = vsel %vm2917_vm0, %v2919_v16, %v2915_v23  ;;  %vm2929_vm14 = vmor %vm2927_vm13, %vm2928_vm10 }
 0x353   : > { %v3079_v44 = vmul.f32 %v2920_v11, %v8557_v35  ;;  %v2924_v24 = vsub.f32 1.0, %v2923_v20  ;;  %v2096_v9 = vpop.permute.xlu0 %2095 }
 0x354   : > { %2161 = vst.msk [vmem:[#allocation2 + $0xf8] sm:$0xff] %vm2129_vm11, %v2096_v9 }
 0x355   : > { %3167 = vst.msk [vmem:[#allocation3 + $0x121] sm:$0xff] %vm828_vm2, %v3079_v44  ;;  %v2925_v32 = vmul.f32 %v6194_v47, %v2924_v24  ;;  %v2241_v42 = vld [vmem:[#allocation2 + $0xf0] sm:$0xff] }
 0x357   : > { %v2926_v14 = vadd.f32 %v6194_v47, %v2925_v32 }
 0x359   : > { %v2930_v39 = vsel %vm2929_vm14, %v6194_v47, %v2926_v14 }
 0x35a   : > { %v2935_v37 = vsel %vm2932_vm15, %v2934_v48, %v2930_v39 }
 0x35b   : > { %v3080_v35 = vmul.f32 %v2935_v37, %v8566_v43  ;;  %v2242_v27 = vld [vmem:[#allocation2 + $0xf8] sm:$0xff]  ;;  %v6008_v43 = vld [vmem:[%s9723_s9 + $0x48] sm:$0xff] }
 0x35c   : > { %v2258_v8 = vpack.c.bf16 %v2242_v27, %v2241_v42  ;;  %v3253_v46 = vld [vmem:[#allocation3 + $0x121] sm:$0xff]  ;;  %4163 = vmatpush.bf16.msrb.mxu2 %v6008_v43 }
 0x35d   : > { %3168 = vst.msk [vmem:[#allocation3 + $0x129] sm:$0xff] %vm828_vm2, %v3080_v35  ;;  %v3834_v25 = vld [vmem:[#allocation3 + $0x120] sm:$0xff] }
 0x35e   : > { %5746 = vmatmul.msk.bf16.gmra.mxu3 %vm828_vm2, %v2258_v8 }
 0x361   : > { %v2396_v21 = vpop.f32.mrf.mxu3 }
 0x362   : > { %v2397_v10 = vadd.f32 %v8321_v54, %v2396_v21 }
 0x364   : > { %v2441_v12 = vadd.f32 %v7352_v34, %v2397_v10  ;;  %v3254_v26 = vld [vmem:[#allocation3 + $0x129] sm:$0xff] }
 0x365   : > { %v3603_v36 = vld [vmem:[#allocation3 + $0x122] sm:$0xff]  ;;  %v3604_v2 = vld [vmem:[#allocation3 + $0x12a] sm:$0xff]  ;;  %v3273_v49 = vpack.c.bf16 %v3254_v26, %v3253_v46  ;;  %v8617_v46 = vpop.f32.mrf.mxu0 }
 0x366   : > { %v5771_v59 = vmul.f32 -1.442695, %v2441_v12  ;;  %v3623_v4 = vpack.c.bf16 %v3604_v2, %v3603_v36  ;;  %v3835_v60 = vld [vmem:[#allocation3 + $0x128] sm:$0xff] }
 0x367   : > { %v8601_v7 = vpack.c.bf16 %v3835_v60, %v3834_v25  ;;  %5799 = vmatmul.msk.bf16.gmra.mxu2 %vm828_vm2, %v3273_v49  ;;  %v3182_v49 = vld [vmem:[#allocation3 + $0x38] sm:$0xff]  ;;  %v3181_v25 = vld [vmem:[#allocation3 + $0x30] sm:$0xff]  ;;  %v8626_v60 = vpop.f32.mrf.mxu1 }
 0x368   : > { %6195 = vpow2.f32 %v5771_v59  ;;  %5847 = vmatmul.msk.bf16.gmra.mxu0 %vm828_vm2, %v3623_v4 }
 0x369   : > { %5870 = vmatmul.msk.bf16.gmra.mxu1 %vm828_vm2, %v8601_v7  ;;  %v2398_v61 = vpop.f32.mrf.mxu3 }
 0x36a   : > { %v2399_v51 = vadd.f32 %v8321_v54, %v2398_v61  ;;  %v3180_v54 = vld [vmem:[#allocation3 + $0x20] sm:$0xff]  ;;  %v8629_v61 = vpack.c.bf16 %v3182_v49, %v3181_v25  ;;  %v3186_v25 = vld [vmem:[#allocation3 + $0x68] sm:$0xff] }
 0x36b   : > { %v3210_v32 = vpack.c.bf16 %v3180_v54, %v3179_v31 }
 0x36c   : > { %v2442_v62 = vadd.f32 %v7352_v34, %v2399_v51 }
 0x36d   : > { %v8631_v51 = vpop.f32.mrf.mxu0 }
 0x36e   : > { %v6196_v55 = vpop.eup %6195  ;;  %v5772_v45 = vmul.f32 -1.442695, %v2442_v62  ;;  %5811 = vmatmul.msk.bf16.vlgmr.msrb.gmra.mxu3 %vm828_vm2, %v3209_v6 }
 0x36f   : > { %v2569_v47 = vadd.f32 1.0, %v6196_v55 }
 0x370   : > { %6197 = vpow2.f32 %v5772_v45 }
 0x371   : > { %6199 = vrcp.f32 %v2569_v47  ;;  %v2948_v44 = vand.u32 2147483648, %v2569_v47  ;;  %v2946_v9 = vand.u32 2147483647, %v2569_v47  ;;  %vm2942_vm9 = vweird.f32 %v2569_v47 }
 0x373   : > { %v2949_v48 = vor.u32 1.1754944e-38, %v2948_v44  ;;  %vm2947_vm4 = vcmp.eq.f32.partialorder %v2946_v9, 8.507059e+37  ;;  %v6007_v44 = vld [vmem:[%s9723_s9 + $0x40] sm:$0xff]  ;;  %v8644_v9 = vpop.f32.mrf.mxu1 }
 0x374   : > { %4164 = vmatpush.bf16.msrb.mxu2 %v6007_v44 }
 0x376   : > { %v6198_v16 = vpop.eup %6197 }
 0x377   : > { %v6200_v23 = vpop.eup %6199  ;;  %v2570_v20 = vadd.f32 1.0, %v6198_v16 }
 0x378   : > { %v2938_v57 = vmul.f32 %v6200_v23, %v2569_v47  ;;  %vm2943_vm11 = vweird.f32 %v6200_v23 }
 0x379   : > { %6201 = vrcp.f32 %v2570_v20  ;;  %vm2944_vm12 = vmor %vm2942_vm9, %vm2943_vm11  ;;  %v2963_v8 = vand.u32 2147483648, %v2570_v20  ;;  %v2961_v10 = vand.u32 2147483647, %v2570_v20  ;;  %vm2957_vm6 = vweird.f32 %v2570_v20 }
 0x37a   : > { %v2939_v11 = vsub.f32 1.0, %v2938_v57 }
 0x37b   : > { %v2964_v43 = vor.u32 1.1754944e-38, %v2963_v8  ;;  %vm2962_vm8 = vcmp.eq.f32.partialorder %v2961_v10, 8.507059e+37 }
 0x37c   : > { %v2940_v24 = vmul.f32 %v6200_v23, %v2939_v11 }
 0x37e   : > { %v2941_v0 = vadd.f32 %v6200_v23, %v2940_v24  ;;  %5812 = vmatmul.msk.bf16.gmra.mxu3 %vm828_vm2, %v3210_v32 }
 0x37f   : > { %v6202_v14 = vpop.eup %6201 }
 0x380   : > { %v2945_v39 = vsel %vm2944_vm12, %v6200_v23, %v2941_v0  ;;  %v2953_v42 = vmul.f32 %v6202_v14, %v2570_v20  ;;  %vm2958_vm5 = vweird.f32 %v6202_v14  ;;  %v8648_v0 = vpop.f32.mrf.mxu0 }
 0x381   : > { %v2950_v37 = vsel %vm2947_vm4, %v2949_v48, %v2945_v39  ;;  %vm2959_vm7 = vmor %vm2957_vm6, %vm2958_vm5  ;;  %v3183_v48 = vld [vmem:[#allocation3 + $0x48] sm:$0xff] }
 0x382   : > { %v3081_v35 = vmul.f32 %v2950_v37, %v2441_v12  ;;  %v2954_v27 = vsub.f32 1.0, %v2953_v42  ;;  %v8622_v12 = vld [vmem:[%s9722_s8] ss:$0 sm:$0xff] }
 0x384   : > { %3169 = vst.msk [vmem:[#allocation3 + $0x139] sm:$0xff] %vm828_vm2, %v3081_v35  ;;  %v2955_v21 = vmul.f32 %v6202_v14, %v2954_v27 }
 0x386   : > { %v2956_v41 = vadd.f32 %v6202_v14, %v2955_v21 }
 0x388   : > { %v2960_v26 = vsel %vm2959_vm7, %v6202_v14, %v2956_v41  ;;  %v3184_v14 = vld [vmem:[#allocation3 + $0x50] sm:$0xff]  ;;  %v8654_v8 = vpop.f32.mrf.mxu0 }
 0x389   : > { %v2965_v36 = vsel %vm2962_vm8, %v2964_v43, %v2960_v26  ;;  %v2401_v59 = vpop.f32.mrf.mxu3  ;;  %v8650_v39 = vpack.c.bf16 %v3184_v14, %v3183_v48 }
 0x38a   : > { %v3082_v2 = vmul.f32 %v2965_v36, %v2442_v62  ;;  %v2402_v4 = vadd.f32 %v8622_v12, %v2401_v59 }
 0x38b   : > { %v3255_v6 = vld [vmem:[#allocation3 + $0x139] sm:$0xff] }
 0x38c   : > { %3170 = vst.msk [vmem:[#allocation3 + $0x141] sm:$0xff] %vm828_vm2, %v3082_v2  ;;  %v2443_v50 = vadd.f32 %v7352_v34, %v2402_v4  ;;  %v3836_v20 = vld [vmem:[#allocation3 + $0x138] sm:$0xff] }
 0x38e   : > { %v5773_v63 = vmul.f32 -1.442695, %v2443_v50  ;;  %5813 = vmatmul.msk.bf16.gmra.mxu3 %vm828_vm2, %v8629_v61 }
 0x390   : > { %6203 = vpow2.f32 %v5773_v63 }
 0x391   : > { %v2403_v19 = vpop.f32.mrf.mxu3 }
 0x392   : > { %v2404_v62 = vadd.f32 %v8622_v12, %v2403_v19 }
 0x393   : > { %v3256_v55 = vld [vmem:[#allocation3 + $0x141] sm:$0xff] }
 0x394   : > { %v3605_v45 = vld [vmem:[#allocation3 + $0x13a] sm:$0xff]  ;;  %v3606_v47 = vld [vmem:[#allocation3 + $0x142] sm:$0xff]  ;;  %v3274_v16 = vpack.c.bf16 %v3256_v55, %v3255_v6  ;;  %v2444_v11 = vadd.f32 %v7352_v34, %v2404_v62  ;;  %v8656_v55 = vpop.f32.mrf.mxu0 }
 0x395   : > { %v3624_v23 = vpack.c.bf16 %v3606_v47, %v3605_v45  ;;  %v3837_v57 = vld [vmem:[#allocation3 + $0x140] sm:$0xff] }
 0x396   : > { %v8637_v54 = vpack.c.bf16 %v3837_v57, %v3836_v20  ;;  %5800 = vmatmul.msk.bf16.gmra.mxu2 %vm828_vm2, %v3274_v16  ;;  %v6204_v24 = vpop.eup %6203  ;;  %v5774_v31 = vmul.f32 -1.442695, %v2444_v11  ;;  %v3185_v62 = vld [vmem:[#allocation3 + $0x60] sm:$0xff] }
 0x397   : > { %5848 = vmatmul.msk.bf16.gmra.mxu0 %vm828_vm2, %v3624_v23  ;;  %v2571_v32 = vadd.f32 1.0, %v6204_v24  ;;  %v8659_v16 = vpack.c.bf16 %v3186_v25, %v3185_v62 }
 0x398   : > { %5871 = vmatmul.msk.bf16.gmra.mxu1 %vm828_vm2, %v8637_v54  ;;  %6205 = vpow2.f32 %v5774_v31  ;;  %v8663_v31 = vpop.f32.mrf.mxu1 }
 0x399   : > { %6207 = vrcp.f32 %v2571_v32  ;;  %v2978_v10 = vand.u32 2147483648, %v2571_v32  ;;  %v2976_v43 = vand.u32 2147483647, %v2571_v32  ;;  %vm2972_vm10 = vweird.f32 %v2571_v32 }
 0x39b   : > { %v2979_v2 = vor.u32 1.1754944e-38, %v2978_v10  ;;  %vm2977_vm14 = vcmp.eq.f32.partialorder %v2976_v43, 8.507059e+37 }
 0x39c   : > { %v8668_v48 = vpop.f32.mrf.mxu0 }
 0x39e   : > { %v6206_v42 = vpop.eup %6205  ;;  %5814 = vmatmul.msk.bf16.gmra.mxu3 %vm828_vm2, %v8650_v39 }
 0x39f   : > { %v6208_v37 = vpop.eup %6207  ;;  %v2572_v35 = vadd.f32 1.0, %v6206_v42 }
 0x3a0   : > { %v2968_v27 = vmul.f32 %v6208_v37, %v2571_v32  ;;  %vm2973_vm0 = vweird.f32 %v6208_v37 }
 0x3a1   : > { %6209 = vrcp.f32 %v2572_v35  ;;  %vm2974_vm13 = vmor %vm2972_vm10, %vm2973_vm0  ;;  %v2993_v6 = vand.u32 2147483648, %v2572_v35  ;;  %v2991_v47 = vand.u32 2147483647, %v2572_v35  ;;  %vm2987_vm11 = vweird.f32 %v2572_v35 }
 0x3a2   : > { %v2969_v21 = vsub.f32 1.0, %v2968_v27 }
 0x3a3   : > { %v2994_v20 = vor.u32 1.1754944e-38, %v2993_v6  ;;  %vm2992_vm12 = vcmp.eq.f32.partialorder %v2991_v47, 8.507059e+37 }
 0x3a4   : > { %v2970_v41 = vmul.f32 %v6208_v37, %v2969_v21  ;;  %v3187_v21 = vld [vmem:[#allocation3 + $0x78] sm:$0xff]  ;;  %v8687_v62 = vpop.f32.mrf.mxu0 }
 0x3a6   : > { %v2971_v26 = vadd.f32 %v6208_v37, %v2970_v41 }
 0x3a7   : > { %v6210_v36 = vpop.eup %6209 }
 0x3a8   : > { %v2975_v59 = vsel %vm2974_vm13, %v6208_v37, %v2971_v26  ;;  %v2983_v49 = vmul.f32 %v6210_v36, %v2572_v35  ;;  %vm2988_vm15 = vweird.f32 %v6210_v36  ;;  %v3188_v37 = vld [vmem:[#allocation3 + $0x80] sm:$0xff] }
 0x3a9   : > { %v2980_v4 = vsel %vm2977_vm14, %v2979_v2, %v2975_v59  ;;  %vm2989_vm9 = vmor %vm2987_vm11, %vm2988_vm15 }
 0x3aa   : > { %v3083_v63 = vmul.f32 %v2980_v4, %v2443_v50  ;;  %v2984_v19 = vsub.f32 1.0, %v2983_v49  ;;  %v8675_v4 = vpop.f32.mrf.mxu1 }
 0x3ac   : > { %3171 = vst.msk [vmem:[#allocation3 + $0x151] sm:$0xff] %vm828_vm2, %v3083_v63  ;;  %v2985_v45 = vmul.f32 %v6210_v36, %v2984_v19 }
 0x3ae   : > { %v2986_v23 = vadd.f32 %v6210_v36, %v2985_v45  ;;  %5815 = vmatmul.msk.bf16.gmra.mxu3 %vm828_vm2, %v8659_v16 }
 0x3b0   : > { %v2990_v50 = vsel %vm2989_vm9, %v6210_v36, %v2986_v23  ;;  %v8673_v36 = vpack.c.bf16 %v3188_v37, %v3187_v21 }
 0x3b1   : > { %v2995_v57 = vsel %vm2992_vm12, %v2994_v20, %v2990_v50 }
 0x3b2   : > { %v3084_v44 = vmul.f32 %v2995_v57, %v2444_v11  ;;  %v8689_v23 = vpop.f32.mrf.mxu1 }
 0x3b3   : > { %v2406_v24 = vpop.f32.mrf.mxu3  ;;  %v3257_v27 = vld [vmem:[#allocation3 + $0x151] sm:$0xff] }
 0x3b4   : > { %v2407_v32 = vadd.f32 %v8622_v12, %v2406_v24  ;;  %3172 = vst.msk [vmem:[#allocation3 + $0x159] sm:$0xff] %vm828_vm2, %v3084_v44  ;;  %v3838_v59 = vld [vmem:[#allocation3 + $0x150] sm:$0xff]  ;;  %v3190_v44 = vld [vmem:[#allocation3 + $0x98] sm:$0xff]  ;;  %v8691_v24 = vpop.f32.mrf.mxu0 }
 0x3b5   : > { %9794 = vst [vmem:[#allocation18_spill] sm:$0xff] %v8691_v24  ;;  %v4047_v24 = vld [vmem:[#allocation3 + $0x31] sm:$0xff] }
 0x3b6   : > { %v2445_v14 = vadd.f32 %v7352_v34, %v2407_v32 }
 0x3b8   : > { %v5775_v42 = vmul.f32 -1.442695, %v2445_v14 }
 0x3ba   : > { %6211 = vpow2.f32 %v5775_v42  ;;  %v3189_v42 = vld [vmem:[#allocation3 + $0x90] sm:$0xff] }
 0x3bb   : > { %v2408_v35 = vpop.f32.mrf.mxu3  ;;  %v3258_v11 = vld [vmem:[#allocation3 + $0x159] sm:$0xff] }
 0x3bc   : > { %v2409_v10 = vadd.f32 %v8622_v12, %v2408_v35  ;;  %v3607_v41 = vld [vmem:[#allocation3 + $0x152] sm:$0xff]  ;;  %v3608_v43 = vld [vmem:[#allocation3 + $0x15a] sm:$0xff]  ;;  %v8671_v26 = vpack.c.bf16 %v3258_v11, %v3257_v27  ;;  %v8693_v35 = vpack.c.bf16 %v3190_v44, %v3189_v42 }
 0x3bd   : > { %v3625_v2 = vpack.c.bf16 %v3608_v43, %v3607_v41  ;;  %v3839_v49 = vld [vmem:[#allocation3 + $0x158] sm:$0xff]  ;;  %v8697_v43 = vpop.f32.mrf.mxu1 }
 0x3be   : > { %9793 = vst [vmem:[#allocation17_spill] sm:$0xff] %v8671_v26  ;;  %v2446_v25 = vadd.f32 %v7352_v34, %v2409_v10  ;;  %v8678_v63 = vpack.c.bf16 %v3839_v49, %v3838_v59  ;;  %5801 = vmatmul.msk.bf16.gmra.mxu2 %vm828_vm2, %v8671_v26  ;;  %5816 = vmatmul.msk.bf16.gmra.mxu3 %vm828_vm2, %v8673_v36 }
 0x3bf   : > { %5849 = vmatmul.msk.bf16.gmra.mxu0 %vm828_vm2, %v3625_v2 }
 0x3c0   : > { %v6212_v19 = vpop.eup %6211  ;;  %v5776_v6 = vmul.f32 -1.442695, %v2446_v25  ;;  %5872 = vmatmul.msk.bf16.gmra.mxu1 %vm828_vm2, %v8678_v63 }
 0x3c1   : > { %v2573_v45 = vadd.f32 1.0, %v6212_v19 }
 0x3c2   : > { %6213 = vpow2.f32 %v5776_v6 }
 0x3c3   : > { %6215 = vrcp.f32 %v2573_v45  ;;  %v3008_v37 = vand.u32 2147483648, %v2573_v45  ;;  %v3006_v21 = vand.u32 2147483647, %v2573_v45  ;;  %vm3002_vm5 = vweird.f32 %v2573_v45 }
 0x3c5   : > { %v3009_v41 = vor.u32 1.1754944e-38, %v3008_v37  ;;  %vm3007_vm7 = vcmp.eq.f32.partialorder %v3006_v21, 8.507059e+37 }
 0x3c8   : > { %v6214_v47 = vpop.eup %6213 }
 0x3c9   : > { %v6216_v20 = vpop.eup %6215  ;;  %v2574_v50 = vadd.f32 1.0, %v6214_v47  ;;  %v8699_v47 = vpop.f32.mrf.mxu0 }
 0x3ca   : > { %v2998_v57 = vmul.f32 %v6216_v20, %v2573_v45  ;;  %vm3003_vm4 = vweird.f32 %v6216_v20  ;;  %9795 = vst [vmem:[#allocation19_spill] sm:$0xff] %v8699_v47 }
 0x3cb   : > { %6217 = vrcp.f32 %v2574_v50  ;;  %vm3004_vm6 = vmor %vm3002_vm5, %vm3003_vm4  ;;  %vm3017_vm0 = vweird.f32 %v2574_v50 }
 0x3cc   : > { %v2999_v32 = vsub.f32 1.0, %v2998_v57  ;;  %v3023_v57 = vand.u32 2147483648, %v2574_v50 }
 0x3ce   : > { %v3000_v27 = vmul.f32 %v6216_v20, %v2999_v32  ;;  %5817 = vmatmul.msk.bf16.gmra.mxu3 %vm828_vm2, %v8693_v35  ;;  %v3021_v32 = vand.u32 2147483647, %v2574_v50  ;;  %v3024_v42 = vor.u32 1.1754944e-38, %v3023_v57 }
 0x3d0   : > { %v3001_v10 = vadd.f32 %v6216_v20, %v3000_v27  ;;  %vm3022_vm13 = vcmp.eq.f32.partialorder %v3021_v32, 8.507059e+37  ;;  %v8702_v27 = vpop.f32.mrf.mxu2 }
 0x3d1   : > { %v6218_v11 = vpop.eup %6217  ;;  %9796 = vst [vmem:[#allocation20_spill] sm:$0xff] %v8702_v27  ;;  %v4046_v27 = vld [vmem:[#allocation3 + $0x21] sm:$0xff] }
 0x3d2   : > { %v3005_v2 = vsel %vm3004_vm6, %v6216_v20, %v3001_v10  ;;  %v3013_v59 = vmul.f32 %v6218_v11, %v2574_v50  ;;  %vm3018_vm8 = vweird.f32 %v6218_v11  ;;  %v3192_v20 = vld [vmem:[#allocation3 + $0xb0] sm:$0xff] }
 0x3d3   : > { %v3010_v49 = vsel %vm3007_vm7, %v3009_v41, %v3005_v2  ;;  %vm3019_vm10 = vmor %vm3017_vm0, %vm3018_vm8  ;;  %v3191_v41 = vld [vmem:[#allocation3 + $0xa8] sm:$0xff] }
 0x3d4   : > { %v3085_v19 = vmul.f32 %v3010_v49, %v2445_v14  ;;  %v3014_v6 = vsub.f32 1.0, %v3013_v59  ;;  %v8704_v14 = vpop.f32.mrf.mxu1  ;;  %v8706_v2 = vpack.c.bf16 %v3192_v20, %v3191_v41  ;;  %v8709_v59 = vpop.f32.mrf.mxu0 }
 0x3d5   : > { %9797 = vst [vmem:[#allocation21_spill] sm:$0xff] %v8709_v59 }
 0x3d6   : > { %3173 = vst.msk [vmem:[#allocation3 + $0x169] sm:$0xff] %vm828_vm2, %v3085_v19  ;;  %v3015_v44 = vmul.f32 %v6218_v11, %v3014_v6 }
 0x3d8   : > { %v3016_v45 = vadd.f32 %v6218_v11, %v3015_v44  ;;  %v8714_v19 = vpop.f32.mrf.mxu2 }
 0x3d9   : > { %9798 = vst [vmem:[#allocation22_spill] sm:$0xff] %v8714_v19 }
 0x3da   : > { %v3020_v37 = vsel %vm3019_vm10, %v6218_v11, %v3016_v45 }
 0x3db   : > { %v3025_v21 = vsel %vm3022_vm13, %v3024_v42, %v3020_v37 }
 0x3dc   : > { %v3086_v10 = vmul.f32 %v3025_v21, %v2446_v25  ;;  %v8719_v32 = vpop.f32.mrf.mxu1  ;;  %v8729_v41 = vpop.f32.mrf.mxu0 }
 0x3dd   : > { %v3259_v49 = vld [vmem:[#allocation3 + $0x169] sm:$0xff]  ;;  %9800 = vst [vmem:[#allocation24_spill] sm:$0xff] %v8729_v41 }
 0x3de   : > { %3174 = vst.msk [vmem:[#allocation3 + $0x171] sm:$0xff] %vm828_vm2, %v3086_v10  ;;  %5818 = vmatmul.msk.bf16.gmra.mxu3 %vm828_vm2, %v8706_v2  ;;  %v3840_v37 = vld [vmem:[#allocation3 + $0x168] sm:$0xff] }
 0x3e1   : > { %v2411_v50 = vpop.f32.mrf.mxu3 }
 0x3e2   : > { %v2412_v11 = vadd.f32 %v8622_v12, %v2411_v50 }
 0x3e4   : > { %v8717_v6 = vadd.f32 %v7352_v34, %v2412_v11  ;;  %v3194_v11 = vld [vmem:[#allocation3 + $0xc8] sm:$0xff]  ;;  %v8763_v19 = vpop.f32.mrf.mxu0 }
 0x3e5   : > { %v3260_v25 = vld [vmem:[#allocation3 + $0x171] sm:$0xff]  ;;  %9802 = vst [vmem:[#allocation26_spill] sm:$0xff] %v8763_v19 }
 0x3e6   : > { %v3609_v57 = vld [vmem:[#allocation3 + $0x16a] sm:$0xff]  ;;  %v3610_v44 = vld [vmem:[#allocation3 + $0x172] sm:$0xff]  ;;  %v8721_v45 = vpack.c.bf16 %v3260_v25, %v3259_v49  ;;  %v5777_v21 = vmul.f32 -1.442695, %v8717_v6  ;;  %v3193_v25 = vld [vmem:[#allocation3 + $0xc0] sm:$0xff] }
 0x3e7   : > { %v3626_v42 = vpack.c.bf16 %v3610_v44, %v3609_v57  ;;  %v3841_v20 = vld [vmem:[#allocation3 + $0x170] sm:$0xff]  ;;  %v8734_v57 = vpop.f32.mrf.mxu2 }
 0x3e8   : > { %9799 = vst [vmem:[#allocation23_spill] sm:$0xff] %v8721_v45  ;;  %v8724_v10 = vpack.c.bf16 %v3841_v20, %v3840_v37  ;;  %5802 = vmatmul.msk.bf16.gmra.mxu2 %vm828_vm2, %v8721_v45  ;;  %6219 = vpow2.f32 %v5777_v21  ;;  %v8739_v37 = vpack.c.bf16 %v3194_v11, %v3193_v25  ;;  %v6010_v20 = vld [vmem:[%s9723_s9 + $0x58] sm:$0xff]  ;;  %v6011_v11 = vld [vmem:[%s9723_s9 + $0x60] sm:$0xff] }
 0x3e9   : > { %5850 = vmatmul.msk.bf16.gmra.mxu0 %vm828_vm2, %v3626_v42  ;;  %v2413_v50 = vpop.f32.mrf.mxu3  ;;  %9801 = vst [vmem:[#allocation25_spill] sm:$0xff] %v8734_v57  ;;  %v6012_v42 = vld [vmem:[%s9723_s9 + $0x68] sm:$0xff]  ;;  %v6014_v21 = vld [vmem:[%s9723_s9 + $0x78] sm:$0xff]  ;;  %4396 = vmatpush.bf16.msra.mxu3 %v6010_v20 }
 0x3ea   : > { %5873 = vmatmul.msk.bf16.gmra.mxu1 %vm828_vm2, %v8724_v10  ;;  %v2414_v49 = vadd.f32 %v8622_v12, %v2413_v50  ;;  %v6016_v12 = vld [vmem:[%s9723_s9 + $0x88] sm:$0xff]  ;;  %4630 = vmatpush.bf16.msrb.mxu0 %v6012_v42  ;;  %v4077_v42 = vpack.c.bf16 %v4046_v27, %v4045_v22  ;;  %v3195_v22 = vld [vmem:[#allocation3 + $0xd8] sm:$0xff] }
 0x3eb   : > { %5096 = vmatpush.bf16.msra.mxu2 %v6016_v12  ;;  %4863 = vmatpush.bf16.msra.mxu1 %v6014_v21 }
 0x3ec   : > { %v8737_v44 = vadd.f32 %v7352_v34, %v2414_v49  ;;  %v8759_v49 = vpop.f32.mrf.mxu1  ;;  %v8774_v27 = vpop.f32.mrf.mxu0 }
 0x3ed   : > { %9805 = vst [vmem:[#allocation29_spill] sm:$0xff] %v8774_v27 }
 0x3ee   : > { %v6220_v34 = vpop.eup %6219  ;;  %v5778_v50 = vmul.f32 -1.442695, %v8737_v44  ;;  %5819 = vmatmul.msk.bf16.gmra.mxu3 %vm828_vm2, %v8739_v37  ;;  %4631 = vmatpush.bf16.msrb.mxu0 %v6011_v11 }
 0x3ef   : > { %v2575_v25 = vadd.f32 1.0, %v6220_v34  ;;  %v8765_v41 = vpop.f32.mrf.mxu2  ;;  %v3196_v34 = vld [vmem:[#allocation3 + $0xe0] sm:$0xff] }
 0x3f0   : > { %6221 = vpow2.f32 %v5778_v50  ;;  %9803 = vst [vmem:[#allocation27_spill] sm:$0xff] %v8765_v41  ;;  %v8776_v19 = vpack.c.bf16 %v3196_v34, %v3195_v22  ;;  %v4048_v22 = vld [vmem:[#allocation3 + $0x39] sm:$0xff] }
 0x3f1   : > { %6223 = vrcp.f32 %v2575_v25  ;;  %v8761_v57 = vpop.f32.mrf.mxu3  ;;  %v3038_v11 = vand.u32 2147483648, %v2575_v25  ;;  %vm3032_vm15 = vweird.f32 %v2575_v25 }
 0x3f3   : > { %v3039_v26 = vor.u32 1.1754944e-38, %v3038_v11 }
 0x3f4   : > { %v8770_v12 = vpop.f32.mrf.mxu1  ;;  %v8791_v11 = vpop.f32.mrf.mxu0 }
 0x3f5   : > { %9804 = vst [vmem:[#allocation28_spill] sm:$0xff] %v8770_v12 }
 0x3f6   : > { %v6222_v45 = vpop.eup %6221  ;;  %9807 = vst [vmem:[#allocation31_spill] sm:$0xff] %v8791_v11 }
 0x3f7   : > { %v6224_v56 = vpop.eup %6223  ;;  %v2576_v59 = vadd.f32 1.0, %v6222_v45  ;;  %v3036_v45 = vand.u32 2147483647, %v2575_v25 }
 0x3f8   : > { %5883 = vmatmul.msk.bf16.vlgmr.msrb.gmra.mxu2 %vm828_vm2, %v4077_v42  ;;  %v3028_v20 = vmul.f32 %v6224_v56, %v2575_v25  ;;  %vm3033_vm14 = vweird.f32 %v6224_v56  ;;  %v8778_v42 = vpop.f32.mrf.mxu2 }
 0x3f9   : > { %5931 = vmatmul.msk.bf16.vlgmr.msrb.gmra.mxu0 %vm828_vm2, %v8629_v61  ;;  %6225 = vrcp.f32 %v2576_v59  ;;  %v8772_v21 = vpop.f32.mrf.mxu3  ;;  %9806 = vst [vmem:[#allocation30_spill] sm:$0xff] %v8778_v42  ;;  %vm3034_vm11 = vmor %vm3032_vm15, %vm3033_vm14  ;;  %vm3037_vm9 = vcmp.eq.f32.partialorder %v3036_v45, 8.507059e+37  ;;  %v3051_v42 = vand.u32 2147483647, %v2576_v59  ;;  %vm3047_vm4 = vweird.f32 %v2576_v59 }
 0x3fa   : > { %v3029_v50 = vsub.f32 1.0, %v3028_v20 }
 0x3fb   : > { %vm3052_vm6 = vcmp.eq.f32.partialorder %v3051_v42, 8.507059e+37 }
 0x3fc   : > { %v3030_v41 = vmul.f32 %v6224_v56, %v3029_v50  ;;  %v8785_v5 = vpop.f32.mrf.mxu1 }
 0x3fe   : > { %v3031_v61 = vadd.f32 %v6224_v56, %v3030_v41  ;;  %5820 = vmatmul.msk.bf16.gmra.mxu3 %vm828_vm2, %v8776_v19  ;;  %v3053_v41 = vand.u32 2147483648, %v2576_v59 }
 0x3ff   : > { %v6226_v17 = vpop.eup %6225 }
 0x400   : > { %v3035_v20 = vsel %vm3034_vm11, %v6224_v56, %v3031_v61  ;;  %v3043_v47 = vmul.f32 %v6226_v17, %v2576_v59  ;;  %vm3048_vm12 = vweird.f32 %v6226_v17  ;;  %v6013_v56 = vld [vmem:[%s9723_s9 + $0x70] sm:$0xff] }
 0x401   : > { %v3040_v12 = vsel %vm3037_vm9, %v3039_v26, %v3035_v20  ;;  %v8782_v27 = vpop.f32.mrf.mxu3  ;;  %v4078_v26 = vpack.c.bf16 %v4048_v22, %v4047_v24  ;;  %4864 = vmatpush.bf16.msra.mxu1 %v6013_v56  ;;  %vm3049_vm5 = vmor %vm3047_vm4, %vm3048_vm12 }
 0x402   : > { %v3087_v50 = vmul.f32 %v3040_v12, %v8717_v6  ;;  %v3044_v34 = vsub.f32 1.0, %v3043_v47  ;;  %v3054_v47 = vor.u32 1.1754944e-38, %v3053_v41  ;;  %v8796_v6 = vpop.f32.mrf.mxu2 }
 0x403   : > { %9808 = vst [vmem:[#allocation32_spill] sm:$0xff] %v8796_v6  ;;  %v4053_v6 = vld [vmem:[#allocation3 + $0x79] sm:$0xff] }
 0x404   : > { %3175 = vst.msk [vmem:[#allocation3 + $0x181] sm:$0xff] %vm828_vm2, %v3087_v50  ;;  %v3045_v25 = vmul.f32 %v6226_v17, %v3044_v34  ;;  %v8802_v59 = vpop.f32.mrf.mxu1  ;;  %v8806_v50 = vpop.f32.mrf.mxu0 }
 0x405   : > { %9809 = vst [vmem:[#allocation33_spill] sm:$0xff] %v8806_v50 }
 0x406   : > { %v3046_v45 = vadd.f32 %v6226_v17, %v3045_v25  ;;  %v4049_v25 = vld [vmem:[#allocation3 + $0x49] sm:$0xff] }
 0x408   : > { %5884 = vmatmul.msk.bf16.gmra.mxu2 %vm828_vm2, %v4078_v26  ;;  %v3050_v12 = vsel %vm3049_vm5, %v6226_v17, %v3046_v45  ;;  %v4050_v17 = vld [vmem:[#allocation3 + $0x51] sm:$0xff] }
 0x409   : > { %5932 = vmatmul.msk.bf16.gmra.mxu0 %vm828_vm2, %v8650_v39  ;;  %v3055_v61 = vsel %vm3052_vm6, %v3054_v47, %v3050_v12  ;;  %v8798_v20 = vpop.f32.mrf.mxu3 }
 0x40a   : > { %v3088_v24 = vmul.f32 %v3055_v61, %v8737_v44  ;;  %v8808_v34 = vpop.f32.mrf.mxu2  ;;  %v4079_v44 = vpack.c.bf16 %v4050_v17, %v4049_v25  ;;  %v4052_v17 = vld [vmem:[#allocation3 + $0x69] sm:$0xff] }
 0x40b   : > { %9810 = vst [vmem:[#allocation34_spill] sm:$0xff] %v8808_v34  ;;  %v3842_v42 = vld [vmem:[#allocation3 + $0x180] sm:$0xff] }
 0x40c   : > { %3176 = vst.msk [vmem:[#allocation3 + $0x189] sm:$0xff] %vm828_vm2, %v3088_v24  ;;  %v8816_v56 = vpop.f32.mrf.mxu1  ;;  %v8823_v45 = vpop.f32.mrf.mxu0 }
 0x40d   : > { %9811 = vst [vmem:[#allocation35_spill] sm:$0xff] %v8816_v56 }
 0x40e   : > { %5821 = vmatmul.msk.bf16.gmra.mxu3 %vm828_vm2, %v8529_v58  ;;  %9812 = vst [vmem:[#allocation36_spill] sm:$0xff] %v8823_v45 }
 0x411   : > { %v8810_v39 = vpop.f32.mrf.mxu3 }
 0x412   : > { %v8825_v47 = vpop.f32.mrf.mxu2 }
 0x413   : > { %v3843_v22 = vld [vmem:[#allocation3 + $0x188] sm:$0xff]  ;;  %9813 = vst [vmem:[#allocation37_spill] sm:$0xff] %v8825_v47 }
 0x414   : > { %v8812_v41 = vpack.c.bf16 %v3843_v22, %v3842_v42  ;;  %v8829_v12 = vpop.f32.mrf.mxu1  ;;  %v8835_v42 = vpop.f32.mrf.mxu0  ;;  %v4051_v22 = vld [vmem:[#allocation3 + $0x61] sm:$0xff] }
 0x415   : > { %9814 = vst [vmem:[#allocation38_spill] sm:$0xff] %v8829_v12  ;;  %v4061_v12 = vld [vmem:[#allocation3 + $0xd9] sm:$0xff] }
 0x416   : > { %5874 = vmatmul.msk.bf16.gmra.mxu1 %vm828_vm2, %v8812_v41  ;;  %9816 = vst [vmem:[#allocation40_spill] sm:$0xff] %v8835_v42 }
 0x418   : > { %5885 = vmatmul.msk.bf16.gmra.mxu2 %vm828_vm2, %v4079_v44 }
 0x419   : > { %5933 = vmatmul.msk.bf16.gmra.mxu0 %vm828_vm2, %v8659_v16  ;;  %v8821_v58 = vpop.f32.mrf.mxu3  ;;  %v4080_v16 = vpack.c.bf16 %v4052_v17, %v4051_v22  ;;  %v4054_v17 = vld [vmem:[#allocation3 + $0x81] sm:$0xff] }
 0x41a   : > { %v8833_v24 = vpop.f32.mrf.mxu2 }
 0x41b   : > { %9815 = vst [vmem:[#allocation39_spill] sm:$0xff] %v8833_v24 }
 0x41c   : > { %v8841_v25 = vpop.f32.mrf.mxu1  ;;  %v8847_v34 = vpop.f32.mrf.mxu0 }
 0x41d   : > { %9817 = vst [vmem:[#allocation41_spill] sm:$0xff] %v8841_v25 }
 0x41e   : > { %5822 = vmatmul.msk.bf16.gmra.mxu3 %vm828_vm2, %v8568_v52  ;;  %9819 = vst [vmem:[#allocation43_spill] sm:$0xff] %v8847_v34 }
 0x421   : > { %v8831_v61 = vpop.f32.mrf.mxu3 }
 0x422   : > { %v8845_v47 = vpop.f32.mrf.mxu2 }
 0x423   : > { %9818 = vst [vmem:[#allocation42_spill] sm:$0xff] %v8845_v47 }
 0x424   : > { %v8857_v42 = vpop.f32.mrf.mxu0 }
 0x425   : > { %9822 = vst [vmem:[#allocation46_spill] sm:$0xff] %v8857_v42 }
 0x426   : > { %5955 = vmatmul.msk.bf16.vlgmr.msra.gmra.mxu1 %vm828_vm2, %v4078_v26  ;;  %v8853_v26 = vpop.f32.mrf.mxu1 }
 0x427   : > { %9820 = vst [vmem:[#allocation44_spill] sm:$0xff] %v8853_v26  ;;  %v4059_v26 = vld [vmem:[#allocation3 + $0xc1] sm:$0xff] }
 0x428   : > { %5886 = vmatmul.msk.bf16.gmra.mxu2 %vm828_vm2, %v4080_v16 }
 0x429   : > { %5934 = vmatmul.msk.bf16.gmra.mxu0 %vm828_vm2, %v8673_v36  ;;  %v8843_v52 = vpop.f32.mrf.mxu3  ;;  %v4081_v36 = vpack.c.bf16 %v4054_v17, %v4053_v6  ;;  %v4056_v17 = vld [vmem:[#allocation3 + $0x99] sm:$0xff] }
 0x42a   : > { %v8855_v22 = vpop.f32.mrf.mxu2 }
 0x42b   : > { %9821 = vst [vmem:[#allocation45_spill] sm:$0xff] %v8855_v22 }
 0x42c   : > { %v8871_v22 = vpop.f32.mrf.mxu0 }
 0x42d   : > { %9825 = vst [vmem:[#allocation49_spill] sm:$0xff] %v8871_v22  ;;  %v6009_v22 = vld [vmem:[%s9723_s9 + $0x50] sm:$0xff] }
 0x42e   : > { %5823 = vmatmul.msk.bf16.gmra.mxu3 %vm828_vm2, %v8601_v7  ;;  %v8865_v7 = vpop.f32.mrf.mxu1 }
 0x42f   : > { %9823 = vst [vmem:[#allocation47_spill] sm:$0xff] %v8865_v7  ;;  %4397 = vmatpush.bf16.msra.mxu3 %v6009_v22  ;;  %v6015_v22 = vld [vmem:[%s9723_s9 + $0x80] sm:$0xff] }
 0x430   : > { %5097 = vmatpush.bf16.msra.mxu2 %v6015_v22 }
 0x431   : > { %v8851_v24 = vpop.f32.mrf.mxu3 }
 0x432   : > { %v8867_v34 = vpop.f32.mrf.mxu2 }
 0x433   : > { %9824 = vst [vmem:[#allocation48_spill] sm:$0xff] %v8867_v34 }
 0x436   : > { %5956 = vmatmul.msk.bf16.gmra.mxu1 %vm828_vm2, %v4079_v44  ;;  %v4055_v44 = vld [vmem:[#allocation3 + $0x91] sm:$0xff]  ;;  %v8875_v42 = vpop.f32.mrf.mxu1 }
 0x437   : > { %9826 = vst [vmem:[#allocation50_spill] sm:$0xff] %v8875_v42  ;;  %v4082_v45 = vpack.c.bf16 %v4056_v17, %v4055_v44 }
 0x438   : > { %5887 = vmatmul.msk.bf16.gmra.mxu2 %vm828_vm2, %v4081_v36 }
 0x439   : > { %5935 = vmatmul.msk.bf16.gmra.mxu0 %vm828_vm2, %v8693_v35  ;;  %v8863_v47 = vpop.f32.mrf.mxu3  ;;  %v8883_v35 = vpop.f32.mrf.mxu0 }
 0x43a   : > { %v8877_v50 = vpop.f32.mrf.mxu2  ;;  %9828 = vst [vmem:[#allocation52_spill] sm:$0xff] %v8883_v35 }
 0x43b   : > { %9827 = vst [vmem:[#allocation51_spill] sm:$0xff] %v8877_v50  ;;  %v4057_v50 = vld [vmem:[#allocation3 + $0xa9] sm:$0xff] }
 0x43e   : > { %5824 = vmatmul.msk.bf16.gmra.mxu3 %vm828_vm2, %v8637_v54  ;;  %v8890_v7 = vpop.f32.mrf.mxu1 }
 0x43f   : > { %9829 = vst [vmem:[#allocation53_spill] sm:$0xff] %v8890_v7 }
 0x441   : > { %v8873_v6 = vpop.f32.mrf.mxu3  ;;  %v8898_v44 = vpop.f32.mrf.mxu0 }
 0x442   : > { %9831 = vst [vmem:[#allocation55_spill] sm:$0xff] %v8898_v44 }
 0x446   : > { %5957 = vmatmul.msk.bf16.gmra.mxu1 %vm828_vm2, %v4080_v16  ;;  %v8894_v16 = vpop.f32.mrf.mxu2  ;;  %v8901_v42 = vpop.f32.mrf.mxu1 }
 0x447   : > { %9830 = vst [vmem:[#allocation54_spill] sm:$0xff] %v8894_v16 }
 0x448   : > { %5888 = vmatmul.msk.bf16.gmra.mxu2 %vm828_vm2, %v4082_v45  ;;  %9832 = vst [vmem:[#allocation56_spill] sm:$0xff] %v8901_v42 }
 0x449   : > { %5936 = vmatmul.msk.bf16.gmra.mxu0 %vm828_vm2, %v8706_v2  ;;  %v8885_v34 = vpop.f32.mrf.mxu3  ;;  %v4058_v2 = vld [vmem:[#allocation3 + $0xb1] sm:$0xff]  ;;  %v8913_v44 = vpop.f32.mrf.mxu0 }
 0x44a   : > { %v4083_v35 = vpack.c.bf16 %v4058_v2, %v4057_v50  ;;  %9834 = vst [vmem:[#allocation58_spill] sm:$0xff] %v8913_v44  ;;  %v4278_v44 = vld [vmem:[#allocation3 + $0x1a] sm:$0xff] }
 0x44e   : > { %5825 = vmatmul.msk.bf16.gmra.mxu3 %vm828_vm2, %v8678_v63  ;;  %v8909_v16 = vpop.f32.mrf.mxu2  ;;  %v8917_v50 = vpop.f32.mrf.mxu1 }
 0x44f   : > { %9833 = vst [vmem:[#allocation57_spill] sm:$0xff] %v8909_v16 }
 0x450   : > { %9835 = vst [vmem:[#allocation59_spill] sm:$0xff] %v8917_v50  ;;  %v4279_v50 = vld [vmem:[#allocation3 + $0x22] sm:$0xff] }
 0x451   : > { %v8896_v17 = vpop.f32.mrf.mxu3  ;;  %v8923_v42 = vpop.f32.mrf.mxu0 }
 0x452   : > { %9838 = vst [vmem:[#allocation62_spill] sm:$0xff] %v8923_v42  ;;  %v4310_v42 = vpack.c.bf16 %v4279_v50, %v4278_v44  ;;  %v4280_v50 = vld [vmem:[#allocation3 + $0x32] sm:$0xff] }
 0x456   : > { %5958 = vmatmul.msk.bf16.gmra.mxu1 %vm828_vm2, %v4081_v36  ;;  %v8921_v2 = vpop.f32.mrf.mxu2  ;;  %v8929_v22 = vpop.f32.mrf.mxu1 }
 0x457   : > { %9837 = vst [vmem:[#allocation61_spill] sm:$0xff] %v8921_v2 }
 0x458   : > { %5889 = vmatmul.msk.bf16.gmra.mxu2 %vm828_vm2, %v4083_v35  ;;  %9839 = vst [vmem:[#allocation63_spill] sm:$0xff] %v8929_v22  ;;  %v4062_v22 = vld [vmem:[#allocation3 + $0xe1] sm:$0xff] }
 0x459   : > { %5937 = vmatmul.msk.bf16.gmra.mxu0 %vm828_vm2, %v8739_v37  ;;  %v8911_v7 = vpop.f32.mrf.mxu3  ;;  %v4060_v37 = vld [vmem:[#allocation3 + $0xc9] sm:$0xff]  ;;  %v8935_v2 = vpop.f32.mrf.mxu0  ;;  %v4085_v56 = vpack.c.bf16 %v4062_v22, %v4061_v12 }
 0x45a   : > { %v4084_v11 = vpack.c.bf16 %v4060_v37, %v4059_v26  ;;  %9842 = vst [vmem:[#allocation66_spill] sm:$0xff] %v8935_v2 }
 0x45e   : > { %5826 = vmatmul.msk.bf16.gmra.mxu3 %vm828_vm2, %v8724_v10  ;;  %v8938_v26 = vpop.f32.mrf.mxu1 }
 0x461   : > { %v8919_v36 = vpop.f32.mrf.mxu3  ;;  %v8947_v44 = vpop.f32.mrf.mxu0 }
 0x462   : > { %9836 = vst [vmem:[#allocation60_spill] sm:$0xff] %v8919_v36  ;;  %v4528_v36 = vld [vmem:[#allocation3 + $0xf0] sm:$0xff] }
 0x466   : > { %5959 = vmatmul.msk.bf16.gmra.mxu1 %vm828_vm2, %v4082_v45  ;;  %v3500_v45 = vadd.f32 %v8761_v57, %v8326_v29  ;;  %v3502_v29 = vadd.f32 %v8772_v21, %v8356_v53  ;;  %v8957_v12 = vpop.f32.mrf.mxu1  ;;  %v3505_v53 = vadd.f32 %v8782_v27, %v8378_v33 }
 0x468   : > { %5890 = vmatmul.msk.bf16.gmra.mxu2 %vm828_vm2, %v4084_v11 }
 0x469   : > { %5938 = vmatmul.msk.bf16.gmra.mxu0 %vm828_vm2, %v8776_v19  ;;  %v8931_v16 = vpop.f32.mrf.mxu3  ;;  %v8964_v22 = vpop.f32.mrf.mxu0 }
 0x46a   : > { %9840 = vst [vmem:[#allocation64_spill] sm:$0xff] %v8931_v16  ;;  %v4529_v16 = vld [vmem:[#allocation3 + $0xf8] sm:$0xff] }
 0x46b   : > { %v8933_v25 = vpop.f32.mrf.mxu2  ;;  %v4552_v2 = vpack.c.bf16 %v4529_v16, %v4528_v36  ;;  %9844 = vst [vmem:[#allocation68_spill] sm:$0xff] %v8964_v22 }
 0x46c   : > { %9841 = vst [vmem:[#allocation65_spill] sm:$0xff] %v8933_v25  ;;  %v3780_v25 = vadd.f32 %v8589_v40, %v3500_v45  ;;  %v4531_v45 = vld [vmem:[#allocation3 + $0x110] sm:$0xff] }
 0x46e   : > { %5907 = vmatmul.msk.bf16.vlgmr.msra.gmra.mxu3 %vm828_vm2, %v4310_v42  ;;  %v4013_v42 = vadd.f32 %v8626_v60, %v3780_v25 }
 0x471   : > { %v8942_v37 = vpop.f32.mrf.mxu3  ;;  %v8981_v33 = vpop.f32.mrf.mxu0 }
 0x473   : > { %v8944_v19 = vpop.f32.mrf.mxu2 }
 0x474   : > { %9843 = vst [vmem:[#allocation67_spill] sm:$0xff] %v8944_v19  ;;  %v4281_v19 = vld [vmem:[#allocation3 + $0x3a] sm:$0xff] }
 0x475   : > { %v8961_v36 = vpack.c.bf16 %v4281_v19, %v4280_v50  ;;  %v3782_v50 = vadd.f32 %v8617_v46, %v3505_v53 }
 0x476   : > { %5960 = vmatmul.msk.bf16.gmra.mxu1 %vm828_vm2, %v4083_v35  ;;  %v3781_v35 = vadd.f32 %v8603_v30, %v3502_v29  ;;  %v4063_v30 = vld [vmem:[#allocation3 + $0xf1] sm:$0xff]  ;;  %v4530_v29 = vld [vmem:[#allocation3 + $0x108] sm:$0xff] }
 0x477   : > { %v4553_v22 = vpack.c.bf16 %v4531_v45, %v4530_v29  ;;  %v4066_v29 = vld [vmem:[#allocation3 + $0x111] sm:$0xff] }
 0x478   : > { %5891 = vmatmul.msk.bf16.gmra.mxu2 %vm828_vm2, %v4085_v56  ;;  %v4014_v21 = vadd.f32 %v8644_v9, %v3781_v35  ;;  %v3507_v9 = vadd.f32 %v8798_v20, %v8418_v38  ;;  %v4015_v35 = vadd.f32 %v8663_v31, %v3782_v50  ;;  %v3510_v38 = vadd.f32 %v8810_v39, %v8442_v28  ;;  %v4533_v50 = vld [vmem:[#allocation3 + $0x128] sm:$0xff] }
 0x479   : > { %5939 = vmatmul.msk.bf16.gmra.mxu0 %vm828_vm2, %v4552_v2  ;;  %v8954_v57 = vpop.f32.mrf.mxu3  ;;  %v4064_v2 = vld [vmem:[#allocation3 + $0xf9] sm:$0xff]  ;;  %v3512_v28 = vadd.f32 %v8821_v58, %v8459_v15  ;;  %v3515_v15 = vadd.f32 %v8831_v61, %v8476_v13  ;;  %v3517_v13 = vadd.f32 %v8843_v52, %v8489_v3  ;;  %v3520_v3 = vadd.f32 %v8851_v24, %v8497_v1 }
 0x47b   : > { %v4166_v40 = vpop.f32.mrf.mxu2 }
 0x47c   : > { %v8959_v16 = vadd.f32 %v4166_v40, %v4013_v42  ;;  %v8973_v42 = vpop.f32.mrf.mxu1  ;;  %v4086_v40 = vpack.c.bf16 %v4064_v2, %v4063_v30 }
 0x47e   : > { %5908 = vmatmul.msk.bf16.gmra.mxu3 %vm828_vm2, %v8961_v36 }
 0x481   : > { %v8970_v60 = vpop.f32.mrf.mxu3 }
 0x483   : > { %v4168_v25 = vpop.f32.mrf.mxu2 }
 0x484   : > { %v8975_v19 = vadd.f32 %v4168_v25, %v4014_v21  ;;  %v4282_v21 = vld [vmem:[#allocation3 + $0x4a] sm:$0xff]  ;;  %v4283_v25 = vld [vmem:[#allocation3 + $0x52] sm:$0xff]  ;;  %v8993_v45 = vpop.f32.mrf.mxu1 }
 0x485   : > { %v8990_v2 = vpack.c.bf16 %v4283_v25, %v4282_v21  ;;  %v3784_v21 = vadd.f32 %v8648_v0, %v3510_v38 }
 0x486   : > { %5961 = vmatmul.msk.bf16.gmra.mxu1 %vm828_vm2, %v4084_v11  ;;  %v3783_v11 = vadd.f32 %v8631_v51, %v3507_v9  ;;  %v4065_v51 = vld [vmem:[#allocation3 + $0x109] sm:$0xff]  ;;  %v4532_v9 = vld [vmem:[#allocation3 + $0x120] sm:$0xff] }
 0x487   : > { %v4017_v39 = vadd.f32 %v8689_v23, %v3784_v21 }
 0x488   : > { %5892 = vmatmul.msk.bf16.gmra.mxu2 %vm828_vm2, %v4086_v40  ;;  %v4016_v20 = vadd.f32 %v8675_v4, %v3783_v11  ;;  %v4284_v11 = vld [vmem:[#allocation3 + $0x62] sm:$0xff] }
 0x489   : > { %5940 = vmatmul.msk.bf16.gmra.mxu0 %vm828_vm2, %v4553_v22  ;;  %v8985_v27 = vpop.f32.mrf.mxu3  ;;  %v8997_v22 = vpop.f32.mrf.mxu0 }
 0x48a   : > { %9845 = vst [vmem:[#allocation69_spill] sm:$0xff] %v8997_v22  ;;  %v4554_v22 = vpack.c.bf16 %v4533_v50, %v4532_v9 }
 0x48b   : > { %v4171_v46 = vpop.f32.mrf.mxu2 }
 0x48c   : > { %v8988_v53 = vadd.f32 %v4171_v46, %v4015_v35  ;;  %v9007_v25 = vpop.f32.mrf.mxu1  ;;  %v4087_v46 = vpack.c.bf16 %v4066_v29, %v4065_v51  ;;  %v4068_v51 = vld [vmem:[#allocation3 + $0x129] sm:$0xff] }
 0x48e   : > { %5909 = vmatmul.msk.bf16.gmra.mxu3 %vm828_vm2, %v8990_v2 }
 0x491   : > { %v9001_v31 = vpop.f32.mrf.mxu3  ;;  %v9017_v0 = vpop.f32.mrf.mxu0 }
 0x492   : > { %9846 = vst [vmem:[#allocation70_spill] sm:$0xff] %v9017_v0 }
 0x493   : > { %v4173_v30 = vpop.f32.mrf.mxu2 }
 0x494   : > { %v9004_v35 = vadd.f32 %v4173_v30, %v4016_v20  ;;  %v4285_v20 = vld [vmem:[#allocation3 + $0x6a] sm:$0xff] }
 0x495   : > { %v9021_v29 = vpack.c.bf16 %v4285_v20, %v4284_v11  ;;  %v4286_v20 = vld [vmem:[#allocation3 + $0x7a] sm:$0xff] }
 0x496   : > { %5962 = vmatmul.msk.bf16.gmra.mxu1 %vm828_vm2, %v4085_v56  ;;  %v3785_v56 = vadd.f32 %v8654_v8, %v3512_v28  ;;  %v3786_v8 = vadd.f32 %v8656_v55, %v3515_v15  ;;  %v3787_v15 = vadd.f32 %v8668_v48, %v3517_v13  ;;  %v3788_v48 = vadd.f32 %v8687_v62, %v3520_v3  ;;  %v4288_v62 = vld [vmem:[#allocation3 + $0x92] sm:$0xff]  ;;  %v9852_v3 = vld [vmem:[#allocation18_spill] sm:$0xff] }
 0x498   : > { %5893 = vmatmul.msk.bf16.gmra.mxu2 %vm828_vm2, %v4087_v46  ;;  %v4018_v58 = vadd.f32 %v8697_v43, %v3785_v56  ;;  %v4019_v61 = vadd.f32 %v8704_v14, %v3786_v8  ;;  %v4020_v52 = vadd.f32 %v8719_v32, %v3787_v15  ;;  %v4069_v8 = vld [vmem:[#allocation3 + $0x139] sm:$0xff]  ;;  %v3522_v32 = vadd.f32 %v8863_v47, %v8503_v18 }
 0x499   : > { %5941 = vmatmul.msk.bf16.gmra.mxu0 %vm828_vm2, %v4554_v22  ;;  %v9014_v4 = vpop.f32.mrf.mxu3  ;;  %v9026_v22 = vpop.f32.mrf.mxu1 }
 0x49a   : > { %v9035_v21 = vpop.f32.mrf.mxu0 }
 0x49b   : > { %v4176_v38 = vpop.f32.mrf.mxu2  ;;  %9847 = vst [vmem:[#allocation71_spill] sm:$0xff] %v9035_v21 }
 0x49c   : > { %v9019_v30 = vadd.f32 %v4176_v38, %v4017_v39  ;;  %v4067_v39 = vld [vmem:[#allocation3 + $0x121] sm:$0xff] }
 0x49d   : > { %v4088_v28 = vpack.c.bf16 %v4068_v51, %v4067_v39  ;;  %v4287_v38 = vld [vmem:[#allocation3 + $0x82] sm:$0xff] }
 0x49e   : > { %5910 = vmatmul.msk.bf16.gmra.mxu3 %vm828_vm2, %v9021_v29  ;;  %v4070_v51 = vld [vmem:[#allocation3 + $0x141] sm:$0xff] }
 0x49f   : > { %v4089_v13 = vpack.c.bf16 %v4070_v51, %v4069_v8 }
 0x4a1   : > { %v9030_v23 = vpop.f32.mrf.mxu3  ;;  %v9039_v11 = vpop.f32.mrf.mxu1 }
 0x4a3   : > { %v4178_v50 = vpop.f32.mrf.mxu2 }
 0x4a4   : > { %v9033_v9 = vadd.f32 %v4178_v50, %v4018_v58  ;;  %v9054_v58 = vpop.f32.mrf.mxu0 }
 0x4a5   : > { %9848 = vst [vmem:[#allocation72_spill] sm:$0xff] %v9054_v58  ;;  %v4770_v58 = vld [vmem:[#allocation3 + $0x159] sm:$0xff] }
 0x4a6   : > { %5963 = vmatmul.msk.bf16.gmra.mxu1 %vm828_vm2, %v4086_v40  ;;  %v9051_v40 = vpack.c.bf16 %v4287_v38, %v4286_v20  ;;  %v4021_v20 = vadd.f32 %v8759_v49, %v3788_v48  ;;  %v4289_v38 = vld [vmem:[#allocation3 + $0x9a] sm:$0xff] }
 0x4a7   : > { %v9083_v15 = vpack.c.bf16 %v4289_v38, %v4288_v62  ;;  %v9857_v62 = vld [vmem:[#allocation19_spill] sm:$0xff] }
 0x4a8   : > { %5894 = vmatmul.msk.bf16.gmra.mxu2 %vm828_vm2, %v4088_v28 }
 0x4a9   : > { %5942 = vmatmul.msk.bf16.gmra.mxu0 %vm828_vm2, %v8637_v54  ;;  %v9046_v43 = vpop.f32.mrf.mxu3  ;;  %v9060_v54 = vpop.f32.mrf.mxu1 }
 0x4aa   : > { %9849 = vst [vmem:[#allocation73_spill] sm:$0xff] %v9060_v54 }
 0x4ab   : > { %v4181_v55 = vpop.f32.mrf.mxu2 }
 0x4ac   : > { %v9049_v56 = vadd.f32 %v4181_v55, %v4019_v61  ;;  %v9072_v1 = vpop.f32.mrf.mxu0 }
 0x4ad   : > { %9850 = vst [vmem:[#allocation74_spill] sm:$0xff] %v9072_v1 }
 0x4ae   : > { %5911 = vmatmul.msk.bf16.gmra.mxu3 %vm828_vm2, %v9051_v40 }
 0x4b1   : > { %v9062_v14 = vpop.f32.mrf.mxu3  ;;  %v9076_v24 = vpop.f32.mrf.mxu1 }
 0x4b2   : > { %9851 = vst [vmem:[#allocation75_spill] sm:$0xff] %v9076_v24  ;;  %v4294_v24 = vld [vmem:[#allocation3 + $0xda] sm:$0xff] }
 0x4b3   : > { %v4183_v50 = vpop.f32.mrf.mxu2 }
 0x4b4   : > { %v9065_v39 = vadd.f32 %v4183_v50, %v4020_v52  ;;  %v9853_v52 = vld [vmem:[#allocation13_spill] sm:$0xff]  ;;  %v9854_v50 = vld [vmem:[#allocation28_spill] sm:$0xff]  ;;  %v9093_v8 = vpop.f32.mrf.mxu0 }
 0x4b5   : > { %v3525_v18 = vadd.f32 %v8873_v6, %v9853_v52  ;;  %9855 = vst [vmem:[#allocation18_spill] sm:$0xff] %v9093_v8  ;;  %v9859_v6 = vld [vmem:[#allocation14_spill] sm:$0xff]  ;;  %v4290_v52 = vld [vmem:[#allocation3 + $0xaa] sm:$0xff] }
 0x4b6   : > { %5964 = vmatmul.msk.bf16.gmra.mxu1 %vm828_vm2, %v4087_v46 }
 0x4b7   : > { %v3790_v38 = vadd.f32 %v9857_v62, %v3525_v18 }
 0x4b8   : > { %5895 = vmatmul.msk.bf16.gmra.mxu2 %vm828_vm2, %v4089_v13 }
 0x4b9   : > { %5943 = vmatmul.msk.bf16.gmra.mxu0 %vm828_vm2, %v8678_v63  ;;  %v9078_v61 = vpop.f32.mrf.mxu3  ;;  %v3789_v63 = vadd.f32 %v9852_v3, %v3522_v32  ;;  %v9095_v48 = vpop.f32.mrf.mxu1  ;;  %v9858_v32 = vld [vmem:[#allocation17_spill] sm:$0xff] }
 0x4ba   : > { %9856 = vst [vmem:[#allocation13_spill] sm:$0xff] %v9095_v48 }
 0x4bb   : > { %v4186_v55 = vpop.f32.mrf.mxu2  ;;  %v4022_v51 = vadd.f32 %v9854_v50, %v3789_v63  ;;  %v4023_v63 = vadd.f32 %v8785_v5, %v3790_v38  ;;  %v4291_v50 = vld [vmem:[#allocation3 + $0xb2] sm:$0xff] }
 0x4bc   : > { %v9081_v46 = vadd.f32 %v4186_v55, %v4021_v20  ;;  %v3527_v55 = vadd.f32 %v8885_v34, %v9859_v6  ;;  %v9112_v18 = vpack.c.bf16 %v4291_v50, %v4290_v52  ;;  %v9864_v52 = vld [vmem:[#allocation24_spill] sm:$0xff] }
 0x4be   : > { %5912 = vmatmul.msk.bf16.gmra.mxu3 %vm828_vm2, %v9083_v15 }
 0x4c1   : > { %v9090_v47 = vpop.f32.mrf.mxu3  ;;  %v9117_v8 = vpop.f32.mrf.mxu1 }
 0x4c2   : > { %9862 = vst [vmem:[#allocation19_spill] sm:$0xff] %v9117_v8 }
 0x4c3   : > { %v4188_v49 = vpop.f32.mrf.mxu2 }
 0x4c4   : > { %v9097_v20 = vadd.f32 %v4188_v49, %v4022_v51 }
 0x4c6   : > { %5965 = vmatmul.msk.bf16.gmra.mxu1 %vm828_vm2, %v4088_v28  ;;  %v9860_v28 = vld [vmem:[#allocation21_spill] sm:$0xff] }
 0x4c7   : > { %v3791_v62 = vadd.f32 %v9860_v28, %v3527_v55  ;;  %v9867_v28 = vld [vmem:[#allocation23_spill] sm:$0xff] }
 0x4c8   : > { %5896 = vmatmul.msk.bf16.gmra.mxu2 %vm828_vm2, %v9858_v32  ;;  %v9115_v32 = vpop.f32.mrf.mxu0 }
 0x4c9   : > { %5944 = vmatmul.msk.bf16.gmra.mxu0 %vm828_vm2, %v8724_v10  ;;  %v9107_v3 = vpop.f32.mrf.mxu3  ;;  %9861 = vst [vmem:[#allocation28_spill] sm:$0xff] %v9115_v32  ;;  %v9863_v10 = vld [vmem:[#allocation15_spill] sm:$0xff]  ;;  %v4024_v38 = vadd.f32 %v8802_v59, %v3791_v62  ;;  %v9870_v32 = vld [vmem:[#allocation26_spill] sm:$0xff] }
 0x4ca   : > { %v3530_v34 = vadd.f32 %v8896_v17, %v9863_v10  ;;  %v9868_v17 = vld [vmem:[#allocation16_spill] sm:$0xff]  ;;  %v9869_v10 = vld [vmem:[#allocation35_spill] sm:$0xff] }
 0x4cb   : > { %v4191_v51 = vpop.f32.mrf.mxu2  ;;  %v3532_v59 = vadd.f32 %v8911_v7, %v9868_v17 }
 0x4cc   : > { %v9110_v49 = vadd.f32 %v4191_v51, %v4023_v63  ;;  %v3792_v50 = vadd.f32 %v9864_v52, %v3530_v34  ;;  %v9132_v51 = vpop.f32.mrf.mxu1  ;;  %v4292_v34 = vld [vmem:[#allocation3 + $0xc2] sm:$0xff] }
 0x4cd   : > { %9866 = vst [vmem:[#allocation14_spill] sm:$0xff] %v9132_v51  ;;  %v3793_v1 = vadd.f32 %v9870_v32, %v3532_v59  ;;  %v4075_v32 = vld [vmem:[#allocation3 + $0x181] sm:$0xff]  ;;  %v9875_v59 = vld [vmem:[#allocation29_spill] sm:$0xff] }
 0x4ce   : > { %5913 = vmatmul.msk.bf16.gmra.mxu3 %vm828_vm2, %v9112_v18 }
 0x4d0   : > { %v9130_v55 = vpop.f32.mrf.mxu0 }
 0x4d1   : > { %v9123_v5 = vpop.f32.mrf.mxu3  ;;  %9865 = vst [vmem:[#allocation17_spill] sm:$0xff] %v9130_v55 }
 0x4d3   : > { %v4193_v6 = vpop.f32.mrf.mxu2 }
 0x4d4   : > { %v9126_v63 = vadd.f32 %v4193_v6, %v4024_v38  ;;  %v4025_v38 = vadd.f32 %v9869_v10, %v3792_v50  ;;  %v4293_v6 = vld [vmem:[#allocation3 + $0xca] sm:$0xff]  ;;  %v9152_v7 = vpop.f32.mrf.mxu1  ;;  %v9874_v50 = vld [vmem:[#allocation38_spill] sm:$0xff] }
 0x4d5   : > { %v9145_v55 = vpack.c.bf16 %v4293_v6, %v4292_v34  ;;  %9873 = vst [vmem:[#allocation21_spill] sm:$0xff] %v9152_v7  ;;  %v4026_v10 = vadd.f32 %v9874_v50, %v3793_v1  ;;  %v4769_v34 = vld [vmem:[#allocation3 + $0x151] sm:$0xff] }
 0x4d6   : > { %5966 = vmatmul.msk.bf16.gmra.mxu1 %vm828_vm2, %v4089_v13  ;;  %v4789_v6 = vpack.c.bf16 %v4770_v58, %v4769_v34  ;;  %v9878_v1 = vld [vmem:[#allocation41_spill] sm:$0xff] }
 0x4d8   : > { %5897 = vmatmul.msk.bf16.gmra.mxu2 %vm828_vm2, %v9867_v28  ;;  %v9872_v28 = vld [vmem:[#allocation60_spill] sm:$0xff] }
 0x4d9   : > { %5945 = vmatmul.msk.bf16.gmra.mxu0 %vm828_vm2, %v8812_v41  ;;  %v9140_v62 = vpop.f32.mrf.mxu3  ;;  %v9871_v41 = vld [vmem:[#allocation20_spill] sm:$0xff] }
 0x4da   : > { %v3535_v51 = vadd.f32 %v9872_v28, %v9871_v41  ;;  %v9876_v41 = vld [vmem:[#allocation22_spill] sm:$0xff]  ;;  %v9877_v28 = vld [vmem:[#allocation64_spill] sm:$0xff] }
 0x4db   : > { %v4196_v13 = vpop.f32.mrf.mxu2  ;;  %v3537_v7 = vadd.f32 %v9877_v28, %v9876_v41  ;;  %v9882_v41 = vld [vmem:[#allocation44_spill] sm:$0xff] }
 0x4dc   : > { %v9143_v52 = vadd.f32 %v4196_v13, %v4025_v38  ;;  %v4076_v38 = vld [vmem:[#allocation3 + $0x189] sm:$0xff]  ;;  %v3794_v21 = vadd.f32 %v9875_v59, %v3535_v51  ;;  %v9167_v54 = vpop.f32.mrf.mxu1  ;;  %v4772_v28 = vld [vmem:[#allocation3 + $0x171] sm:$0xff] }
 0x4dd   : > { %v4092_v48 = vpack.c.bf16 %v4076_v38, %v4075_v32  ;;  %9879 = vst [vmem:[#allocation15_spill] sm:$0xff] %v9167_v54  ;;  %v9880_v38 = vld [vmem:[#allocation31_spill] sm:$0xff] }
 0x4de   : > { %5914 = vmatmul.msk.bf16.gmra.mxu3 %vm828_vm2, %v9145_v55  ;;  %v4027_v50 = vadd.f32 %v9878_v1, %v3794_v21  ;;  %v3795_v34 = vadd.f32 %v9880_v38, %v3537_v7 }
 0x4e0   : > { %v4028_v21 = vadd.f32 %v9882_v41, %v3795_v34  ;;  %v4296_v41 = vld [vmem:[#allocation3 + $0xf2] sm:$0xff] }
 0x4e1   : > { %v9154_v17 = vpop.f32.mrf.mxu3 }
 0x4e3   : > { %v4198_v8 = vpop.f32.mrf.mxu2 }
 0x4e4   : > { %v9157_v13 = vadd.f32 %v4198_v8, %v4026_v10  ;;  %v4295_v8 = vld [vmem:[#allocation3 + $0xe2] sm:$0xff]  ;;  %v9185_v38 = vpop.f32.mrf.mxu1 }
 0x4e5   : > { %v9171_v51 = vpack.c.bf16 %v4295_v8, %v4294_v24  ;;  %v4771_v24 = vld [vmem:[#allocation3 + $0x169] sm:$0xff]  ;;  %9884 = vst [vmem:[#allocation24_spill] sm:$0xff] %v9185_v38 }
 0x4e6   : > { %5967 = vmatmul.msk.bf16.gmra.mxu1 %vm828_vm2, %v4789_v6  ;;  %v9881_v6 = vld [vmem:[#allocation25_spill] sm:$0xff]  ;;  %v4790_v8 = vpack.c.bf16 %v4772_v28, %v4771_v24 }
 0x4e7   : > { %v3540_v32 = vadd.f32 %v8942_v37, %v9881_v6  ;;  %v9885_v37 = vld [vmem:[#allocation27_spill] sm:$0xff] }
 0x4e8   : > { %5898 = vmatmul.msk.bf16.gmra.mxu2 %vm828_vm2, %v4092_v48  ;;  %v3542_v34 = vadd.f32 %v8954_v57, %v9885_v37  ;;  %v9888_v57 = vld [vmem:[#allocation30_spill] sm:$0xff] }
 0x4e9   : > { %v9164_v0 = vpop.f32.mrf.mxu3 }
 0x4eb   : > { %v4201_v10 = vpop.f32.mrf.mxu2 }
 0x4ec   : > { %v9169_v58 = vadd.f32 %v4201_v10, %v4027_v50  ;;  %v9883_v10 = vld [vmem:[#allocation33_spill] sm:$0xff] }
 0x4ed   : > { %v3796_v7 = vadd.f32 %v9883_v10, %v3540_v32 }
 0x4ee   : > { %5915 = vmatmul.msk.bf16.gmra.mxu3 %vm828_vm2, %v9171_v51 }
 0x4f1   : > { %v4399_v59 = vpop.f32.mrf.mxu3 }
 0x4f2   : > { %v9180_v1 = vadd.f32 %v4399_v59, %v8959_v16  ;;  %v9886_v16 = vld [vmem:[#allocation47_spill] sm:$0xff] }
 0x4f3   : > { %v4203_v54 = vpop.f32.mrf.mxu2  ;;  %v4029_v59 = vadd.f32 %v9886_v16, %v3796_v7  ;;  %v3545_v7 = vadd.f32 %v8970_v60, %v9888_v57  ;;  %v9889_v16 = vld [vmem:[#allocation50_spill] sm:$0xff] }
 0x4f4   : > { %v9182_v50 = vadd.f32 %v4203_v54, %v4028_v21  ;;  %v4297_v54 = vld [vmem:[#allocation3 + $0xfa] sm:$0xff] }
 0x4f5   : > { %v9198_v24 = vpack.c.bf16 %v4297_v54, %v4296_v41  ;;  %v9890_v41 = vld [vmem:[#allocation40_spill] sm:$0xff] }
 0x4f6   : > { %5968 = vmatmul.msk.bf16.gmra.mxu1 %vm828_vm2, %v4790_v8  ;;  %v9887_v8 = vld [vmem:[#allocation36_spill] sm:$0xff]  ;;  %v3798_v54 = vadd.f32 %v9890_v41, %v3545_v7  ;;  %v9895_v41 = vld [vmem:[#allocation43_spill] sm:$0xff] }
 0x4f7   : > { %v3797_v10 = vadd.f32 %v9887_v8, %v3542_v34  ;;  %v9215_v34 = vpop.f32.mrf.mxu0 }
 0x4f8   : > { %5979 = vmatmul.msk.bf16.vlgmr.msra.gmra.mxu2 %vm828_vm2, %v8961_v36  ;;  %v9203_v36 = vpop.f32.mrf.mxu1  ;;  %9891 = vst [vmem:[#allocation23_spill] sm:$0xff] %v9215_v34 }
 0x4f9   : > { %v4401_v6 = vpop.f32.mrf.mxu3  ;;  %v4030_v38 = vadd.f32 %v9889_v16, %v3797_v10 }
 0x4fa   : > { %v9194_v21 = vadd.f32 %v4401_v6, %v8975_v19 }
 0x4fb   : > { %v4206_v28 = vpop.f32.mrf.mxu2 }
 0x4fc   : > { %v9196_v32 = vadd.f32 %v4206_v28, %v4029_v59  ;;  %v9892_v28 = vld [vmem:[#allocation32_spill] sm:$0xff] }
 0x4fd   : > { %v3547_v60 = vadd.f32 %v8985_v27, %v9892_v28  ;;  %v9896_v27 = vld [vmem:[#allocation34_spill] sm:$0xff] }
 0x4fe   : > { %5916 = vmatmul.msk.bf16.gmra.mxu3 %vm828_vm2, %v9198_v24  ;;  %v3550_v28 = vadd.f32 %v9001_v31, %v9896_v27  ;;  %v9902_v27 = vld [vmem:[#allocation59_spill] sm:$0xff] }
 0x500   : > { %v9221_v8 = vpop.f32.mrf.mxu1 }
 0x501   : > { %v4404_v37 = vpop.f32.mrf.mxu3  ;;  %9893 = vst [vmem:[#allocation16_spill] sm:$0xff] %v9221_v8  ;;  %v9236_v8 = vpop.f32.mrf.mxu0 }
 0x502   : > { %v9209_v19 = vadd.f32 %v4404_v37, %v8988_v53  ;;  %v9894_v53 = vld [vmem:[#allocation53_spill] sm:$0xff]  ;;  %v4298_v37 = vld [vmem:[#allocation3 + $0x10a] sm:$0xff]  ;;  %9897 = vst [vmem:[#allocation35_spill] sm:$0xff] %v9236_v8 }
 0x503   : > { %v4208_v6 = vpop.f32.mrf.mxu2  ;;  %v4031_v57 = vadd.f32 %v9894_v53, %v3798_v54  ;;  %v9898_v53 = vld [vmem:[#allocation56_spill] sm:$0xff] }
 0x504   : > { %v9211_v59 = vadd.f32 %v4208_v6, %v4030_v38  ;;  %v4299_v38 = vld [vmem:[#allocation3 + $0x112] sm:$0xff] }
 0x505   : > { %v9229_v6 = vpack.c.bf16 %v4299_v38, %v4298_v37 }
 0x506   : > { %5969 = vmatmul.msk.bf16.gmra.mxu1 %vm828_vm2, %v4092_v48 }
 0x508   : > { %5980 = vmatmul.msk.bf16.gmra.mxu2 %vm828_vm2, %v8990_v2  ;;  %v3799_v2 = vadd.f32 %v9895_v41, %v3547_v60  ;;  %v9900_v60 = vld [vmem:[#allocation46_spill] sm:$0xff] }
 0x509   : > { %v4406_v10 = vpop.f32.mrf.mxu3  ;;  %v3800_v38 = vadd.f32 %v9900_v60, %v3550_v28 }
 0x50a   : > { %v9225_v16 = vadd.f32 %v4406_v10, %v9004_v35  ;;  %v4032_v34 = vadd.f32 %v9898_v53, %v3799_v2  ;;  %v4300_v2 = vld [vmem:[#allocation3 + $0x122] sm:$0xff]  ;;  %v4301_v53 = vld [vmem:[#allocation3 + $0x12a] sm:$0xff] }
 0x50b   : > { %v4211_v7 = vpop.f32.mrf.mxu2  ;;  %v4033_v8 = vadd.f32 %v9902_v27, %v3800_v38  ;;  %v9259_v28 = vpack.c.bf16 %v4301_v53, %v4300_v2  ;;  %v9908_v2 = vld [vmem:[#allocation52_spill] sm:$0xff] }
 0x50c   : > { %v9227_v48 = vadd.f32 %v4211_v7, %v4031_v57  ;;  %v9242_v57 = vpop.f32.mrf.mxu1  ;;  %v9901_v7 = vld [vmem:[#allocation37_spill] sm:$0xff] }
 0x50d   : > { %9899 = vst [vmem:[#allocation26_spill] sm:$0xff] %v9242_v57  ;;  %v3552_v31 = vadd.f32 %v9014_v4, %v9901_v7  ;;  %v9255_v57 = vpop.f32.mrf.mxu0  ;;  %v9905_v4 = vld [vmem:[#allocation39_spill] sm:$0xff] }
 0x50e   : > { %5917 = vmatmul.msk.bf16.gmra.mxu3 %vm828_vm2, %v9229_v6  ;;  %v3555_v38 = vadd.f32 %v9030_v23, %v9905_v4 }
 0x510   : > { %v3802_v53 = vadd.f32 %v9908_v2, %v3555_v38  ;;  %v9911_v2 = vld [vmem:[#allocation55_spill] sm:$0xff] }
 0x511   : > { %v4409_v54 = vpop.f32.mrf.mxu3 }
 0x512   : > { %v9240_v35 = vadd.f32 %v4409_v54, %v9019_v30 }
 0x513   : > { %v4213_v10 = vpop.f32.mrf.mxu2 }
 0x514   : > { %v9244_v37 = vadd.f32 %v4213_v10, %v4032_v34  ;;  %v9903_v10 = vld [vmem:[#allocation49_spill] sm:$0xff]  ;;  %v9262_v60 = vpop.f32.mrf.mxu1 }
 0x515   : > { %9904 = vst [vmem:[#allocation20_spill] sm:$0xff] %v9262_v60  ;;  %v9909_v60 = vld [vmem:[#allocation42_spill] sm:$0xff] }
 0x516   : > { %v3557_v23 = vadd.f32 %v9046_v43, %v9909_v60  ;;  %v9912_v43 = vld [vmem:[#allocation45_spill] sm:$0xff] }
 0x518   : > { %5981 = vmatmul.msk.bf16.gmra.mxu2 %vm828_vm2, %v9021_v29  ;;  %v3801_v29 = vadd.f32 %v9903_v10, %v3552_v31  ;;  %v9275_v31 = vpop.f32.mrf.mxu0 }
 0x519   : > { %v4411_v41 = vpop.f32.mrf.mxu3 }
 0x51a   : > { %v9253_v30 = vadd.f32 %v4411_v41, %v9033_v9  ;;  %v9906_v9 = vld [vmem:[#allocation63_spill] sm:$0xff] }
 0x51b   : > { %v4216_v54 = vpop.f32.mrf.mxu2  ;;  %v4034_v41 = vadd.f32 %v9906_v9, %v3801_v29  ;;  %v4035_v29 = vadd.f32 %v8938_v26, %v3802_v53  ;;  %v3560_v26 = vadd.f32 %v9062_v14, %v9912_v43 }
 0x51c   : > { %v9257_v34 = vadd.f32 %v4216_v54, %v4033_v8  ;;  %v9277_v10 = vpop.f32.mrf.mxu1 }
 0x51e   : > { %5918 = vmatmul.msk.bf16.gmra.mxu3 %vm828_vm2, %v9259_v28 }
 0x521   : > { %v4414_v7 = vpop.f32.mrf.mxu3 }
 0x522   : > { %v9270_v27 = vadd.f32 %v4414_v7, %v9049_v56  ;;  %v4302_v56 = vld [vmem:[#allocation3 + $0x13a] sm:$0xff]  ;;  %v4303_v7 = vld [vmem:[#allocation3 + $0x142] sm:$0xff] }
 0x523   : > { %v4218_v8 = vpop.f32.mrf.mxu2 }
 0x524   : > { %v9272_v54 = vadd.f32 %v4218_v8, %v4034_v41  ;;  %v9289_v8 = vpack.c.bf16 %v4303_v7, %v4302_v56  ;;  %v9298_v60 = vpop.f32.mrf.mxu1 }
 0x526   : > { %9907 = vst [vmem:[#allocation60_spill] sm:$0xff] %v9272_v54  ;;  %v3803_v54 = vadd.f32 %v9911_v2, %v3557_v23  ;;  %v9914_v23 = vld [vmem:[#allocation58_spill] sm:$0xff] }
 0x527   : > { %v3804_v7 = vadd.f32 %v9914_v23, %v3560_v26 }
 0x528   : > { %5982 = vmatmul.msk.bf16.gmra.mxu2 %vm828_vm2, %v9051_v40  ;;  %v9294_v40 = vpop.f32.mrf.mxu0 }
 0x529   : > { %v4416_v4 = vpop.f32.mrf.mxu3 }
 0x52a   : > { %v9285_v9 = vadd.f32 %v4416_v4, %v9065_v39  ;;  %v4036_v39 = vadd.f32 %v8957_v12, %v3803_v54  ;;  %v4304_v12 = vld [vmem:[#allocation3 + $0x152] sm:$0xff]  ;;  %v4305_v54 = vld [vmem:[#allocation3 + $0x15a] sm:$0xff] }
 0x52b   : > { %v4221_v41 = vpop.f32.mrf.mxu2 }
 0x52c   : > { %v9287_v38 = vadd.f32 %v4221_v41, %v4035_v29  ;;  %v9915_v41 = vld [vmem:[#allocation48_spill] sm:$0xff] }
 0x52d   : > { %v3562_v2 = vadd.f32 %v9078_v61, %v9915_v41  ;;  %v9918_v61 = vld [vmem:[#allocation51_spill] sm:$0xff] }
 0x52e   : > { %9910 = vst [vmem:[#allocation38_spill] sm:$0xff] %v9287_v38  ;;  %5919 = vmatmul.msk.bf16.gmra.mxu3 %vm828_vm2, %v9289_v8  ;;  %v4037_v38 = vadd.f32 %v8973_v42, %v3804_v7  ;;  %v3565_v42 = vadd.f32 %v9090_v47, %v9918_v61  ;;  %v4776_v47 = vld [vmem:[#allocation3 + $0x1a1] sm:$0xff] }
 0x530   : > { %v9311_v14 = vpop.f32.mrf.mxu0 }
 0x531   : > { %v4419_v53 = vpop.f32.mrf.mxu3 }
 0x532   : > { %v9302_v4 = vadd.f32 %v4419_v53, %v9081_v46 }
 0x533   : > { %v4223_v29 = vpop.f32.mrf.mxu2 }
 0x534   : > { %v9304_v56 = vadd.f32 %v4223_v29, %v4036_v39  ;;  %v9317_v39 = vpop.f32.mrf.mxu1  ;;  %v9321_v29 = vpack.c.bf16 %v4305_v54, %v4304_v12  ;;  %v4542_v12 = vld [vmem:[#allocation3 + $0x198] sm:$0xff]  ;;  %v4543_v54 = vld [vmem:[#allocation3 + $0x1a0] sm:$0xff] }
 0x536   : > { %9913 = vst [vmem:[#allocation29_spill] sm:$0xff] %v9304_v56 }
 0x538   : > { %5983 = vmatmul.msk.bf16.gmra.mxu2 %vm828_vm2, %v9083_v15  ;;  %v9917_v15 = vld [vmem:[#allocation62_spill] sm:$0xff]  ;;  %v9332_v56 = vpop.f32.mrf.mxu0 }
 0x539   : > { %v4421_v43 = vpop.f32.mrf.mxu3  ;;  %v3805_v23 = vadd.f32 %v9917_v15, %v3562_v2  ;;  %v9920_v2 = vld [vmem:[#allocation66_spill] sm:$0xff] }
 0x53a   : > { %v9315_v46 = vadd.f32 %v4421_v43, %v9097_v20 }
 0x53b   : > { %v4226_v53 = vpop.f32.mrf.mxu2  ;;  %v4038_v41 = vadd.f32 %v8993_v45, %v3805_v23  ;;  %v4775_v45 = vld [vmem:[#allocation3 + $0x199] sm:$0xff] }
 0x53c   : > { %v9319_v26 = vadd.f32 %v4226_v53, %v4037_v38  ;;  %v3806_v53 = vadd.f32 %v9920_v2, %v3565_v42  ;;  %v9337_v15 = vpop.f32.mrf.mxu1  ;;  %v9921_v23 = vld [vmem:[#allocation54_spill] sm:$0xff] }
 0x53d   : > { %v3567_v61 = vadd.f32 %v9107_v3, %v9921_v23  ;;  %v9923_v3 = vld [vmem:[#allocation57_spill] sm:$0xff] }
 0x53e   : > { %9916 = vst [vmem:[#allocation22_spill] sm:$0xff] %v9319_v26  ;;  %5920 = vmatmul.msk.bf16.gmra.mxu3 %vm828_vm2, %v9321_v29  ;;  %v4559_v26 = vpack.c.bf16 %v4543_v54, %v4542_v12 }
 0x53f   : > { %v3807_v54 = vadd.f32 %v8947_v44, %v3567_v61  ;;  %v9925_v44 = vld [vmem:[#allocation68_spill] sm:$0xff] }
 0x540   : > { %5946 = vmatmul.msk.bf16.gmra.mxu0 %vm828_vm2, %v4559_v26  ;;  %v9354_v2 = vpop.f32.mrf.mxu0 }
 0x541   : > { %v4424_v7 = vpop.f32.mrf.mxu3 }
 0x542   : > { %v9330_v20 = vadd.f32 %v4424_v7, %v9110_v49  ;;  %v4792_v49 = vpack.c.bf16 %v4776_v47, %v4775_v45  ;;  %v4040_v45 = vadd.f32 %v9026_v22, %v3807_v54 }
 0x543   : > { %v4228_v43 = vpop.f32.mrf.mxu2 }
 0x544   : > { %v9334_v38 = vadd.f32 %v4228_v43, %v4038_v41  ;;  %v4039_v41 = vadd.f32 %v9007_v25, %v3806_v53  ;;  %v4306_v43 = vld [vmem:[#allocation3 + $0x16a] sm:$0xff]  ;;  %5970 = vmatmul.msk.bf16.gmra.mxu1 %vm828_vm2, %v4792_v49  ;;  %v9358_v25 = vpop.f32.mrf.mxu1 }
 0x546   : > { %9919 = vst [vmem:[#allocation64_spill] sm:$0xff] %v9334_v38  ;;  %v4307_v38 = vld [vmem:[#allocation3 + $0x172] sm:$0xff] }
 0x547   : > { %v9351_v26 = vpack.c.bf16 %v4307_v38, %v4306_v43 }
 0x548   : > { %5984 = vmatmul.msk.bf16.gmra.mxu2 %vm828_vm2, %v9112_v18  ;;  %v9369_v61 = vpop.f32.mrf.mxu0 }
 0x549   : > { %v4426_v7 = vpop.f32.mrf.mxu3 }
 0x54a   : > { %v9346_v42 = vadd.f32 %v4426_v7, %v9126_v63  ;;  %v3570_v63 = vadd.f32 %v9123_v5, %v9923_v3  ;;  %v9926_v7 = vld [vmem:[#allocation61_spill] sm:$0xff] }
 0x54b   : > { %v4231_v12 = vpop.f32.mrf.mxu2 }
 0x54c   : > { %v9349_v18 = vadd.f32 %v4231_v12, %v4039_v41  ;;  %v3808_v23 = vadd.f32 %v9925_v44, %v3570_v63  ;;  %v3572_v41 = vadd.f32 %v9140_v62, %v9926_v7  ;;  %v9375_v5 = vpop.f32.mrf.mxu1  ;;  %v4309_v12 = vld [vmem:[#allocation3 + $0x18a] sm:$0xff]  ;;  %v9928_v62 = vld [vmem:[#allocation65_spill] sm:$0xff] }
 0x54d   : > { %v9929_v44 = vld [vmem:[#allocation73_spill] sm:$0xff] }
 0x54e   : > { %9922 = vst [vmem:[#allocation41_spill] sm:$0xff] %v9349_v18  ;;  %5921 = vmatmul.msk.bf16.gmra.mxu3 %vm828_vm2, %v9351_v26  ;;  %v4041_v22 = vadd.f32 %v9039_v11, %v3808_v23 }
 0x551   : > { %v4429_v53 = vpop.f32.mrf.mxu3 }
 0x552   : > { %v9364_v47 = vadd.f32 %v4429_v53, %v9143_v52  ;;  %v4308_v52 = vld [vmem:[#allocation3 + $0x182] sm:$0xff] }
 0x553   : > { %v4233_v38 = vpop.f32.mrf.mxu2  ;;  %v9383_v53 = vpack.c.bf16 %v4309_v12, %v4308_v52  ;;  %v9932_v52 = vld [vmem:[#allocation67_spill] sm:$0xff] }
 0x554   : > { %v9366_v49 = vadd.f32 %v4233_v38, %v4040_v45  ;;  %v3575_v45 = vadd.f32 %v9154_v17, %v9928_v62  ;;  %v9390_v38 = vpop.f32.mrf.mxu0  ;;  %v3577_v17 = vadd.f32 %v9164_v0, %v9932_v52  ;;  %v9938_v52 = vld [vmem:[#allocation71_spill] sm:$0xff] }
 0x556   : > { %9924 = vst [vmem:[#allocation31_spill] sm:$0xff] %v9366_v49 }
 0x558   : > { %5985 = vmatmul.msk.bf16.gmra.mxu2 %vm828_vm2, %v9145_v55  ;;  %v3809_v55 = vadd.f32 %v8981_v33, %v3572_v41  ;;  %v9931_v33 = vld [vmem:[#allocation69_spill] sm:$0xff] }
 0x559   : > { %v4431_v43 = vpop.f32.mrf.mxu3  ;;  %v3810_v41 = vadd.f32 %v9931_v33, %v3575_v45  ;;  %v9936_v33 = vld [vmem:[#allocation13_spill] sm:$0xff] }
 0x55a   : > { %v9379_v54 = vadd.f32 %v4431_v43, %v9157_v13  ;;  %v4042_v23 = vadd.f32 %v9929_v44, %v3809_v55  ;;  %v9396_v43 = vpop.f32.mrf.mxu1 }
 0x55b   : > { %v4236_v3 = vpop.f32.mrf.mxu2 }
 0x55c   : > { %v9381_v63 = vadd.f32 %v4236_v3, %v4041_v22  ;;  %v9933_v3 = vld [vmem:[#allocation75_spill] sm:$0xff] }
 0x55d   : > { %v4043_v62 = vadd.f32 %v9933_v3, %v3810_v41 }
 0x55e   : > { %9927 = vst [vmem:[#allocation25_spill] sm:$0xff] %v9381_v63  ;;  %5922 = vmatmul.msk.bf16.gmra.mxu3 %vm828_vm2, %v9383_v53  ;;  %v9944_v63 = vld [vmem:[#allocation14_spill] sm:$0xff] }
 0x561   : > { %v4434_v11 = vpop.f32.mrf.mxu3 }
 0x562   : > { %v9394_v13 = vadd.f32 %v4434_v11, %v9169_v58  ;;  %v9409_v11 = vpop.f32.mrf.mxu0  ;;  %v9414_v45 = vpop.f32.mrf.mxu1 }
 0x563   : > { %v4238_v7 = vpop.f32.mrf.mxu2 }
 0x564   : > { %v9398_v22 = vadd.f32 %v4238_v7, %v4042_v23  ;;  %v9935_v23 = vld [vmem:[#allocation70_spill] sm:$0xff] }
 0x565   : > { %v3811_v7 = vadd.f32 %v9935_v23, %v3577_v17 }
 0x566   : > { %9930 = vst [vmem:[#allocation44_spill] sm:$0xff] %v9398_v22 }
 0x567   : > { %v4044_v22 = vadd.f32 %v9936_v33, %v3811_v7 }
 0x568   : > { %5986 = vmatmul.msk.bf16.gmra.mxu2 %vm828_vm2, %v9171_v51 }
 0x569   : > { %v4436_v12 = vpop.f32.mrf.mxu3 }
 0x56a   : > { %v9407_v55 = vadd.f32 %v4436_v12, %v9182_v50  ;;  %v4713_v12 = vadd.f32 %v9938_v52, %v9180_v1  ;;  %v9424_v3 = vpop.f32.mrf.mxu0  ;;  %v9437_v1 = vld [vmem:[%s9724_s10] ss:$0 sm:$0xff] }
 0x56b   : > { %v4241_v58 = vpop.f32.mrf.mxu2 }
 0x56c   : > { %v9411_v44 = vadd.f32 %v4241_v58, %v4043_v62  ;;  %v9426_v62 = vpop.f32.mrf.mxu1  ;;  %v9940_v58 = vld [vmem:[#allocation19_spill] sm:$0xff] }
 0x56d   : > { %9939 = vst [vmem:[#allocation47_spill] sm:$0xff] %v9426_v62  ;;  %v4946_v23 = vadd.f32 %v9940_v58, %v4713_v12 }
 0x56e   : > { %9934 = vst [vmem:[#allocation33_spill] sm:$0xff] %v9411_v44 }
 0x571   : > { %v4439_v51 = vpop.f32.mrf.mxu3 }
 0x572   : > { %v9418_v0 = vadd.f32 %v4439_v51, %v9196_v32  ;;  %v6230_v51 = vld [vmem:[%s6531_s22 + $0x18] sm:$0xff]  ;;  %v9443_v44 = vpop.f32.mrf.mxu0 }
 0x573   : > { %v4243_v41 = vpop.f32.mrf.mxu2  ;;  %v5295_v33 = vrot.slane %v6230_v51, 1  ;;  %9942 = vst [vmem:[#allocation36_spill] sm:$0xff] %v9443_v44 }
 0x574   : > { %v9420_v50 = vadd.f32 %v4243_v41, %v4044_v22  ;;  %v6231_v41 = vld [vmem:[%s6531_s22 + $0x20] sm:$0xff] }
 0x575   : > { %v5296_v52 = vrot.slane %v6231_v41, 1 }
 0x576   : > { %9937 = vst [vmem:[#allocation27_spill] sm:$0xff] %v9420_v50  ;;  %v9941_v50 = vld [vmem:[#allocation72_spill] sm:$0xff] }
 0x578   : > { %5987 = vmatmul.msk.bf16.gmra.mxu2 %vm828_vm2, %v9198_v24  ;;  %v4714_v24 = vadd.f32 %v9941_v50, %v9194_v21 }
 0x579   : > { %v4441_v17 = vpop.f32.mrf.mxu3 }
 0x57a   : > { %v9432_v32 = vadd.f32 %v4441_v17, %v9211_v59  ;;  %v5297_v59 = vsel %vm942_vm1, %v5295_v33, %v5296_v52  ;;  %v6232_v17 = vld [vmem:[%s6531_s22 + $0x28] sm:$0x3]  ;;  %v4947_v51 = vadd.f32 %v9944_v63, %v4714_v24  ;;  %v6234_v24 = vld [vmem:[%s6531_s22 + $0x38] sm:$0xff] }
 0x57b   : > { %v5099_v7 = vpop.f32.mrf.mxu2  ;;  %v5298_v58 = vrot.slane %v6232_v17, 1 }
 0x57c   : > { %v5179_v22 = vadd.f32 %v5099_v7, %v4946_v23  ;;  %v9448_v23 = vpop.f32.mrf.mxu1 }
 0x57d   : > { %9943 = vst [vmem:[#allocation30_spill] sm:$0xff] %v9448_v23  ;;  %v5299_v18 = vsel %vm942_vm1, %v5296_v52, %v5298_v58  ;;  %v6233_v23 = vld [vmem:[%s6531_s22 + $0x30] sm:$0xff] }
 0x57e   : > { %v5215_v12 = vadd.f32 %v9437_v1, %v5179_v22  ;;  %v9945_v22 = vld [vmem:[#allocation74_spill] sm:$0xff]  ;;  %v5300_v63 = vrot.slane %v6233_v23, 1  ;;  %v9947_v52 = vld [vmem:[#allocation21_spill] sm:$0xff] }
 0x57f   : > { %v4715_v33 = vadd.f32 %v9945_v22, %v9209_v19 }
 0x580   : > { %v5407_v21 = vsub.f32 %v5297_v59, %v5215_v12 }
 0x581   : > { %v4444_v7 = vpop.f32.mrf.mxu3  ;;  %v4948_v59 = vadd.f32 %v9947_v52, %v4715_v33 }
 0x582   : > { %v9452_v41 = vadd.f32 %v4444_v7, %v9227_v48  ;;  %v5439_v17 = vmul.f32 %v5407_v21, %v5407_v21  ;;  %v5301_v48 = vrot.slane %v6234_v24, 1  ;;  %v9462_v7 = vpop.f32.mrf.mxu0  ;;  %v6235_v24 = vld [vmem:[%s6531_s22 + $0x40] sm:$0x3] }
 0x583   : > { %v5101_v49 = vpop.f32.mrf.mxu2  ;;  %9946 = vst [vmem:[#allocation50_spill] sm:$0xff] %v9462_v7  ;;  %v9950_v7 = vld [vmem:[#allocation15_spill] sm:$0xff] }
 0x584   : > { %v5180_v50 = vadd.f32 %v5101_v49, %v4947_v51  ;;  %v9468_v51 = vpop.f32.mrf.mxu1  ;;  %v5302_v21 = vsel %vm942_vm1, %v5300_v63, %v5301_v48 }
 0x585   : > { %9948 = vst [vmem:[#allocation40_spill] sm:$0xff] %v9468_v51 }
 0x586   : > { %v5216_v44 = vadd.f32 %v9437_v1, %v5180_v50  ;;  %v9949_v50 = vld [vmem:[#allocation18_spill] sm:$0xff] }
 0x588   : > { %v5408_v62 = vsub.f32 %v5299_v18, %v5216_v44  ;;  %5988 = vmatmul.msk.bf16.gmra.mxu2 %vm828_vm2, %v9229_v6  ;;  %v5471_v18 = vsel %vm861_vm3, %v5439_v17, 0.0 }
 0x589   : > { %v4446_v12 = vpop.f32.mrf.mxu3 }
 0x58a   : > { %v5440_v49 = vmul.f32 %v5408_v62, %v5408_v62  ;;  %v9466_v19 = vadd.f32 %v4446_v12, %v9244_v37  ;;  %v4716_v62 = vadd.f32 %v9949_v50, %v9225_v16  ;;  %v5303_v37 = vrot.slane %v6235_v24, 1 }
 0x58b   : > { %v5104_v58 = vpop.f32.mrf.mxu2 }
 0x58c   : > { %v5472_v6 = vsel %vm861_vm3, %v5440_v49, 0.0  ;;  %v5181_v44 = vadd.f32 %v5104_v58, %v4948_v59  ;;  %v4949_v51 = vadd.f32 %v9950_v7, %v4716_v62  ;;  %v4683_v59 = vpop.f32.mrf.mxu0  ;;  %v4916_v50 = vpop.f32.mrf.mxu1 }
 0x58d   : > { %v5473_v23 = vadd.f32 %v5472_v6, %v5471_v18  ;;  %v5304_v6 = vsel %vm942_vm1, %v5301_v48, %v5303_v37 }
 0x58e   : > { %v5217_v22 = vadd.f32 %v9437_v1, %v5181_v44  ;;  %v9951_v44 = vld [vmem:[#allocation28_spill] sm:$0xff] }
 0x590   : > { %v5409_v33 = vsub.f32 %v5302_v21, %v5217_v22  ;;  %v4717_v21 = vadd.f32 %v9951_v44, %v9240_v35 }
 0x591   : > { %v4449_v52 = vpop.f32.mrf.mxu3 }
 0x592   : > { %v5441_v12 = vmul.f32 %v5409_v33, %v5409_v33  ;;  %v4499_v17 = vadd.f32 %v4449_v52, %v9257_v34  ;;  %v6236_v34 = vld [vmem:[%s6531_s22 + $0x48] sm:$0xff] }
 0x593   : > { %v5106_v49 = vpop.f32.mrf.mxu2  ;;  %v5305_v62 = vrot.slane %v6236_v34, 1 }
 0x594   : > { %v5474_v63 = vsel %vm861_vm3, %v5441_v12, 0.0  ;;  %v5182_v58 = vadd.f32 %v5106_v49, %v4949_v51  ;;  %v4733_v16 = vadd.f32 %v4683_v59, %v4499_v17  ;;  %v6237_v51 = vld [vmem:[%s6531_s22 + $0x50] sm:$0xff] }
 0x595   : > { %v5475_v18 = vadd.f32 %v5474_v63, %v5473_v23  ;;  %v5306_v23 = vrot.slane %v6237_v51, 1  ;;  %v9952_v12 = vld [vmem:[#allocation24_spill] sm:$0xff]  ;;  %v9953_v59 = vld [vmem:[#allocation17_spill] sm:$0xff] }
 0x596   : > { %v5218_v22 = vadd.f32 %v9437_v1, %v5182_v58  ;;  %v9484_v33 = vadd.f32 %v4916_v50, %v4733_v16  ;;  %v4950_v48 = vadd.f32 %v9952_v12, %v4717_v21  ;;  %v4718_v63 = vadd.f32 %v9953_v59, %v9253_v30  ;;  %v6238_v16 = vld [vmem:[%s6531_s22 + $0x58] sm:$0x3]  ;;  %v6239_v12 = vld [vmem:[%s6531_s22 + $0x60] sm:$0xff] }
 0x597   : > { %v5307_v49 = vsel %vm942_vm1, %v5305_v62, %v5306_v23  ;;  %v9954_v62 = vld [vmem:[#allocation23_spill] sm:$0xff] }
 0x598   : > { %v5410_v7 = vsub.f32 %v5304_v6, %v5218_v22  ;;  %5989 = vmatmul.msk.bf16.gmra.mxu2 %vm828_vm2, %v9259_v28  ;;  %v5308_v6 = vrot.slane %v6238_v16, 1  ;;  %v4951_v21 = vadd.f32 %v9203_v36, %v4718_v63  ;;  %v4719_v30 = vadd.f32 %v9954_v62, %v9270_v27  ;;  %v6240_v36 = vld [vmem:[%s6531_s22 + $0x68] sm:$0xff] }
 0x59a   : > { %v5442_v24 = vmul.f32 %v5410_v7, %v5410_v7  ;;  %v5309_v34 = vsel %vm942_vm1, %v5306_v23, %v5308_v6  ;;  %v6241_v6 = vld [vmem:[%s6531_s22 + $0x70] sm:$0x3] }
 0x59b   : > { %v5109_v37 = vpop.f32.mrf.mxu2 }
 0x59c   : > { %v5476_v35 = vsel %vm861_vm3, %v5442_v24, 0.0  ;;  %v5183_v52 = vadd.f32 %v5109_v37, %v4950_v48  ;;  %v5310_v48 = vrot.slane %v6239_v12, 1  ;;  %v5311_v37 = vrot.slane %v6240_v36, 1  ;;  %v6242_v12 = vld [vmem:[%s6531_s22 + $0x78] sm:$0xff]  ;;  %v6243_v36 = vld [vmem:[%s6531_s22 + $0x80] sm:$0xff] }
 0x59d   : > { %v5477_v17 = vadd.f32 %v5476_v35, %v5475_v18 }
 0x59e   : > { %v5219_v28 = vadd.f32 %v9437_v1, %v5183_v52  ;;  %v9955_v52 = vld [vmem:[#allocation16_spill] sm:$0xff]  ;;  %v5312_v27 = vsel %vm942_vm1, %v5310_v48, %v5311_v37  ;;  %v5315_v48 = vrot.slane %v6242_v12, 1 }
 0x5a0   : > { %v5411_v58 = vsub.f32 %v5307_v49, %v5219_v28  ;;  %v4952_v49 = vadd.f32 %v9955_v52, %v4719_v30  ;;  %v9956_v28 = vld [vmem:[#allocation35_spill] sm:$0xff] }
 0x5a2   : > { %v5443_v44 = vmul.f32 %v5411_v58, %v5411_v58  ;;  %v4720_v58 = vadd.f32 %v9956_v28, %v9285_v9  ;;  %v4721_v9 = vadd.f32 %v9255_v57, %v9302_v4  ;;  %v4722_v4 = vadd.f32 %v9275_v31, %v9315_v46  ;;  %v6244_v28 = vld [vmem:[%s6531_s22 + $0x88] sm:$0x3] }
 0x5a3   : > { %v5111_v50 = vpop.f32.mrf.mxu2  ;;  %v4723_v31 = vadd.f32 %v9294_v40, %v9330_v20  ;;  %v4724_v20 = vadd.f32 %v9311_v14, %v9346_v42  ;;  %v4725_v14 = vadd.f32 %v9332_v56, %v9364_v47  ;;  %v4726_v47 = vadd.f32 %v9354_v2, %v9379_v54 }
 0x5a4   : > { %v5478_v22 = vsel %vm861_vm3, %v5443_v44, 0.0  ;;  %v5184_v7 = vadd.f32 %v5111_v50, %v4951_v21  ;;  %v5313_v44 = vrot.slane %v6241_v6, 1  ;;  %v9957_v50 = vld [vmem:[#allocation26_spill] sm:$0xff]  ;;  %v4727_v54 = vadd.f32 %v9369_v61, %v9394_v13 }
 0x5a5   : > { %v5479_v18 = vadd.f32 %v5478_v22, %v5477_v17  ;;  %v4953_v22 = vadd.f32 %v9957_v50, %v4720_v58  ;;  %v5318_v58 = vrot.slane %v6244_v28, 1  ;;  %v4728_v13 = vadd.f32 %v9390_v38, %v9407_v55 }
 0x5a6   : > { %v5220_v51 = vadd.f32 %v9437_v1, %v5184_v7  ;;  %v5314_v30 = vsel %vm942_vm1, %v5311_v37, %v5313_v44 }
 0x5a8   : > { %v5412_v24 = vsub.f32 %v5309_v34, %v5220_v51  ;;  %5990 = vmatmul.msk.bf16.gmra.mxu2 %vm828_vm2, %v9289_v8 }
 0x5aa   : > { %v5444_v35 = vmul.f32 %v5412_v24, %v5412_v24 }
 0x5ab   : > { %v5114_v17 = vpop.f32.mrf.mxu2 }
 0x5ac   : > { %v5480_v23 = vsel %vm861_vm3, %v5444_v35, 0.0  ;;  %v5185_v59 = vadd.f32 %v5114_v17, %v4952_v49  ;;  %v5316_v35 = vrot.slane %v6243_v36, 1  ;;  %v9958_v49 = vld [vmem:[#allocation20_spill] sm:$0xff] }
 0x5ad   : > { %v5481_v63 = vadd.f32 %v5480_v23, %v5479_v18  ;;  %v4954_v17 = vadd.f32 %v9958_v49, %v4721_v9  ;;  %v4956_v9 = vadd.f32 %v9298_v60, %v4723_v31  ;;  %v4957_v60 = vadd.f32 %v9317_v39, %v4724_v20  ;;  %v6249_v39 = vld [vmem:[%s6531_s22 + $0xb0] sm:$0xff]  ;;  %v5008_v31 = vld [vmem:[#allocation3 + $0x19a] sm:$0xff] }
 0x5ae   : > { %v5221_v8 = vadd.f32 %v9437_v1, %v5185_v59  ;;  %v5317_v57 = vsel %vm942_vm1, %v5315_v48, %v5316_v35  ;;  %v4960_v20 = vadd.f32 %v9375_v5, %v4727_v54  ;;  %v4961_v5 = vadd.f32 %v9396_v43, %v4728_v13 }
 0x5b0   : > { %v5413_v16 = vsub.f32 %v5312_v27, %v5221_v8 }
 0x5b2   : > { %v5445_v21 = vmul.f32 %v5413_v16, %v5413_v16  ;;  %v4955_v16 = vadd.f32 %v9277_v10, %v4722_v4  ;;  %v6246_v10 = vld [vmem:[%s6531_s22 + $0x98] sm:$0xff]  ;;  %v6248_v4 = vld [vmem:[%s6531_s22 + $0xa8] sm:$0xff] }
 0x5b3   : > { %v5116_v7 = vpop.f32.mrf.mxu2 }
 0x5b4   : > { %v5482_v34 = vsel %vm861_vm3, %v5445_v21, 0.0  ;;  %v5186_v62 = vadd.f32 %v5116_v7, %v4953_v22  ;;  %v5319_v22 = vsel %vm942_vm1, %v5316_v35, %v5318_v58  ;;  %v6247_v35 = vld [vmem:[%s6531_s22 + $0xa0] sm:$0x3]  ;;  %v4958_v58 = vadd.f32 %v9337_v15, %v4725_v14 }
 0x5b5   : > { %v5483_v18 = vadd.f32 %v5482_v34, %v5481_v63  ;;  %v6245_v34 = vld [vmem:[%s6531_s22 + $0x90] sm:$0xff] }
 0x5b6   : > { %v5222_v51 = vadd.f32 %v9437_v1, %v5186_v62  ;;  %v5320_v62 = vrot.slane %v6245_v34, 1 }
 0x5b8   : > { %v5414_v24 = vsub.f32 %v5314_v30, %v5222_v51  ;;  %5991 = vmatmul.msk.bf16.gmra.mxu2 %vm828_vm2, %v9321_v29 }
 0x5ba   : > { %v5446_v52 = vmul.f32 %v5414_v24, %v5414_v24 }
 0x5bb   : > { %v5119_v23 = vpop.f32.mrf.mxu2 }
 0x5bc   : > { %v5484_v37 = vsel %vm861_vm3, %v5446_v52, 0.0  ;;  %v5187_v59 = vadd.f32 %v5119_v23, %v4954_v17  ;;  %v5323_v52 = vrot.slane %v6247_v35, 1 }
 0x5bd   : > { %v5485_v63 = vadd.f32 %v5484_v37, %v5483_v18  ;;  %v5321_v18 = vrot.slane %v6246_v10, 1 }
 0x5be   : > { %v5223_v29 = vadd.f32 %v9437_v1, %v5187_v59 }
 0x5bf   : > { %v5322_v40 = vsel %vm942_vm1, %v5320_v62, %v5321_v18 }
 0x5c0   : > { %v5415_v27 = vsub.f32 %v5317_v57, %v5223_v29  ;;  %v5325_v29 = vrot.slane %v6248_v4, 1  ;;  %v4729_v4 = vadd.f32 %v9409_v11, %v9418_v0  ;;  %v4730_v11 = vadd.f32 %v9424_v3, %v9432_v32  ;;  %v9960_v3 = vld [vmem:[#allocation36_spill] sm:$0xff] }
 0x5c1   : > { %v4731_v32 = vadd.f32 %v9960_v3, %v9452_v41 }
 0x5c2   : > { %v5447_v8 = vmul.f32 %v5415_v27, %v5415_v27  ;;  %v5326_v27 = vrot.slane %v6249_v39, 1  ;;  %v4962_v43 = vadd.f32 %v9414_v45, %v4729_v4 }
 0x5c3   : > { %v5121_v6 = vpop.f32.mrf.mxu2 }
 0x5c4   : > { %v5486_v44 = vsel %vm861_vm3, %v5447_v8, 0.0  ;;  %v5188_v21 = vadd.f32 %v5121_v6, %v4955_v16  ;;  %v5327_v56 = vsel %vm942_vm1, %v5325_v29, %v5326_v27  ;;  %v6254_v29 = vld [vmem:[%s6531_s22 + $0xd8] sm:$0xff] }
 0x5c5   : > { %v5487_v50 = vadd.f32 %v5486_v44, %v5485_v63  ;;  %v5324_v63 = vsel %vm942_vm1, %v5321_v18, %v5323_v52  ;;  %v5335_v39 = vrot.slane %v6254_v29, 1 }
 0x5c6   : > { %v5224_v46 = vadd.f32 %v9437_v1, %v5188_v21 }
 0x5c8   : > { %v5416_v7 = vsub.f32 %v5319_v22, %v5224_v46  ;;  %5992 = vmatmul.msk.bf16.gmra.mxu2 %vm828_vm2, %v9351_v26  ;;  %v5009_v46 = vld [vmem:[#allocation3 + $0x1a2] sm:$0xff] }
 0x5c9   : > { %v5025_v18 = vpack.c.bf16 %v5009_v46, %v5008_v31  ;;  %v4451_v31 = vpop.f32.mrf.mxu3 }
 0x5ca   : > { %v5448_v30 = vmul.f32 %v5416_v7, %v5416_v7  ;;  %v4959_v7 = vadd.f32 %v9358_v25, %v4726_v47  ;;  %v6252_v25 = vld [vmem:[%s6531_s22 + $0xc8] sm:$0xff] }
 0x5cb   : > { %v5124_v51 = vpop.f32.mrf.mxu2 }
 0x5cc   : > { %v5488_v24 = vsel %vm861_vm3, %v5448_v30, 0.0  ;;  %v5189_v12 = vadd.f32 %v5124_v51, %v4956_v9 }
 0x5cd   : > { %v5489_v48 = vadd.f32 %v5488_v24, %v5487_v50  ;;  %v6250_v50 = vld [vmem:[%s6531_s22 + $0xb8] sm:$0x3]  ;;  %v6251_v24 = vld [vmem:[%s6531_s22 + $0xc0] sm:$0xff] }
 0x5ce   : > { %v5225_v26 = vadd.f32 %v9437_v1, %v5189_v12  ;;  %v5328_v22 = vrot.slane %v6250_v50, 1  ;;  %v5330_v12 = vrot.slane %v6251_v24, 1 }
 0x5d0   : > { %v5417_v36 = vsub.f32 %v5322_v40, %v5225_v26  ;;  %v5329_v2 = vsel %vm942_vm1, %v5326_v27, %v5328_v22  ;;  %v6255_v27 = vld [vmem:[%s6531_s22 + $0xe0] sm:$0xff] }
 0x5d1   : > { %v9959_v22 = vld [vmem:[#allocation47_spill] sm:$0xff] }
 0x5d2   : > { %v5449_v49 = vmul.f32 %v5417_v36, %v5417_v36  ;;  %v4963_v45 = vadd.f32 %v9959_v22, %v4730_v11 }
 0x5d3   : > { %v5126_v17 = vpop.f32.mrf.mxu2 }
 0x5d4   : > { %v5490_v23 = vsel %vm861_vm3, %v5449_v49, 0.0  ;;  %v5190_v37 = vadd.f32 %v5126_v17, %v4957_v60  ;;  %v6253_v17 = vld [vmem:[%s6531_s22 + $0xd0] sm:$0x3] }
 0x5d5   : > { %v5491_v59 = vadd.f32 %v5490_v23, %v5489_v48  ;;  %v5331_v48 = vrot.slane %v6252_v25, 1  ;;  %v5333_v23 = vrot.slane %v6253_v17, 1 }
 0x5d6   : > { %v5226_v42 = vadd.f32 %v9437_v1, %v5190_v37 }
 0x5d7   : > { %v5332_v61 = vsel %vm942_vm1, %v5330_v12, %v5331_v48  ;;  %v9961_v12 = vld [vmem:[#allocation30_spill] sm:$0xff] }
 0x5d8   : > { %v5418_v57 = vsub.f32 %v5324_v63, %v5226_v42  ;;  %5993 = vmatmul.msk.bf16.gmra.mxu2 %vm828_vm2, %v9383_v53  ;;  %v4964_v25 = vadd.f32 %v9961_v12, %v4731_v32  ;;  %v6264_v12 = vld [vmem:[%s6531_s22 + $0x128] sm:$0xff] }
 0x5da   : > { %v5450_v28 = vmul.f32 %v5418_v57, %v5418_v57  ;;  %v5334_v57 = vsel %vm942_vm1, %v5331_v48, %v5333_v23 }
 0x5db   : > { %v5129_v8 = vpop.f32.mrf.mxu2 }
 0x5dc   : > { %v5492_v16 = vsel %vm861_vm3, %v5450_v28, 0.0  ;;  %v5191_v6 = vadd.f32 %v5129_v8, %v4958_v58  ;;  %v5336_v28 = vrot.slane %v6255_v27, 1 }
 0x5dd   : > { %v5493_v44 = vadd.f32 %v5492_v16, %v5491_v59 }
 0x5de   : > { %v5227_v21 = vadd.f32 %v9437_v1, %v5191_v6 }
 0x5e0   : > { %v5419_v53 = vsub.f32 %v5327_v56, %v5227_v21  ;;  %v5337_v56 = vsel %vm942_vm1, %v5335_v39, %v5336_v28  ;;  %v6256_v21 = vld [vmem:[%s6531_s22 + $0xe8] sm:$0x3] }
 0x5e1   : > { %v6260_v39 = vld [vmem:[%s6531_s22 + $0x108] sm:$0xff] }
 0x5e2   : > { %v5451_v15 = vmul.f32 %v5419_v53, %v5419_v53  ;;  %v5338_v53 = vrot.slane %v6256_v21, 1  ;;  %v5345_v27 = vrot.slane %v6260_v39, 1 }
 0x5e3   : > { %v5131_v34 = vpop.f32.mrf.mxu2 }
 0x5e4   : > { %v5494_v62 = vsel %vm861_vm3, %v5451_v15, 0.0  ;;  %v5192_v10 = vadd.f32 %v5131_v34, %v4959_v7 }
 0x5e5   : > { %v5495_v30 = vadd.f32 %v5494_v62, %v5493_v44  ;;  %v5339_v62 = vsel %vm942_vm1, %v5336_v28, %v5338_v53  ;;  %v6261_v28 = vld [vmem:[%s6531_s22 + $0x110] sm:$0xff] }
 0x5e6   : > { %v5228_v9 = vadd.f32 %v9437_v1, %v5192_v10 }
 0x5e8   : > { %v5420_v51 = vsub.f32 %v5329_v2, %v5228_v9  ;;  %5994 = vmatmul.msk.bf16.gmra.mxu2 %vm828_vm2, %v5025_v18  ;;  %v6257_v2 = vld [vmem:[%s6531_s22 + $0xf0] sm:$0xff]  ;;  %v6258_v9 = vld [vmem:[%s6531_s22 + $0xf8] sm:$0xff] }
 0x5e9   : > { %v5340_v54 = vrot.slane %v6257_v2, 1 }
 0x5ea   : > { %v5452_v40 = vmul.f32 %v5420_v51, %v5420_v51  ;;  %v5341_v51 = vrot.slane %v6258_v9, 1 }
 0x5eb   : > { %v5134_v26 = vpop.f32.mrf.mxu2 }
 0x5ec   : > { %v5496_v36 = vsel %vm861_vm3, %v5452_v40, 0.0  ;;  %v5193_v35 = vadd.f32 %v5134_v26, %v4960_v20  ;;  %v4918_v40 = vpop.f32.mrf.mxu1  ;;  %v5342_v41 = vsel %vm942_vm1, %v5340_v54, %v5341_v51 }
 0x5ed   : > { %v5497_v52 = vadd.f32 %v5496_v36, %v5495_v30  ;;  %v4685_v30 = vpop.f32.mrf.mxu0  ;;  %v4454_v36 = vpop.f32.mrf.mxu3 }
 0x5ee   : > { %v5229_v49 = vadd.f32 %v9437_v1, %v5193_v35 }
 0x5f0   : > { %v5421_v60 = vsub.f32 %v5332_v61, %v5229_v49 }
 0x5f2   : > { %v5453_v37 = vmul.f32 %v5421_v60, %v5421_v60  ;;  %v6259_v60 = vld [vmem:[%s6531_s22 + $0x100] sm:$0x3] }
 0x5f3   : > { %v5136_v59 = vpop.f32.mrf.mxu2  ;;  %v5343_v17 = vrot.slane %v6259_v60, 1 }
 0x5f4   : > { %v5498_v63 = vsel %vm861_vm3, %v5453_v37, 0.0  ;;  %v5194_v14 = vadd.f32 %v5136_v59, %v4961_v5  ;;  %v9963_v37 = vld [vmem:[#allocation40_spill] sm:$0xff] }
 0x5f5   : > { %v5499_v42 = vadd.f32 %v5498_v63, %v5497_v52  ;;  %v9962_v52 = vld [vmem:[#allocation50_spill] sm:$0xff]  ;;  %v4688_v59 = vpop.f32.mrf.mxu0  ;;  %v5344_v4 = vsel %vm942_vm1, %v5341_v51, %v5343_v17 }
 0x5f6   : > { %v5230_v38 = vadd.f32 %v9437_v1, %v5194_v14  ;;  %v4732_v61 = vadd.f32 %v9962_v52, %v9466_v19  ;;  %v6263_v51 = vld [vmem:[%s6531_s22 + $0x120] sm:$0xff] }
 0x5f8   : > { %v5422_v55 = vsub.f32 %v5334_v57, %v5230_v38  ;;  %v4965_v5 = vadd.f32 %v9963_v37, %v4732_v61  ;;  %v4921_v38 = vpop.f32.mrf.mxu1 }
 0x5fa   : > { %v5454_v58 = vmul.f32 %v5422_v55, %v5422_v55  ;;  %v4456_v55 = vpop.f32.mrf.mxu3 }
 0x5fb   : > { %v5139_v8 = vpop.f32.mrf.mxu2 }
 0x5fc   : > { %v5500_v16 = vsel %vm861_vm3, %v5454_v58, 0.0  ;;  %v5195_v6 = vadd.f32 %v5139_v8, %v4962_v43  ;;  %v5346_v58 = vrot.slane %v6261_v28, 1  ;;  %v9964_v43 = vld [vmem:[#allocation60_spill] sm:$0xff] }
 0x5fd   : > { %v5501_v44 = vadd.f32 %v5500_v16, %v5499_v42  ;;  %v4500_v8 = vadd.f32 %v4451_v31, %v9964_v43  ;;  %v4690_v11 = vpop.f32.mrf.mxu0 }
 0x5fe   : > { %v5231_v0 = vadd.f32 %v9437_v1, %v5195_v6 }
 0x5ff   : > { %v4734_v21 = vadd.f32 %v4685_v30, %v4500_v8  ;;  %v6266_v8 = vld [vmem:[%s6531_s22 + $0x138] sm:$0xff] }
 0x600   : > { %v5423_v47 = vsub.f32 %v5337_v56, %v5231_v0 }
 0x602   : > { %v5455_v50 = vmul.f32 %v5423_v47, %v5423_v47  ;;  %v5347_v47 = vsel %vm942_vm1, %v5345_v27, %v5346_v58 }
 0x603   : > { %v5141_v46 = vpop.f32.mrf.mxu2 }
 0x604   : > { %v5502_v15 = vsel %vm861_vm3, %v5455_v50, 0.0  ;;  %v5196_v7 = vadd.f32 %v5141_v46, %v4963_v45  ;;  %v4923_v50 = vpop.f32.mrf.mxu1  ;;  %v4459_v45 = vpop.f32.mrf.mxu3  ;;  %v6262_v46 = vld [vmem:[%s6531_s22 + $0x118] sm:$0x3] }
 0x605   : > { %v5503_v34 = vadd.f32 %v5502_v15, %v5501_v44  ;;  %v5348_v31 = vrot.slane %v6262_v46, 1  ;;  %v9965_v15 = vld [vmem:[#allocation38_spill] sm:$0xff]  ;;  %v4693_v54 = vpop.f32.mrf.mxu0 }
 0x606   : > { %v5232_v10 = vadd.f32 %v9437_v1, %v5196_v7  ;;  %v4501_v7 = vadd.f32 %v4454_v36, %v9965_v15 }
 0x608   : > { %v5424_v18 = vsub.f32 %v5339_v62, %v5232_v10  ;;  %v4967_v62 = vadd.f32 %v4918_v40, %v4734_v21  ;;  %v4735_v30 = vadd.f32 %v4688_v59, %v4501_v7 }
 0x60a   : > { %v5456_v24 = vmul.f32 %v5424_v18, %v5424_v18  ;;  %v5349_v18 = vsel %vm942_vm1, %v5346_v58, %v5348_v31  ;;  %v4968_v36 = vadd.f32 %v4921_v38, %v4735_v30 }
 0x60b   : > { %v5144_v48 = vpop.f32.mrf.mxu2 }
 0x60c   : > { %v5504_v20 = vsel %vm861_vm3, %v5456_v24, 0.0  ;;  %v5197_v26 = vadd.f32 %v5144_v48, %v4964_v25  ;;  %v5350_v24 = vrot.slane %v6263_v51, 1  ;;  %v5351_v25 = vrot.slane %v6264_v12, 1  ;;  %v4926_v48 = vpop.f32.mrf.mxu1 }
 0x60d   : > { %v5505_v35 = vadd.f32 %v5504_v20, %v5503_v34  ;;  %v9966_v20 = vld [vmem:[#allocation29_spill] sm:$0xff]  ;;  %v4695_v37 = vpop.f32.mrf.mxu0 }
 0x60e   : > { %v5233_v13 = vadd.f32 %v9437_v1, %v5197_v26  ;;  %v4502_v40 = vadd.f32 %v4456_v55, %v9966_v20 }
 0x610   : > { %v5425_v49 = vsub.f32 %v5342_v41, %v5233_v13  ;;  %v4736_v60 = vadd.f32 %v4690_v11, %v4502_v40 }
 0x612   : > { %v5457_v23 = vmul.f32 %v5425_v49, %v5425_v49  ;;  %v5352_v49 = vsel %vm942_vm1, %v5350_v24, %v5351_v25 }
 0x613   : > { %v5146_v63 = vpop.f32.mrf.mxu2 }
 0x614   : > { %v5506_v14 = vsel %vm861_vm3, %v5457_v23, 0.0  ;;  %v5198_v42 = vadd.f32 %v5146_v63, %v4965_v5  ;;  %v6265_v5 = vld [vmem:[%s6531_s22 + $0x130] sm:$0x3]  ;;  %v9967_v63 = vld [vmem:[#allocation22_spill] sm:$0xff]  ;;  %v4928_v38 = vpop.f32.mrf.mxu1 }
 0x615   : > { %v5507_v57 = vadd.f32 %v5506_v14, %v5505_v35  ;;  %v4461_v35 = vpop.f32.mrf.mxu3  ;;  %v5353_v59 = vrot.slane %v6265_v5, 1  ;;  %v4503_v14 = vadd.f32 %v4459_v45, %v9967_v63  ;;  %v4698_v21 = vpop.f32.mrf.mxu0 }
 0x616   : > { %v5234_v19 = vadd.f32 %v9437_v1, %v5198_v42 }
 0x617   : > { %v5354_v27 = vsel %vm942_vm1, %v5351_v25, %v5353_v59  ;;  %v4737_v28 = vadd.f32 %v4693_v54, %v4503_v14 }
 0x618   : > { %v5426_v29 = vsub.f32 %v5344_v4, %v5234_v19 }
 0x61a   : > { %v5458_v16 = vmul.f32 %v5426_v29, %v5426_v29 }
 0x61b   : > { %v5149_v6 = vpop.f32.mrf.mxu2 }
 0x61c   : > { %v5508_v44 = vsel %vm861_vm3, %v5458_v16, 0.0  ;;  %v5199_v56 = vadd.f32 %v5149_v6, %v9484_v33  ;;  %v5355_v16 = vrot.slane %v6266_v8, 1  ;;  %v6267_v6 = vld [vmem:[%s6531_s22 + $0x140] sm:$0xff]  ;;  %v4931_v31 = vpop.f32.mrf.mxu1 }
 0x61d   : > { %v5509_v0 = vadd.f32 %v5508_v44, %v5507_v57  ;;  %v4969_v57 = vadd.f32 %v4923_v50, %v4736_v60  ;;  %v4464_v29 = vpop.f32.mrf.mxu3  ;;  %v5356_v44 = vrot.slane %v6267_v6, 1  ;;  %v4700_v51 = vpop.f32.mrf.mxu0 }
 0x61e   : > { %v5235_v53 = vadd.f32 %v9437_v1, %v5199_v56  ;;  %v9968_v56 = vld [vmem:[#allocation64_spill] sm:$0xff] }
 0x61f   : > { %v4504_v11 = vadd.f32 %v4461_v35, %v9968_v56  ;;  %v5357_v46 = vsel %vm942_vm1, %v5355_v16, %v5356_v44 }
 0x620   : > { %v5427_v22 = vsub.f32 %v5347_v47, %v5235_v53  ;;  %v4970_v47 = vadd.f32 %v4926_v48, %v4737_v28 }
 0x621   : > { %v4738_v15 = vadd.f32 %v4695_v37, %v4504_v11 }
 0x622   : > { %v5459_v34 = vmul.f32 %v5427_v22, %v5427_v22 }
 0x623   : > { %v5151_v3 = vpop.f32.mrf.mxu2  ;;  %v4971_v30 = vadd.f32 %v4928_v38, %v4738_v15 }
 0x624   : > { %v5510_v33 = vsel %vm861_vm3, %v5459_v34, 0.0  ;;  %v5200_v32 = vadd.f32 %v5151_v3, %v4967_v62  ;;  %v6268_v3 = vld [vmem:[%s6531_s22 + $0x148] sm:$0x3]  ;;  %v4933_v20 = vpop.f32.mrf.mxu1 }
 0x625   : > { %v5511_v10 = vadd.f32 %v5510_v33, %v5509_v0  ;;  %v4466_v34 = vpop.f32.mrf.mxu3  ;;  %v5358_v33 = vrot.slane %v6268_v3, 1 }
 0x626   : > { %v5236_v2 = vadd.f32 %v9437_v1, %v5200_v32  ;;  %v9969_v32 = vld [vmem:[#allocation41_spill] sm:$0xff] }
 0x627   : > { %v5359_v12 = vsel %vm942_vm1, %v5356_v44, %v5358_v33 }
 0x628   : > { %v5428_v9 = vsub.f32 %v5349_v18, %v5236_v2 }
 0x62a   : > { %v5460_v26 = vmul.f32 %v5428_v9, %v5428_v9 }
 0x62b   : > { %v5154_v41 = vpop.f32.mrf.mxu2 }
 0x62c   : > { %v5512_v52 = vsel %vm861_vm3, %v5460_v26, 0.0  ;;  %v5201_v61 = vadd.f32 %v5154_v41, %v4968_v36  ;;  %v6269_v36 = vld [vmem:[%s6531_s22 + $0x150] sm:$0xff]  ;;  %v6270_v41 = vld [vmem:[%s6531_s22 + $0x158] sm:$0xff] }
 0x62d   : > { %v5513_v13 = vadd.f32 %v5512_v52, %v5511_v10  ;;  %v4505_v10 = vadd.f32 %v4464_v29, %v9969_v32  ;;  %v4469_v26 = vpop.f32.mrf.mxu3  ;;  %v5360_v35 = vrot.slane %v6269_v36, 1  ;;  %v5361_v52 = vrot.slane %v6270_v41, 1 }
 0x62e   : > { %v5237_v17 = vadd.f32 %v9437_v1, %v5201_v61  ;;  %v9970_v61 = vld [vmem:[#allocation31_spill] sm:$0xff] }
 0x62f   : > { %v4739_v25 = vadd.f32 %v4698_v21, %v4505_v10  ;;  %v5362_v59 = vsel %vm942_vm1, %v5360_v35, %v5361_v52 }
 0x630   : > { %v5429_v23 = vsub.f32 %v5352_v49, %v5237_v17 }
 0x631   : > { %v4972_v60 = vadd.f32 %v4931_v31, %v4739_v25 }
 0x632   : > { %v5461_v42 = vmul.f32 %v5429_v23, %v5429_v23 }
 0x633   : > { %v5156_v4 = vpop.f32.mrf.mxu2 }
 0x634   : > { %v5514_v19 = vsel %vm861_vm3, %v5461_v42, 0.0  ;;  %v5202_v55 = vadd.f32 %v5156_v4, %v4969_v57  ;;  %v4703_v42 = vpop.f32.mrf.mxu0  ;;  %v6271_v4 = vld [vmem:[%s6531_s22 + $0x160] sm:$0x3] }
 0x635   : > { %v5515_v39 = vadd.f32 %v5514_v19, %v5513_v13  ;;  %v4506_v13 = vadd.f32 %v4466_v34, %v9970_v61  ;;  %v5363_v38 = vrot.slane %v6271_v4, 1  ;;  %v4936_v19 = vpop.f32.mrf.mxu1  ;;  %v4471_v28 = vpop.f32.mrf.mxu3 }
 0x636   : > { %v5238_v58 = vadd.f32 %v9437_v1, %v5202_v55  ;;  %v9971_v55 = vld [vmem:[#allocation25_spill] sm:$0xff] }
 0x637   : > { %v4740_v63 = vadd.f32 %v4700_v51, %v4506_v13  ;;  %v4507_v29 = vadd.f32 %v4469_v26, %v9971_v55  ;;  %v5364_v6 = vsel %vm942_vm1, %v5361_v52, %v5363_v38  ;;  %v9973_v51 = vld [vmem:[#allocation33_spill] sm:$0xff] }
 0x638   : > { %v5430_v43 = vsub.f32 %v5354_v27, %v5238_v58 }
 0x639   : > { %v4973_v27 = vadd.f32 %v4933_v20, %v4740_v63  ;;  %v4741_v44 = vadd.f32 %v4703_v42, %v4507_v29 }
 0x63a   : > { %v5462_v0 = vmul.f32 %v5430_v43, %v5430_v43 }
 0x63b   : > { %v5159_v53 = vpop.f32.mrf.mxu2  ;;  %v4974_v31 = vadd.f32 %v4936_v19, %v4741_v44 }
 0x63c   : > { %v5516_v50 = vsel %vm861_vm3, %v5462_v0, 0.0  ;;  %v5203_v22 = vadd.f32 %v5159_v53, %v4970_v47  ;;  %v4705_v0 = vpop.f32.mrf.mxu0  ;;  %v6272_v47 = vld [vmem:[%s6531_s22 + $0x168] sm:$0xff]  ;;  %v6273_v53 = vld [vmem:[%s6531_s22 + $0x170] sm:$0xff] }
 0x63d   : > { %v5517_v45 = vadd.f32 %v5516_v50, %v5515_v39  ;;  %v5365_v21 = vrot.slane %v6272_v47, 1  ;;  %v5366_v50 = vrot.slane %v6273_v53, 1  ;;  %v4474_v3 = vpop.f32.mrf.mxu3 }
 0x63e   : > { %v5239_v7 = vadd.f32 %v9437_v1, %v5203_v22  ;;  %v9972_v22 = vld [vmem:[#allocation44_spill] sm:$0xff] }
 0x63f   : > { %v5367_v32 = vsel %vm942_vm1, %v5365_v21, %v5366_v50 }
 0x640   : > { %v5431_v62 = vsub.f32 %v5357_v46, %v5239_v7 }
 0x642   : > { %v5463_v18 = vmul.f32 %v5431_v62, %v5431_v62  ;;  %v4938_v62 = vpop.f32.mrf.mxu1 }
 0x643   : > { %v5161_v2 = vpop.f32.mrf.mxu2 }
 0x644   : > { %v5518_v54 = vsel %vm861_vm3, %v5463_v18, 0.0  ;;  %v5204_v9 = vadd.f32 %v5161_v2, %v4971_v30  ;;  %v4708_v2 = vpop.f32.mrf.mxu0 }
 0x645   : > { %v5519_v24 = vadd.f32 %v5518_v54, %v5517_v45  ;;  %v4508_v45 = vadd.f32 %v4471_v28, %v9972_v22  ;;  %v6274_v54 = vld [vmem:[%s6531_s22 + $0x178] sm:$0x3]  ;;  %v4476_v61 = vpop.f32.mrf.mxu3  ;;  %v6277_v28 = vld [vmem:[%s6531_s22 + $0x190] sm:$0x3] }
 0x646   : > { %v5240_v48 = vadd.f32 %v9437_v1, %v5204_v9  ;;  %v5368_v9 = vrot.slane %v6274_v54, 1 }
 0x647   : > { %v4742_v10 = vadd.f32 %v4705_v0, %v4508_v45 }
 0x648   : > { %v5432_v40 = vsub.f32 %v5359_v12, %v5240_v48  ;;  %v5369_v35 = vsel %vm942_vm1, %v5366_v50, %v5368_v9 }
 0x649   : > { %v4975_v25 = vadd.f32 %v4938_v62, %v4742_v10 }
 0x64a   : > { %v5464_v49 = vmul.f32 %v5432_v40, %v5432_v40  ;;  %v4941_v26 = vpop.f32.mrf.mxu1 }
 0x64b   : > { %v5164_v17 = vpop.f32.mrf.mxu2 }
 0x64c   : > { %v5520_v23 = vsel %vm861_vm3, %v5464_v49, 0.0  ;;  %v5205_v37 = vadd.f32 %v5164_v17, %v4972_v60  ;;  %v6275_v49 = vld [vmem:[%s6531_s22 + $0x180] sm:$0xff]  ;;  %v6276_v17 = vld [vmem:[%s6531_s22 + $0x188] sm:$0xff]  ;;  %s430_s22 = sand.u32 1, %s6370_s18  }
 0x64d   : > { %v5521_v5 = vadd.f32 %v5520_v23, %v5519_v24  ;;  %v4509_v24 = vadd.f32 %v4474_v3, %v9973_v51  ;;  %v5370_v60 = vrot.slane %v6275_v49, 1  ;;  %v5371_v23 = vrot.slane %v6276_v17, 1  ;;  %s431_s29 = scalar_lea.vmem [#allocation9], %s430_s22  ;;  %s5547_s2 = scalar_lea.sflag [#allocation5], %s430_s22 }
 0x64e   : > { %v5241_v14 = vadd.f32 %v9437_v1, %v5205_v37  ;;  %s5557_s15 = sshll.u32 %s431_s29, 4  ;;  %s5558_s15 = int_to_ptr.vmem [resolvable:$true] %s5557_s15 }
 0x64f   : > { %v4743_v41 = vadd.f32 %v4708_v2, %v4509_v24  ;;  %v5372_v38 = vsel %vm942_vm1, %v5370_v60, %v5371_v23 }
 0x650   : > { %v5433_v57 = vsub.f32 %v5362_v59, %v5241_v14  ;;  %v4710_v14 = vpop.f32.mrf.mxu0 }
 0x651   : > { %v4976_v37 = vadd.f32 %v4941_v26, %v4743_v41 }
 0x652   : > { %v5465_v39 = vmul.f32 %v5433_v57, %v5433_v57 }
 0x653   : > { %v5166_v58 = vpop.f32.mrf.mxu2 }
 0x654   : > { %v5522_v43 = vsel %vm861_vm3, %v5465_v39, 0.0  ;;  %v5206_v8 = vadd.f32 %v5166_v58, %v4973_v27  ;;  %v4943_v39 = vpop.f32.mrf.mxu1  ;;  %v5373_v58 = vrot.slane %v6277_v28, 1 }
 0x655   : > { %v5523_v16 = vadd.f32 %v5522_v43, %v5521_v5  ;;  %v9974_v5 = vld [vmem:[#allocation27_spill] sm:$0xff] }
 0x656   : > { %v5242_v56 = vadd.f32 %v9437_v1, %v5206_v8  ;;  %v4510_v59 = vadd.f32 %v4476_v61, %v9974_v5 }
 0x658   : > { %v5434_v11 = vsub.f32 %v5364_v6, %v5242_v56  ;;  %v4744_v55 = vadd.f32 %v4710_v14, %v4510_v59  ;;  %v5374_v56 = vsel %vm942_vm1, %v5371_v23, %v5373_v58 }
 0x65a   : > { %v5466_v46 = vmul.f32 %v5434_v11, %v5434_v11  ;;  %v4977_v43 = vadd.f32 %v4943_v39, %v4744_v55 }
 0x65b   : > { %v5169_v15 = vpop.f32.mrf.mxu2 }
 0x65c   : > { %v5524_v7 = vsel %vm861_vm3, %v5466_v46, 0.0  ;;  %v5207_v34 = vadd.f32 %v5169_v15, %v4974_v31 }
 0x65d   : > { %v5525_v33 = vadd.f32 %v5524_v7, %v5523_v16 }
 0x65e   : > { %v5243_v18 = vadd.f32 %v9437_v1, %v5207_v34 }
 0x660   : > { %v5435_v30 = vsub.f32 %v5367_v32, %v5243_v18 }
 0x662   : > { %v5467_v12 = vmul.f32 %v5435_v30, %v5435_v30 }
 0x663   : > { %v5171_v48 = vpop.f32.mrf.mxu2 }
 0x664   : > { %v5526_v20 = vsel %vm861_vm3, %v5467_v12, 0.0  ;;  %v5208_v40 = vadd.f32 %v5171_v48, %v4975_v25 }
 0x665   : > { %v5527_v36 = vadd.f32 %v5526_v20, %v5525_v33 }
 0x666   : > { %v5244_v52 = vadd.f32 %v9437_v1, %v5208_v40 }
 0x668   : > { %v5436_v13 = vsub.f32 %v5369_v35, %v5244_v52 }
 0x66a   : > { %v5468_v63 = vmul.f32 %v5436_v13, %v5436_v13 }
 0x66b   : > { %v5174_v42 = vpop.f32.mrf.mxu2 }
 0x66c   : > { %v5528_v57 = vsel %vm861_vm3, %v5468_v63, 0.0  ;;  %v5209_v4 = vadd.f32 %v5174_v42, %v4976_v37 }
 0x66d   : > { %v5529_v19 = vadd.f32 %v5528_v57, %v5527_v36 }
 0x66e   : > { %v5245_v29 = vadd.f32 %v9437_v1, %v5209_v4 }
 0x670   : > { %v5437_v27 = vsub.f32 %v5372_v38, %v5245_v29 }
 0x672   : > { %v5469_v8 = vmul.f32 %v5437_v27, %v5437_v27 }
 0x673   : > { %v5176_v16 = vpop.f32.mrf.mxu2 }
 0x674   : > { %v5210_v6 = vadd.f32 %v5176_v16, %v4977_v43  ;;  %v5530_v44 = vsel %vm861_vm3, %v5469_v8, 0.0 }
 0x675   : > { %v5531_v11 = vadd.f32 %v5530_v44, %v5529_v19 }
 0x676   : > { %v5246_v0 = vadd.f32 %v9437_v1, %v5210_v6 }
 0x678   : > { %v5438_v47 = vsub.f32 %v5374_v56, %v5246_v0 }
 0x67a   : > { %v5470_v21 = vmul.f32 %v5438_v47, %v5438_v47 }
 0x67c   : > { %v5532_v53 = vsel %vm861_vm3, %v5470_v21, 0.0 }
 0x67d   : > { %v5533_v50 = vadd.f32 %v5532_v53, %v5531_v11 }
 0x67f   : > { %5534 = vadd.xlane.f32.xlu1 %v5533_v50 }
 0x6f2   : > { %v5535_v22 = vpop.xlane.xlu1 %5534 }
 0x6f3   : > { %v5536_v45 = vrot.slane %v5535_v22, 4 }
 0x6f5   : > { %v5537_v46 = vadd.f32 %v5536_v45, %v5535_v22 }
 0x6f7   : > { %v5538_v31 = vrot.slane %v5537_v46, 2 }
 0x6f9   : > { %v5539_v15 = vadd.f32 %v5538_v31, %v5537_v46 }
 0x6fb   : > { %v5540_v7 = vrot.slane %v5539_v15, 1 }
 0x6fd   : > { %v5541_v34 = vadd.f32 %v5540_v7, %v5539_v15 }
 0x6ff   : > { %6022 = vpush %v5541_v34 }
 0x730   : > { %s6023_s13 = spop %6022 }
 0x731   : > { %v5543_v1 = vstv %s6023_s13 }
 0x732   : > { %5545 = vst [vmem:[%s431_s29] sm:$0x1] %v5543_v1 }
 0x733   : > { %6335 = shalt.err (!%p6332_p8)
}
 0x734   : > { %6032 = dma.vmem_to_hbm [thread:$0]  (%p6489_p5), %s5558_s15, 16, %s5560_s25, %s5547_s2  }
 0x735 PF: > { %p6049_p9 = scmp.ge.s32.totalorder %s6378_s20, 2  ;;  %s5571_s22 = sand.u32 1, %s6366_s17  }
 0x736   : > { %s5572_s0 = scalar_lea.sflag [#allocation5], %s5571_s22 }
 0x737   : > { %p6042_p10 = pnand %p6049_p9, %p6493_p6 }
 0x739   : > { %p6043_p11 = pneg %p6042_p10 }
 0x73b   : > { %6361 = dma.done.wait (%p6043_p11), %s5572_s0, 16  }
 0x73c   : > { %6363 = vsyncadd (%p6043_p11), %s5572_s0, 4294967280  ;;  %p23_p12 = scmp.ge.s32.totalorder %s6476_s23, 4   ;;  %s9975_s17 = smov %s6370_s18 }
 0x73d   : > { %s9976_s18 = smov %s6374_s19  ;;  %s9977_s19 = smov %s6487_s26 }
 0x73e   : > { %s9978_s20 = smov %s6476_s23  ;;  %25 = sbr.rel (!%p23_p12) target bundleno = 10 (0xa), region = 116 }
 0x743   :  { %5577 = vsyncpa [#allocation5], 1 }
 0x744   :  { %5579 = vsyncpa [#allocation5 + $0x1], 1 }
 0x745   :  { %5580 = vsyncpa [#allocation6], 1 }
 0x746   :  { %5582 = vsyncpa [#allocation6 + $0x1], 1 }
 0x747   :  { %5583 = vsyncpa [#allocation8], 1 }

</bundles_post_ra>
